<compile_context>
chip_gen: v7x
topology: tpu7x:2x2x1
jax: 0.10.0
libtpu: 0.0.40
codegen_flags: <defaults>
</compile_context>

<pallas_src>
import functools

import numpy as np
import jax
import jax.numpy as jnp
from jax import lax
from jax.experimental import pallas as pl
from jax.experimental.pallas import tpu as pltpu

_GRAY_W = (0.2989, 0.587, 0.114)  # torchvision rgb_to_grayscale weights

(OP_IDENTITY, OP_BRIGHTNESS, OP_COLOR, OP_CONTRAST, OP_SHARPNESS,
 OP_POSTERIZE, OP_SOLARIZE, OP_AUTOCONTRAST, OP_EQUALIZE) = range(9)

_OP_IDS = {
    "Identity": OP_IDENTITY, "Brightness": OP_BRIGHTNESS, "Color": OP_COLOR,
    "Contrast": OP_CONTRAST, "Sharpness": OP_SHARPNESS, "Posterize": OP_POSTERIZE,
    "Solarize": OP_SOLARIZE, "AutoContrast": OP_AUTOCONTRAST, "Equalize": OP_EQUALIZE,
}


def _choose_rows_per_channel(H, W):
    """Largest R<=8 with R|H that keeps the lane dim (H/R)*W >= 128 (sublane packing)."""
    best = 1
    for r in range(1, 9):
        if H % r == 0 and (H // r) * W >= 128:
            best = r
    return best


# --------------------------------------------------------------------------- fused kernel
def _make_fused_kernel(C, H, W, R, num_ops):
    Hb = H // R
    L = Hb * W                       # lane extent (>=128 for realistic sizes)
    S = C * R                        # sublane extent; rows [c*R, (c+1)*R) = channel c
    total = float(H * W)             # pixels per channel

    def gray_blocks(xf):             # (S, L) -> (R, L), truncated like torchvision
        return jnp.floor(_GRAY_W[0] * xf[0:R] + _GRAY_W[1] * xf[R:2 * R]
                         + _GRAY_W[2] * xf[2 * R:3 * R])

    def dot_t(a, b):
        # (16, L) x (16, L) -> (16, 16), contracting the lane (pixel) axis on the MXU.
        # Exact: one-hot entries are 0/1 in bf16, accumulation is f32.
        return lax.dot_general(a.astype(jnp.bfloat16), b.astype(jnp.bfloat16),
                               dimension_numbers=(((1,), (1,)), ((), ())),
                               preferred_element_type=jnp.float32)

    def kernel(op_ids_ref, mags_ref, img_ref, out_ref):
        b = pl.program_id(0)
        # out_ref doubles as the VMEM-resident working buffer for the fused op chain.
        out_ref[...] = img_ref[...]

        for i in range(num_ops):               # static unroll (num_ops is small)
            op_id = op_ids_ref[b, i]           # SMEM scalar (runtime, no recompile)
            mag = mags_ref[b, i]               # SMEM scalar (runtime, no recompile)

            # ---------------- Brightness: blend(img, zeros, 1+mag)
            @pl.when(op_id == OP_BRIGHTNESS)
            def _():
                xf = out_ref[...].astype(jnp.float32)
                out_ref[...] = jnp.clip((1.0 + mag) * xf, 0.0, 255.0).astype(jnp.uint8)

            # ---------------- Color (saturation); torchvision is a no-op for 1 channel.
            if C == 3:
                @pl.when(op_id == OP_COLOR)
                def _():
                    xf = out_ref[...].astype(jnp.float32)
                    f = 1.0 + mag
                    g = gray_blocks(xf)                                   # (R, L)
                    res = jnp.concatenate(
                        [jnp.clip(f * xf[c * R:(c + 1) * R] + (1.0 - f) * g, 0.0, 255.0)
                         for c in range(3)], axis=0)
                    out_ref[...] = res.astype(jnp.uint8)

            # ---------------- Contrast: blend against the global grayscale mean.
            @pl.when(op_id == OP_CONTRAST)
            def _():
                xf = out_ref[...].astype(jnp.float32)
                f = 1.0 + mag
                g = gray_blocks(xf) if C == 3 else xf
                mean = jnp.mean(g, keepdims=True)                          # (1, 1)
                out_ref[...] = jnp.clip(f * xf + (1.0 - f) * mean,
                                        0.0, 255.0).astype(jnp.uint8)

            # ---------------- Sharpness; torchvision is a no-op if H<=2 or W<=2.
            if H > 2 and W > 2:
                @pl.when(op_id == OP_SHARPNESS)
                def _():
                    xf = out_ref[...].astype(jnp.float32)
                    f = 1.0 + mag
                    # Interior mask generated in-kernel from iotas (no HBM mask input).
                    lane = lax.broadcasted_iota(jnp.int32, (1, L), 1).astype(jnp.float32)
                    sub = lax.broadcasted_iota(jnp.int32, (S, 1), 0).astype(jnp.float32)
                    xcol = lane - W * jnp.floor(lane * (1.0 / W))          # image x coord
                    rblk = sub - R * jnp.floor(sub * (1.0 / R))            # row group index
                    border = ((xcol == 0.0) | (xcol == float(W - 1))
                              | ((rblk == 0.0) & (lane < float(W)))
                              | ((rblk == float(R - 1)) & (lane >= float(L - W))))
                    interior = jnp.where(border, 0.0, 1.0)
                    # Separable 3x3 box sum: lane rolls inside each R-row block, with the
                    # cross-block vertical neighbours patched via sublane shifts + selects.
                    # Wrap-around only ever contaminates border pixels, which are masked.
                    row3 = (xf + pltpu.roll(xf, shift=1, axis=1)
                            + pltpu.roll(xf, shift=L - 1, axis=1))
                    prev_rows = jnp.concatenate([row3[S - 1:S], row3[0:S - 1]], axis=0)
                    next_rows = jnp.concatenate([row3[1:S], row3[0:1]], axis=0)
                    up_src = jnp.where(lane >= float(L - W), prev_rows, row3)
                    dn_src = jnp.where(lane < float(W), next_rows, row3)
                    up = pltpu.roll(up_src, shift=W % L, axis=1) if (W % L) else up_src
                    dn = (pltpu.roll(dn_src, shift=(L - W) % L, axis=1)
                          if ((L - W) % L) else dn_src)
                    blur = (row3 + up + dn + 4.0 * xf) * (1.0 / 13.0)
                    # blend(img, degenerate, f) with borders preserved, fused:
                    out_ref[...] = jnp.clip(
                        xf + (1.0 - f) * interior * (jnp.round(blur) - xf),
                        0.0, 255.0).astype(jnp.uint8)

            # ---------------- Posterize: keep top `bits` bits (exact pow2 floor-quantize).
            @pl.when(op_id == OP_POSTERIZE)
            def _():
                xf = out_ref[...].astype(jnp.float32)
                bits = mag.astype(jnp.int32)
                q = jnp.left_shift(jnp.int32(1), 8 - bits).astype(jnp.float32)
                out_ref[...] = (jnp.floor(xf * (1.0 / q)) * q).astype(jnp.uint8)

            # ---------------- Solarize
            @pl.when(op_id == OP_SOLARIZE)
            def _():
                xf = out_ref[...].astype(jnp.float32)
                out_ref[...] = jnp.where(xf >= mag, 255.0 - xf, xf).astype(jnp.uint8)

            # ---------------- AutoContrast (per-channel min/max stretch)
            @pl.when(op_id == OP_AUTOCONTRAST)
            def _():
                xf = out_ref[...].astype(jnp.float32)
                outs = []
                for c in range(C):
                    blk = xf[c * R:(c + 1) * R]
                    mn = jnp.min(blk, keepdims=True)
                    mx = jnp.max(blk, keepdims=True)
                    eq = mx == mn
                    scale = jnp.where(eq, 1.0, 255.0 / jnp.where(eq, 1.0, mx - mn))
                    mn0 = jnp.where(eq, 0.0, mn)
                    outs.append(jnp.clip((blk - mn0) * scale, 0.0, 255.0))
                out_ref[...] = jnp.concatenate(outs, axis=0).astype(jnp.uint8)

            # ---------------- Equalize (torch histc -> cum LUT -> gather)
            # Exact 16x16 radix (high/low nibble) one-hots; the per-(pixel,bin) work runs
            # as bf16 MXU matmuls with f32 accumulation instead of 512 serial VPU passes.
            @pl.when(op_id == OP_EQUALIZE)
            def _():
                xf = out_ref[...].astype(jnp.float32)
                nib = lax.broadcasted_iota(jnp.int32, (16, 1), 0).astype(jnp.float32)
                hi2 = lax.broadcasted_iota(jnp.int32, (16, 16), 0)
                li2 = lax.broadcasted_iota(jnp.int32, (16, 16), 1)
                is_bin0 = (hi2 == 0) & (li2 == 0)
                ch_outs = []
                for c in range(C):
                    # --- pass 1: cumulative histogram cum[h,l] = #pixels <= 16h+l
                    acc_le = jnp.zeros((16, 16), jnp.float32)
                    acc_eq = jnp.zeros((16, 16), jnp.float32)
                    acc_lt = jnp.zeros((16, 1), jnp.float32)
                    for r in range(R):
                        row = xf[c * R + r: c * R + r + 1]                 # (1, L)
                        hv = jnp.floor(row * (1.0 / 16.0))
                        lv = row - 16.0 * hv
                        oh_eq = jnp.where(hv == nib, 1.0, 0.0)             # (16, L)
                        acc_le = acc_le + dot_t(oh_eq, jnp.where(lv <= nib, 1.0, 0.0))
                        acc_eq = acc_eq + dot_t(oh_eq, jnp.where(lv == nib, 1.0, 0.0))
                        acc_lt = acc_lt + jnp.sum(jnp.where(hv < nib, 1.0, 0.0),
                                                  axis=1, keepdims=True)
                    cum = acc_le + acc_lt                                  # (16, 16)
                    hist = acc_eq
                    cum_prev = cum - hist
                    last_nz = jnp.sum(jnp.where((cum >= total - 0.5) & (hist > 0.5),
                                                hist, 0.0), keepdims=True)
                    step = jnp.floor((total - last_nz) * (1.0 / 255.0))    # (1, 1)
                    sden = jnp.maximum(step, 1.0)
                    # integer-exact floor division via remainder correction
                    a = cum_prev + jnp.floor(step * 0.5)
                    q = jnp.floor(a / sden)
                    rem = a - q * sden
                    q = jnp.where(rem < 0.0, q - 1.0, q)
                    q = jnp.where(rem >= sden, q + 1.0, q)
                    lut2d = jnp.where(is_bin0, 0.0, jnp.clip(q, 0.0, 255.0))
                    lut2d_b = lut2d.astype(jnp.bfloat16)                   # exact (0..255)
                    use_eq = step >= 0.5
                    # --- pass 2: LUT gather = one-hot @ lut on the MXU
                    rows_out = []
                    for r in range(R):
                        row = xf[c * R + r: c * R + r + 1]
                        hv = jnp.floor(row * (1.0 / 16.0))
                        lv = row - 16.0 * hv
                        oh_eq = jnp.where(hv == nib, 1.0, 0.0)             # (16, L) f32
                        ol_eq = jnp.where(lv == nib, 1.0, 0.0).astype(jnp.bfloat16)
                        mrow = jnp.dot(lut2d_b, ol_eq,
                                       preferred_element_type=jnp.float32)  # (16, L)
                        mapped = jnp.sum(oh_eq * mrow, axis=0, keepdims=True)
                        rows_out.append(jnp.where(use_eq, mapped, row))
                    ch_outs.append(jnp.concatenate(rows_out, axis=0))
                out_ref[...] = jnp.concatenate(ch_outs, axis=0).astype(jnp.uint8)

    return kernel


# --------------------------------------------------------------------------- wrapper
def _vmem_limit_bytes(S, L):
    try:
        cap = int(pltpu.get_tpu_info().vmem_capacity_bytes)
    except Exception:
        cap = 64 * 1024 * 1024                       # conservative (v7x per-TC VMEM)
    need = 48 * S * L + (4 << 20)                    # u8 in/out dbl-buffers + f32 temporaries
    return int(min(max(need, 16 << 20), int(cap * 0.85)))


@functools.lru_cache(maxsize=None)
def _build_randaugment_call(B, C, H, W, num_ops):
    """One compiled fused kernel per (batch, image shape); ops/magnitudes are runtime data."""
    R = _choose_rows_per_channel(H, W)
    Hb = H // R
    L = Hb * W
    S = C * R
    kernel = _make_fused_kernel(C, H, W, R, num_ops)

    call = pl.pallas_call(
        kernel,
        out_shape=jax.ShapeDtypeStruct((B, S, L), jnp.uint8),
        grid=(B,),
        in_specs=[
            pl.BlockSpec(memory_space=pltpu.MemorySpace.SMEM),   # op ids   (B, num_ops) i32
            pl.BlockSpec(memory_space=pltpu.MemorySpace.SMEM),   # magnitudes (B, num_ops) f32
            pl.BlockSpec((None, S, L), lambda b: (b, 0, 0)),     # per-image VMEM block
        ],
        out_specs=pl.BlockSpec((None, S, L), lambda b: (b, 0, 0)),
        compiler_params=pltpu.CompilerParams(
            dimension_semantics=("parallel",),
            vmem_limit_bytes=_vmem_limit_bytes(S, L)),
    )

    @jax.jit
    def run(op_ids, mags, imgs):
        flat = imgs.reshape(B, S, L)                 # free view: sublane-dense layout
        return call(op_ids, mags, flat).reshape(B, C, H, W)

    return run


def apply_ops_pallas(img, op_ids, magnitudes):
    """Apply a fixed sequence of photometric ops (by id) to a single (C, H, W) image."""
    C, H, W = img.shape
    run = _build_randaugment_call(1, C, H, W, len(op_ids))
    out = run(jnp.asarray(op_ids, jnp.int32).reshape(1, -1),
              jnp.asarray(magnitudes, jnp.float32).reshape(1, -1),
              img[None])
    return out[0]


def apply_ops_pallas_batched(imgs, op_ids, magnitudes):
    """Batched variant: imgs (B, C, H, W), op_ids/magnitudes (B, num_ops)."""
    B, C, H, W = imgs.shape
    op_ids = jnp.asarray(op_ids, jnp.int32).reshape(B, -1)
    magnitudes = jnp.asarray(magnitudes, jnp.float32).reshape(B, -1)
    run = _build_randaugment_call(B, C, H, W, op_ids.shape[1])
    return run(op_ids, magnitudes, imgs)


class RandAugmentPallas:
    """Pallas-TPU port of the RandAugment module's forward pass (photometric space)."""

    def __init__(self, num_ops=2, magnitude=9, num_magnitude_bins=31, seed=0):
        self.num_ops = num_ops
        self.magnitude = magnitude
        self.num_magnitude_bins = num_magnitude_bins
        self._rng = np.random.RandomState(seed)     # host-side op selection

    def _augmentation_space(self, num_bins):
        return {
            "Identity": (np.array(0.0), False),
            "Brightness": (np.linspace(0.0, 0.9, num_bins), True),
            "Color": (np.linspace(0.0, 0.9, num_bins), True),
            "Contrast": (np.linspace(0.0, 0.9, num_bins), True),
            "Sharpness": (np.linspace(0.0, 0.9, num_bins), True),
            "Posterize": (8 - np.round(np.arange(num_bins) / ((num_bins - 1) / 4)).astype(np.int64),
                          False),
            "Solarize": (np.linspace(255.0, 0.0, num_bins), False),
            "AutoContrast": (np.array(0.0), False),
            "Equalize": (np.array(0.0), False),
        }

    def __call__(self, img, label):
        op_meta = self._augmentation_space(self.num_magnitude_bins)
        names = list(op_meta.keys())
        op_ids, mags = [], []
        for _ in range(self.num_ops):
            op_index = int(self._rng.randint(len(op_meta)))
            op_name = names[op_index]
            magnitudes, signed = op_meta[op_name]
            magnitude = float(magnitudes[self.magnitude]) if magnitudes.ndim > 0 else 0.0
            if signed and self._rng.randint(2):
                magnitude *= -1.0
            op_ids.append(_OP_IDS[op_name])
            mags.append(magnitude)
            # Only Identity (a no-op) would also touch the label in this photometric
            # augmentation space, so the label passes through unchanged.
        out = apply_ops_pallas(img, op_ids, mags)
        return out, label


# --------------------------------------------------------------------------- host reference
def _reference_op(img, op_id, mag):
    C, H, W = img.shape
    x = img.astype(np.float64)

    def blend(deg):
        f = 1.0 + mag
        return np.clip(f * x + (1.0 - f) * deg, 0.0, 255.0).astype(np.uint8)

    if op_id == OP_IDENTITY:
        return img.copy()
    if op_id == OP_BRIGHTNESS:
        return blend(np.zeros_like(x))
    if op_id == OP_COLOR:
        if C != 3:
            return img.copy()
        gray = np.floor(_GRAY_W[0] * x[0] + _GRAY_W[1] * x[1] + _GRAY_W[2] * x[2])
        return blend(gray[None])
    if op_id == OP_CONTRAST:
        gray = (np.floor(_GRAY_W[0] * x[0] + _GRAY_W[1] * x[1] + _GRAY_W[2] * x[2])
                if C == 3 else x[0])
        return blend(gray.mean())
    if op_id == OP_SHARPNESS:
        if H <= 2 or W <= 2:
            return img.copy()
        k = np.array([[1., 1., 1.], [1., 5., 1.], [1., 1., 1.]]) / 13.0
        deg = x.copy()
        for c in range(C):
            acc = np.zeros((H - 2, W - 2))
            for dy in range(3):
                for dx in range(3):
                    acc += k[dy, dx] * x[c, dy:dy + H - 2, dx:dx + W - 2]
            deg[c, 1:-1, 1:-1] = np.round(acc)
        return blend(deg)
    if op_id == OP_POSTERIZE:
        bits = int(mag)
        mask = np.uint8((0xFF << (8 - bits)) & 0xFF) if bits < 8 else np.uint8(0xFF)
        return img & mask
    if op_id == OP_SOLARIZE:
        return np.where(x >= mag, 255.0 - x, x).astype(np.uint8)
    if op_id == OP_AUTOCONTRAST:
        out = np.empty_like(x)
        for c in range(C):
            mn, mx = x[c].min(), x[c].max()
            out[c] = x[c] if mx == mn else np.clip((x[c] - mn) * (255.0 / (mx - mn)), 0.0, 255.0)
        return out.astype(np.uint8)
    if op_id == OP_EQUALIZE:
        out = np.empty_like(img)
        for c in range(C):
            hist = np.bincount(img[c].reshape(-1), minlength=256).astype(np.int64)
            nz = np.nonzero(hist)[0]
            step = int(hist.sum() - hist[nz[-1]]) // 255
            if step == 0:
                out[c] = img[c]
                continue
            lut = (np.cumsum(hist) + step // 2) // step
            lut = np.clip(np.concatenate([[0], lut[:-1]]), 0, 255)
            out[c] = lut[img[c]]
        return out
    raise ValueError(op_id)


def _reference_chain(img, op_ids, mags):
    out = img.copy()
    for o, m in zip(op_ids, mags):
        out = _reference_op(out, o, m)
    return out


# --------------------------------------------------------------------------- main
if __name__ == "__main__":
    key = jax.random.PRNGKey(0)
    k1, k2 = jax.random.split(key)
    img = jax.random.randint(k1, (3, 16, 16), 0, 256, dtype=jnp.int32).astype(jnp.uint8)
    label = jax.random.randint(k2, (1, 16, 16), 0, 2, dtype=jnp.int32).astype(jnp.uint8)
    img_np = np.asarray(img)

    # Per-op correctness vs. a host reference (tol 1 absorbs f32-vs-f64 blend rounding).
    single_tests = [
        (OP_IDENTITY, 0.0), (OP_BRIGHTNESS, 0.27), (OP_BRIGHTNESS, -0.27),
        (OP_COLOR, 0.27), (OP_CONTRAST, -0.27), (OP_SHARPNESS, 0.27),
        (OP_SHARPNESS, -0.27), (OP_POSTERIZE, 5.0), (OP_SOLARIZE, 128.0),
        (OP_AUTOCONTRAST, 0.0), (OP_EQUALIZE, 0.0),
    ]
    for op, m in single_tests:
        out = np.asarray(jax.block_until_ready(
            apply_ops_pallas(img, [op, OP_IDENTITY], [m, 0.0])))
        ref = _reference_chain(img_np, [op], [m])
        diff = int(np.abs(out.astype(np.int32) - ref.astype(np.int32)).max())
        assert out.shape == img_np.shape and out.dtype == np.uint8
        assert diff <= 1, f"op {op}: max abs diff {diff}"

    # Exact identities.
    assert np.array_equal(np.asarray(apply_ops_pallas(img, [OP_IDENTITY, OP_IDENTITY],
                                                      [0.0, 0.0])), img_np)
    assert np.array_equal(np.asarray(apply_ops_pallas(img, [OP_POSTERIZE, OP_IDENTITY],
                                                      [8.0, 0.0])), img_np)
    assert np.array_equal(np.asarray(apply_ops_pallas(img, [OP_BRIGHTNESS, OP_IDENTITY],
                                                      [0.0, 0.0])), img_np)

    # Batched grid path must match per-image calls exactly.
    imgs = jnp.stack([img, jnp.flip(img, axis=-1)])
    ops_b = np.array([[OP_CONTRAST, OP_SOLARIZE], [OP_EQUALIZE, OP_BRIGHTNESS]], np.int32)
    mags_b = np.array([[0.27, 128.0], [0.0, -0.27]], np.float32)
    out_b = np.asarray(jax.block_until_ready(apply_ops_pallas_batched(imgs, ops_b, mags_b)))
    for bi in range(2):
        single = np.asarray(apply_ops_pallas(imgs[bi], list(ops_b[bi]), list(mags_b[bi])))
        assert np.array_equal(out_b[bi], single)

    # Module-style forward pass.
    aug = RandAugmentPallas(num_ops=2, magnitude=9, num_magnitude_bins=31, seed=0)
    out_img, out_label = aug(img, label)
    jax.block_until_ready(out_img)
    jax.block_until_ready(out_label)
    assert out_img.shape == img.shape and out_img.dtype == jnp.uint8
    assert out_label.shape == label.shape and out_label.dtype == label.dtype
    print("KERNEL_OK")
</pallas_src>

<mosaic_0001>
module attributes {stable_mosaic.version = 11 : i64} {
  func.func @kernel(%arg0: i32, %arg1: memref<1x2xi32, #tpu.memory_space<smem>>, %arg2: memref<1x2xf32, #tpu.memory_space<smem>>, %arg3: memref<1x6x128xi8, #tpu.memory_space<vmem>>, %arg4: memref<1x6x128xi8, #tpu.memory_space<vmem>>) attributes {dimension_semantics = [#tpu.dimension_semantics<parallel>], iteration_bounds = array<i64: 1>, scalar_prefetch = 0 : i64, scratch_operands = 0 : i64, tpu.core_type = #tpu.core_type<tc>, window_params = [{transform_indices = @transform_0, window_bounds = array<i64: 1, 2>}, {transform_indices = @transform_1, window_bounds = array<i64: 1, 2>}, {transform_indices = @transform_2, window_bounds = array<i64: 1, 6, 128>}, {transform_indices = @transform_3, window_bounds = array<i64: 1, 6, 128>}]} {
    %c0 = arith.constant 0 : index
    %c0_0 = arith.constant 0 : index
    %c0_1 = arith.constant 0 : index
    %0 = vector.load %arg3[%c0, %c0_0, %c0_1] : memref<1x6x128xi8, #tpu.memory_space<vmem>>, vector<1x6x128xi8>
    %1 = vector.shape_cast %0 : vector<1x6x128xi8> to vector<6x128xi8>
    %c0_2 = arith.constant 0 : index
    %c0_3 = arith.constant 0 : index
    %c0_4 = arith.constant 0 : index
    %2 = vector.load %arg4[%c0_2, %c0_3, %c0_4] : memref<1x6x128xi8, #tpu.memory_space<vmem>>, vector<1x6x128xi8>
    %3 = vector.shape_cast %2 : vector<1x6x128xi8> to vector<6x128xi8>
    %4 = vector.shape_cast %1 : vector<6x128xi8> to vector<1x6x128xi8>
    tpu.vector_store %arg4[%c0_2, %c0_3, %c0_4], %4 {strides = array<i32>} : memref<1x6x128xi8, #tpu.memory_space<vmem>>, vector<1x6x128xi8>,
    %5 = arith.index_cast %arg0 : i32 to index
    %c0_5 = arith.constant 0 : index
    %6 = memref.load %arg1[%5, %c0_5] : memref<1x2xi32, #tpu.memory_space<smem>>
    %7 = arith.index_cast %arg0 : i32 to index
    %c0_6 = arith.constant 0 : index
    %8 = memref.load %arg2[%7, %c0_6] : memref<1x2xf32, #tpu.memory_space<smem>>
    %c1_i32 = arith.constant 1 : i32
    %9 = arith.cmpi eq, %6, %c1_i32 : i32
    %10 = arith.extui %9 : i1 to i32
    %c0_i32 = arith.constant 0 : i32
    %11 = arith.cmpi ne, %10, %c0_i32 : i32
    scf.if %11 {
      %c0_31 = arith.constant 0 : index
      %c0_32 = arith.constant 0 : index
      %c0_33 = arith.constant 0 : index
      %61 = vector.load %arg4[%c0_31, %c0_32, %c0_33] : memref<1x6x128xi8, #tpu.memory_space<vmem>>, vector<1x6x128xi8>
      %62 = vector.shape_cast %61 : vector<1x6x128xi8> to vector<6x128xi8>
      %63 = arith.uitofp %62 : vector<6x128xi8> to vector<6x128xf32>
      %cst = arith.constant 1.000000e+00 : f32
      %64 = arith.addf %cst, %8 : f32
      %65 = vector.broadcast %64 : f32 to vector<6x128xf32>
      %66 = arith.mulf %65, %63 : vector<6x128xf32>
      %cst_34 = arith.constant 0.000000e+00 : f32
      %cst_35 = arith.constant 2.550000e+02 : f32
      %67 = vector.broadcast %cst_34 : f32 to vector<6x128xf32>
      %68 = arith.maximumf %67, %66 : vector<6x128xf32>
      %69 = vector.broadcast %cst_35 : f32 to vector<6x128xf32>
      %70 = arith.minimumf %69, %68 : vector<6x128xf32>
      %71 = arith.fptoui %70 : vector<6x128xf32> to vector<6x128xi8>
      %c0_36 = arith.constant 0 : index
      %c0_37 = arith.constant 0 : index
      %c0_38 = arith.constant 0 : index
      %72 = vector.load %arg4[%c0_36, %c0_37, %c0_38] : memref<1x6x128xi8, #tpu.memory_space<vmem>>, vector<1x6x128xi8>
      %73 = vector.shape_cast %72 : vector<1x6x128xi8> to vector<6x128xi8>
      %74 = vector.shape_cast %71 : vector<6x128xi8> to vector<1x6x128xi8>
      tpu.vector_store %arg4[%c0_36, %c0_37, %c0_38], %74 {strides = array<i32>} : memref<1x6x128xi8, #tpu.memory_space<vmem>>, vector<1x6x128xi8>,
    } else {
    }
    %c2_i32 = arith.constant 2 : i32
    %12 = arith.cmpi eq, %6, %c2_i32 : i32
    %13 = arith.extui %12 : i1 to i32
    %c0_i32_7 = arith.constant 0 : i32
    %14 = arith.cmpi ne, %13, %c0_i32_7 : i32
    scf.if %14 {
      %c0_31 = arith.constant 0 : index
      %c0_32 = arith.constant 0 : index
      %c0_33 = arith.constant 0 : index
      %61 = vector.load %arg4[%c0_31, %c0_32, %c0_33] : memref<1x6x128xi8, #tpu.memory_space<vmem>>, vector<1x6x128xi8>
      %62 = vector.shape_cast %61 : vector<1x6x128xi8> to vector<6x128xi8>
      %63 = arith.uitofp %62 : vector<6x128xi8> to vector<6x128xf32>
      %cst = arith.constant 1.000000e+00 : f32
      %64 = arith.addf %cst, %8 : f32
      %65 = vector.extract_strided_slice %63 {offsets = [0, 0], sizes = [2, 128], strides = [1, 1]} : vector<6x128xf32> to vector<2x128xf32>
      %cst_34 = arith.constant 2.989000e-01 : f32
      %66 = vector.broadcast %cst_34 : f32 to vector<2x128xf32>
      %67 = arith.mulf %66, %65 : vector<2x128xf32>
      %68 = vector.extract_strided_slice %63 {offsets = [2, 0], sizes = [2, 128], strides = [1, 1]} : vector<6x128xf32> to vector<2x128xf32>
      %cst_35 = arith.constant 5.870000e-01 : f32
      %69 = vector.broadcast %cst_35 : f32 to vector<2x128xf32>
      %70 = arith.mulf %69, %68 : vector<2x128xf32>
      %71 = arith.addf %67, %70 : vector<2x128xf32>
      %72 = vector.extract_strided_slice %63 {offsets = [4, 0], sizes = [2, 128], strides = [1, 1]} : vector<6x128xf32> to vector<2x128xf32>
      %cst_36 = arith.constant 1.140000e-01 : f32
      %73 = vector.broadcast %cst_36 : f32 to vector<2x128xf32>
      %74 = arith.mulf %73, %72 : vector<2x128xf32>
      %75 = arith.addf %71, %74 : vector<2x128xf32>
      %76 = math.floor %75 : vector<2x128xf32>
      %77 = vector.extract_strided_slice %63 {offsets = [0, 0], sizes = [2, 128], strides = [1, 1]} : vector<6x128xf32> to vector<2x128xf32>
      %78 = vector.broadcast %64 : f32 to vector<2x128xf32>
      %79 = arith.mulf %78, %77 : vector<2x128xf32>
      %cst_37 = arith.constant 1.000000e+00 : f32
      %80 = arith.subf %cst_37, %64 : f32
      %81 = vector.broadcast %80 : f32 to vector<2x128xf32>
      %82 = arith.mulf %81, %76 : vector<2x128xf32>
      %83 = arith.addf %79, %82 : vector<2x128xf32>
      %cst_38 = arith.constant 0.000000e+00 : f32
      %cst_39 = arith.constant 2.550000e+02 : f32
      %84 = vector.broadcast %cst_38 : f32 to vector<2x128xf32>
      %85 = arith.maximumf %84, %83 : vector<2x128xf32>
      %86 = vector.broadcast %cst_39 : f32 to vector<2x128xf32>
      %87 = arith.minimumf %86, %85 : vector<2x128xf32>
      %88 = vector.extract_strided_slice %63 {offsets = [2, 0], sizes = [2, 128], strides = [1, 1]} : vector<6x128xf32> to vector<2x128xf32>
      %89 = vector.broadcast %64 : f32 to vector<2x128xf32>
      %90 = arith.mulf %89, %88 : vector<2x128xf32>
      %cst_40 = arith.constant 1.000000e+00 : f32
      %91 = arith.subf %cst_40, %64 : f32
      %92 = vector.broadcast %91 : f32 to vector<2x128xf32>
      %93 = arith.mulf %92, %76 : vector<2x128xf32>
      %94 = arith.addf %90, %93 : vector<2x128xf32>
      %cst_41 = arith.constant 0.000000e+00 : f32
      %cst_42 = arith.constant 2.550000e+02 : f32
      %95 = vector.broadcast %cst_41 : f32 to vector<2x128xf32>
      %96 = arith.maximumf %95, %94 : vector<2x128xf32>
      %97 = vector.broadcast %cst_42 : f32 to vector<2x128xf32>
      %98 = arith.minimumf %97, %96 : vector<2x128xf32>
      %99 = vector.extract_strided_slice %63 {offsets = [4, 0], sizes = [2, 128], strides = [1, 1]} : vector<6x128xf32> to vector<2x128xf32>
      %100 = vector.broadcast %64 : f32 to vector<2x128xf32>
      %101 = arith.mulf %100, %99 : vector<2x128xf32>
      %cst_43 = arith.constant 1.000000e+00 : f32
      %102 = arith.subf %cst_43, %64 : f32
      %103 = vector.broadcast %102 : f32 to vector<2x128xf32>
      %104 = arith.mulf %103, %76 : vector<2x128xf32>
      %105 = arith.addf %101, %104 : vector<2x128xf32>
      %cst_44 = arith.constant 0.000000e+00 : f32
      %cst_45 = arith.constant 2.550000e+02 : f32
      %106 = vector.broadcast %cst_44 : f32 to vector<2x128xf32>
      %107 = arith.maximumf %106, %105 : vector<2x128xf32>
      %108 = vector.broadcast %cst_45 : f32 to vector<2x128xf32>
      %109 = arith.minimumf %108, %107 : vector<2x128xf32>
      %110 = tpu.concatenate %87, %98, %109 in 0 : vector<2x128xf32>, vector<2x128xf32>, vector<2x128xf32> -> vector<6x128xf32>
      %111 = arith.fptoui %110 : vector<6x128xf32> to vector<6x128xi8>
      %c0_46 = arith.constant 0 : index
      %c0_47 = arith.constant 0 : index
      %c0_48 = arith.constant 0 : index
      %112 = vector.load %arg4[%c0_46, %c0_47, %c0_48] : memref<1x6x128xi8, #tpu.memory_space<vmem>>, vector<1x6x128xi8>
      %113 = vector.shape_cast %112 : vector<1x6x128xi8> to vector<6x128xi8>
      %114 = vector.shape_cast %111 : vector<6x128xi8> to vector<1x6x128xi8>
      tpu.vector_store %arg4[%c0_46, %c0_47, %c0_48], %114 {strides = array<i32>} : memref<1x6x128xi8, #tpu.memory_space<vmem>>, vector<1x6x128xi8>,
    } else {
    }
    %c3_i32 = arith.constant 3 : i32
    %15 = arith.cmpi eq, %6, %c3_i32 : i32
    %16 = arith.extui %15 : i1 to i32
    %c0_i32_8 = arith.constant 0 : i32
    %17 = arith.cmpi ne, %16, %c0_i32_8 : i32
    scf.if %17 {
      %c0_31 = arith.constant 0 : index
      %c0_32 = arith.constant 0 : index
      %c0_33 = arith.constant 0 : index
      %61 = vector.load %arg4[%c0_31, %c0_32, %c0_33] : memref<1x6x128xi8, #tpu.memory_space<vmem>>, vector<1x6x128xi8>
      %62 = vector.shape_cast %61 : vector<1x6x128xi8> to vector<6x128xi8>
      %63 = arith.uitofp %62 : vector<6x128xi8> to vector<6x128xf32>
      %cst = arith.constant 1.000000e+00 : f32
      %64 = arith.addf %cst, %8 : f32
      %65 = vector.extract_strided_slice %63 {offsets = [0, 0], sizes = [2, 128], strides = [1, 1]} : vector<6x128xf32> to vector<2x128xf32>
      %cst_34 = arith.constant 2.989000e-01 : f32
      %66 = vector.broadcast %cst_34 : f32 to vector<2x128xf32>
      %67 = arith.mulf %66, %65 : vector<2x128xf32>
      %68 = vector.extract_strided_slice %63 {offsets = [2, 0], sizes = [2, 128], strides = [1, 1]} : vector<6x128xf32> to vector<2x128xf32>
      %cst_35 = arith.constant 5.870000e-01 : f32
      %69 = vector.broadcast %cst_35 : f32 to vector<2x128xf32>
      %70 = arith.mulf %69, %68 : vector<2x128xf32>
      %71 = arith.addf %67, %70 : vector<2x128xf32>
      %72 = vector.extract_strided_slice %63 {offsets = [4, 0], sizes = [2, 128], strides = [1, 1]} : vector<6x128xf32> to vector<2x128xf32>
      %cst_36 = arith.constant 1.140000e-01 : f32
      %73 = vector.broadcast %cst_36 : f32 to vector<2x128xf32>
      %74 = arith.mulf %73, %72 : vector<2x128xf32>
      %75 = arith.addf %71, %74 : vector<2x128xf32>
      %76 = math.floor %75 : vector<2x128xf32>
      %77 = vector.shape_cast %76 : vector<2x128xf32> to vector<1x2x128xf32>
      %cst_37 = arith.constant dense<0.000000e+00> : vector<1xf32>
      %78 = vector.multi_reduction <add>, %77, %cst_37 [1, 2] : vector<1x2x128xf32> to vector<1xf32>
      %79 = vector.shape_cast %78 : vector<1xf32> to vector<1x1x1xf32>
      %80 = vector.extract %79[0, 0, 0] : f32 from vector<1x1x1xf32>
      %81 = vector.broadcast %80 : f32 to vector<1x1xf32>
      %cst_38 = arith.constant 2.560000e+02 : f32
      %82 = vector.broadcast %cst_38 : f32 to vector<1x1xf32>
      %83 = arith.divf %81, %82 : vector<1x1xf32>
      %84 = vector.broadcast %64 : f32 to vector<6x128xf32>
      %85 = arith.mulf %84, %63 : vector<6x128xf32>
      %cst_39 = arith.constant 1.000000e+00 : f32
      %86 = arith.subf %cst_39, %64 : f32
      %87 = vector.broadcast %86 : f32 to vector<1x1xf32>
      %88 = arith.mulf %87, %83 : vector<1x1xf32>
      %89 = vector.broadcast %88 : vector<1x1xf32> to vector<6x128xf32>
      %90 = arith.addf %85, %89 : vector<6x128xf32>
      %cst_40 = arith.constant 0.000000e+00 : f32
      %cst_41 = arith.constant 2.550000e+02 : f32
      %91 = vector.broadcast %cst_40 : f32 to vector<6x128xf32>
      %92 = arith.maximumf %91, %90 : vector<6x128xf32>
      %93 = vector.broadcast %cst_41 : f32 to vector<6x128xf32>
      %94 = arith.minimumf %93, %92 : vector<6x128xf32>
      %95 = arith.fptoui %94 : vector<6x128xf32> to vector<6x128xi8>
      %c0_42 = arith.constant 0 : index
      %c0_43 = arith.constant 0 : index
      %c0_44 = arith.constant 0 : index
      %96 = vector.load %arg4[%c0_42, %c0_43, %c0_44] : memref<1x6x128xi8, #tpu.memory_space<vmem>>, vector<1x6x128xi8>
      %97 = vector.shape_cast %96 : vector<1x6x128xi8> to vector<6x128xi8>
      %98 = vector.shape_cast %95 : vector<6x128xi8> to vector<1x6x128xi8>
      tpu.vector_store %arg4[%c0_42, %c0_43, %c0_44], %98 {strides = array<i32>} : memref<1x6x128xi8, #tpu.memory_space<vmem>>, vector<1x6x128xi8>,
    } else {
    }
    %c4_i32 = arith.constant 4 : i32
    %18 = arith.cmpi eq, %6, %c4_i32 : i32
    %19 = arith.extui %18 : i1 to i32
    %c0_i32_9 = arith.constant 0 : i32
    %20 = arith.cmpi ne, %19, %c0_i32_9 : i32
    scf.if %20 {
      %c0_31 = arith.constant 0 : index
      %c0_32 = arith.constant 0 : index
      %c0_33 = arith.constant 0 : index
      %61 = vector.load %arg4[%c0_31, %c0_32, %c0_33] : memref<1x6x128xi8, #tpu.memory_space<vmem>>, vector<1x6x128xi8>
      %62 = vector.shape_cast %61 : vector<1x6x128xi8> to vector<6x128xi8>
      %63 = arith.uitofp %62 : vector<6x128xi8> to vector<6x128xf32>
      %cst = arith.constant 1.000000e+00 : f32
      %64 = arith.addf %cst, %8 : f32
      %65 = tpu.iota {dimensions = array<i32: 1>} : vector<1x128xi32>
      %66 = arith.sitofp %65 : vector<1x128xi32> to vector<1x128xf32>
      %67 = tpu.iota {dimensions = array<i32: 0>} : vector<6x1xi32>
      %68 = arith.sitofp %67 : vector<6x1xi32> to vector<6x1xf32>
      %cst_34 = arith.constant 6.250000e-02 : f32
      %69 = vector.broadcast %cst_34 : f32 to vector<1x128xf32>
      %70 = arith.mulf %66, %69 : vector<1x128xf32>
      %71 = math.floor %70 : vector<1x128xf32>
      %cst_35 = arith.constant 1.600000e+01 : f32
      %72 = vector.broadcast %cst_35 : f32 to vector<1x128xf32>
      %73 = arith.mulf %72, %71 : vector<1x128xf32>
      %74 = arith.subf %66, %73 : vector<1x128xf32>
      %cst_36 = arith.constant 5.000000e-01 : f32
      %75 = vector.broadcast %cst_36 : f32 to vector<6x1xf32>
      %76 = arith.mulf %68, %75 : vector<6x1xf32>
      %77 = math.floor %76 : vector<6x1xf32>
      %cst_37 = arith.constant 2.000000e+00 : f32
      %78 = vector.broadcast %cst_37 : f32 to vector<6x1xf32>
      %79 = arith.mulf %78, %77 : vector<6x1xf32>
      %80 = arith.subf %68, %79 : vector<6x1xf32>
      %cst_38 = arith.constant 0.000000e+00 : f32
      %81 = vector.broadcast %cst_38 : f32 to vector<1x128xf32>
      %82 = arith.cmpf oeq, %74, %81 : vector<1x128xf32>
      %cst_39 = arith.constant 1.500000e+01 : f32
      %83 = vector.broadcast %cst_39 : f32 to vector<1x128xf32>
      %84 = arith.cmpf oeq, %74, %83 : vector<1x128xf32>
      %85 = arith.ori %82, %84 : vector<1x128xi1>
      %cst_40 = arith.constant 0.000000e+00 : f32
      %86 = vector.broadcast %cst_40 : f32 to vector<6x1xf32>
      %87 = arith.cmpf oeq, %80, %86 : vector<6x1xf32>
      %cst_41 = arith.constant 1.600000e+01 : f32
      %88 = vector.broadcast %cst_41 : f32 to vector<1x128xf32>
      %89 = arith.cmpf olt, %66, %88 : vector<1x128xf32>
      %90 = vector.broadcast %87 : vector<6x1xi1> to vector<6x128xi1>
      %91 = vector.broadcast %89 : vector<1x128xi1> to vector<6x128xi1>
      %92 = arith.andi %90, %91 : vector<6x128xi1>
      %93 = vector.broadcast %85 : vector<1x128xi1> to vector<6x128xi1>
      %94 = arith.ori %93, %92 : vector<6x128xi1>
      %cst_42 = arith.constant 1.000000e+00 : f32
      %95 = vector.broadcast %cst_42 : f32 to vector<6x1xf32>
      %96 = arith.cmpf oeq, %80, %95 : vector<6x1xf32>
      %cst_43 = arith.constant 1.120000e+02 : f32
      %97 = vector.broadcast %cst_43 : f32 to vector<1x128xf32>
      %98 = arith.cmpf oge, %66, %97 : vector<1x128xf32>
      %99 = vector.broadcast %96 : vector<6x1xi1> to vector<6x128xi1>
      %100 = vector.broadcast %98 : vector<1x128xi1> to vector<6x128xi1>
      %101 = arith.andi %99, %100 : vector<6x128xi1>
      %102 = arith.ori %94, %101 : vector<6x128xi1>
      %cst_44 = arith.constant 0.000000e+00 : f32
      %cst_45 = arith.constant 1.000000e+00 : f32
      %103 = vector.broadcast %cst_44 : f32 to vector<6x128xf32>
      %104 = vector.broadcast %cst_45 : f32 to vector<6x128xf32>
      %105 = arith.select %102, %103, %104 : vector<6x128xi1>, vector<6x128xf32>
      %c1_i32_46 = arith.constant 1 : i32
      %106 = tpu.dynamic_rotate %63 by %c1_i32_46 dim 1 : vector<6x128xf32>, i32 -> vector<6x128xf32>
      %107 = arith.addf %63, %106 : vector<6x128xf32>
      %c127_i32 = arith.constant 127 : i32
      %108 = tpu.dynamic_rotate %63 by %c127_i32 dim 1 : vector<6x128xf32>, i32 -> vector<6x128xf32>
      %109 = arith.addf %107, %108 : vector<6x128xf32>
      %110 = vector.extract_strided_slice %109 {offsets = [5, 0], sizes = [1, 128], strides = [1, 1]} : vector<6x128xf32> to vector<1x128xf32>
      %111 = vector.extract_strided_slice %109 {offsets = [0, 0], sizes = [5, 128], strides = [1, 1]} : vector<6x128xf32> to vector<5x128xf32>
      %112 = tpu.concatenate %110, %111 in 0 : vector<1x128xf32>, vector<5x128xf32> -> vector<6x128xf32>
      %113 = vector.extract_strided_slice %109 {offsets = [1, 0], sizes = [5, 128], strides = [1, 1]} : vector<6x128xf32> to vector<5x128xf32>
      %114 = vector.extract_strided_slice %109 {offsets = [0, 0], sizes = [1, 128], strides = [1, 1]} : vector<6x128xf32> to vector<1x128xf32>
      %115 = tpu.concatenate %113, %114 in 0 : vector<5x128xf32>, vector<1x128xf32> -> vector<6x128xf32>
      %cst_47 = arith.constant 1.120000e+02 : f32
      %116 = vector.broadcast %cst_47 : f32 to vector<1x128xf32>
      %117 = arith.cmpf oge, %66, %116 : vector<1x128xf32>
      %118 = vector.shape_cast %117 : vector<1x128xi1> to vector<1x128xi1>
      %119 = vector.broadcast %118 : vector<1x128xi1> to vector<6x128xi1>
      %120 = arith.select %119, %112, %109 : vector<6x128xi1>, vector<6x128xf32>
      %cst_48 = arith.constant 1.600000e+01 : f32
      %121 = vector.broadcast %cst_48 : f32 to vector<1x128xf32>
      %122 = arith.cmpf olt, %66, %121 : vector<1x128xf32>
      %123 = vector.shape_cast %122 : vector<1x128xi1> to vector<1x128xi1>
      %124 = vector.broadcast %123 : vector<1x128xi1> to vector<6x128xi1>
      %125 = arith.select %124, %115, %109 : vector<6x128xi1>, vector<6x128xf32>
      %c16_i32 = arith.constant 16 : i32
      %126 = tpu.dynamic_rotate %120 by %c16_i32 dim 1 : vector<6x128xf32>, i32 -> vector<6x128xf32>
      %c112_i32 = arith.constant 112 : i32
      %127 = tpu.dynamic_rotate %125 by %c112_i32 dim 1 : vector<6x128xf32>, i32 -> vector<6x128xf32>
      %128 = arith.addf %109, %126 : vector<6x128xf32>
      %129 = arith.addf %128, %127 : vector<6x128xf32>
      %cst_49 = arith.constant 4.000000e+00 : f32
      %130 = vector.broadcast %cst_49 : f32 to vector<6x128xf32>
      %131 = arith.mulf %130, %63 : vector<6x128xf32>
      %132 = arith.addf %129, %131 : vector<6x128xf32>
      %cst_50 = arith.constant 0.0769230798 : f32
      %133 = vector.broadcast %cst_50 : f32 to vector<6x128xf32>
      %134 = arith.mulf %132, %133 : vector<6x128xf32>
      %cst_51 = arith.constant 1.000000e+00 : f32
      %135 = arith.subf %cst_51, %64 : f32
      %136 = vector.broadcast %135 : f32 to vector<6x128xf32>
      %137 = arith.mulf %136, %105 : vector<6x128xf32>
      %138 = math.roundeven %134 : vector<6x128xf32>
      %139 = arith.subf %138, %63 : vector<6x128xf32>
      %140 = arith.mulf %137, %139 : vector<6x128xf32>
      %141 = arith.addf %63, %140 : vector<6x128xf32>
      %cst_52 = arith.constant 0.000000e+00 : f32
      %cst_53 = arith.constant 2.550000e+02 : f32
      %142 = vector.broadcast %cst_52 : f32 to vector<6x128xf32>
      %143 = arith.maximumf %142, %141 : vector<6x128xf32>
      %144 = vector.broadcast %cst_53 : f32 to vector<6x128xf32>
      %145 = arith.minimumf %144, %143 : vector<6x128xf32>
      %146 = arith.fptoui %145 : vector<6x128xf32> to vector<6x128xi8>
      %c0_54 = arith.constant 0 : index
      %c0_55 = arith.constant 0 : index
      %c0_56 = arith.constant 0 : index
      %147 = vector.load %arg4[%c0_54, %c0_55, %c0_56] : memref<1x6x128xi8, #tpu.memory_space<vmem>>, vector<1x6x128xi8>
      %148 = vector.shape_cast %147 : vector<1x6x128xi8> to vector<6x128xi8>
      %149 = vector.shape_cast %146 : vector<6x128xi8> to vector<1x6x128xi8>
      tpu.vector_store %arg4[%c0_54, %c0_55, %c0_56], %149 {strides = array<i32>} : memref<1x6x128xi8, #tpu.memory_space<vmem>>, vector<1x6x128xi8>,
    } else {
    }
    %c5_i32 = arith.constant 5 : i32
    %21 = arith.cmpi eq, %6, %c5_i32 : i32
    %22 = arith.extui %21 : i1 to i32
    %c0_i32_10 = arith.constant 0 : i32
    %23 = arith.cmpi ne, %22, %c0_i32_10 : i32
    scf.if %23 {
      %c0_31 = arith.constant 0 : index
      %c0_32 = arith.constant 0 : index
      %c0_33 = arith.constant 0 : index
      %61 = vector.load %arg4[%c0_31, %c0_32, %c0_33] : memref<1x6x128xi8, #tpu.memory_space<vmem>>, vector<1x6x128xi8>
      %62 = vector.shape_cast %61 : vector<1x6x128xi8> to vector<6x128xi8>
      %63 = arith.uitofp %62 : vector<6x128xi8> to vector<6x128xf32>
      %64 = arith.fptosi %8 : f32 to i32
      %c8_i32_34 = arith.constant 8 : i32
      %65 = arith.subi %c8_i32_34, %64 : i32
      %c1_i32_35 = arith.constant 1 : i32
      %66 = arith.shli %c1_i32_35, %65 : i32
      %67 = arith.sitofp %66 : i32 to f32
      %cst = arith.constant 1.000000e+00 : f32
      %68 = arith.divf %cst, %67 : f32
      %69 = vector.broadcast %68 : f32 to vector<6x128xf32>
      %70 = arith.mulf %63, %69 : vector<6x128xf32>
      %71 = math.floor %70 : vector<6x128xf32>
      %72 = vector.broadcast %67 : f32 to vector<6x128xf32>
      %73 = arith.mulf %71, %72 : vector<6x128xf32>
      %74 = arith.fptoui %73 : vector<6x128xf32> to vector<6x128xi8>
      %c0_36 = arith.constant 0 : index
      %c0_37 = arith.constant 0 : index
      %c0_38 = arith.constant 0 : index
      %75 = vector.load %arg4[%c0_36, %c0_37, %c0_38] : memref<1x6x128xi8, #tpu.memory_space<vmem>>, vector<1x6x128xi8>
      %76 = vector.shape_cast %75 : vector<1x6x128xi8> to vector<6x128xi8>
      %77 = vector.shape_cast %74 : vector<6x128xi8> to vector<1x6x128xi8>
      tpu.vector_store %arg4[%c0_36, %c0_37, %c0_38], %77 {strides = array<i32>} : memref<1x6x128xi8, #tpu.memory_space<vmem>>, vector<1x6x128xi8>,
    } else {
    }
    %c6_i32 = arith.constant 6 : i32
    %24 = arith.cmpi eq, %6, %c6_i32 : i32
    %25 = arith.extui %24 : i1 to i32
    %c0_i32_11 = arith.constant 0 : i32
    %26 = arith.cmpi ne, %25, %c0_i32_11 : i32
    scf.if %26 {
      %c0_31 = arith.constant 0 : index
      %c0_32 = arith.constant 0 : index
      %c0_33 = arith.constant 0 : index
      %61 = vector.load %arg4[%c0_31, %c0_32, %c0_33] : memref<1x6x128xi8, #tpu.memory_space<vmem>>, vector<1x6x128xi8>
      %62 = vector.shape_cast %61 : vector<1x6x128xi8> to vector<6x128xi8>
      %63 = arith.uitofp %62 : vector<6x128xi8> to vector<6x128xf32>
      %64 = vector.broadcast %8 : f32 to vector<6x128xf32>
      %65 = arith.cmpf oge, %63, %64 : vector<6x128xf32>
      %cst = arith.constant 2.550000e+02 : f32
      %66 = vector.broadcast %cst : f32 to vector<6x128xf32>
      %67 = arith.subf %66, %63 : vector<6x128xf32>
      %68 = arith.select %65, %67, %63 : vector<6x128xi1>, vector<6x128xf32>
      %69 = arith.fptoui %68 : vector<6x128xf32> to vector<6x128xi8>
      %c0_34 = arith.constant 0 : index
      %c0_35 = arith.constant 0 : index
      %c0_36 = arith.constant 0 : index
      %70 = vector.load %arg4[%c0_34, %c0_35, %c0_36] : memref<1x6x128xi8, #tpu.memory_space<vmem>>, vector<1x6x128xi8>
      %71 = vector.shape_cast %70 : vector<1x6x128xi8> to vector<6x128xi8>
      %72 = vector.shape_cast %69 : vector<6x128xi8> to vector<1x6x128xi8>
      tpu.vector_store %arg4[%c0_34, %c0_35, %c0_36], %72 {strides = array<i32>} : memref<1x6x128xi8, #tpu.memory_space<vmem>>, vector<1x6x128xi8>,
    } else {
    }
    %c7_i32 = arith.constant 7 : i32
    %27 = arith.cmpi eq, %6, %c7_i32 : i32
    %28 = arith.extui %27 : i1 to i32
    %c0_i32_12 = arith.constant 0 : i32
    %29 = arith.cmpi ne, %28, %c0_i32_12 : i32
    scf.if %29 {
      %c0_31 = arith.constant 0 : index
      %c0_32 = arith.constant 0 : index
      %c0_33 = arith.constant 0 : index
      %61 = vector.load %arg4[%c0_31, %c0_32, %c0_33] : memref<1x6x128xi8, #tpu.memory_space<vmem>>, vector<1x6x128xi8>
      %62 = vector.shape_cast %61 : vector<1x6x128xi8> to vector<6x128xi8>
      %63 = arith.uitofp %62 : vector<6x128xi8> to vector<6x128xf32>
      %64 = vector.extract_strided_slice %63 {offsets = [0, 0], sizes = [2, 128], strides = [1, 1]} : vector<6x128xf32> to vector<2x128xf32>
      %65 = vector.shape_cast %64 : vector<2x128xf32> to vector<1x2x128xf32>
      %cst = arith.constant dense<0x7F800000> : vector<1xf32>
      %66 = vector.multi_reduction <minimumf>, %65, %cst [1, 2] : vector<1x2x128xf32> to vector<1xf32>
      %67 = vector.shape_cast %66 : vector<1xf32> to vector<1x1x1xf32>
      %68 = vector.extract %67[0, 0, 0] : f32 from vector<1x1x1xf32>
      %69 = vector.broadcast %68 : f32 to vector<1x1xf32>
      %70 = vector.shape_cast %64 : vector<2x128xf32> to vector<1x2x128xf32>
      %cst_34 = arith.constant dense<0xFF800000> : vector<1xf32>
      %71 = vector.multi_reduction <maximumf>, %70, %cst_34 [1, 2] : vector<1x2x128xf32> to vector<1xf32>
      %72 = vector.shape_cast %71 : vector<1xf32> to vector<1x1x1xf32>
      %73 = vector.extract %72[0, 0, 0] : f32 from vector<1x1x1xf32>
      %74 = vector.broadcast %73 : f32 to vector<1x1xf32>
      %75 = arith.cmpf oeq, %74, %69 : vector<1x1xf32>
      %76 = arith.subf %74, %69 : vector<1x1xf32>
      %cst_35 = arith.constant 1.000000e+00 : f32
      %77 = vector.broadcast %cst_35 : f32 to vector<1x1xf32>
      %78 = arith.select %75, %77, %76 : vector<1x1xi1>, vector<1x1xf32>
      %cst_36 = arith.constant 2.550000e+02 : f32
      %79 = vector.broadcast %cst_36 : f32 to vector<1x1xf32>
      %80 = arith.divf %79, %78 : vector<1x1xf32>
      %cst_37 = arith.constant 1.000000e+00 : f32
      %81 = vector.broadcast %cst_37 : f32 to vector<1x1xf32>
      %82 = arith.select %75, %81, %80 : vector<1x1xi1>, vector<1x1xf32>
      %cst_38 = arith.constant 0.000000e+00 : f32
      %83 = vector.broadcast %cst_38 : f32 to vector<1x1xf32>
      %84 = arith.select %75, %83, %69 : vector<1x1xi1>, vector<1x1xf32>
      %85 = vector.broadcast %84 : vector<1x1xf32> to vector<2x128xf32>
      %86 = arith.subf %64, %85 : vector<2x128xf32>
      %87 = vector.broadcast %82 : vector<1x1xf32> to vector<2x128xf32>
      %88 = arith.mulf %86, %87 : vector<2x128xf32>
      %cst_39 = arith.constant 0.000000e+00 : f32
      %cst_40 = arith.constant 2.550000e+02 : f32
      %89 = vector.broadcast %cst_39 : f32 to vector<2x128xf32>
      %90 = arith.maximumf %89, %88 : vector<2x128xf32>
      %91 = vector.broadcast %cst_40 : f32 to vector<2x128xf32>
      %92 = arith.minimumf %91, %90 : vector<2x128xf32>
      %93 = vector.extract_strided_slice %63 {offsets = [2, 0], sizes = [2, 128], strides = [1, 1]} : vector<6x128xf32> to vector<2x128xf32>
      %94 = vector.shape_cast %93 : vector<2x128xf32> to vector<1x2x128xf32>
      %cst_41 = arith.constant dense<0x7F800000> : vector<1xf32>
      %95 = vector.multi_reduction <minimumf>, %94, %cst_41 [1, 2] : vector<1x2x128xf32> to vector<1xf32>
      %96 = vector.shape_cast %95 : vector<1xf32> to vector<1x1x1xf32>
      %97 = vector.extract %96[0, 0, 0] : f32 from vector<1x1x1xf32>
      %98 = vector.broadcast %97 : f32 to vector<1x1xf32>
      %99 = vector.shape_cast %93 : vector<2x128xf32> to vector<1x2x128xf32>
      %cst_42 = arith.constant dense<0xFF800000> : vector<1xf32>
      %100 = vector.multi_reduction <maximumf>, %99, %cst_42 [1, 2] : vector<1x2x128xf32> to vector<1xf32>
      %101 = vector.shape_cast %100 : vector<1xf32> to vector<1x1x1xf32>
      %102 = vector.extract %101[0, 0, 0] : f32 from vector<1x1x1xf32>
      %103 = vector.broadcast %102 : f32 to vector<1x1xf32>
      %104 = arith.cmpf oeq, %103, %98 : vector<1x1xf32>
      %105 = arith.subf %103, %98 : vector<1x1xf32>
      %cst_43 = arith.constant 1.000000e+00 : f32
      %106 = vector.broadcast %cst_43 : f32 to vector<1x1xf32>
      %107 = arith.select %104, %106, %105 : vector<1x1xi1>, vector<1x1xf32>
      %cst_44 = arith.constant 2.550000e+02 : f32
      %108 = vector.broadcast %cst_44 : f32 to vector<1x1xf32>
      %109 = arith.divf %108, %107 : vector<1x1xf32>
      %cst_45 = arith.constant 1.000000e+00 : f32
      %110 = vector.broadcast %cst_45 : f32 to vector<1x1xf32>
      %111 = arith.select %104, %110, %109 : vector<1x1xi1>, vector<1x1xf32>
      %cst_46 = arith.constant 0.000000e+00 : f32
      %112 = vector.broadcast %cst_46 : f32 to vector<1x1xf32>
      %113 = arith.select %104, %112, %98 : vector<1x1xi1>, vector<1x1xf32>
      %114 = vector.broadcast %113 : vector<1x1xf32> to vector<2x128xf32>
      %115 = arith.subf %93, %114 : vector<2x128xf32>
      %116 = vector.broadcast %111 : vector<1x1xf32> to vector<2x128xf32>
      %117 = arith.mulf %115, %116 : vector<2x128xf32>
      %cst_47 = arith.constant 0.000000e+00 : f32
      %cst_48 = arith.constant 2.550000e+02 : f32
      %118 = vector.broadcast %cst_47 : f32 to vector<2x128xf32>
      %119 = arith.maximumf %118, %117 : vector<2x128xf32>
      %120 = vector.broadcast %cst_48 : f32 to vector<2x128xf32>
      %121 = arith.minimumf %120, %119 : vector<2x128xf32>
      %122 = vector.extract_strided_slice %63 {offsets = [4, 0], sizes = [2, 128], strides = [1, 1]} : vector<6x128xf32> to vector<2x128xf32>
      %123 = vector.shape_cast %122 : vector<2x128xf32> to vector<1x2x128xf32>
      %cst_49 = arith.constant dense<0x7F800000> : vector<1xf32>
      %124 = vector.multi_reduction <minimumf>, %123, %cst_49 [1, 2] : vector<1x2x128xf32> to vector<1xf32>
      %125 = vector.shape_cast %124 : vector<1xf32> to vector<1x1x1xf32>
      %126 = vector.extract %125[0, 0, 0] : f32 from vector<1x1x1xf32>
      %127 = vector.broadcast %126 : f32 to vector<1x1xf32>
      %128 = vector.shape_cast %122 : vector<2x128xf32> to vector<1x2x128xf32>
      %cst_50 = arith.constant dense<0xFF800000> : vector<1xf32>
      %129 = vector.multi_reduction <maximumf>, %128, %cst_50 [1, 2] : vector<1x2x128xf32> to vector<1xf32>
      %130 = vector.shape_cast %129 : vector<1xf32> to vector<1x1x1xf32>
      %131 = vector.extract %130[0, 0, 0] : f32 from vector<1x1x1xf32>
      %132 = vector.broadcast %131 : f32 to vector<1x1xf32>
      %133 = arith.cmpf oeq, %132, %127 : vector<1x1xf32>
      %134 = arith.subf %132, %127 : vector<1x1xf32>
      %cst_51 = arith.constant 1.000000e+00 : f32
      %135 = vector.broadcast %cst_51 : f32 to vector<1x1xf32>
      %136 = arith.select %133, %135, %134 : vector<1x1xi1>, vector<1x1xf32>
      %cst_52 = arith.constant 2.550000e+02 : f32
      %137 = vector.broadcast %cst_52 : f32 to vector<1x1xf32>
      %138 = arith.divf %137, %136 : vector<1x1xf32>
      %cst_53 = arith.constant 1.000000e+00 : f32
      %139 = vector.broadcast %cst_53 : f32 to vector<1x1xf32>
      %140 = arith.select %133, %139, %138 : vector<1x1xi1>, vector<1x1xf32>
      %cst_54 = arith.constant 0.000000e+00 : f32
      %141 = vector.broadcast %cst_54 : f32 to vector<1x1xf32>
      %142 = arith.select %133, %141, %127 : vector<1x1xi1>, vector<1x1xf32>
      %143 = vector.broadcast %142 : vector<1x1xf32> to vector<2x128xf32>
      %144 = arith.subf %122, %143 : vector<2x128xf32>
      %145 = vector.broadcast %140 : vector<1x1xf32> to vector<2x128xf32>
      %146 = arith.mulf %144, %145 : vector<2x128xf32>
      %cst_55 = arith.constant 0.000000e+00 : f32
      %cst_56 = arith.constant 2.550000e+02 : f32
      %147 = vector.broadcast %cst_55 : f32 to vector<2x128xf32>
      %148 = arith.maximumf %147, %146 : vector<2x128xf32>
      %149 = vector.broadcast %cst_56 : f32 to vector<2x128xf32>
      %150 = arith.minimumf %149, %148 : vector<2x128xf32>
      %151 = tpu.concatenate %92, %121, %150 in 0 : vector<2x128xf32>, vector<2x128xf32>, vector<2x128xf32> -> vector<6x128xf32>
      %152 = arith.fptoui %151 : vector<6x128xf32> to vector<6x128xi8>
      %c0_57 = arith.constant 0 : index
      %c0_58 = arith.constant 0 : index
      %c0_59 = arith.constant 0 : index
      %153 = vector.load %arg4[%c0_57, %c0_58, %c0_59] : memref<1x6x128xi8, #tpu.memory_space<vmem>>, vector<1x6x128xi8>
      %154 = vector.shape_cast %153 : vector<1x6x128xi8> to vector<6x128xi8>
      %155 = vector.shape_cast %152 : vector<6x128xi8> to vector<1x6x128xi8>
      tpu.vector_store %arg4[%c0_57, %c0_58, %c0_59], %155 {strides = array<i32>} : memref<1x6x128xi8, #tpu.memory_space<vmem>>, vector<1x6x128xi8>,
    } else {
    }
    %c8_i32 = arith.constant 8 : i32
    %30 = arith.cmpi eq, %6, %c8_i32 : i32
    %31 = arith.extui %30 : i1 to i32
    %c0_i32_13 = arith.constant 0 : i32
    %32 = arith.cmpi ne, %31, %c0_i32_13 : i32
    scf.if %32 {
      %c0_31 = arith.constant 0 : index
      %c0_32 = arith.constant 0 : index
      %c0_33 = arith.constant 0 : index
      %61 = vector.load %arg4[%c0_31, %c0_32, %c0_33] : memref<1x6x128xi8, #tpu.memory_space<vmem>>, vector<1x6x128xi8>
      %62 = vector.shape_cast %61 : vector<1x6x128xi8> to vector<6x128xi8>
      %63 = arith.uitofp %62 : vector<6x128xi8> to vector<6x128xf32>
      %64 = tpu.iota {dimensions = array<i32: 0>} : vector<16x1xi32>
      %65 = arith.sitofp %64 : vector<16x1xi32> to vector<16x1xf32>
      %66 = tpu.iota {dimensions = array<i32: 0>} : vector<16x16xi32>
      %67 = tpu.iota {dimensions = array<i32: 1>} : vector<16x16xi32>
      %c0_i32_34 = arith.constant 0 : i32
      %68 = vector.broadcast %c0_i32_34 : i32 to vector<16x16xi32>
      %69 = arith.cmpi eq, %66, %68 : vector<16x16xi32>
      %c0_i32_35 = arith.constant 0 : i32
      %70 = vector.broadcast %c0_i32_35 : i32 to vector<16x16xi32>
      %71 = arith.cmpi eq, %67, %70 : vector<16x16xi32>
      %72 = arith.andi %69, %71 : vector<16x16xi1>
      %cst = arith.constant 0.000000e+00 : f32
      %73 = vector.broadcast %cst : f32 to vector<16x16xf32>
      %cst_36 = arith.constant 0.000000e+00 : f32
      %74 = vector.broadcast %cst_36 : f32 to vector<16x16xf32>
      %cst_37 = arith.constant 0.000000e+00 : f32
      %75 = vector.broadcast %cst_37 : f32 to vector<16x1xf32>
      %76 = vector.extract_strided_slice %63 {offsets = [0, 0], sizes = [1, 128], strides = [1, 1]} : vector<6x128xf32> to vector<1x128xf32>
      %cst_38 = arith.constant 6.250000e-02 : f32
      %77 = vector.broadcast %cst_38 : f32 to vector<1x128xf32>
      %78 = arith.mulf %76, %77 : vector<1x128xf32>
      %79 = math.floor %78 : vector<1x128xf32>
      %cst_39 = arith.constant 1.600000e+01 : f32
      %80 = vector.broadcast %cst_39 : f32 to vector<1x128xf32>
      %81 = arith.mulf %80, %79 : vector<1x128xf32>
      %82 = arith.subf %76, %81 : vector<1x128xf32>
      %83 = vector.broadcast %79 : vector<1x128xf32> to vector<16x128xf32>
      %84 = vector.broadcast %65 : vector<16x1xf32> to vector<16x128xf32>
      %85 = arith.cmpf oeq, %83, %84 : vector<16x128xf32>
      %cst_40 = arith.constant 1.000000e+00 : f32
      %cst_41 = arith.constant 0.000000e+00 : f32
      %86 = vector.broadcast %cst_40 : f32 to vector<16x128xf32>
      %87 = vector.broadcast %cst_41 : f32 to vector<16x128xf32>
      %88 = arith.select %85, %86, %87 : vector<16x128xi1>, vector<16x128xf32>
      %89 = vector.broadcast %82 : vector<1x128xf32> to vector<16x128xf32>
      %90 = vector.broadcast %65 : vector<16x1xf32> to vector<16x128xf32>
      %91 = arith.cmpf ole, %89, %90 : vector<16x128xf32>
      %cst_42 = arith.constant 1.000000e+00 : f32
      %cst_43 = arith.constant 0.000000e+00 : f32
      %92 = vector.broadcast %cst_42 : f32 to vector<16x128xf32>
      %93 = vector.broadcast %cst_43 : f32 to vector<16x128xf32>
      %94 = arith.select %91, %92, %93 : vector<16x128xi1>, vector<16x128xf32>
      %95 = arith.truncf %88 : vector<16x128xf32> to vector<16x128xbf16>
      %96 = arith.truncf %94 : vector<16x128xf32> to vector<16x128xbf16>
      %cst_44 = arith.constant dense<0.000000e+00> : vector<16x16xf32>
      %97 = tpu.matmul %95, %96, %cst_44 {dimension_numbers = #tpu.dot_dimension_numbers<[1], [1], [0], [0], [0, 0, 1, 0], [], []>} : vector<16x128xbf16>, vector<16x128xbf16>, vector<16x16xf32> -> vector<16x16xf32>
      %98 = arith.addf %73, %97 : vector<16x16xf32>
      %99 = vector.broadcast %82 : vector<1x128xf32> to vector<16x128xf32>
      %100 = vector.broadcast %65 : vector<16x1xf32> to vector<16x128xf32>
      %101 = arith.cmpf oeq, %99, %100 : vector<16x128xf32>
      %cst_45 = arith.constant 1.000000e+00 : f32
      %cst_46 = arith.constant 0.000000e+00 : f32
      %102 = vector.broadcast %cst_45 : f32 to vector<16x128xf32>
      %103 = vector.broadcast %cst_46 : f32 to vector<16x128xf32>
      %104 = arith.select %101, %102, %103 : vector<16x128xi1>, vector<16x128xf32>
      %105 = arith.truncf %88 : vector<16x128xf32> to vector<16x128xbf16>
      %106 = arith.truncf %104 : vector<16x128xf32> to vector<16x128xbf16>
      %cst_47 = arith.constant dense<0.000000e+00> : vector<16x16xf32>
      %107 = tpu.matmul %105, %106, %cst_47 {dimension_numbers = #tpu.dot_dimension_numbers<[1], [1], [0], [0], [0, 0, 1, 0], [], []>} : vector<16x128xbf16>, vector<16x128xbf16>, vector<16x16xf32> -> vector<16x16xf32>
      %108 = arith.addf %74, %107 : vector<16x16xf32>
      %109 = vector.broadcast %79 : vector<1x128xf32> to vector<16x128xf32>
      %110 = vector.broadcast %65 : vector<16x1xf32> to vector<16x128xf32>
      %111 = arith.cmpf olt, %109, %110 : vector<16x128xf32>
      %cst_48 = arith.constant 1.000000e+00 : f32
      %cst_49 = arith.constant 0.000000e+00 : f32
      %112 = vector.broadcast %cst_48 : f32 to vector<16x128xf32>
      %113 = vector.broadcast %cst_49 : f32 to vector<16x128xf32>
      %114 = arith.select %111, %112, %113 : vector<16x128xi1>, vector<16x128xf32>
      %cst_50 = arith.constant dense<0.000000e+00> : vector<16xf32>
      %115 = vector.multi_reduction <add>, %114, %cst_50 [1] : vector<16x128xf32> to vector<16xf32>
      %116 = vector.shape_cast %115 : vector<16xf32> to vector<16x1xf32>
      %117 = arith.addf %75, %116 : vector<16x1xf32>
      %118 = vector.extract_strided_slice %63 {offsets = [1, 0], sizes = [1, 128], strides = [1, 1]} : vector<6x128xf32> to vector<1x128xf32>
      %cst_51 = arith.constant 6.250000e-02 : f32
      %119 = vector.broadcast %cst_51 : f32 to vector<1x128xf32>
      %120 = arith.mulf %118, %119 : vector<1x128xf32>
      %121 = math.floor %120 : vector<1x128xf32>
      %cst_52 = arith.constant 1.600000e+01 : f32
      %122 = vector.broadcast %cst_52 : f32 to vector<1x128xf32>
      %123 = arith.mulf %122, %121 : vector<1x128xf32>
      %124 = arith.subf %118, %123 : vector<1x128xf32>
      %125 = vector.broadcast %121 : vector<1x128xf32> to vector<16x128xf32>
      %126 = vector.broadcast %65 : vector<16x1xf32> to vector<16x128xf32>
      %127 = arith.cmpf oeq, %125, %126 : vector<16x128xf32>
      %cst_53 = arith.constant 1.000000e+00 : f32
      %cst_54 = arith.constant 0.000000e+00 : f32
      %128 = vector.broadcast %cst_53 : f32 to vector<16x128xf32>
      %129 = vector.broadcast %cst_54 : f32 to vector<16x128xf32>
      %130 = arith.select %127, %128, %129 : vector<16x128xi1>, vector<16x128xf32>
      %131 = vector.broadcast %124 : vector<1x128xf32> to vector<16x128xf32>
      %132 = vector.broadcast %65 : vector<16x1xf32> to vector<16x128xf32>
      %133 = arith.cmpf ole, %131, %132 : vector<16x128xf32>
      %cst_55 = arith.constant 1.000000e+00 : f32
      %cst_56 = arith.constant 0.000000e+00 : f32
      %134 = vector.broadcast %cst_55 : f32 to vector<16x128xf32>
      %135 = vector.broadcast %cst_56 : f32 to vector<16x128xf32>
      %136 = arith.select %133, %134, %135 : vector<16x128xi1>, vector<16x128xf32>
      %137 = arith.truncf %130 : vector<16x128xf32> to vector<16x128xbf16>
      %138 = arith.truncf %136 : vector<16x128xf32> to vector<16x128xbf16>
      %cst_57 = arith.constant dense<0.000000e+00> : vector<16x16xf32>
      %139 = tpu.matmul %137, %138, %cst_57 {dimension_numbers = #tpu.dot_dimension_numbers<[1], [1], [0], [0], [0, 0, 1, 0], [], []>} : vector<16x128xbf16>, vector<16x128xbf16>, vector<16x16xf32> -> vector<16x16xf32>
      %140 = arith.addf %98, %139 : vector<16x16xf32>
      %141 = vector.broadcast %124 : vector<1x128xf32> to vector<16x128xf32>
      %142 = vector.broadcast %65 : vector<16x1xf32> to vector<16x128xf32>
      %143 = arith.cmpf oeq, %141, %142 : vector<16x128xf32>
      %cst_58 = arith.constant 1.000000e+00 : f32
      %cst_59 = arith.constant 0.000000e+00 : f32
      %144 = vector.broadcast %cst_58 : f32 to vector<16x128xf32>
      %145 = vector.broadcast %cst_59 : f32 to vector<16x128xf32>
      %146 = arith.select %143, %144, %145 : vector<16x128xi1>, vector<16x128xf32>
      %147 = arith.truncf %130 : vector<16x128xf32> to vector<16x128xbf16>
      %148 = arith.truncf %146 : vector<16x128xf32> to vector<16x128xbf16>
      %cst_60 = arith.constant dense<0.000000e+00> : vector<16x16xf32>
      %149 = tpu.matmul %147, %148, %cst_60 {dimension_numbers = #tpu.dot_dimension_numbers<[1], [1], [0], [0], [0, 0, 1, 0], [], []>} : vector<16x128xbf16>, vector<16x128xbf16>, vector<16x16xf32> -> vector<16x16xf32>
      %150 = arith.addf %108, %149 : vector<16x16xf32>
      %151 = vector.broadcast %121 : vector<1x128xf32> to vector<16x128xf32>
      %152 = vector.broadcast %65 : vector<16x1xf32> to vector<16x128xf32>
      %153 = arith.cmpf olt, %151, %152 : vector<16x128xf32>
      %cst_61 = arith.constant 1.000000e+00 : f32
      %cst_62 = arith.constant 0.000000e+00 : f32
      %154 = vector.broadcast %cst_61 : f32 to vector<16x128xf32>
      %155 = vector.broadcast %cst_62 : f32 to vector<16x128xf32>
      %156 = arith.select %153, %154, %155 : vector<16x128xi1>, vector<16x128xf32>
      %cst_63 = arith.constant dense<0.000000e+00> : vector<16xf32>
      %157 = vector.multi_reduction <add>, %156, %cst_63 [1] : vector<16x128xf32> to vector<16xf32>
      %158 = vector.shape_cast %157 : vector<16xf32> to vector<16x1xf32>
      %159 = arith.addf %117, %158 : vector<16x1xf32>
      %160 = vector.broadcast %159 : vector<16x1xf32> to vector<16x16xf32>
      %161 = arith.addf %140, %160 : vector<16x16xf32>
      %162 = arith.subf %161, %150 : vector<16x16xf32>
      %cst_64 = arith.constant 2.555000e+02 : f32
      %163 = vector.broadcast %cst_64 : f32 to vector<16x16xf32>
      %164 = arith.cmpf oge, %161, %163 : vector<16x16xf32>
      %cst_65 = arith.constant 5.000000e-01 : f32
      %165 = vector.broadcast %cst_65 : f32 to vector<16x16xf32>
      %166 = arith.cmpf ogt, %150, %165 : vector<16x16xf32>
      %167 = arith.andi %164, %166 : vector<16x16xi1>
      %cst_66 = arith.constant 0.000000e+00 : f32
      %168 = vector.broadcast %cst_66 : f32 to vector<16x16xf32>
      %169 = arith.select %167, %150, %168 : vector<16x16xi1>, vector<16x16xf32>
      %170 = vector.shape_cast %169 : vector<16x16xf32> to vector<1x16x16xf32>
      %cst_67 = arith.constant dense<0.000000e+00> : vector<1xf32>
      %171 = vector.multi_reduction <add>, %170, %cst_67 [1, 2] : vector<1x16x16xf32> to vector<1xf32>
      %172 = vector.shape_cast %171 : vector<1xf32> to vector<1x1x1xf32>
      %173 = vector.extract %172[0, 0, 0] : f32 from vector<1x1x1xf32>
      %174 = vector.broadcast %173 : f32 to vector<1x1xf32>
      %cst_68 = arith.constant 2.560000e+02 : f32
      %175 = vector.broadcast %cst_68 : f32 to vector<1x1xf32>
      %176 = arith.subf %175, %174 : vector<1x1xf32>
      %cst_69 = arith.constant 0.00392156886 : f32
      %177 = vector.broadcast %cst_69 : f32 to vector<1x1xf32>
      %178 = arith.mulf %176, %177 : vector<1x1xf32>
      %179 = math.floor %178 : vector<1x1xf32>
      %cst_70 = arith.constant 1.000000e+00 : f32
      %180 = vector.broadcast %cst_70 : f32 to vector<1x1xf32>
      %181 = arith.maximumf %179, %180 : vector<1x1xf32>
      %cst_71 = arith.constant 5.000000e-01 : f32
      %182 = vector.broadcast %cst_71 : f32 to vector<1x1xf32>
      %183 = arith.mulf %179, %182 : vector<1x1xf32>
      %184 = math.floor %183 : vector<1x1xf32>
      %185 = vector.broadcast %184 : vector<1x1xf32> to vector<16x16xf32>
      %186 = arith.addf %162, %185 : vector<16x16xf32>
      %187 = vector.broadcast %181 : vector<1x1xf32> to vector<16x16xf32>
      %188 = arith.divf %186, %187 : vector<16x16xf32>
      %189 = math.floor %188 : vector<16x16xf32>
      %190 = vector.broadcast %181 : vector<1x1xf32> to vector<16x16xf32>
      %191 = arith.mulf %189, %190 : vector<16x16xf32>
      %192 = arith.subf %186, %191 : vector<16x16xf32>
      %cst_72 = arith.constant 0.000000e+00 : f32
      %193 = vector.broadcast %cst_72 : f32 to vector<16x16xf32>
      %194 = arith.cmpf olt, %192, %193 : vector<16x16xf32>
      %cst_73 = arith.constant 1.000000e+00 : f32
      %195 = vector.broadcast %cst_73 : f32 to vector<16x16xf32>
      %196 = arith.subf %189, %195 : vector<16x16xf32>
      %197 = arith.select %194, %196, %189 : vector<16x16xi1>, vector<16x16xf32>
      %198 = vector.broadcast %181 : vector<1x1xf32> to vector<16x16xf32>
      %199 = arith.cmpf oge, %192, %198 : vector<16x16xf32>
      %cst_74 = arith.constant 1.000000e+00 : f32
      %200 = vector.broadcast %cst_74 : f32 to vector<16x16xf32>
      %201 = arith.addf %197, %200 : vector<16x16xf32>
      %202 = arith.select %199, %201, %197 : vector<16x16xi1>, vector<16x16xf32>
      %cst_75 = arith.constant 0.000000e+00 : f32
      %cst_76 = arith.constant 2.550000e+02 : f32
      %203 = vector.broadcast %cst_75 : f32 to vector<16x16xf32>
      %204 = arith.maximumf %203, %202 : vector<16x16xf32>
      %205 = vector.broadcast %cst_76 : f32 to vector<16x16xf32>
      %206 = arith.minimumf %205, %204 : vector<16x16xf32>
      %cst_77 = arith.constant 0.000000e+00 : f32
      %207 = vector.broadcast %cst_77 : f32 to vector<16x16xf32>
      %208 = arith.select %72, %207, %206 : vector<16x16xi1>, vector<16x16xf32>
      %209 = arith.truncf %208 : vector<16x16xf32> to vector<16x16xbf16>
      %cst_78 = arith.constant 5.000000e-01 : f32
      %210 = vector.broadcast %cst_78 : f32 to vector<1x1xf32>
      %211 = arith.cmpf oge, %179, %210 : vector<1x1xf32>
      %212 = vector.extract_strided_slice %63 {offsets = [0, 0], sizes = [1, 128], strides = [1, 1]} : vector<6x128xf32> to vector<1x128xf32>
      %cst_79 = arith.constant 6.250000e-02 : f32
      %213 = vector.broadcast %cst_79 : f32 to vector<1x128xf32>
      %214 = arith.mulf %212, %213 : vector<1x128xf32>
      %215 = math.floor %214 : vector<1x128xf32>
      %cst_80 = arith.constant 1.600000e+01 : f32
      %216 = vector.broadcast %cst_80 : f32 to vector<1x128xf32>
      %217 = arith.mulf %216, %215 : vector<1x128xf32>
      %218 = arith.subf %212, %217 : vector<1x128xf32>
      %219 = vector.broadcast %215 : vector<1x128xf32> to vector<16x128xf32>
      %220 = vector.broadcast %65 : vector<16x1xf32> to vector<16x128xf32>
      %221 = arith.cmpf oeq, %219, %220 : vector<16x128xf32>
      %cst_81 = arith.constant 1.000000e+00 : f32
      %cst_82 = arith.constant 0.000000e+00 : f32
      %222 = vector.broadcast %cst_81 : f32 to vector<16x128xf32>
      %223 = vector.broadcast %cst_82 : f32 to vector<16x128xf32>
      %224 = arith.select %221, %222, %223 : vector<16x128xi1>, vector<16x128xf32>
      %225 = vector.broadcast %218 : vector<1x128xf32> to vector<16x128xf32>
      %226 = vector.broadcast %65 : vector<16x1xf32> to vector<16x128xf32>
      %227 = arith.cmpf oeq, %225, %226 : vector<16x128xf32>
      %cst_83 = arith.constant 1.000000e+00 : f32
      %cst_84 = arith.constant 0.000000e+00 : f32
      %228 = vector.broadcast %cst_83 : f32 to vector<16x128xf32>
      %229 = vector.broadcast %cst_84 : f32 to vector<16x128xf32>
      %230 = arith.select %227, %228, %229 : vector<16x128xi1>, vector<16x128xf32>
      %231 = arith.truncf %230 : vector<16x128xf32> to vector<16x128xbf16>
      %cst_85 = arith.constant dense<0.000000e+00> : vector<16x128xf32>
      %232 = tpu.matmul %209, %231, %cst_85 {dimension_numbers = #tpu.dot_dimension_numbers<[1], [0], [0], [1], [0, 0, 1, 1], [], []>} : vector<16x16xbf16>, vector<16x128xbf16>, vector<16x128xf32> -> vector<16x128xf32>
      %233 = arith.mulf %224, %232 : vector<16x128xf32>
      %cst_86 = arith.constant dense<0.000000e+00> : vector<128xf32>
      %234 = vector.multi_reduction <add>, %233, %cst_86 [0] : vector<16x128xf32> to vector<128xf32>
      %235 = vector.shape_cast %234 : vector<128xf32> to vector<1x128xf32>
      %236 = vector.shape_cast %211 : vector<1x1xi1> to vector<1x1xi1>
      %237 = vector.broadcast %236 : vector<1x1xi1> to vector<1x128xi1>
      %238 = arith.select %237, %235, %212 : vector<1x128xi1>, vector<1x128xf32>
      %239 = vector.extract_strided_slice %63 {offsets = [1, 0], sizes = [1, 128], strides = [1, 1]} : vector<6x128xf32> to vector<1x128xf32>
      %cst_87 = arith.constant 6.250000e-02 : f32
      %240 = vector.broadcast %cst_87 : f32 to vector<1x128xf32>
      %241 = arith.mulf %239, %240 : vector<1x128xf32>
      %242 = math.floor %241 : vector<1x128xf32>
      %cst_88 = arith.constant 1.600000e+01 : f32
      %243 = vector.broadcast %cst_88 : f32 to vector<1x128xf32>
      %244 = arith.mulf %243, %242 : vector<1x128xf32>
      %245 = arith.subf %239, %244 : vector<1x128xf32>
      %246 = vector.broadcast %242 : vector<1x128xf32> to vector<16x128xf32>
      %247 = vector.broadcast %65 : vector<16x1xf32> to vector<16x128xf32>
      %248 = arith.cmpf oeq, %246, %247 : vector<16x128xf32>
      %cst_89 = arith.constant 1.000000e+00 : f32
      %cst_90 = arith.constant 0.000000e+00 : f32
      %249 = vector.broadcast %cst_89 : f32 to vector<16x128xf32>
      %250 = vector.broadcast %cst_90 : f32 to vector<16x128xf32>
      %251 = arith.select %248, %249, %250 : vector<16x128xi1>, vector<16x128xf32>
      %252 = vector.broadcast %245 : vector<1x128xf32> to vector<16x128xf32>
      %253 = vector.broadcast %65 : vector<16x1xf32> to vector<16x128xf32>
      %254 = arith.cmpf oeq, %252, %253 : vector<16x128xf32>
      %cst_91 = arith.constant 1.000000e+00 : f32
      %cst_92 = arith.constant 0.000000e+00 : f32
      %255 = vector.broadcast %cst_91 : f32 to vector<16x128xf32>
      %256 = vector.broadcast %cst_92 : f32 to vector<16x128xf32>
      %257 = arith.select %254, %255, %256 : vector<16x128xi1>, vector<16x128xf32>
      %258 = arith.truncf %257 : vector<16x128xf32> to vector<16x128xbf16>
      %cst_93 = arith.constant dense<0.000000e+00> : vector<16x128xf32>
      %259 = tpu.matmul %209, %258, %cst_93 {dimension_numbers = #tpu.dot_dimension_numbers<[1], [0], [0], [1], [0, 0, 1, 1], [], []>} : vector<16x16xbf16>, vector<16x128xbf16>, vector<16x128xf32> -> vector<16x128xf32>
      %260 = arith.mulf %251, %259 : vector<16x128xf32>
      %cst_94 = arith.constant dense<0.000000e+00> : vector<128xf32>
      %261 = vector.multi_reduction <add>, %260, %cst_94 [0] : vector<16x128xf32> to vector<128xf32>
      %262 = vector.shape_cast %261 : vector<128xf32> to vector<1x128xf32>
      %263 = vector.shape_cast %211 : vector<1x1xi1> to vector<1x1xi1>
      %264 = vector.broadcast %263 : vector<1x1xi1> to vector<1x128xi1>
      %265 = arith.select %264, %262, %239 : vector<1x128xi1>, vector<1x128xf32>
      %266 = tpu.concatenate %238, %265 in 0 : vector<1x128xf32>, vector<1x128xf32> -> vector<2x128xf32>
      %cst_95 = arith.constant 0.000000e+00 : f32
      %267 = vector.broadcast %cst_95 : f32 to vector<16x16xf32>
      %cst_96 = arith.constant 0.000000e+00 : f32
      %268 = vector.broadcast %cst_96 : f32 to vector<16x16xf32>
      %cst_97 = arith.constant 0.000000e+00 : f32
      %269 = vector.broadcast %cst_97 : f32 to vector<16x1xf32>
      %270 = vector.extract_strided_slice %63 {offsets = [2, 0], sizes = [1, 128], strides = [1, 1]} : vector<6x128xf32> to vector<1x128xf32>
      %cst_98 = arith.constant 6.250000e-02 : f32
      %271 = vector.broadcast %cst_98 : f32 to vector<1x128xf32>
      %272 = arith.mulf %270, %271 : vector<1x128xf32>
      %273 = math.floor %272 : vector<1x128xf32>
      %cst_99 = arith.constant 1.600000e+01 : f32
      %274 = vector.broadcast %cst_99 : f32 to vector<1x128xf32>
      %275 = arith.mulf %274, %273 : vector<1x128xf32>
      %276 = arith.subf %270, %275 : vector<1x128xf32>
      %277 = vector.broadcast %273 : vector<1x128xf32> to vector<16x128xf32>
      %278 = vector.broadcast %65 : vector<16x1xf32> to vector<16x128xf32>
      %279 = arith.cmpf oeq, %277, %278 : vector<16x128xf32>
      %cst_100 = arith.constant 1.000000e+00 : f32
      %cst_101 = arith.constant 0.000000e+00 : f32
      %280 = vector.broadcast %cst_100 : f32 to vector<16x128xf32>
      %281 = vector.broadcast %cst_101 : f32 to vector<16x128xf32>
      %282 = arith.select %279, %280, %281 : vector<16x128xi1>, vector<16x128xf32>
      %283 = vector.broadcast %276 : vector<1x128xf32> to vector<16x128xf32>
      %284 = vector.broadcast %65 : vector<16x1xf32> to vector<16x128xf32>
      %285 = arith.cmpf ole, %283, %284 : vector<16x128xf32>
      %cst_102 = arith.constant 1.000000e+00 : f32
      %cst_103 = arith.constant 0.000000e+00 : f32
      %286 = vector.broadcast %cst_102 : f32 to vector<16x128xf32>
      %287 = vector.broadcast %cst_103 : f32 to vector<16x128xf32>
      %288 = arith.select %285, %286, %287 : vector<16x128xi1>, vector<16x128xf32>
      %289 = arith.truncf %282 : vector<16x128xf32> to vector<16x128xbf16>
      %290 = arith.truncf %288 : vector<16x128xf32> to vector<16x128xbf16>
      %cst_104 = arith.constant dense<0.000000e+00> : vector<16x16xf32>
      %291 = tpu.matmul %289, %290, %cst_104 {dimension_numbers = #tpu.dot_dimension_numbers<[1], [1], [0], [0], [0, 0, 1, 0], [], []>} : vector<16x128xbf16>, vector<16x128xbf16>, vector<16x16xf32> -> vector<16x16xf32>
      %292 = arith.addf %267, %291 : vector<16x16xf32>
      %293 = vector.broadcast %276 : vector<1x128xf32> to vector<16x128xf32>
      %294 = vector.broadcast %65 : vector<16x1xf32> to vector<16x128xf32>
      %295 = arith.cmpf oeq, %293, %294 : vector<16x128xf32>
      %cst_105 = arith.constant 1.000000e+00 : f32
      %cst_106 = arith.constant 0.000000e+00 : f32
      %296 = vector.broadcast %cst_105 : f32 to vector<16x128xf32>
      %297 = vector.broadcast %cst_106 : f32 to vector<16x128xf32>
      %298 = arith.select %295, %296, %297 : vector<16x128xi1>, vector<16x128xf32>
      %299 = arith.truncf %282 : vector<16x128xf32> to vector<16x128xbf16>
      %300 = arith.truncf %298 : vector<16x128xf32> to vector<16x128xbf16>
      %cst_107 = arith.constant dense<0.000000e+00> : vector<16x16xf32>
      %301 = tpu.matmul %299, %300, %cst_107 {dimension_numbers = #tpu.dot_dimension_numbers<[1], [1], [0], [0], [0, 0, 1, 0], [], []>} : vector<16x128xbf16>, vector<16x128xbf16>, vector<16x16xf32> -> vector<16x16xf32>
      %302 = arith.addf %268, %301 : vector<16x16xf32>
      %303 = vector.broadcast %273 : vector<1x128xf32> to vector<16x128xf32>
      %304 = vector.broadcast %65 : vector<16x1xf32> to vector<16x128xf32>
      %305 = arith.cmpf olt, %303, %304 : vector<16x128xf32>
      %cst_108 = arith.constant 1.000000e+00 : f32
      %cst_109 = arith.constant 0.000000e+00 : f32
      %306 = vector.broadcast %cst_108 : f32 to vector<16x128xf32>
      %307 = vector.broadcast %cst_109 : f32 to vector<16x128xf32>
      %308 = arith.select %305, %306, %307 : vector<16x128xi1>, vector<16x128xf32>
      %cst_110 = arith.constant dense<0.000000e+00> : vector<16xf32>
      %309 = vector.multi_reduction <add>, %308, %cst_110 [1] : vector<16x128xf32> to vector<16xf32>
      %310 = vector.shape_cast %309 : vector<16xf32> to vector<16x1xf32>
      %311 = arith.addf %269, %310 : vector<16x1xf32>
      %312 = vector.extract_strided_slice %63 {offsets = [3, 0], sizes = [1, 128], strides = [1, 1]} : vector<6x128xf32> to vector<1x128xf32>
      %cst_111 = arith.constant 6.250000e-02 : f32
      %313 = vector.broadcast %cst_111 : f32 to vector<1x128xf32>
      %314 = arith.mulf %312, %313 : vector<1x128xf32>
      %315 = math.floor %314 : vector<1x128xf32>
      %cst_112 = arith.constant 1.600000e+01 : f32
      %316 = vector.broadcast %cst_112 : f32 to vector<1x128xf32>
      %317 = arith.mulf %316, %315 : vector<1x128xf32>
      %318 = arith.subf %312, %317 : vector<1x128xf32>
      %319 = vector.broadcast %315 : vector<1x128xf32> to vector<16x128xf32>
      %320 = vector.broadcast %65 : vector<16x1xf32> to vector<16x128xf32>
      %321 = arith.cmpf oeq, %319, %320 : vector<16x128xf32>
      %cst_113 = arith.constant 1.000000e+00 : f32
      %cst_114 = arith.constant 0.000000e+00 : f32
      %322 = vector.broadcast %cst_113 : f32 to vector<16x128xf32>
      %323 = vector.broadcast %cst_114 : f32 to vector<16x128xf32>
      %324 = arith.select %321, %322, %323 : vector<16x128xi1>, vector<16x128xf32>
      %325 = vector.broadcast %318 : vector<1x128xf32> to vector<16x128xf32>
      %326 = vector.broadcast %65 : vector<16x1xf32> to vector<16x128xf32>
      %327 = arith.cmpf ole, %325, %326 : vector<16x128xf32>
      %cst_115 = arith.constant 1.000000e+00 : f32
      %cst_116 = arith.constant 0.000000e+00 : f32
      %328 = vector.broadcast %cst_115 : f32 to vector<16x128xf32>
      %329 = vector.broadcast %cst_116 : f32 to vector<16x128xf32>
      %330 = arith.select %327, %328, %329 : vector<16x128xi1>, vector<16x128xf32>
      %331 = arith.truncf %324 : vector<16x128xf32> to vector<16x128xbf16>
      %332 = arith.truncf %330 : vector<16x128xf32> to vector<16x128xbf16>
      %cst_117 = arith.constant dense<0.000000e+00> : vector<16x16xf32>
      %333 = tpu.matmul %331, %332, %cst_117 {dimension_numbers = #tpu.dot_dimension_numbers<[1], [1], [0], [0], [0, 0, 1, 0], [], []>} : vector<16x128xbf16>, vector<16x128xbf16>, vector<16x16xf32> -> vector<16x16xf32>
      %334 = arith.addf %292, %333 : vector<16x16xf32>
      %335 = vector.broadcast %318 : vector<1x128xf32> to vector<16x128xf32>
      %336 = vector.broadcast %65 : vector<16x1xf32> to vector<16x128xf32>
      %337 = arith.cmpf oeq, %335, %336 : vector<16x128xf32>
      %cst_118 = arith.constant 1.000000e+00 : f32
      %cst_119 = arith.constant 0.000000e+00 : f32
      %338 = vector.broadcast %cst_118 : f32 to vector<16x128xf32>
      %339 = vector.broadcast %cst_119 : f32 to vector<16x128xf32>
      %340 = arith.select %337, %338, %339 : vector<16x128xi1>, vector<16x128xf32>
      %341 = arith.truncf %324 : vector<16x128xf32> to vector<16x128xbf16>
      %342 = arith.truncf %340 : vector<16x128xf32> to vector<16x128xbf16>
      %cst_120 = arith.constant dense<0.000000e+00> : vector<16x16xf32>
      %343 = tpu.matmul %341, %342, %cst_120 {dimension_numbers = #tpu.dot_dimension_numbers<[1], [1], [0], [0], [0, 0, 1, 0], [], []>} : vector<16x128xbf16>, vector<16x128xbf16>, vector<16x16xf32> -> vector<16x16xf32>
      %344 = arith.addf %302, %343 : vector<16x16xf32>
      %345 = vector.broadcast %315 : vector<1x128xf32> to vector<16x128xf32>
      %346 = vector.broadcast %65 : vector<16x1xf32> to vector<16x128xf32>
      %347 = arith.cmpf olt, %345, %346 : vector<16x128xf32>
      %cst_121 = arith.constant 1.000000e+00 : f32
      %cst_122 = arith.constant 0.000000e+00 : f32
      %348 = vector.broadcast %cst_121 : f32 to vector<16x128xf32>
      %349 = vector.broadcast %cst_122 : f32 to vector<16x128xf32>
      %350 = arith.select %347, %348, %349 : vector<16x128xi1>, vector<16x128xf32>
      %cst_123 = arith.constant dense<0.000000e+00> : vector<16xf32>
      %351 = vector.multi_reduction <add>, %350, %cst_123 [1] : vector<16x128xf32> to vector<16xf32>
      %352 = vector.shape_cast %351 : vector<16xf32> to vector<16x1xf32>
      %353 = arith.addf %311, %352 : vector<16x1xf32>
      %354 = vector.broadcast %353 : vector<16x1xf32> to vector<16x16xf32>
      %355 = arith.addf %334, %354 : vector<16x16xf32>
      %356 = arith.subf %355, %344 : vector<16x16xf32>
      %cst_124 = arith.constant 2.555000e+02 : f32
      %357 = vector.broadcast %cst_124 : f32 to vector<16x16xf32>
      %358 = arith.cmpf oge, %355, %357 : vector<16x16xf32>
      %cst_125 = arith.constant 5.000000e-01 : f32
      %359 = vector.broadcast %cst_125 : f32 to vector<16x16xf32>
      %360 = arith.cmpf ogt, %344, %359 : vector<16x16xf32>
      %361 = arith.andi %358, %360 : vector<16x16xi1>
      %cst_126 = arith.constant 0.000000e+00 : f32
      %362 = vector.broadcast %cst_126 : f32 to vector<16x16xf32>
      %363 = arith.select %361, %344, %362 : vector<16x16xi1>, vector<16x16xf32>
      %364 = vector.shape_cast %363 : vector<16x16xf32> to vector<1x16x16xf32>
      %cst_127 = arith.constant dense<0.000000e+00> : vector<1xf32>
      %365 = vector.multi_reduction <add>, %364, %cst_127 [1, 2] : vector<1x16x16xf32> to vector<1xf32>
      %366 = vector.shape_cast %365 : vector<1xf32> to vector<1x1x1xf32>
      %367 = vector.extract %366[0, 0, 0] : f32 from vector<1x1x1xf32>
      %368 = vector.broadcast %367 : f32 to vector<1x1xf32>
      %cst_128 = arith.constant 2.560000e+02 : f32
      %369 = vector.broadcast %cst_128 : f32 to vector<1x1xf32>
      %370 = arith.subf %369, %368 : vector<1x1xf32>
      %cst_129 = arith.constant 0.00392156886 : f32
      %371 = vector.broadcast %cst_129 : f32 to vector<1x1xf32>
      %372 = arith.mulf %370, %371 : vector<1x1xf32>
      %373 = math.floor %372 : vector<1x1xf32>
      %cst_130 = arith.constant 1.000000e+00 : f32
      %374 = vector.broadcast %cst_130 : f32 to vector<1x1xf32>
      %375 = arith.maximumf %373, %374 : vector<1x1xf32>
      %cst_131 = arith.constant 5.000000e-01 : f32
      %376 = vector.broadcast %cst_131 : f32 to vector<1x1xf32>
      %377 = arith.mulf %373, %376 : vector<1x1xf32>
      %378 = math.floor %377 : vector<1x1xf32>
      %379 = vector.broadcast %378 : vector<1x1xf32> to vector<16x16xf32>
      %380 = arith.addf %356, %379 : vector<16x16xf32>
      %381 = vector.broadcast %375 : vector<1x1xf32> to vector<16x16xf32>
      %382 = arith.divf %380, %381 : vector<16x16xf32>
      %383 = math.floor %382 : vector<16x16xf32>
      %384 = vector.broadcast %375 : vector<1x1xf32> to vector<16x16xf32>
      %385 = arith.mulf %383, %384 : vector<16x16xf32>
      %386 = arith.subf %380, %385 : vector<16x16xf32>
      %cst_132 = arith.constant 0.000000e+00 : f32
      %387 = vector.broadcast %cst_132 : f32 to vector<16x16xf32>
      %388 = arith.cmpf olt, %386, %387 : vector<16x16xf32>
      %cst_133 = arith.constant 1.000000e+00 : f32
      %389 = vector.broadcast %cst_133 : f32 to vector<16x16xf32>
      %390 = arith.subf %383, %389 : vector<16x16xf32>
      %391 = arith.select %388, %390, %383 : vector<16x16xi1>, vector<16x16xf32>
      %392 = vector.broadcast %375 : vector<1x1xf32> to vector<16x16xf32>
      %393 = arith.cmpf oge, %386, %392 : vector<16x16xf32>
      %cst_134 = arith.constant 1.000000e+00 : f32
      %394 = vector.broadcast %cst_134 : f32 to vector<16x16xf32>
      %395 = arith.addf %391, %394 : vector<16x16xf32>
      %396 = arith.select %393, %395, %391 : vector<16x16xi1>, vector<16x16xf32>
      %cst_135 = arith.constant 0.000000e+00 : f32
      %cst_136 = arith.constant 2.550000e+02 : f32
      %397 = vector.broadcast %cst_135 : f32 to vector<16x16xf32>
      %398 = arith.maximumf %397, %396 : vector<16x16xf32>
      %399 = vector.broadcast %cst_136 : f32 to vector<16x16xf32>
      %400 = arith.minimumf %399, %398 : vector<16x16xf32>
      %cst_137 = arith.constant 0.000000e+00 : f32
      %401 = vector.broadcast %cst_137 : f32 to vector<16x16xf32>
      %402 = arith.select %72, %401, %400 : vector<16x16xi1>, vector<16x16xf32>
      %403 = arith.truncf %402 : vector<16x16xf32> to vector<16x16xbf16>
      %cst_138 = arith.constant 5.000000e-01 : f32
      %404 = vector.broadcast %cst_138 : f32 to vector<1x1xf32>
      %405 = arith.cmpf oge, %373, %404 : vector<1x1xf32>
      %406 = vector.extract_strided_slice %63 {offsets = [2, 0], sizes = [1, 128], strides = [1, 1]} : vector<6x128xf32> to vector<1x128xf32>
      %cst_139 = arith.constant 6.250000e-02 : f32
      %407 = vector.broadcast %cst_139 : f32 to vector<1x128xf32>
      %408 = arith.mulf %406, %407 : vector<1x128xf32>
      %409 = math.floor %408 : vector<1x128xf32>
      %cst_140 = arith.constant 1.600000e+01 : f32
      %410 = vector.broadcast %cst_140 : f32 to vector<1x128xf32>
      %411 = arith.mulf %410, %409 : vector<1x128xf32>
      %412 = arith.subf %406, %411 : vector<1x128xf32>
      %413 = vector.broadcast %409 : vector<1x128xf32> to vector<16x128xf32>
      %414 = vector.broadcast %65 : vector<16x1xf32> to vector<16x128xf32>
      %415 = arith.cmpf oeq, %413, %414 : vector<16x128xf32>
      %cst_141 = arith.constant 1.000000e+00 : f32
      %cst_142 = arith.constant 0.000000e+00 : f32
      %416 = vector.broadcast %cst_141 : f32 to vector<16x128xf32>
      %417 = vector.broadcast %cst_142 : f32 to vector<16x128xf32>
      %418 = arith.select %415, %416, %417 : vector<16x128xi1>, vector<16x128xf32>
      %419 = vector.broadcast %412 : vector<1x128xf32> to vector<16x128xf32>
      %420 = vector.broadcast %65 : vector<16x1xf32> to vector<16x128xf32>
      %421 = arith.cmpf oeq, %419, %420 : vector<16x128xf32>
      %cst_143 = arith.constant 1.000000e+00 : f32
      %cst_144 = arith.constant 0.000000e+00 : f32
      %422 = vector.broadcast %cst_143 : f32 to vector<16x128xf32>
      %423 = vector.broadcast %cst_144 : f32 to vector<16x128xf32>
      %424 = arith.select %421, %422, %423 : vector<16x128xi1>, vector<16x128xf32>
      %425 = arith.truncf %424 : vector<16x128xf32> to vector<16x128xbf16>
      %cst_145 = arith.constant dense<0.000000e+00> : vector<16x128xf32>
      %426 = tpu.matmul %403, %425, %cst_145 {dimension_numbers = #tpu.dot_dimension_numbers<[1], [0], [0], [1], [0, 0, 1, 1], [], []>} : vector<16x16xbf16>, vector<16x128xbf16>, vector<16x128xf32> -> vector<16x128xf32>
      %427 = arith.mulf %418, %426 : vector<16x128xf32>
      %cst_146 = arith.constant dense<0.000000e+00> : vector<128xf32>
      %428 = vector.multi_reduction <add>, %427, %cst_146 [0] : vector<16x128xf32> to vector<128xf32>
      %429 = vector.shape_cast %428 : vector<128xf32> to vector<1x128xf32>
      %430 = vector.shape_cast %405 : vector<1x1xi1> to vector<1x1xi1>
      %431 = vector.broadcast %430 : vector<1x1xi1> to vector<1x128xi1>
      %432 = arith.select %431, %429, %406 : vector<1x128xi1>, vector<1x128xf32>
      %433 = vector.extract_strided_slice %63 {offsets = [3, 0], sizes = [1, 128], strides = [1, 1]} : vector<6x128xf32> to vector<1x128xf32>
      %cst_147 = arith.constant 6.250000e-02 : f32
      %434 = vector.broadcast %cst_147 : f32 to vector<1x128xf32>
      %435 = arith.mulf %433, %434 : vector<1x128xf32>
      %436 = math.floor %435 : vector<1x128xf32>
      %cst_148 = arith.constant 1.600000e+01 : f32
      %437 = vector.broadcast %cst_148 : f32 to vector<1x128xf32>
      %438 = arith.mulf %437, %436 : vector<1x128xf32>
      %439 = arith.subf %433, %438 : vector<1x128xf32>
      %440 = vector.broadcast %436 : vector<1x128xf32> to vector<16x128xf32>
      %441 = vector.broadcast %65 : vector<16x1xf32> to vector<16x128xf32>
      %442 = arith.cmpf oeq, %440, %441 : vector<16x128xf32>
      %cst_149 = arith.constant 1.000000e+00 : f32
      %cst_150 = arith.constant 0.000000e+00 : f32
      %443 = vector.broadcast %cst_149 : f32 to vector<16x128xf32>
      %444 = vector.broadcast %cst_150 : f32 to vector<16x128xf32>
      %445 = arith.select %442, %443, %444 : vector<16x128xi1>, vector<16x128xf32>
      %446 = vector.broadcast %439 : vector<1x128xf32> to vector<16x128xf32>
      %447 = vector.broadcast %65 : vector<16x1xf32> to vector<16x128xf32>
      %448 = arith.cmpf oeq, %446, %447 : vector<16x128xf32>
      %cst_151 = arith.constant 1.000000e+00 : f32
      %cst_152 = arith.constant 0.000000e+00 : f32
      %449 = vector.broadcast %cst_151 : f32 to vector<16x128xf32>
      %450 = vector.broadcast %cst_152 : f32 to vector<16x128xf32>
      %451 = arith.select %448, %449, %450 : vector<16x128xi1>, vector<16x128xf32>
      %452 = arith.truncf %451 : vector<16x128xf32> to vector<16x128xbf16>
      %cst_153 = arith.constant dense<0.000000e+00> : vector<16x128xf32>
      %453 = tpu.matmul %403, %452, %cst_153 {dimension_numbers = #tpu.dot_dimension_numbers<[1], [0], [0], [1], [0, 0, 1, 1], [], []>} : vector<16x16xbf16>, vector<16x128xbf16>, vector<16x128xf32> -> vector<16x128xf32>
      %454 = arith.mulf %445, %453 : vector<16x128xf32>
      %cst_154 = arith.constant dense<0.000000e+00> : vector<128xf32>
      %455 = vector.multi_reduction <add>, %454, %cst_154 [0] : vector<16x128xf32> to vector<128xf32>
      %456 = vector.shape_cast %455 : vector<128xf32> to vector<1x128xf32>
      %457 = vector.shape_cast %405 : vector<1x1xi1> to vector<1x1xi1>
      %458 = vector.broadcast %457 : vector<1x1xi1> to vector<1x128xi1>
      %459 = arith.select %458, %456, %433 : vector<1x128xi1>, vector<1x128xf32>
      %460 = tpu.concatenate %432, %459 in 0 : vector<1x128xf32>, vector<1x128xf32> -> vector<2x128xf32>
      %cst_155 = arith.constant 0.000000e+00 : f32
      %461 = vector.broadcast %cst_155 : f32 to vector<16x16xf32>
      %cst_156 = arith.constant 0.000000e+00 : f32
      %462 = vector.broadcast %cst_156 : f32 to vector<16x16xf32>
      %cst_157 = arith.constant 0.000000e+00 : f32
      %463 = vector.broadcast %cst_157 : f32 to vector<16x1xf32>
      %464 = vector.extract_strided_slice %63 {offsets = [4, 0], sizes = [1, 128], strides = [1, 1]} : vector<6x128xf32> to vector<1x128xf32>
      %cst_158 = arith.constant 6.250000e-02 : f32
      %465 = vector.broadcast %cst_158 : f32 to vector<1x128xf32>
      %466 = arith.mulf %464, %465 : vector<1x128xf32>
      %467 = math.floor %466 : vector<1x128xf32>
      %cst_159 = arith.constant 1.600000e+01 : f32
      %468 = vector.broadcast %cst_159 : f32 to vector<1x128xf32>
      %469 = arith.mulf %468, %467 : vector<1x128xf32>
      %470 = arith.subf %464, %469 : vector<1x128xf32>
      %471 = vector.broadcast %467 : vector<1x128xf32> to vector<16x128xf32>
      %472 = vector.broadcast %65 : vector<16x1xf32> to vector<16x128xf32>
      %473 = arith.cmpf oeq, %471, %472 : vector<16x128xf32>
      %cst_160 = arith.constant 1.000000e+00 : f32
      %cst_161 = arith.constant 0.000000e+00 : f32
      %474 = vector.broadcast %cst_160 : f32 to vector<16x128xf32>
      %475 = vector.broadcast %cst_161 : f32 to vector<16x128xf32>
      %476 = arith.select %473, %474, %475 : vector<16x128xi1>, vector<16x128xf32>
      %477 = vector.broadcast %470 : vector<1x128xf32> to vector<16x128xf32>
      %478 = vector.broadcast %65 : vector<16x1xf32> to vector<16x128xf32>
      %479 = arith.cmpf ole, %477, %478 : vector<16x128xf32>
      %cst_162 = arith.constant 1.000000e+00 : f32
      %cst_163 = arith.constant 0.000000e+00 : f32
      %480 = vector.broadcast %cst_162 : f32 to vector<16x128xf32>
      %481 = vector.broadcast %cst_163 : f32 to vector<16x128xf32>
      %482 = arith.select %479, %480, %481 : vector<16x128xi1>, vector<16x128xf32>
      %483 = arith.truncf %476 : vector<16x128xf32> to vector<16x128xbf16>
      %484 = arith.truncf %482 : vector<16x128xf32> to vector<16x128xbf16>
      %cst_164 = arith.constant dense<0.000000e+00> : vector<16x16xf32>
      %485 = tpu.matmul %483, %484, %cst_164 {dimension_numbers = #tpu.dot_dimension_numbers<[1], [1], [0], [0], [0, 0, 1, 0], [], []>} : vector<16x128xbf16>, vector<16x128xbf16>, vector<16x16xf32> -> vector<16x16xf32>
      %486 = arith.addf %461, %485 : vector<16x16xf32>
      %487 = vector.broadcast %470 : vector<1x128xf32> to vector<16x128xf32>
      %488 = vector.broadcast %65 : vector<16x1xf32> to vector<16x128xf32>
      %489 = arith.cmpf oeq, %487, %488 : vector<16x128xf32>
      %cst_165 = arith.constant 1.000000e+00 : f32
      %cst_166 = arith.constant 0.000000e+00 : f32
      %490 = vector.broadcast %cst_165 : f32 to vector<16x128xf32>
      %491 = vector.broadcast %cst_166 : f32 to vector<16x128xf32>
      %492 = arith.select %489, %490, %491 : vector<16x128xi1>, vector<16x128xf32>
      %493 = arith.truncf %476 : vector<16x128xf32> to vector<16x128xbf16>
      %494 = arith.truncf %492 : vector<16x128xf32> to vector<16x128xbf16>
      %cst_167 = arith.constant dense<0.000000e+00> : vector<16x16xf32>
      %495 = tpu.matmul %493, %494, %cst_167 {dimension_numbers = #tpu.dot_dimension_numbers<[1], [1], [0], [0], [0, 0, 1, 0], [], []>} : vector<16x128xbf16>, vector<16x128xbf16>, vector<16x16xf32> -> vector<16x16xf32>
      %496 = arith.addf %462, %495 : vector<16x16xf32>
      %497 = vector.broadcast %467 : vector<1x128xf32> to vector<16x128xf32>
      %498 = vector.broadcast %65 : vector<16x1xf32> to vector<16x128xf32>
      %499 = arith.cmpf olt, %497, %498 : vector<16x128xf32>
      %cst_168 = arith.constant 1.000000e+00 : f32
      %cst_169 = arith.constant 0.000000e+00 : f32
      %500 = vector.broadcast %cst_168 : f32 to vector<16x128xf32>
      %501 = vector.broadcast %cst_169 : f32 to vector<16x128xf32>
      %502 = arith.select %499, %500, %501 : vector<16x128xi1>, vector<16x128xf32>
      %cst_170 = arith.constant dense<0.000000e+00> : vector<16xf32>
      %503 = vector.multi_reduction <add>, %502, %cst_170 [1] : vector<16x128xf32> to vector<16xf32>
      %504 = vector.shape_cast %503 : vector<16xf32> to vector<16x1xf32>
      %505 = arith.addf %463, %504 : vector<16x1xf32>
      %506 = vector.extract_strided_slice %63 {offsets = [5, 0], sizes = [1, 128], strides = [1, 1]} : vector<6x128xf32> to vector<1x128xf32>
      %cst_171 = arith.constant 6.250000e-02 : f32
      %507 = vector.broadcast %cst_171 : f32 to vector<1x128xf32>
      %508 = arith.mulf %506, %507 : vector<1x128xf32>
      %509 = math.floor %508 : vector<1x128xf32>
      %cst_172 = arith.constant 1.600000e+01 : f32
      %510 = vector.broadcast %cst_172 : f32 to vector<1x128xf32>
      %511 = arith.mulf %510, %509 : vector<1x128xf32>
      %512 = arith.subf %506, %511 : vector<1x128xf32>
      %513 = vector.broadcast %509 : vector<1x128xf32> to vector<16x128xf32>
      %514 = vector.broadcast %65 : vector<16x1xf32> to vector<16x128xf32>
      %515 = arith.cmpf oeq, %513, %514 : vector<16x128xf32>
      %cst_173 = arith.constant 1.000000e+00 : f32
      %cst_174 = arith.constant 0.000000e+00 : f32
      %516 = vector.broadcast %cst_173 : f32 to vector<16x128xf32>
      %517 = vector.broadcast %cst_174 : f32 to vector<16x128xf32>
      %518 = arith.select %515, %516, %517 : vector<16x128xi1>, vector<16x128xf32>
      %519 = vector.broadcast %512 : vector<1x128xf32> to vector<16x128xf32>
      %520 = vector.broadcast %65 : vector<16x1xf32> to vector<16x128xf32>
      %521 = arith.cmpf ole, %519, %520 : vector<16x128xf32>
      %cst_175 = arith.constant 1.000000e+00 : f32
      %cst_176 = arith.constant 0.000000e+00 : f32
      %522 = vector.broadcast %cst_175 : f32 to vector<16x128xf32>
      %523 = vector.broadcast %cst_176 : f32 to vector<16x128xf32>
      %524 = arith.select %521, %522, %523 : vector<16x128xi1>, vector<16x128xf32>
      %525 = arith.truncf %518 : vector<16x128xf32> to vector<16x128xbf16>
      %526 = arith.truncf %524 : vector<16x128xf32> to vector<16x128xbf16>
      %cst_177 = arith.constant dense<0.000000e+00> : vector<16x16xf32>
      %527 = tpu.matmul %525, %526, %cst_177 {dimension_numbers = #tpu.dot_dimension_numbers<[1], [1], [0], [0], [0, 0, 1, 0], [], []>} : vector<16x128xbf16>, vector<16x128xbf16>, vector<16x16xf32> -> vector<16x16xf32>
      %528 = arith.addf %486, %527 : vector<16x16xf32>
      %529 = vector.broadcast %512 : vector<1x128xf32> to vector<16x128xf32>
      %530 = vector.broadcast %65 : vector<16x1xf32> to vector<16x128xf32>
      %531 = arith.cmpf oeq, %529, %530 : vector<16x128xf32>
      %cst_178 = arith.constant 1.000000e+00 : f32
      %cst_179 = arith.constant 0.000000e+00 : f32
      %532 = vector.broadcast %cst_178 : f32 to vector<16x128xf32>
      %533 = vector.broadcast %cst_179 : f32 to vector<16x128xf32>
      %534 = arith.select %531, %532, %533 : vector<16x128xi1>, vector<16x128xf32>
      %535 = arith.truncf %518 : vector<16x128xf32> to vector<16x128xbf16>
      %536 = arith.truncf %534 : vector<16x128xf32> to vector<16x128xbf16>
      %cst_180 = arith.constant dense<0.000000e+00> : vector<16x16xf32>
      %537 = tpu.matmul %535, %536, %cst_180 {dimension_numbers = #tpu.dot_dimension_numbers<[1], [1], [0], [0], [0, 0, 1, 0], [], []>} : vector<16x128xbf16>, vector<16x128xbf16>, vector<16x16xf32> -> vector<16x16xf32>
      %538 = arith.addf %496, %537 : vector<16x16xf32>
      %539 = vector.broadcast %509 : vector<1x128xf32> to vector<16x128xf32>
      %540 = vector.broadcast %65 : vector<16x1xf32> to vector<16x128xf32>
      %541 = arith.cmpf olt, %539, %540 : vector<16x128xf32>
      %cst_181 = arith.constant 1.000000e+00 : f32
      %cst_182 = arith.constant 0.000000e+00 : f32
      %542 = vector.broadcast %cst_181 : f32 to vector<16x128xf32>
      %543 = vector.broadcast %cst_182 : f32 to vector<16x128xf32>
      %544 = arith.select %541, %542, %543 : vector<16x128xi1>, vector<16x128xf32>
      %cst_183 = arith.constant dense<0.000000e+00> : vector<16xf32>
      %545 = vector.multi_reduction <add>, %544, %cst_183 [1] : vector<16x128xf32> to vector<16xf32>
      %546 = vector.shape_cast %545 : vector<16xf32> to vector<16x1xf32>
      %547 = arith.addf %505, %546 : vector<16x1xf32>
      %548 = vector.broadcast %547 : vector<16x1xf32> to vector<16x16xf32>
      %549 = arith.addf %528, %548 : vector<16x16xf32>
      %550 = arith.subf %549, %538 : vector<16x16xf32>
      %cst_184 = arith.constant 2.555000e+02 : f32
      %551 = vector.broadcast %cst_184 : f32 to vector<16x16xf32>
      %552 = arith.cmpf oge, %549, %551 : vector<16x16xf32>
      %cst_185 = arith.constant 5.000000e-01 : f32
      %553 = vector.broadcast %cst_185 : f32 to vector<16x16xf32>
      %554 = arith.cmpf ogt, %538, %553 : vector<16x16xf32>
      %555 = arith.andi %552, %554 : vector<16x16xi1>
      %cst_186 = arith.constant 0.000000e+00 : f32
      %556 = vector.broadcast %cst_186 : f32 to vector<16x16xf32>
      %557 = arith.select %555, %538, %556 : vector<16x16xi1>, vector<16x16xf32>
      %558 = vector.shape_cast %557 : vector<16x16xf32> to vector<1x16x16xf32>
      %cst_187 = arith.constant dense<0.000000e+00> : vector<1xf32>
      %559 = vector.multi_reduction <add>, %558, %cst_187 [1, 2] : vector<1x16x16xf32> to vector<1xf32>
      %560 = vector.shape_cast %559 : vector<1xf32> to vector<1x1x1xf32>
      %561 = vector.extract %560[0, 0, 0] : f32 from vector<1x1x1xf32>
      %562 = vector.broadcast %561 : f32 to vector<1x1xf32>
      %cst_188 = arith.constant 2.560000e+02 : f32
      %563 = vector.broadcast %cst_188 : f32 to vector<1x1xf32>
      %564 = arith.subf %563, %562 : vector<1x1xf32>
      %cst_189 = arith.constant 0.00392156886 : f32
      %565 = vector.broadcast %cst_189 : f32 to vector<1x1xf32>
      %566 = arith.mulf %564, %565 : vector<1x1xf32>
      %567 = math.floor %566 : vector<1x1xf32>
      %cst_190 = arith.constant 1.000000e+00 : f32
      %568 = vector.broadcast %cst_190 : f32 to vector<1x1xf32>
      %569 = arith.maximumf %567, %568 : vector<1x1xf32>
      %cst_191 = arith.constant 5.000000e-01 : f32
      %570 = vector.broadcast %cst_191 : f32 to vector<1x1xf32>
      %571 = arith.mulf %567, %570 : vector<1x1xf32>
      %572 = math.floor %571 : vector<1x1xf32>
      %573 = vector.broadcast %572 : vector<1x1xf32> to vector<16x16xf32>
      %574 = arith.addf %550, %573 : vector<16x16xf32>
      %575 = vector.broadcast %569 : vector<1x1xf32> to vector<16x16xf32>
      %576 = arith.divf %574, %575 : vector<16x16xf32>
      %577 = math.floor %576 : vector<16x16xf32>
      %578 = vector.broadcast %569 : vector<1x1xf32> to vector<16x16xf32>
      %579 = arith.mulf %577, %578 : vector<16x16xf32>
      %580 = arith.subf %574, %579 : vector<16x16xf32>
      %cst_192 = arith.constant 0.000000e+00 : f32
      %581 = vector.broadcast %cst_192 : f32 to vector<16x16xf32>
      %582 = arith.cmpf olt, %580, %581 : vector<16x16xf32>
      %cst_193 = arith.constant 1.000000e+00 : f32
      %583 = vector.broadcast %cst_193 : f32 to vector<16x16xf32>
      %584 = arith.subf %577, %583 : vector<16x16xf32>
      %585 = arith.select %582, %584, %577 : vector<16x16xi1>, vector<16x16xf32>
      %586 = vector.broadcast %569 : vector<1x1xf32> to vector<16x16xf32>
      %587 = arith.cmpf oge, %580, %586 : vector<16x16xf32>
      %cst_194 = arith.constant 1.000000e+00 : f32
      %588 = vector.broadcast %cst_194 : f32 to vector<16x16xf32>
      %589 = arith.addf %585, %588 : vector<16x16xf32>
      %590 = arith.select %587, %589, %585 : vector<16x16xi1>, vector<16x16xf32>
      %cst_195 = arith.constant 0.000000e+00 : f32
      %cst_196 = arith.constant 2.550000e+02 : f32
      %591 = vector.broadcast %cst_195 : f32 to vector<16x16xf32>
      %592 = arith.maximumf %591, %590 : vector<16x16xf32>
      %593 = vector.broadcast %cst_196 : f32 to vector<16x16xf32>
      %594 = arith.minimumf %593, %592 : vector<16x16xf32>
      %cst_197 = arith.constant 0.000000e+00 : f32
      %595 = vector.broadcast %cst_197 : f32 to vector<16x16xf32>
      %596 = arith.select %72, %595, %594 : vector<16x16xi1>, vector<16x16xf32>
      %597 = arith.truncf %596 : vector<16x16xf32> to vector<16x16xbf16>
      %cst_198 = arith.constant 5.000000e-01 : f32
      %598 = vector.broadcast %cst_198 : f32 to vector<1x1xf32>
      %599 = arith.cmpf oge, %567, %598 : vector<1x1xf32>
      %600 = vector.extract_strided_slice %63 {offsets = [4, 0], sizes = [1, 128], strides = [1, 1]} : vector<6x128xf32> to vector<1x128xf32>
      %cst_199 = arith.constant 6.250000e-02 : f32
      %601 = vector.broadcast %cst_199 : f32 to vector<1x128xf32>
      %602 = arith.mulf %600, %601 : vector<1x128xf32>
      %603 = math.floor %602 : vector<1x128xf32>
      %cst_200 = arith.constant 1.600000e+01 : f32
      %604 = vector.broadcast %cst_200 : f32 to vector<1x128xf32>
      %605 = arith.mulf %604, %603 : vector<1x128xf32>
      %606 = arith.subf %600, %605 : vector<1x128xf32>
      %607 = vector.broadcast %603 : vector<1x128xf32> to vector<16x128xf32>
      %608 = vector.broadcast %65 : vector<16x1xf32> to vector<16x128xf32>
      %609 = arith.cmpf oeq, %607, %608 : vector<16x128xf32>
      %cst_201 = arith.constant 1.000000e+00 : f32
      %cst_202 = arith.constant 0.000000e+00 : f32
      %610 = vector.broadcast %cst_201 : f32 to vector<16x128xf32>
      %611 = vector.broadcast %cst_202 : f32 to vector<16x128xf32>
      %612 = arith.select %609, %610, %611 : vector<16x128xi1>, vector<16x128xf32>
      %613 = vector.broadcast %606 : vector<1x128xf32> to vector<16x128xf32>
      %614 = vector.broadcast %65 : vector<16x1xf32> to vector<16x128xf32>
      %615 = arith.cmpf oeq, %613, %614 : vector<16x128xf32>
      %cst_203 = arith.constant 1.000000e+00 : f32
      %cst_204 = arith.constant 0.000000e+00 : f32
      %616 = vector.broadcast %cst_203 : f32 to vector<16x128xf32>
      %617 = vector.broadcast %cst_204 : f32 to vector<16x128xf32>
      %618 = arith.select %615, %616, %617 : vector<16x128xi1>, vector<16x128xf32>
      %619 = arith.truncf %618 : vector<16x128xf32> to vector<16x128xbf16>
      %cst_205 = arith.constant dense<0.000000e+00> : vector<16x128xf32>
      %620 = tpu.matmul %597, %619, %cst_205 {dimension_numbers = #tpu.dot_dimension_numbers<[1], [0], [0], [1], [0, 0, 1, 1], [], []>} : vector<16x16xbf16>, vector<16x128xbf16>, vector<16x128xf32> -> vector<16x128xf32>
      %621 = arith.mulf %612, %620 : vector<16x128xf32>
      %cst_206 = arith.constant dense<0.000000e+00> : vector<128xf32>
      %622 = vector.multi_reduction <add>, %621, %cst_206 [0] : vector<16x128xf32> to vector<128xf32>
      %623 = vector.shape_cast %622 : vector<128xf32> to vector<1x128xf32>
      %624 = vector.shape_cast %599 : vector<1x1xi1> to vector<1x1xi1>
      %625 = vector.broadcast %624 : vector<1x1xi1> to vector<1x128xi1>
      %626 = arith.select %625, %623, %600 : vector<1x128xi1>, vector<1x128xf32>
      %627 = vector.extract_strided_slice %63 {offsets = [5, 0], sizes = [1, 128], strides = [1, 1]} : vector<6x128xf32> to vector<1x128xf32>
      %cst_207 = arith.constant 6.250000e-02 : f32
      %628 = vector.broadcast %cst_207 : f32 to vector<1x128xf32>
      %629 = arith.mulf %627, %628 : vector<1x128xf32>
      %630 = math.floor %629 : vector<1x128xf32>
      %cst_208 = arith.constant 1.600000e+01 : f32
      %631 = vector.broadcast %cst_208 : f32 to vector<1x128xf32>
      %632 = arith.mulf %631, %630 : vector<1x128xf32>
      %633 = arith.subf %627, %632 : vector<1x128xf32>
      %634 = vector.broadcast %630 : vector<1x128xf32> to vector<16x128xf32>
      %635 = vector.broadcast %65 : vector<16x1xf32> to vector<16x128xf32>
      %636 = arith.cmpf oeq, %634, %635 : vector<16x128xf32>
      %cst_209 = arith.constant 1.000000e+00 : f32
      %cst_210 = arith.constant 0.000000e+00 : f32
      %637 = vector.broadcast %cst_209 : f32 to vector<16x128xf32>
      %638 = vector.broadcast %cst_210 : f32 to vector<16x128xf32>
      %639 = arith.select %636, %637, %638 : vector<16x128xi1>, vector<16x128xf32>
      %640 = vector.broadcast %633 : vector<1x128xf32> to vector<16x128xf32>
      %641 = vector.broadcast %65 : vector<16x1xf32> to vector<16x128xf32>
      %642 = arith.cmpf oeq, %640, %641 : vector<16x128xf32>
      %cst_211 = arith.constant 1.000000e+00 : f32
      %cst_212 = arith.constant 0.000000e+00 : f32
      %643 = vector.broadcast %cst_211 : f32 to vector<16x128xf32>
      %644 = vector.broadcast %cst_212 : f32 to vector<16x128xf32>
      %645 = arith.select %642, %643, %644 : vector<16x128xi1>, vector<16x128xf32>
      %646 = arith.truncf %645 : vector<16x128xf32> to vector<16x128xbf16>
      %cst_213 = arith.constant dense<0.000000e+00> : vector<16x128xf32>
      %647 = tpu.matmul %597, %646, %cst_213 {dimension_numbers = #tpu.dot_dimension_numbers<[1], [0], [0], [1], [0, 0, 1, 1], [], []>} : vector<16x16xbf16>, vector<16x128xbf16>, vector<16x128xf32> -> vector<16x128xf32>
      %648 = arith.mulf %639, %647 : vector<16x128xf32>
      %cst_214 = arith.constant dense<0.000000e+00> : vector<128xf32>
      %649 = vector.multi_reduction <add>, %648, %cst_214 [0] : vector<16x128xf32> to vector<128xf32>
      %650 = vector.shape_cast %649 : vector<128xf32> to vector<1x128xf32>
      %651 = vector.shape_cast %599 : vector<1x1xi1> to vector<1x1xi1>
      %652 = vector.broadcast %651 : vector<1x1xi1> to vector<1x128xi1>
      %653 = arith.select %652, %650, %627 : vector<1x128xi1>, vector<1x128xf32>
      %654 = tpu.concatenate %626, %653 in 0 : vector<1x128xf32>, vector<1x128xf32> -> vector<2x128xf32>
      %655 = tpu.concatenate %266, %460, %654 in 0 : vector<2x128xf32>, vector<2x128xf32>, vector<2x128xf32> -> vector<6x128xf32>
      %656 = arith.fptoui %655 : vector<6x128xf32> to vector<6x128xi8>
      %c0_215 = arith.constant 0 : index
      %c0_216 = arith.constant 0 : index
      %c0_217 = arith.constant 0 : index
      %657 = vector.load %arg4[%c0_215, %c0_216, %c0_217] : memref<1x6x128xi8, #tpu.memory_space<vmem>>, vector<1x6x128xi8>
      %658 = vector.shape_cast %657 : vector<1x6x128xi8> to vector<6x128xi8>
      %659 = vector.shape_cast %656 : vector<6x128xi8> to vector<1x6x128xi8>
      tpu.vector_store %arg4[%c0_215, %c0_216, %c0_217], %659 {strides = array<i32>} : memref<1x6x128xi8, #tpu.memory_space<vmem>>, vector<1x6x128xi8>,
    } else {
    }
    %33 = arith.index_cast %arg0 : i32 to index
    %c1 = arith.constant 1 : index
    %34 = memref.load %arg1[%33, %c1] : memref<1x2xi32, #tpu.memory_space<smem>>
    %35 = arith.index_cast %arg0 : i32 to index
    %c1_14 = arith.constant 1 : index
    %36 = memref.load %arg2[%35, %c1_14] : memref<1x2xf32, #tpu.memory_space<smem>>
    %c1_i32_15 = arith.constant 1 : i32
    %37 = arith.cmpi eq, %34, %c1_i32_15 : i32
    %38 = arith.extui %37 : i1 to i32
    %c0_i32_16 = arith.constant 0 : i32
    %39 = arith.cmpi ne, %38, %c0_i32_16 : i32
    scf.if %39 {
      %c0_31 = arith.constant 0 : index
      %c0_32 = arith.constant 0 : index
      %c0_33 = arith.constant 0 : index
      %61 = vector.load %arg4[%c0_31, %c0_32, %c0_33] : memref<1x6x128xi8, #tpu.memory_space<vmem>>, vector<1x6x128xi8>
      %62 = vector.shape_cast %61 : vector<1x6x128xi8> to vector<6x128xi8>
      %63 = arith.uitofp %62 : vector<6x128xi8> to vector<6x128xf32>
      %cst = arith.constant 1.000000e+00 : f32
      %64 = arith.addf %cst, %36 : f32
      %65 = vector.broadcast %64 : f32 to vector<6x128xf32>
      %66 = arith.mulf %65, %63 : vector<6x128xf32>
      %cst_34 = arith.constant 0.000000e+00 : f32
      %cst_35 = arith.constant 2.550000e+02 : f32
      %67 = vector.broadcast %cst_34 : f32 to vector<6x128xf32>
      %68 = arith.maximumf %67, %66 : vector<6x128xf32>
      %69 = vector.broadcast %cst_35 : f32 to vector<6x128xf32>
      %70 = arith.minimumf %69, %68 : vector<6x128xf32>
      %71 = arith.fptoui %70 : vector<6x128xf32> to vector<6x128xi8>
      %c0_36 = arith.constant 0 : index
      %c0_37 = arith.constant 0 : index
      %c0_38 = arith.constant 0 : index
      %72 = vector.load %arg4[%c0_36, %c0_37, %c0_38] : memref<1x6x128xi8, #tpu.memory_space<vmem>>, vector<1x6x128xi8>
      %73 = vector.shape_cast %72 : vector<1x6x128xi8> to vector<6x128xi8>
      %74 = vector.shape_cast %71 : vector<6x128xi8> to vector<1x6x128xi8>
      tpu.vector_store %arg4[%c0_36, %c0_37, %c0_38], %74 {strides = array<i32>} : memref<1x6x128xi8, #tpu.memory_space<vmem>>, vector<1x6x128xi8>,
    } else {
    }
    %c2_i32_17 = arith.constant 2 : i32
    %40 = arith.cmpi eq, %34, %c2_i32_17 : i32
    %41 = arith.extui %40 : i1 to i32
    %c0_i32_18 = arith.constant 0 : i32
    %42 = arith.cmpi ne, %41, %c0_i32_18 : i32
    scf.if %42 {
      %c0_31 = arith.constant 0 : index
      %c0_32 = arith.constant 0 : index
      %c0_33 = arith.constant 0 : index
      %61 = vector.load %arg4[%c0_31, %c0_32, %c0_33] : memref<1x6x128xi8, #tpu.memory_space<vmem>>, vector<1x6x128xi8>
      %62 = vector.shape_cast %61 : vector<1x6x128xi8> to vector<6x128xi8>
      %63 = arith.uitofp %62 : vector<6x128xi8> to vector<6x128xf32>
      %cst = arith.constant 1.000000e+00 : f32
      %64 = arith.addf %cst, %36 : f32
      %65 = vector.extract_strided_slice %63 {offsets = [0, 0], sizes = [2, 128], strides = [1, 1]} : vector<6x128xf32> to vector<2x128xf32>
      %cst_34 = arith.constant 2.989000e-01 : f32
      %66 = vector.broadcast %cst_34 : f32 to vector<2x128xf32>
      %67 = arith.mulf %66, %65 : vector<2x128xf32>
      %68 = vector.extract_strided_slice %63 {offsets = [2, 0], sizes = [2, 128], strides = [1, 1]} : vector<6x128xf32> to vector<2x128xf32>
      %cst_35 = arith.constant 5.870000e-01 : f32
      %69 = vector.broadcast %cst_35 : f32 to vector<2x128xf32>
      %70 = arith.mulf %69, %68 : vector<2x128xf32>
      %71 = arith.addf %67, %70 : vector<2x128xf32>
      %72 = vector.extract_strided_slice %63 {offsets = [4, 0], sizes = [2, 128], strides = [1, 1]} : vector<6x128xf32> to vector<2x128xf32>
      %cst_36 = arith.constant 1.140000e-01 : f32
      %73 = vector.broadcast %cst_36 : f32 to vector<2x128xf32>
      %74 = arith.mulf %73, %72 : vector<2x128xf32>
      %75 = arith.addf %71, %74 : vector<2x128xf32>
      %76 = math.floor %75 : vector<2x128xf32>
      %77 = vector.extract_strided_slice %63 {offsets = [0, 0], sizes = [2, 128], strides = [1, 1]} : vector<6x128xf32> to vector<2x128xf32>
      %78 = vector.broadcast %64 : f32 to vector<2x128xf32>
      %79 = arith.mulf %78, %77 : vector<2x128xf32>
      %cst_37 = arith.constant 1.000000e+00 : f32
      %80 = arith.subf %cst_37, %64 : f32
      %81 = vector.broadcast %80 : f32 to vector<2x128xf32>
      %82 = arith.mulf %81, %76 : vector<2x128xf32>
      %83 = arith.addf %79, %82 : vector<2x128xf32>
      %cst_38 = arith.constant 0.000000e+00 : f32
      %cst_39 = arith.constant 2.550000e+02 : f32
      %84 = vector.broadcast %cst_38 : f32 to vector<2x128xf32>
      %85 = arith.maximumf %84, %83 : vector<2x128xf32>
      %86 = vector.broadcast %cst_39 : f32 to vector<2x128xf32>
      %87 = arith.minimumf %86, %85 : vector<2x128xf32>
      %88 = vector.extract_strided_slice %63 {offsets = [2, 0], sizes = [2, 128], strides = [1, 1]} : vector<6x128xf32> to vector<2x128xf32>
      %89 = vector.broadcast %64 : f32 to vector<2x128xf32>
      %90 = arith.mulf %89, %88 : vector<2x128xf32>
      %cst_40 = arith.constant 1.000000e+00 : f32
      %91 = arith.subf %cst_40, %64 : f32
      %92 = vector.broadcast %91 : f32 to vector<2x128xf32>
      %93 = arith.mulf %92, %76 : vector<2x128xf32>
      %94 = arith.addf %90, %93 : vector<2x128xf32>
      %cst_41 = arith.constant 0.000000e+00 : f32
      %cst_42 = arith.constant 2.550000e+02 : f32
      %95 = vector.broadcast %cst_41 : f32 to vector<2x128xf32>
      %96 = arith.maximumf %95, %94 : vector<2x128xf32>
      %97 = vector.broadcast %cst_42 : f32 to vector<2x128xf32>
      %98 = arith.minimumf %97, %96 : vector<2x128xf32>
      %99 = vector.extract_strided_slice %63 {offsets = [4, 0], sizes = [2, 128], strides = [1, 1]} : vector<6x128xf32> to vector<2x128xf32>
      %100 = vector.broadcast %64 : f32 to vector<2x128xf32>
      %101 = arith.mulf %100, %99 : vector<2x128xf32>
      %cst_43 = arith.constant 1.000000e+00 : f32
      %102 = arith.subf %cst_43, %64 : f32
      %103 = vector.broadcast %102 : f32 to vector<2x128xf32>
      %104 = arith.mulf %103, %76 : vector<2x128xf32>
      %105 = arith.addf %101, %104 : vector<2x128xf32>
      %cst_44 = arith.constant 0.000000e+00 : f32
      %cst_45 = arith.constant 2.550000e+02 : f32
      %106 = vector.broadcast %cst_44 : f32 to vector<2x128xf32>
      %107 = arith.maximumf %106, %105 : vector<2x128xf32>
      %108 = vector.broadcast %cst_45 : f32 to vector<2x128xf32>
      %109 = arith.minimumf %108, %107 : vector<2x128xf32>
      %110 = tpu.concatenate %87, %98, %109 in 0 : vector<2x128xf32>, vector<2x128xf32>, vector<2x128xf32> -> vector<6x128xf32>
      %111 = arith.fptoui %110 : vector<6x128xf32> to vector<6x128xi8>
      %c0_46 = arith.constant 0 : index
      %c0_47 = arith.constant 0 : index
      %c0_48 = arith.constant 0 : index
      %112 = vector.load %arg4[%c0_46, %c0_47, %c0_48] : memref<1x6x128xi8, #tpu.memory_space<vmem>>, vector<1x6x128xi8>
      %113 = vector.shape_cast %112 : vector<1x6x128xi8> to vector<6x128xi8>
      %114 = vector.shape_cast %111 : vector<6x128xi8> to vector<1x6x128xi8>
      tpu.vector_store %arg4[%c0_46, %c0_47, %c0_48], %114 {strides = array<i32>} : memref<1x6x128xi8, #tpu.memory_space<vmem>>, vector<1x6x128xi8>,
    } else {
    }
    %c3_i32_19 = arith.constant 3 : i32
    %43 = arith.cmpi eq, %34, %c3_i32_19 : i32
    %44 = arith.extui %43 : i1 to i32
    %c0_i32_20 = arith.constant 0 : i32
    %45 = arith.cmpi ne, %44, %c0_i32_20 : i32
    scf.if %45 {
      %c0_31 = arith.constant 0 : index
      %c0_32 = arith.constant 0 : index
      %c0_33 = arith.constant 0 : index
      %61 = vector.load %arg4[%c0_31, %c0_32, %c0_33] : memref<1x6x128xi8, #tpu.memory_space<vmem>>, vector<1x6x128xi8>
      %62 = vector.shape_cast %61 : vector<1x6x128xi8> to vector<6x128xi8>
      %63 = arith.uitofp %62 : vector<6x128xi8> to vector<6x128xf32>
      %cst = arith.constant 1.000000e+00 : f32
      %64 = arith.addf %cst, %36 : f32
      %65 = vector.extract_strided_slice %63 {offsets = [0, 0], sizes = [2, 128], strides = [1, 1]} : vector<6x128xf32> to vector<2x128xf32>
      %cst_34 = arith.constant 2.989000e-01 : f32
      %66 = vector.broadcast %cst_34 : f32 to vector<2x128xf32>
      %67 = arith.mulf %66, %65 : vector<2x128xf32>
      %68 = vector.extract_strided_slice %63 {offsets = [2, 0], sizes = [2, 128], strides = [1, 1]} : vector<6x128xf32> to vector<2x128xf32>
      %cst_35 = arith.constant 5.870000e-01 : f32
      %69 = vector.broadcast %cst_35 : f32 to vector<2x128xf32>
      %70 = arith.mulf %69, %68 : vector<2x128xf32>
      %71 = arith.addf %67, %70 : vector<2x128xf32>
      %72 = vector.extract_strided_slice %63 {offsets = [4, 0], sizes = [2, 128], strides = [1, 1]} : vector<6x128xf32> to vector<2x128xf32>
      %cst_36 = arith.constant 1.140000e-01 : f32
      %73 = vector.broadcast %cst_36 : f32 to vector<2x128xf32>
      %74 = arith.mulf %73, %72 : vector<2x128xf32>
      %75 = arith.addf %71, %74 : vector<2x128xf32>
      %76 = math.floor %75 : vector<2x128xf32>
      %77 = vector.shape_cast %76 : vector<2x128xf32> to vector<1x2x128xf32>
      %cst_37 = arith.constant dense<0.000000e+00> : vector<1xf32>
      %78 = vector.multi_reduction <add>, %77, %cst_37 [1, 2] : vector<1x2x128xf32> to vector<1xf32>
      %79 = vector.shape_cast %78 : vector<1xf32> to vector<1x1x1xf32>
      %80 = vector.extract %79[0, 0, 0] : f32 from vector<1x1x1xf32>
      %81 = vector.broadcast %80 : f32 to vector<1x1xf32>
      %cst_38 = arith.constant 2.560000e+02 : f32
      %82 = vector.broadcast %cst_38 : f32 to vector<1x1xf32>
      %83 = arith.divf %81, %82 : vector<1x1xf32>
      %84 = vector.broadcast %64 : f32 to vector<6x128xf32>
      %85 = arith.mulf %84, %63 : vector<6x128xf32>
      %cst_39 = arith.constant 1.000000e+00 : f32
      %86 = arith.subf %cst_39, %64 : f32
      %87 = vector.broadcast %86 : f32 to vector<1x1xf32>
      %88 = arith.mulf %87, %83 : vector<1x1xf32>
      %89 = vector.broadcast %88 : vector<1x1xf32> to vector<6x128xf32>
      %90 = arith.addf %85, %89 : vector<6x128xf32>
      %cst_40 = arith.constant 0.000000e+00 : f32
      %cst_41 = arith.constant 2.550000e+02 : f32
      %91 = vector.broadcast %cst_40 : f32 to vector<6x128xf32>
      %92 = arith.maximumf %91, %90 : vector<6x128xf32>
      %93 = vector.broadcast %cst_41 : f32 to vector<6x128xf32>
      %94 = arith.minimumf %93, %92 : vector<6x128xf32>
      %95 = arith.fptoui %94 : vector<6x128xf32> to vector<6x128xi8>
      %c0_42 = arith.constant 0 : index
      %c0_43 = arith.constant 0 : index
      %c0_44 = arith.constant 0 : index
      %96 = vector.load %arg4[%c0_42, %c0_43, %c0_44] : memref<1x6x128xi8, #tpu.memory_space<vmem>>, vector<1x6x128xi8>
      %97 = vector.shape_cast %96 : vector<1x6x128xi8> to vector<6x128xi8>
      %98 = vector.shape_cast %95 : vector<6x128xi8> to vector<1x6x128xi8>
      tpu.vector_store %arg4[%c0_42, %c0_43, %c0_44], %98 {strides = array<i32>} : memref<1x6x128xi8, #tpu.memory_space<vmem>>, vector<1x6x128xi8>,
    } else {
    }
    %c4_i32_21 = arith.constant 4 : i32
    %46 = arith.cmpi eq, %34, %c4_i32_21 : i32
    %47 = arith.extui %46 : i1 to i32
    %c0_i32_22 = arith.constant 0 : i32
    %48 = arith.cmpi ne, %47, %c0_i32_22 : i32
    scf.if %48 {
      %c0_31 = arith.constant 0 : index
      %c0_32 = arith.constant 0 : index
      %c0_33 = arith.constant 0 : index
      %61 = vector.load %arg4[%c0_31, %c0_32, %c0_33] : memref<1x6x128xi8, #tpu.memory_space<vmem>>, vector<1x6x128xi8>
      %62 = vector.shape_cast %61 : vector<1x6x128xi8> to vector<6x128xi8>
      %63 = arith.uitofp %62 : vector<6x128xi8> to vector<6x128xf32>
      %cst = arith.constant 1.000000e+00 : f32
      %64 = arith.addf %cst, %36 : f32
      %65 = tpu.iota {dimensions = array<i32: 1>} : vector<1x128xi32>
      %66 = arith.sitofp %65 : vector<1x128xi32> to vector<1x128xf32>
      %67 = tpu.iota {dimensions = array<i32: 0>} : vector<6x1xi32>
      %68 = arith.sitofp %67 : vector<6x1xi32> to vector<6x1xf32>
      %cst_34 = arith.constant 6.250000e-02 : f32
      %69 = vector.broadcast %cst_34 : f32 to vector<1x128xf32>
      %70 = arith.mulf %66, %69 : vector<1x128xf32>
      %71 = math.floor %70 : vector<1x128xf32>
      %cst_35 = arith.constant 1.600000e+01 : f32
      %72 = vector.broadcast %cst_35 : f32 to vector<1x128xf32>
      %73 = arith.mulf %72, %71 : vector<1x128xf32>
      %74 = arith.subf %66, %73 : vector<1x128xf32>
      %cst_36 = arith.constant 5.000000e-01 : f32
      %75 = vector.broadcast %cst_36 : f32 to vector<6x1xf32>
      %76 = arith.mulf %68, %75 : vector<6x1xf32>
      %77 = math.floor %76 : vector<6x1xf32>
      %cst_37 = arith.constant 2.000000e+00 : f32
      %78 = vector.broadcast %cst_37 : f32 to vector<6x1xf32>
      %79 = arith.mulf %78, %77 : vector<6x1xf32>
      %80 = arith.subf %68, %79 : vector<6x1xf32>
      %cst_38 = arith.constant 0.000000e+00 : f32
      %81 = vector.broadcast %cst_38 : f32 to vector<1x128xf32>
      %82 = arith.cmpf oeq, %74, %81 : vector<1x128xf32>
      %cst_39 = arith.constant 1.500000e+01 : f32
      %83 = vector.broadcast %cst_39 : f32 to vector<1x128xf32>
      %84 = arith.cmpf oeq, %74, %83 : vector<1x128xf32>
      %85 = arith.ori %82, %84 : vector<1x128xi1>
      %cst_40 = arith.constant 0.000000e+00 : f32
      %86 = vector.broadcast %cst_40 : f32 to vector<6x1xf32>
      %87 = arith.cmpf oeq, %80, %86 : vector<6x1xf32>
      %cst_41 = arith.constant 1.600000e+01 : f32
      %88 = vector.broadcast %cst_41 : f32 to vector<1x128xf32>
      %89 = arith.cmpf olt, %66, %88 : vector<1x128xf32>
      %90 = vector.broadcast %87 : vector<6x1xi1> to vector<6x128xi1>
      %91 = vector.broadcast %89 : vector<1x128xi1> to vector<6x128xi1>
      %92 = arith.andi %90, %91 : vector<6x128xi1>
      %93 = vector.broadcast %85 : vector<1x128xi1> to vector<6x128xi1>
      %94 = arith.ori %93, %92 : vector<6x128xi1>
      %cst_42 = arith.constant 1.000000e+00 : f32
      %95 = vector.broadcast %cst_42 : f32 to vector<6x1xf32>
      %96 = arith.cmpf oeq, %80, %95 : vector<6x1xf32>
      %cst_43 = arith.constant 1.120000e+02 : f32
      %97 = vector.broadcast %cst_43 : f32 to vector<1x128xf32>
      %98 = arith.cmpf oge, %66, %97 : vector<1x128xf32>
      %99 = vector.broadcast %96 : vector<6x1xi1> to vector<6x128xi1>
      %100 = vector.broadcast %98 : vector<1x128xi1> to vector<6x128xi1>
      %101 = arith.andi %99, %100 : vector<6x128xi1>
      %102 = arith.ori %94, %101 : vector<6x128xi1>
      %cst_44 = arith.constant 0.000000e+00 : f32
      %cst_45 = arith.constant 1.000000e+00 : f32
      %103 = vector.broadcast %cst_44 : f32 to vector<6x128xf32>
      %104 = vector.broadcast %cst_45 : f32 to vector<6x128xf32>
      %105 = arith.select %102, %103, %104 : vector<6x128xi1>, vector<6x128xf32>
      %c1_i32_46 = arith.constant 1 : i32
      %106 = tpu.dynamic_rotate %63 by %c1_i32_46 dim 1 : vector<6x128xf32>, i32 -> vector<6x128xf32>
      %107 = arith.addf %63, %106 : vector<6x128xf32>
      %c127_i32 = arith.constant 127 : i32
      %108 = tpu.dynamic_rotate %63 by %c127_i32 dim 1 : vector<6x128xf32>, i32 -> vector<6x128xf32>
      %109 = arith.addf %107, %108 : vector<6x128xf32>
      %110 = vector.extract_strided_slice %109 {offsets = [5, 0], sizes = [1, 128], strides = [1, 1]} : vector<6x128xf32> to vector<1x128xf32>
      %111 = vector.extract_strided_slice %109 {offsets = [0, 0], sizes = [5, 128], strides = [1, 1]} : vector<6x128xf32> to vector<5x128xf32>
      %112 = tpu.concatenate %110, %111 in 0 : vector<1x128xf32>, vector<5x128xf32> -> vector<6x128xf32>
      %113 = vector.extract_strided_slice %109 {offsets = [1, 0], sizes = [5, 128], strides = [1, 1]} : vector<6x128xf32> to vector<5x128xf32>
      %114 = vector.extract_strided_slice %109 {offsets = [0, 0], sizes = [1, 128], strides = [1, 1]} : vector<6x128xf32> to vector<1x128xf32>
      %115 = tpu.concatenate %113, %114 in 0 : vector<5x128xf32>, vector<1x128xf32> -> vector<6x128xf32>
      %cst_47 = arith.constant 1.120000e+02 : f32
      %116 = vector.broadcast %cst_47 : f32 to vector<1x128xf32>
      %117 = arith.cmpf oge, %66, %116 : vector<1x128xf32>
      %118 = vector.shape_cast %117 : vector<1x128xi1> to vector<1x128xi1>
      %119 = vector.broadcast %118 : vector<1x128xi1> to vector<6x128xi1>
      %120 = arith.select %119, %112, %109 : vector<6x128xi1>, vector<6x128xf32>
      %cst_48 = arith.constant 1.600000e+01 : f32
      %121 = vector.broadcast %cst_48 : f32 to vector<1x128xf32>
      %122 = arith.cmpf olt, %66, %121 : vector<1x128xf32>
      %123 = vector.shape_cast %122 : vector<1x128xi1> to vector<1x128xi1>
      %124 = vector.broadcast %123 : vector<1x128xi1> to vector<6x128xi1>
      %125 = arith.select %124, %115, %109 : vector<6x128xi1>, vector<6x128xf32>
      %c16_i32 = arith.constant 16 : i32
      %126 = tpu.dynamic_rotate %120 by %c16_i32 dim 1 : vector<6x128xf32>, i32 -> vector<6x128xf32>
      %c112_i32 = arith.constant 112 : i32
      %127 = tpu.dynamic_rotate %125 by %c112_i32 dim 1 : vector<6x128xf32>, i32 -> vector<6x128xf32>
      %128 = arith.addf %109, %126 : vector<6x128xf32>
      %129 = arith.addf %128, %127 : vector<6x128xf32>
      %cst_49 = arith.constant 4.000000e+00 : f32
      %130 = vector.broadcast %cst_49 : f32 to vector<6x128xf32>
      %131 = arith.mulf %130, %63 : vector<6x128xf32>
      %132 = arith.addf %129, %131 : vector<6x128xf32>
      %cst_50 = arith.constant 0.0769230798 : f32
      %133 = vector.broadcast %cst_50 : f32 to vector<6x128xf32>
      %134 = arith.mulf %132, %133 : vector<6x128xf32>
      %cst_51 = arith.constant 1.000000e+00 : f32
      %135 = arith.subf %cst_51, %64 : f32
      %136 = vector.broadcast %135 : f32 to vector<6x128xf32>
      %137 = arith.mulf %136, %105 : vector<6x128xf32>
      %138 = math.roundeven %134 : vector<6x128xf32>
      %139 = arith.subf %138, %63 : vector<6x128xf32>
      %140 = arith.mulf %137, %139 : vector<6x128xf32>
      %141 = arith.addf %63, %140 : vector<6x128xf32>
      %cst_52 = arith.constant 0.000000e+00 : f32
      %cst_53 = arith.constant 2.550000e+02 : f32
      %142 = vector.broadcast %cst_52 : f32 to vector<6x128xf32>
      %143 = arith.maximumf %142, %141 : vector<6x128xf32>
      %144 = vector.broadcast %cst_53 : f32 to vector<6x128xf32>
      %145 = arith.minimumf %144, %143 : vector<6x128xf32>
      %146 = arith.fptoui %145 : vector<6x128xf32> to vector<6x128xi8>
      %c0_54 = arith.constant 0 : index
      %c0_55 = arith.constant 0 : index
      %c0_56 = arith.constant 0 : index
      %147 = vector.load %arg4[%c0_54, %c0_55, %c0_56] : memref<1x6x128xi8, #tpu.memory_space<vmem>>, vector<1x6x128xi8>
      %148 = vector.shape_cast %147 : vector<1x6x128xi8> to vector<6x128xi8>
      %149 = vector.shape_cast %146 : vector<6x128xi8> to vector<1x6x128xi8>
      tpu.vector_store %arg4[%c0_54, %c0_55, %c0_56], %149 {strides = array<i32>} : memref<1x6x128xi8, #tpu.memory_space<vmem>>, vector<1x6x128xi8>,
    } else {
    }
    %c5_i32_23 = arith.constant 5 : i32
    %49 = arith.cmpi eq, %34, %c5_i32_23 : i32
    %50 = arith.extui %49 : i1 to i32
    %c0_i32_24 = arith.constant 0 : i32
    %51 = arith.cmpi ne, %50, %c0_i32_24 : i32
    scf.if %51 {
      %c0_31 = arith.constant 0 : index
      %c0_32 = arith.constant 0 : index
      %c0_33 = arith.constant 0 : index
      %61 = vector.load %arg4[%c0_31, %c0_32, %c0_33] : memref<1x6x128xi8, #tpu.memory_space<vmem>>, vector<1x6x128xi8>
      %62 = vector.shape_cast %61 : vector<1x6x128xi8> to vector<6x128xi8>
      %63 = arith.uitofp %62 : vector<6x128xi8> to vector<6x128xf32>
      %64 = arith.fptosi %36 : f32 to i32
      %c8_i32_34 = arith.constant 8 : i32
      %65 = arith.subi %c8_i32_34, %64 : i32
      %c1_i32_35 = arith.constant 1 : i32
      %66 = arith.shli %c1_i32_35, %65 : i32
      %67 = arith.sitofp %66 : i32 to f32
      %cst = arith.constant 1.000000e+00 : f32
      %68 = arith.divf %cst, %67 : f32
      %69 = vector.broadcast %68 : f32 to vector<6x128xf32>
      %70 = arith.mulf %63, %69 : vector<6x128xf32>
      %71 = math.floor %70 : vector<6x128xf32>
      %72 = vector.broadcast %67 : f32 to vector<6x128xf32>
      %73 = arith.mulf %71, %72 : vector<6x128xf32>
      %74 = arith.fptoui %73 : vector<6x128xf32> to vector<6x128xi8>
      %c0_36 = arith.constant 0 : index
      %c0_37 = arith.constant 0 : index
      %c0_38 = arith.constant 0 : index
      %75 = vector.load %arg4[%c0_36, %c0_37, %c0_38] : memref<1x6x128xi8, #tpu.memory_space<vmem>>, vector<1x6x128xi8>
      %76 = vector.shape_cast %75 : vector<1x6x128xi8> to vector<6x128xi8>
      %77 = vector.shape_cast %74 : vector<6x128xi8> to vector<1x6x128xi8>
      tpu.vector_store %arg4[%c0_36, %c0_37, %c0_38], %77 {strides = array<i32>} : memref<1x6x128xi8, #tpu.memory_space<vmem>>, vector<1x6x128xi8>,
    } else {
    }
    %c6_i32_25 = arith.constant 6 : i32
    %52 = arith.cmpi eq, %34, %c6_i32_25 : i32
    %53 = arith.extui %52 : i1 to i32
    %c0_i32_26 = arith.constant 0 : i32
    %54 = arith.cmpi ne, %53, %c0_i32_26 : i32
    scf.if %54 {
      %c0_31 = arith.constant 0 : index
      %c0_32 = arith.constant 0 : index
      %c0_33 = arith.constant 0 : index
      %61 = vector.load %arg4[%c0_31, %c0_32, %c0_33] : memref<1x6x128xi8, #tpu.memory_space<vmem>>, vector<1x6x128xi8>
      %62 = vector.shape_cast %61 : vector<1x6x128xi8> to vector<6x128xi8>
      %63 = arith.uitofp %62 : vector<6x128xi8> to vector<6x128xf32>
      %64 = vector.broadcast %36 : f32 to vector<6x128xf32>
      %65 = arith.cmpf oge, %63, %64 : vector<6x128xf32>
      %cst = arith.constant 2.550000e+02 : f32
      %66 = vector.broadcast %cst : f32 to vector<6x128xf32>
      %67 = arith.subf %66, %63 : vector<6x128xf32>
      %68 = arith.select %65, %67, %63 : vector<6x128xi1>, vector<6x128xf32>
      %69 = arith.fptoui %68 : vector<6x128xf32> to vector<6x128xi8>
      %c0_34 = arith.constant 0 : index
      %c0_35 = arith.constant 0 : index
      %c0_36 = arith.constant 0 : index
      %70 = vector.load %arg4[%c0_34, %c0_35, %c0_36] : memref<1x6x128xi8, #tpu.memory_space<vmem>>, vector<1x6x128xi8>
      %71 = vector.shape_cast %70 : vector<1x6x128xi8> to vector<6x128xi8>
      %72 = vector.shape_cast %69 : vector<6x128xi8> to vector<1x6x128xi8>
      tpu.vector_store %arg4[%c0_34, %c0_35, %c0_36], %72 {strides = array<i32>} : memref<1x6x128xi8, #tpu.memory_space<vmem>>, vector<1x6x128xi8>,
    } else {
    }
    %c7_i32_27 = arith.constant 7 : i32
    %55 = arith.cmpi eq, %34, %c7_i32_27 : i32
    %56 = arith.extui %55 : i1 to i32
    %c0_i32_28 = arith.constant 0 : i32
    %57 = arith.cmpi ne, %56, %c0_i32_28 : i32
    scf.if %57 {
      %c0_31 = arith.constant 0 : index
      %c0_32 = arith.constant 0 : index
      %c0_33 = arith.constant 0 : index
      %61 = vector.load %arg4[%c0_31, %c0_32, %c0_33] : memref<1x6x128xi8, #tpu.memory_space<vmem>>, vector<1x6x128xi8>
      %62 = vector.shape_cast %61 : vector<1x6x128xi8> to vector<6x128xi8>
      %63 = arith.uitofp %62 : vector<6x128xi8> to vector<6x128xf32>
      %64 = vector.extract_strided_slice %63 {offsets = [0, 0], sizes = [2, 128], strides = [1, 1]} : vector<6x128xf32> to vector<2x128xf32>
      %65 = vector.shape_cast %64 : vector<2x128xf32> to vector<1x2x128xf32>
      %cst = arith.constant dense<0x7F800000> : vector<1xf32>
      %66 = vector.multi_reduction <minimumf>, %65, %cst [1, 2] : vector<1x2x128xf32> to vector<1xf32>
      %67 = vector.shape_cast %66 : vector<1xf32> to vector<1x1x1xf32>
      %68 = vector.extract %67[0, 0, 0] : f32 from vector<1x1x1xf32>
      %69 = vector.broadcast %68 : f32 to vector<1x1xf32>
      %70 = vector.shape_cast %64 : vector<2x128xf32> to vector<1x2x128xf32>
      %cst_34 = arith.constant dense<0xFF800000> : vector<1xf32>
      %71 = vector.multi_reduction <maximumf>, %70, %cst_34 [1, 2] : vector<1x2x128xf32> to vector<1xf32>
      %72 = vector.shape_cast %71 : vector<1xf32> to vector<1x1x1xf32>
      %73 = vector.extract %72[0, 0, 0] : f32 from vector<1x1x1xf32>
      %74 = vector.broadcast %73 : f32 to vector<1x1xf32>
      %75 = arith.cmpf oeq, %74, %69 : vector<1x1xf32>
      %76 = arith.subf %74, %69 : vector<1x1xf32>
      %cst_35 = arith.constant 1.000000e+00 : f32
      %77 = vector.broadcast %cst_35 : f32 to vector<1x1xf32>
      %78 = arith.select %75, %77, %76 : vector<1x1xi1>, vector<1x1xf32>
      %cst_36 = arith.constant 2.550000e+02 : f32
      %79 = vector.broadcast %cst_36 : f32 to vector<1x1xf32>
      %80 = arith.divf %79, %78 : vector<1x1xf32>
      %cst_37 = arith.constant 1.000000e+00 : f32
      %81 = vector.broadcast %cst_37 : f32 to vector<1x1xf32>
      %82 = arith.select %75, %81, %80 : vector<1x1xi1>, vector<1x1xf32>
      %cst_38 = arith.constant 0.000000e+00 : f32
      %83 = vector.broadcast %cst_38 : f32 to vector<1x1xf32>
      %84 = arith.select %75, %83, %69 : vector<1x1xi1>, vector<1x1xf32>
      %85 = vector.broadcast %84 : vector<1x1xf32> to vector<2x128xf32>
      %86 = arith.subf %64, %85 : vector<2x128xf32>
      %87 = vector.broadcast %82 : vector<1x1xf32> to vector<2x128xf32>
      %88 = arith.mulf %86, %87 : vector<2x128xf32>
      %cst_39 = arith.constant 0.000000e+00 : f32
      %cst_40 = arith.constant 2.550000e+02 : f32
      %89 = vector.broadcast %cst_39 : f32 to vector<2x128xf32>
      %90 = arith.maximumf %89, %88 : vector<2x128xf32>
      %91 = vector.broadcast %cst_40 : f32 to vector<2x128xf32>
      %92 = arith.minimumf %91, %90 : vector<2x128xf32>
      %93 = vector.extract_strided_slice %63 {offsets = [2, 0], sizes = [2, 128], strides = [1, 1]} : vector<6x128xf32> to vector<2x128xf32>
      %94 = vector.shape_cast %93 : vector<2x128xf32> to vector<1x2x128xf32>
      %cst_41 = arith.constant dense<0x7F800000> : vector<1xf32>
      %95 = vector.multi_reduction <minimumf>, %94, %cst_41 [1, 2] : vector<1x2x128xf32> to vector<1xf32>
      %96 = vector.shape_cast %95 : vector<1xf32> to vector<1x1x1xf32>
      %97 = vector.extract %96[0, 0, 0] : f32 from vector<1x1x1xf32>
      %98 = vector.broadcast %97 : f32 to vector<1x1xf32>
      %99 = vector.shape_cast %93 : vector<2x128xf32> to vector<1x2x128xf32>
      %cst_42 = arith.constant dense<0xFF800000> : vector<1xf32>
      %100 = vector.multi_reduction <maximumf>, %99, %cst_42 [1, 2] : vector<1x2x128xf32> to vector<1xf32>
      %101 = vector.shape_cast %100 : vector<1xf32> to vector<1x1x1xf32>
      %102 = vector.extract %101[0, 0, 0] : f32 from vector<1x1x1xf32>
      %103 = vector.broadcast %102 : f32 to vector<1x1xf32>
      %104 = arith.cmpf oeq, %103, %98 : vector<1x1xf32>
      %105 = arith.subf %103, %98 : vector<1x1xf32>
      %cst_43 = arith.constant 1.000000e+00 : f32
      %106 = vector.broadcast %cst_43 : f32 to vector<1x1xf32>
      %107 = arith.select %104, %106, %105 : vector<1x1xi1>, vector<1x1xf32>
      %cst_44 = arith.constant 2.550000e+02 : f32
      %108 = vector.broadcast %cst_44 : f32 to vector<1x1xf32>
      %109 = arith.divf %108, %107 : vector<1x1xf32>
      %cst_45 = arith.constant 1.000000e+00 : f32
      %110 = vector.broadcast %cst_45 : f32 to vector<1x1xf32>
      %111 = arith.select %104, %110, %109 : vector<1x1xi1>, vector<1x1xf32>
      %cst_46 = arith.constant 0.000000e+00 : f32
      %112 = vector.broadcast %cst_46 : f32 to vector<1x1xf32>
      %113 = arith.select %104, %112, %98 : vector<1x1xi1>, vector<1x1xf32>
      %114 = vector.broadcast %113 : vector<1x1xf32> to vector<2x128xf32>
      %115 = arith.subf %93, %114 : vector<2x128xf32>
      %116 = vector.broadcast %111 : vector<1x1xf32> to vector<2x128xf32>
      %117 = arith.mulf %115, %116 : vector<2x128xf32>
      %cst_47 = arith.constant 0.000000e+00 : f32
      %cst_48 = arith.constant 2.550000e+02 : f32
      %118 = vector.broadcast %cst_47 : f32 to vector<2x128xf32>
      %119 = arith.maximumf %118, %117 : vector<2x128xf32>
      %120 = vector.broadcast %cst_48 : f32 to vector<2x128xf32>
      %121 = arith.minimumf %120, %119 : vector<2x128xf32>
      %122 = vector.extract_strided_slice %63 {offsets = [4, 0], sizes = [2, 128], strides = [1, 1]} : vector<6x128xf32> to vector<2x128xf32>
      %123 = vector.shape_cast %122 : vector<2x128xf32> to vector<1x2x128xf32>
      %cst_49 = arith.constant dense<0x7F800000> : vector<1xf32>
      %124 = vector.multi_reduction <minimumf>, %123, %cst_49 [1, 2] : vector<1x2x128xf32> to vector<1xf32>
      %125 = vector.shape_cast %124 : vector<1xf32> to vector<1x1x1xf32>
      %126 = vector.extract %125[0, 0, 0] : f32 from vector<1x1x1xf32>
      %127 = vector.broadcast %126 : f32 to vector<1x1xf32>
      %128 = vector.shape_cast %122 : vector<2x128xf32> to vector<1x2x128xf32>
      %cst_50 = arith.constant dense<0xFF800000> : vector<1xf32>
      %129 = vector.multi_reduction <maximumf>, %128, %cst_50 [1, 2] : vector<1x2x128xf32> to vector<1xf32>
      %130 = vector.shape_cast %129 : vector<1xf32> to vector<1x1x1xf32>
      %131 = vector.extract %130[0, 0, 0] : f32 from vector<1x1x1xf32>
      %132 = vector.broadcast %131 : f32 to vector<1x1xf32>
      %133 = arith.cmpf oeq, %132, %127 : vector<1x1xf32>
      %134 = arith.subf %132, %127 : vector<1x1xf32>
      %cst_51 = arith.constant 1.000000e+00 : f32
      %135 = vector.broadcast %cst_51 : f32 to vector<1x1xf32>
      %136 = arith.select %133, %135, %134 : vector<1x1xi1>, vector<1x1xf32>
      %cst_52 = arith.constant 2.550000e+02 : f32
      %137 = vector.broadcast %cst_52 : f32 to vector<1x1xf32>
      %138 = arith.divf %137, %136 : vector<1x1xf32>
      %cst_53 = arith.constant 1.000000e+00 : f32
      %139 = vector.broadcast %cst_53 : f32 to vector<1x1xf32>
      %140 = arith.select %133, %139, %138 : vector<1x1xi1>, vector<1x1xf32>
      %cst_54 = arith.constant 0.000000e+00 : f32
      %141 = vector.broadcast %cst_54 : f32 to vector<1x1xf32>
      %142 = arith.select %133, %141, %127 : vector<1x1xi1>, vector<1x1xf32>
      %143 = vector.broadcast %142 : vector<1x1xf32> to vector<2x128xf32>
      %144 = arith.subf %122, %143 : vector<2x128xf32>
      %145 = vector.broadcast %140 : vector<1x1xf32> to vector<2x128xf32>
      %146 = arith.mulf %144, %145 : vector<2x128xf32>
      %cst_55 = arith.constant 0.000000e+00 : f32
      %cst_56 = arith.constant 2.550000e+02 : f32
      %147 = vector.broadcast %cst_55 : f32 to vector<2x128xf32>
      %148 = arith.maximumf %147, %146 : vector<2x128xf32>
      %149 = vector.broadcast %cst_56 : f32 to vector<2x128xf32>
      %150 = arith.minimumf %149, %148 : vector<2x128xf32>
      %151 = tpu.concatenate %92, %121, %150 in 0 : vector<2x128xf32>, vector<2x128xf32>, vector<2x128xf32> -> vector<6x128xf32>
      %152 = arith.fptoui %151 : vector<6x128xf32> to vector<6x128xi8>
      %c0_57 = arith.constant 0 : index
      %c0_58 = arith.constant 0 : index
      %c0_59 = arith.constant 0 : index
      %153 = vector.load %arg4[%c0_57, %c0_58, %c0_59] : memref<1x6x128xi8, #tpu.memory_space<vmem>>, vector<1x6x128xi8>
      %154 = vector.shape_cast %153 : vector<1x6x128xi8> to vector<6x128xi8>
      %155 = vector.shape_cast %152 : vector<6x128xi8> to vector<1x6x128xi8>
      tpu.vector_store %arg4[%c0_57, %c0_58, %c0_59], %155 {strides = array<i32>} : memref<1x6x128xi8, #tpu.memory_space<vmem>>, vector<1x6x128xi8>,
    } else {
    }
    %c8_i32_29 = arith.constant 8 : i32
    %58 = arith.cmpi eq, %34, %c8_i32_29 : i32
    %59 = arith.extui %58 : i1 to i32
    %c0_i32_30 = arith.constant 0 : i32
    %60 = arith.cmpi ne, %59, %c0_i32_30 : i32
    scf.if %60 {
      %c0_31 = arith.constant 0 : index
      %c0_32 = arith.constant 0 : index
      %c0_33 = arith.constant 0 : index
      %61 = vector.load %arg4[%c0_31, %c0_32, %c0_33] : memref<1x6x128xi8, #tpu.memory_space<vmem>>, vector<1x6x128xi8>
      %62 = vector.shape_cast %61 : vector<1x6x128xi8> to vector<6x128xi8>
      %63 = arith.uitofp %62 : vector<6x128xi8> to vector<6x128xf32>
      %64 = tpu.iota {dimensions = array<i32: 0>} : vector<16x1xi32>
      %65 = arith.sitofp %64 : vector<16x1xi32> to vector<16x1xf32>
      %66 = tpu.iota {dimensions = array<i32: 0>} : vector<16x16xi32>
      %67 = tpu.iota {dimensions = array<i32: 1>} : vector<16x16xi32>
      %c0_i32_34 = arith.constant 0 : i32
      %68 = vector.broadcast %c0_i32_34 : i32 to vector<16x16xi32>
      %69 = arith.cmpi eq, %66, %68 : vector<16x16xi32>
      %c0_i32_35 = arith.constant 0 : i32
      %70 = vector.broadcast %c0_i32_35 : i32 to vector<16x16xi32>
      %71 = arith.cmpi eq, %67, %70 : vector<16x16xi32>
      %72 = arith.andi %69, %71 : vector<16x16xi1>
      %cst = arith.constant 0.000000e+00 : f32
      %73 = vector.broadcast %cst : f32 to vector<16x16xf32>
      %cst_36 = arith.constant 0.000000e+00 : f32
      %74 = vector.broadcast %cst_36 : f32 to vector<16x16xf32>
      %cst_37 = arith.constant 0.000000e+00 : f32
      %75 = vector.broadcast %cst_37 : f32 to vector<16x1xf32>
      %76 = vector.extract_strided_slice %63 {offsets = [0, 0], sizes = [1, 128], strides = [1, 1]} : vector<6x128xf32> to vector<1x128xf32>
      %cst_38 = arith.constant 6.250000e-02 : f32
      %77 = vector.broadcast %cst_38 : f32 to vector<1x128xf32>
      %78 = arith.mulf %76, %77 : vector<1x128xf32>
      %79 = math.floor %78 : vector<1x128xf32>
      %cst_39 = arith.constant 1.600000e+01 : f32
      %80 = vector.broadcast %cst_39 : f32 to vector<1x128xf32>
      %81 = arith.mulf %80, %79 : vector<1x128xf32>
      %82 = arith.subf %76, %81 : vector<1x128xf32>
      %83 = vector.broadcast %79 : vector<1x128xf32> to vector<16x128xf32>
      %84 = vector.broadcast %65 : vector<16x1xf32> to vector<16x128xf32>
      %85 = arith.cmpf oeq, %83, %84 : vector<16x128xf32>
      %cst_40 = arith.constant 1.000000e+00 : f32
      %cst_41 = arith.constant 0.000000e+00 : f32
      %86 = vector.broadcast %cst_40 : f32 to vector<16x128xf32>
      %87 = vector.broadcast %cst_41 : f32 to vector<16x128xf32>
      %88 = arith.select %85, %86, %87 : vector<16x128xi1>, vector<16x128xf32>
      %89 = vector.broadcast %82 : vector<1x128xf32> to vector<16x128xf32>
      %90 = vector.broadcast %65 : vector<16x1xf32> to vector<16x128xf32>
      %91 = arith.cmpf ole, %89, %90 : vector<16x128xf32>
      %cst_42 = arith.constant 1.000000e+00 : f32
      %cst_43 = arith.constant 0.000000e+00 : f32
      %92 = vector.broadcast %cst_42 : f32 to vector<16x128xf32>
      %93 = vector.broadcast %cst_43 : f32 to vector<16x128xf32>
      %94 = arith.select %91, %92, %93 : vector<16x128xi1>, vector<16x128xf32>
      %95 = arith.truncf %88 : vector<16x128xf32> to vector<16x128xbf16>
      %96 = arith.truncf %94 : vector<16x128xf32> to vector<16x128xbf16>
      %cst_44 = arith.constant dense<0.000000e+00> : vector<16x16xf32>
      %97 = tpu.matmul %95, %96, %cst_44 {dimension_numbers = #tpu.dot_dimension_numbers<[1], [1], [0], [0], [0, 0, 1, 0], [], []>} : vector<16x128xbf16>, vector<16x128xbf16>, vector<16x16xf32> -> vector<16x16xf32>
      %98 = arith.addf %73, %97 : vector<16x16xf32>
      %99 = vector.broadcast %82 : vector<1x128xf32> to vector<16x128xf32>
      %100 = vector.broadcast %65 : vector<16x1xf32> to vector<16x128xf32>
      %101 = arith.cmpf oeq, %99, %100 : vector<16x128xf32>
      %cst_45 = arith.constant 1.000000e+00 : f32
      %cst_46 = arith.constant 0.000000e+00 : f32
      %102 = vector.broadcast %cst_45 : f32 to vector<16x128xf32>
      %103 = vector.broadcast %cst_46 : f32 to vector<16x128xf32>
      %104 = arith.select %101, %102, %103 : vector<16x128xi1>, vector<16x128xf32>
      %105 = arith.truncf %88 : vector<16x128xf32> to vector<16x128xbf16>
      %106 = arith.truncf %104 : vector<16x128xf32> to vector<16x128xbf16>
      %cst_47 = arith.constant dense<0.000000e+00> : vector<16x16xf32>
      %107 = tpu.matmul %105, %106, %cst_47 {dimension_numbers = #tpu.dot_dimension_numbers<[1], [1], [0], [0], [0, 0, 1, 0], [], []>} : vector<16x128xbf16>, vector<16x128xbf16>, vector<16x16xf32> -> vector<16x16xf32>
      %108 = arith.addf %74, %107 : vector<16x16xf32>
      %109 = vector.broadcast %79 : vector<1x128xf32> to vector<16x128xf32>
      %110 = vector.broadcast %65 : vector<16x1xf32> to vector<16x128xf32>
      %111 = arith.cmpf olt, %109, %110 : vector<16x128xf32>
      %cst_48 = arith.constant 1.000000e+00 : f32
      %cst_49 = arith.constant 0.000000e+00 : f32
      %112 = vector.broadcast %cst_48 : f32 to vector<16x128xf32>
      %113 = vector.broadcast %cst_49 : f32 to vector<16x128xf32>
      %114 = arith.select %111, %112, %113 : vector<16x128xi1>, vector<16x128xf32>
      %cst_50 = arith.constant dense<0.000000e+00> : vector<16xf32>
      %115 = vector.multi_reduction <add>, %114, %cst_50 [1] : vector<16x128xf32> to vector<16xf32>
      %116 = vector.shape_cast %115 : vector<16xf32> to vector<16x1xf32>
      %117 = arith.addf %75, %116 : vector<16x1xf32>
      %118 = vector.extract_strided_slice %63 {offsets = [1, 0], sizes = [1, 128], strides = [1, 1]} : vector<6x128xf32> to vector<1x128xf32>
      %cst_51 = arith.constant 6.250000e-02 : f32
      %119 = vector.broadcast %cst_51 : f32 to vector<1x128xf32>
      %120 = arith.mulf %118, %119 : vector<1x128xf32>
      %121 = math.floor %120 : vector<1x128xf32>
      %cst_52 = arith.constant 1.600000e+01 : f32
      %122 = vector.broadcast %cst_52 : f32 to vector<1x128xf32>
      %123 = arith.mulf %122, %121 : vector<1x128xf32>
      %124 = arith.subf %118, %123 : vector<1x128xf32>
      %125 = vector.broadcast %121 : vector<1x128xf32> to vector<16x128xf32>
      %126 = vector.broadcast %65 : vector<16x1xf32> to vector<16x128xf32>
      %127 = arith.cmpf oeq, %125, %126 : vector<16x128xf32>
      %cst_53 = arith.constant 1.000000e+00 : f32
      %cst_54 = arith.constant 0.000000e+00 : f32
      %128 = vector.broadcast %cst_53 : f32 to vector<16x128xf32>
      %129 = vector.broadcast %cst_54 : f32 to vector<16x128xf32>
      %130 = arith.select %127, %128, %129 : vector<16x128xi1>, vector<16x128xf32>
      %131 = vector.broadcast %124 : vector<1x128xf32> to vector<16x128xf32>
      %132 = vector.broadcast %65 : vector<16x1xf32> to vector<16x128xf32>
      %133 = arith.cmpf ole, %131, %132 : vector<16x128xf32>
      %cst_55 = arith.constant 1.000000e+00 : f32
      %cst_56 = arith.constant 0.000000e+00 : f32
      %134 = vector.broadcast %cst_55 : f32 to vector<16x128xf32>
      %135 = vector.broadcast %cst_56 : f32 to vector<16x128xf32>
      %136 = arith.select %133, %134, %135 : vector<16x128xi1>, vector<16x128xf32>
      %137 = arith.truncf %130 : vector<16x128xf32> to vector<16x128xbf16>
      %138 = arith.truncf %136 : vector<16x128xf32> to vector<16x128xbf16>
      %cst_57 = arith.constant dense<0.000000e+00> : vector<16x16xf32>
      %139 = tpu.matmul %137, %138, %cst_57 {dimension_numbers = #tpu.dot_dimension_numbers<[1], [1], [0], [0], [0, 0, 1, 0], [], []>} : vector<16x128xbf16>, vector<16x128xbf16>, vector<16x16xf32> -> vector<16x16xf32>
      %140 = arith.addf %98, %139 : vector<16x16xf32>
      %141 = vector.broadcast %124 : vector<1x128xf32> to vector<16x128xf32>
      %142 = vector.broadcast %65 : vector<16x1xf32> to vector<16x128xf32>
      %143 = arith.cmpf oeq, %141, %142 : vector<16x128xf32>
      %cst_58 = arith.constant 1.000000e+00 : f32
      %cst_59 = arith.constant 0.000000e+00 : f32
      %144 = vector.broadcast %cst_58 : f32 to vector<16x128xf32>
      %145 = vector.broadcast %cst_59 : f32 to vector<16x128xf32>
      %146 = arith.select %143, %144, %145 : vector<16x128xi1>, vector<16x128xf32>
      %147 = arith.truncf %130 : vector<16x128xf32> to vector<16x128xbf16>
      %148 = arith.truncf %146 : vector<16x128xf32> to vector<16x128xbf16>
      %cst_60 = arith.constant dense<0.000000e+00> : vector<16x16xf32>
      %149 = tpu.matmul %147, %148, %cst_60 {dimension_numbers = #tpu.dot_dimension_numbers<[1], [1], [0], [0], [0, 0, 1, 0], [], []>} : vector<16x128xbf16>, vector<16x128xbf16>, vector<16x16xf32> -> vector<16x16xf32>
      %150 = arith.addf %108, %149 : vector<16x16xf32>
      %151 = vector.broadcast %121 : vector<1x128xf32> to vector<16x128xf32>
      %152 = vector.broadcast %65 : vector<16x1xf32> to vector<16x128xf32>
      %153 = arith.cmpf olt, %151, %152 : vector<16x128xf32>
      %cst_61 = arith.constant 1.000000e+00 : f32
      %cst_62 = arith.constant 0.000000e+00 : f32
      %154 = vector.broadcast %cst_61 : f32 to vector<16x128xf32>
      %155 = vector.broadcast %cst_62 : f32 to vector<16x128xf32>
      %156 = arith.select %153, %154, %155 : vector<16x128xi1>, vector<16x128xf32>
      %cst_63 = arith.constant dense<0.000000e+00> : vector<16xf32>
      %157 = vector.multi_reduction <add>, %156, %cst_63 [1] : vector<16x128xf32> to vector<16xf32>
      %158 = vector.shape_cast %157 : vector<16xf32> to vector<16x1xf32>
      %159 = arith.addf %117, %158 : vector<16x1xf32>
      %160 = vector.broadcast %159 : vector<16x1xf32> to vector<16x16xf32>
      %161 = arith.addf %140, %160 : vector<16x16xf32>
      %162 = arith.subf %161, %150 : vector<16x16xf32>
      %cst_64 = arith.constant 2.555000e+02 : f32
      %163 = vector.broadcast %cst_64 : f32 to vector<16x16xf32>
      %164 = arith.cmpf oge, %161, %163 : vector<16x16xf32>
      %cst_65 = arith.constant 5.000000e-01 : f32
      %165 = vector.broadcast %cst_65 : f32 to vector<16x16xf32>
      %166 = arith.cmpf ogt, %150, %165 : vector<16x16xf32>
      %167 = arith.andi %164, %166 : vector<16x16xi1>
      %cst_66 = arith.constant 0.000000e+00 : f32
      %168 = vector.broadcast %cst_66 : f32 to vector<16x16xf32>
      %169 = arith.select %167, %150, %168 : vector<16x16xi1>, vector<16x16xf32>
      %170 = vector.shape_cast %169 : vector<16x16xf32> to vector<1x16x16xf32>
      %cst_67 = arith.constant dense<0.000000e+00> : vector<1xf32>
      %171 = vector.multi_reduction <add>, %170, %cst_67 [1, 2] : vector<1x16x16xf32> to vector<1xf32>
      %172 = vector.shape_cast %171 : vector<1xf32> to vector<1x1x1xf32>
      %173 = vector.extract %172[0, 0, 0] : f32 from vector<1x1x1xf32>
      %174 = vector.broadcast %173 : f32 to vector<1x1xf32>
      %cst_68 = arith.constant 2.560000e+02 : f32
      %175 = vector.broadcast %cst_68 : f32 to vector<1x1xf32>
      %176 = arith.subf %175, %174 : vector<1x1xf32>
      %cst_69 = arith.constant 0.00392156886 : f32
      %177 = vector.broadcast %cst_69 : f32 to vector<1x1xf32>
      %178 = arith.mulf %176, %177 : vector<1x1xf32>
      %179 = math.floor %178 : vector<1x1xf32>
      %cst_70 = arith.constant 1.000000e+00 : f32
      %180 = vector.broadcast %cst_70 : f32 to vector<1x1xf32>
      %181 = arith.maximumf %179, %180 : vector<1x1xf32>
      %cst_71 = arith.constant 5.000000e-01 : f32
      %182 = vector.broadcast %cst_71 : f32 to vector<1x1xf32>
      %183 = arith.mulf %179, %182 : vector<1x1xf32>
      %184 = math.floor %183 : vector<1x1xf32>
      %185 = vector.broadcast %184 : vector<1x1xf32> to vector<16x16xf32>
      %186 = arith.addf %162, %185 : vector<16x16xf32>
      %187 = vector.broadcast %181 : vector<1x1xf32> to vector<16x16xf32>
      %188 = arith.divf %186, %187 : vector<16x16xf32>
      %189 = math.floor %188 : vector<16x16xf32>
      %190 = vector.broadcast %181 : vector<1x1xf32> to vector<16x16xf32>
      %191 = arith.mulf %189, %190 : vector<16x16xf32>
      %192 = arith.subf %186, %191 : vector<16x16xf32>
      %cst_72 = arith.constant 0.000000e+00 : f32
      %193 = vector.broadcast %cst_72 : f32 to vector<16x16xf32>
      %194 = arith.cmpf olt, %192, %193 : vector<16x16xf32>
      %cst_73 = arith.constant 1.000000e+00 : f32
      %195 = vector.broadcast %cst_73 : f32 to vector<16x16xf32>
      %196 = arith.subf %189, %195 : vector<16x16xf32>
      %197 = arith.select %194, %196, %189 : vector<16x16xi1>, vector<16x16xf32>
      %198 = vector.broadcast %181 : vector<1x1xf32> to vector<16x16xf32>
      %199 = arith.cmpf oge, %192, %198 : vector<16x16xf32>
      %cst_74 = arith.constant 1.000000e+00 : f32
      %200 = vector.broadcast %cst_74 : f32 to vector<16x16xf32>
      %201 = arith.addf %197, %200 : vector<16x16xf32>
      %202 = arith.select %199, %201, %197 : vector<16x16xi1>, vector<16x16xf32>
      %cst_75 = arith.constant 0.000000e+00 : f32
      %cst_76 = arith.constant 2.550000e+02 : f32
      %203 = vector.broadcast %cst_75 : f32 to vector<16x16xf32>
      %204 = arith.maximumf %203, %202 : vector<16x16xf32>
      %205 = vector.broadcast %cst_76 : f32 to vector<16x16xf32>
      %206 = arith.minimumf %205, %204 : vector<16x16xf32>
      %cst_77 = arith.constant 0.000000e+00 : f32
      %207 = vector.broadcast %cst_77 : f32 to vector<16x16xf32>
      %208 = arith.select %72, %207, %206 : vector<16x16xi1>, vector<16x16xf32>
      %209 = arith.truncf %208 : vector<16x16xf32> to vector<16x16xbf16>
      %cst_78 = arith.constant 5.000000e-01 : f32
      %210 = vector.broadcast %cst_78 : f32 to vector<1x1xf32>
      %211 = arith.cmpf oge, %179, %210 : vector<1x1xf32>
      %212 = vector.extract_strided_slice %63 {offsets = [0, 0], sizes = [1, 128], strides = [1, 1]} : vector<6x128xf32> to vector<1x128xf32>
      %cst_79 = arith.constant 6.250000e-02 : f32
      %213 = vector.broadcast %cst_79 : f32 to vector<1x128xf32>
      %214 = arith.mulf %212, %213 : vector<1x128xf32>
      %215 = math.floor %214 : vector<1x128xf32>
      %cst_80 = arith.constant 1.600000e+01 : f32
      %216 = vector.broadcast %cst_80 : f32 to vector<1x128xf32>
      %217 = arith.mulf %216, %215 : vector<1x128xf32>
      %218 = arith.subf %212, %217 : vector<1x128xf32>
      %219 = vector.broadcast %215 : vector<1x128xf32> to vector<16x128xf32>
      %220 = vector.broadcast %65 : vector<16x1xf32> to vector<16x128xf32>
      %221 = arith.cmpf oeq, %219, %220 : vector<16x128xf32>
      %cst_81 = arith.constant 1.000000e+00 : f32
      %cst_82 = arith.constant 0.000000e+00 : f32
      %222 = vector.broadcast %cst_81 : f32 to vector<16x128xf32>
      %223 = vector.broadcast %cst_82 : f32 to vector<16x128xf32>
      %224 = arith.select %221, %222, %223 : vector<16x128xi1>, vector<16x128xf32>
      %225 = vector.broadcast %218 : vector<1x128xf32> to vector<16x128xf32>
      %226 = vector.broadcast %65 : vector<16x1xf32> to vector<16x128xf32>
      %227 = arith.cmpf oeq, %225, %226 : vector<16x128xf32>
      %cst_83 = arith.constant 1.000000e+00 : f32
      %cst_84 = arith.constant 0.000000e+00 : f32
      %228 = vector.broadcast %cst_83 : f32 to vector<16x128xf32>
      %229 = vector.broadcast %cst_84 : f32 to vector<16x128xf32>
      %230 = arith.select %227, %228, %229 : vector<16x128xi1>, vector<16x128xf32>
      %231 = arith.truncf %230 : vector<16x128xf32> to vector<16x128xbf16>
      %cst_85 = arith.constant dense<0.000000e+00> : vector<16x128xf32>
      %232 = tpu.matmul %209, %231, %cst_85 {dimension_numbers = #tpu.dot_dimension_numbers<[1], [0], [0], [1], [0, 0, 1, 1], [], []>} : vector<16x16xbf16>, vector<16x128xbf16>, vector<16x128xf32> -> vector<16x128xf32>
      %233 = arith.mulf %224, %232 : vector<16x128xf32>
      %cst_86 = arith.constant dense<0.000000e+00> : vector<128xf32>
      %234 = vector.multi_reduction <add>, %233, %cst_86 [0] : vector<16x128xf32> to vector<128xf32>
      %235 = vector.shape_cast %234 : vector<128xf32> to vector<1x128xf32>
      %236 = vector.shape_cast %211 : vector<1x1xi1> to vector<1x1xi1>
      %237 = vector.broadcast %236 : vector<1x1xi1> to vector<1x128xi1>
      %238 = arith.select %237, %235, %212 : vector<1x128xi1>, vector<1x128xf32>
      %239 = vector.extract_strided_slice %63 {offsets = [1, 0], sizes = [1, 128], strides = [1, 1]} : vector<6x128xf32> to vector<1x128xf32>
      %cst_87 = arith.constant 6.250000e-02 : f32
      %240 = vector.broadcast %cst_87 : f32 to vector<1x128xf32>
      %241 = arith.mulf %239, %240 : vector<1x128xf32>
      %242 = math.floor %241 : vector<1x128xf32>
      %cst_88 = arith.constant 1.600000e+01 : f32
      %243 = vector.broadcast %cst_88 : f32 to vector<1x128xf32>
      %244 = arith.mulf %243, %242 : vector<1x128xf32>
      %245 = arith.subf %239, %244 : vector<1x128xf32>
      %246 = vector.broadcast %242 : vector<1x128xf32> to vector<16x128xf32>
      %247 = vector.broadcast %65 : vector<16x1xf32> to vector<16x128xf32>
      %248 = arith.cmpf oeq, %246, %247 : vector<16x128xf32>
      %cst_89 = arith.constant 1.000000e+00 : f32
      %cst_90 = arith.constant 0.000000e+00 : f32
      %249 = vector.broadcast %cst_89 : f32 to vector<16x128xf32>
      %250 = vector.broadcast %cst_90 : f32 to vector<16x128xf32>
      %251 = arith.select %248, %249, %250 : vector<16x128xi1>, vector<16x128xf32>
      %252 = vector.broadcast %245 : vector<1x128xf32> to vector<16x128xf32>
      %253 = vector.broadcast %65 : vector<16x1xf32> to vector<16x128xf32>
      %254 = arith.cmpf oeq, %252, %253 : vector<16x128xf32>
      %cst_91 = arith.constant 1.000000e+00 : f32
      %cst_92 = arith.constant 0.000000e+00 : f32
      %255 = vector.broadcast %cst_91 : f32 to vector<16x128xf32>
      %256 = vector.broadcast %cst_92 : f32 to vector<16x128xf32>
      %257 = arith.select %254, %255, %256 : vector<16x128xi1>, vector<16x128xf32>
      %258 = arith.truncf %257 : vector<16x128xf32> to vector<16x128xbf16>
      %cst_93 = arith.constant dense<0.000000e+00> : vector<16x128xf32>
      %259 = tpu.matmul %209, %258, %cst_93 {dimension_numbers = #tpu.dot_dimension_numbers<[1], [0], [0], [1], [0, 0, 1, 1], [], []>} : vector<16x16xbf16>, vector<16x128xbf16>, vector<16x128xf32> -> vector<16x128xf32>
      %260 = arith.mulf %251, %259 : vector<16x128xf32>
      %cst_94 = arith.constant dense<0.000000e+00> : vector<128xf32>
      %261 = vector.multi_reduction <add>, %260, %cst_94 [0] : vector<16x128xf32> to vector<128xf32>
      %262 = vector.shape_cast %261 : vector<128xf32> to vector<1x128xf32>
      %263 = vector.shape_cast %211 : vector<1x1xi1> to vector<1x1xi1>
      %264 = vector.broadcast %263 : vector<1x1xi1> to vector<1x128xi1>
      %265 = arith.select %264, %262, %239 : vector<1x128xi1>, vector<1x128xf32>
      %266 = tpu.concatenate %238, %265 in 0 : vector<1x128xf32>, vector<1x128xf32> -> vector<2x128xf32>
      %cst_95 = arith.constant 0.000000e+00 : f32
      %267 = vector.broadcast %cst_95 : f32 to vector<16x16xf32>
      %cst_96 = arith.constant 0.000000e+00 : f32
      %268 = vector.broadcast %cst_96 : f32 to vector<16x16xf32>
      %cst_97 = arith.constant 0.000000e+00 : f32
      %269 = vector.broadcast %cst_97 : f32 to vector<16x1xf32>
      %270 = vector.extract_strided_slice %63 {offsets = [2, 0], sizes = [1, 128], strides = [1, 1]} : vector<6x128xf32> to vector<1x128xf32>
      %cst_98 = arith.constant 6.250000e-02 : f32
      %271 = vector.broadcast %cst_98 : f32 to vector<1x128xf32>
      %272 = arith.mulf %270, %271 : vector<1x128xf32>
      %273 = math.floor %272 : vector<1x128xf32>
      %cst_99 = arith.constant 1.600000e+01 : f32
      %274 = vector.broadcast %cst_99 : f32 to vector<1x128xf32>
      %275 = arith.mulf %274, %273 : vector<1x128xf32>
      %276 = arith.subf %270, %275 : vector<1x128xf32>
      %277 = vector.broadcast %273 : vector<1x128xf32> to vector<16x128xf32>
      %278 = vector.broadcast %65 : vector<16x1xf32> to vector<16x128xf32>
      %279 = arith.cmpf oeq, %277, %278 : vector<16x128xf32>
      %cst_100 = arith.constant 1.000000e+00 : f32
      %cst_101 = arith.constant 0.000000e+00 : f32
      %280 = vector.broadcast %cst_100 : f32 to vector<16x128xf32>
      %281 = vector.broadcast %cst_101 : f32 to vector<16x128xf32>
      %282 = arith.select %279, %280, %281 : vector<16x128xi1>, vector<16x128xf32>
      %283 = vector.broadcast %276 : vector<1x128xf32> to vector<16x128xf32>
      %284 = vector.broadcast %65 : vector<16x1xf32> to vector<16x128xf32>
      %285 = arith.cmpf ole, %283, %284 : vector<16x128xf32>
      %cst_102 = arith.constant 1.000000e+00 : f32
      %cst_103 = arith.constant 0.000000e+00 : f32
      %286 = vector.broadcast %cst_102 : f32 to vector<16x128xf32>
      %287 = vector.broadcast %cst_103 : f32 to vector<16x128xf32>
      %288 = arith.select %285, %286, %287 : vector<16x128xi1>, vector<16x128xf32>
      %289 = arith.truncf %282 : vector<16x128xf32> to vector<16x128xbf16>
      %290 = arith.truncf %288 : vector<16x128xf32> to vector<16x128xbf16>
      %cst_104 = arith.constant dense<0.000000e+00> : vector<16x16xf32>
      %291 = tpu.matmul %289, %290, %cst_104 {dimension_numbers = #tpu.dot_dimension_numbers<[1], [1], [0], [0], [0, 0, 1, 0], [], []>} : vector<16x128xbf16>, vector<16x128xbf16>, vector<16x16xf32> -> vector<16x16xf32>
      %292 = arith.addf %267, %291 : vector<16x16xf32>
      %293 = vector.broadcast %276 : vector<1x128xf32> to vector<16x128xf32>
      %294 = vector.broadcast %65 : vector<16x1xf32> to vector<16x128xf32>
      %295 = arith.cmpf oeq, %293, %294 : vector<16x128xf32>
      %cst_105 = arith.constant 1.000000e+00 : f32
      %cst_106 = arith.constant 0.000000e+00 : f32
      %296 = vector.broadcast %cst_105 : f32 to vector<16x128xf32>
      %297 = vector.broadcast %cst_106 : f32 to vector<16x128xf32>
      %298 = arith.select %295, %296, %297 : vector<16x128xi1>, vector<16x128xf32>
      %299 = arith.truncf %282 : vector<16x128xf32> to vector<16x128xbf16>
      %300 = arith.truncf %298 : vector<16x128xf32> to vector<16x128xbf16>
      %cst_107 = arith.constant dense<0.000000e+00> : vector<16x16xf32>
      %301 = tpu.matmul %299, %300, %cst_107 {dimension_numbers = #tpu.dot_dimension_numbers<[1], [1], [0], [0], [0, 0, 1, 0], [], []>} : vector<16x128xbf16>, vector<16x128xbf16>, vector<16x16xf32> -> vector<16x16xf32>
      %302 = arith.addf %268, %301 : vector<16x16xf32>
      %303 = vector.broadcast %273 : vector<1x128xf32> to vector<16x128xf32>
      %304 = vector.broadcast %65 : vector<16x1xf32> to vector<16x128xf32>
      %305 = arith.cmpf olt, %303, %304 : vector<16x128xf32>
      %cst_108 = arith.constant 1.000000e+00 : f32
      %cst_109 = arith.constant 0.000000e+00 : f32
      %306 = vector.broadcast %cst_108 : f32 to vector<16x128xf32>
      %307 = vector.broadcast %cst_109 : f32 to vector<16x128xf32>
      %308 = arith.select %305, %306, %307 : vector<16x128xi1>, vector<16x128xf32>
      %cst_110 = arith.constant dense<0.000000e+00> : vector<16xf32>
      %309 = vector.multi_reduction <add>, %308, %cst_110 [1] : vector<16x128xf32> to vector<16xf32>
      %310 = vector.shape_cast %309 : vector<16xf32> to vector<16x1xf32>
      %311 = arith.addf %269, %310 : vector<16x1xf32>
      %312 = vector.extract_strided_slice %63 {offsets = [3, 0], sizes = [1, 128], strides = [1, 1]} : vector<6x128xf32> to vector<1x128xf32>
      %cst_111 = arith.constant 6.250000e-02 : f32
      %313 = vector.broadcast %cst_111 : f32 to vector<1x128xf32>
      %314 = arith.mulf %312, %313 : vector<1x128xf32>
      %315 = math.floor %314 : vector<1x128xf32>
      %cst_112 = arith.constant 1.600000e+01 : f32
      %316 = vector.broadcast %cst_112 : f32 to vector<1x128xf32>
      %317 = arith.mulf %316, %315 : vector<1x128xf32>
      %318 = arith.subf %312, %317 : vector<1x128xf32>
      %319 = vector.broadcast %315 : vector<1x128xf32> to vector<16x128xf32>
      %320 = vector.broadcast %65 : vector<16x1xf32> to vector<16x128xf32>
      %321 = arith.cmpf oeq, %319, %320 : vector<16x128xf32>
      %cst_113 = arith.constant 1.000000e+00 : f32
      %cst_114 = arith.constant 0.000000e+00 : f32
      %322 = vector.broadcast %cst_113 : f32 to vector<16x128xf32>
      %323 = vector.broadcast %cst_114 : f32 to vector<16x128xf32>
      %324 = arith.select %321, %322, %323 : vector<16x128xi1>, vector<16x128xf32>
      %325 = vector.broadcast %318 : vector<1x128xf32> to vector<16x128xf32>
      %326 = vector.broadcast %65 : vector<16x1xf32> to vector<16x128xf32>
      %327 = arith.cmpf ole, %325, %326 : vector<16x128xf32>
      %cst_115 = arith.constant 1.000000e+00 : f32
      %cst_116 = arith.constant 0.000000e+00 : f32
      %328 = vector.broadcast %cst_115 : f32 to vector<16x128xf32>
      %329 = vector.broadcast %cst_116 : f32 to vector<16x128xf32>
      %330 = arith.select %327, %328, %329 : vector<16x128xi1>, vector<16x128xf32>
      %331 = arith.truncf %324 : vector<16x128xf32> to vector<16x128xbf16>
      %332 = arith.truncf %330 : vector<16x128xf32> to vector<16x128xbf16>
      %cst_117 = arith.constant dense<0.000000e+00> : vector<16x16xf32>
      %333 = tpu.matmul %331, %332, %cst_117 {dimension_numbers = #tpu.dot_dimension_numbers<[1], [1], [0], [0], [0, 0, 1, 0], [], []>} : vector<16x128xbf16>, vector<16x128xbf16>, vector<16x16xf32> -> vector<16x16xf32>
      %334 = arith.addf %292, %333 : vector<16x16xf32>
      %335 = vector.broadcast %318 : vector<1x128xf32> to vector<16x128xf32>
      %336 = vector.broadcast %65 : vector<16x1xf32> to vector<16x128xf32>
      %337 = arith.cmpf oeq, %335, %336 : vector<16x128xf32>
      %cst_118 = arith.constant 1.000000e+00 : f32
      %cst_119 = arith.constant 0.000000e+00 : f32
      %338 = vector.broadcast %cst_118 : f32 to vector<16x128xf32>
      %339 = vector.broadcast %cst_119 : f32 to vector<16x128xf32>
      %340 = arith.select %337, %338, %339 : vector<16x128xi1>, vector<16x128xf32>
      %341 = arith.truncf %324 : vector<16x128xf32> to vector<16x128xbf16>
      %342 = arith.truncf %340 : vector<16x128xf32> to vector<16x128xbf16>
      %cst_120 = arith.constant dense<0.000000e+00> : vector<16x16xf32>
      %343 = tpu.matmul %341, %342, %cst_120 {dimension_numbers = #tpu.dot_dimension_numbers<[1], [1], [0], [0], [0, 0, 1, 0], [], []>} : vector<16x128xbf16>, vector<16x128xbf16>, vector<16x16xf32> -> vector<16x16xf32>
      %344 = arith.addf %302, %343 : vector<16x16xf32>
      %345 = vector.broadcast %315 : vector<1x128xf32> to vector<16x128xf32>
      %346 = vector.broadcast %65 : vector<16x1xf32> to vector<16x128xf32>
      %347 = arith.cmpf olt, %345, %346 : vector<16x128xf32>
      %cst_121 = arith.constant 1.000000e+00 : f32
      %cst_122 = arith.constant 0.000000e+00 : f32
      %348 = vector.broadcast %cst_121 : f32 to vector<16x128xf32>
      %349 = vector.broadcast %cst_122 : f32 to vector<16x128xf32>
      %350 = arith.select %347, %348, %349 : vector<16x128xi1>, vector<16x128xf32>
      %cst_123 = arith.constant dense<0.000000e+00> : vector<16xf32>
      %351 = vector.multi_reduction <add>, %350, %cst_123 [1] : vector<16x128xf32> to vector<16xf32>
      %352 = vector.shape_cast %351 : vector<16xf32> to vector<16x1xf32>
      %353 = arith.addf %311, %352 : vector<16x1xf32>
      %354 = vector.broadcast %353 : vector<16x1xf32> to vector<16x16xf32>
      %355 = arith.addf %334, %354 : vector<16x16xf32>
      %356 = arith.subf %355, %344 : vector<16x16xf32>
      %cst_124 = arith.constant 2.555000e+02 : f32
      %357 = vector.broadcast %cst_124 : f32 to vector<16x16xf32>
      %358 = arith.cmpf oge, %355, %357 : vector<16x16xf32>
      %cst_125 = arith.constant 5.000000e-01 : f32
      %359 = vector.broadcast %cst_125 : f32 to vector<16x16xf32>
      %360 = arith.cmpf ogt, %344, %359 : vector<16x16xf32>
      %361 = arith.andi %358, %360 : vector<16x16xi1>
      %cst_126 = arith.constant 0.000000e+00 : f32
      %362 = vector.broadcast %cst_126 : f32 to vector<16x16xf32>
      %363 = arith.select %361, %344, %362 : vector<16x16xi1>, vector<16x16xf32>
      %364 = vector.shape_cast %363 : vector<16x16xf32> to vector<1x16x16xf32>
      %cst_127 = arith.constant dense<0.000000e+00> : vector<1xf32>
      %365 = vector.multi_reduction <add>, %364, %cst_127 [1, 2] : vector<1x16x16xf32> to vector<1xf32>
      %366 = vector.shape_cast %365 : vector<1xf32> to vector<1x1x1xf32>
      %367 = vector.extract %366[0, 0, 0] : f32 from vector<1x1x1xf32>
      %368 = vector.broadcast %367 : f32 to vector<1x1xf32>
      %cst_128 = arith.constant 2.560000e+02 : f32
      %369 = vector.broadcast %cst_128 : f32 to vector<1x1xf32>
      %370 = arith.subf %369, %368 : vector<1x1xf32>
      %cst_129 = arith.constant 0.00392156886 : f32
      %371 = vector.broadcast %cst_129 : f32 to vector<1x1xf32>
      %372 = arith.mulf %370, %371 : vector<1x1xf32>
      %373 = math.floor %372 : vector<1x1xf32>
      %cst_130 = arith.constant 1.000000e+00 : f32
      %374 = vector.broadcast %cst_130 : f32 to vector<1x1xf32>
      %375 = arith.maximumf %373, %374 : vector<1x1xf32>
      %cst_131 = arith.constant 5.000000e-01 : f32
      %376 = vector.broadcast %cst_131 : f32 to vector<1x1xf32>
      %377 = arith.mulf %373, %376 : vector<1x1xf32>
      %378 = math.floor %377 : vector<1x1xf32>
      %379 = vector.broadcast %378 : vector<1x1xf32> to vector<16x16xf32>
      %380 = arith.addf %356, %379 : vector<16x16xf32>
      %381 = vector.broadcast %375 : vector<1x1xf32> to vector<16x16xf32>
      %382 = arith.divf %380, %381 : vector<16x16xf32>
      %383 = math.floor %382 : vector<16x16xf32>
      %384 = vector.broadcast %375 : vector<1x1xf32> to vector<16x16xf32>
      %385 = arith.mulf %383, %384 : vector<16x16xf32>
      %386 = arith.subf %380, %385 : vector<16x16xf32>
      %cst_132 = arith.constant 0.000000e+00 : f32
      %387 = vector.broadcast %cst_132 : f32 to vector<16x16xf32>
      %388 = arith.cmpf olt, %386, %387 : vector<16x16xf32>
      %cst_133 = arith.constant 1.000000e+00 : f32
      %389 = vector.broadcast %cst_133 : f32 to vector<16x16xf32>
      %390 = arith.subf %383, %389 : vector<16x16xf32>
      %391 = arith.select %388, %390, %383 : vector<16x16xi1>, vector<16x16xf32>
      %392 = vector.broadcast %375 : vector<1x1xf32> to vector<16x16xf32>
      %393 = arith.cmpf oge, %386, %392 : vector<16x16xf32>
      %cst_134 = arith.constant 1.000000e+00 : f32
      %394 = vector.broadcast %cst_134 : f32 to vector<16x16xf32>
      %395 = arith.addf %391, %394 : vector<16x16xf32>
      %396 = arith.select %393, %395, %391 : vector<16x16xi1>, vector<16x16xf32>
      %cst_135 = arith.constant 0.000000e+00 : f32
      %cst_136 = arith.constant 2.550000e+02 : f32
      %397 = vector.broadcast %cst_135 : f32 to vector<16x16xf32>
      %398 = arith.maximumf %397, %396 : vector<16x16xf32>
      %399 = vector.broadcast %cst_136 : f32 to vector<16x16xf32>
      %400 = arith.minimumf %399, %398 : vector<16x16xf32>
      %cst_137 = arith.constant 0.000000e+00 : f32
      %401 = vector.broadcast %cst_137 : f32 to vector<16x16xf32>
      %402 = arith.select %72, %401, %400 : vector<16x16xi1>, vector<16x16xf32>
      %403 = arith.truncf %402 : vector<16x16xf32> to vector<16x16xbf16>
      %cst_138 = arith.constant 5.000000e-01 : f32
      %404 = vector.broadcast %cst_138 : f32 to vector<1x1xf32>
      %405 = arith.cmpf oge, %373, %404 : vector<1x1xf32>
      %406 = vector.extract_strided_slice %63 {offsets = [2, 0], sizes = [1, 128], strides = [1, 1]} : vector<6x128xf32> to vector<1x128xf32>
      %cst_139 = arith.constant 6.250000e-02 : f32
      %407 = vector.broadcast %cst_139 : f32 to vector<1x128xf32>
      %408 = arith.mulf %406, %407 : vector<1x128xf32>
      %409 = math.floor %408 : vector<1x128xf32>
      %cst_140 = arith.constant 1.600000e+01 : f32
      %410 = vector.broadcast %cst_140 : f32 to vector<1x128xf32>
      %411 = arith.mulf %410, %409 : vector<1x128xf32>
      %412 = arith.subf %406, %411 : vector<1x128xf32>
      %413 = vector.broadcast %409 : vector<1x128xf32> to vector<16x128xf32>
      %414 = vector.broadcast %65 : vector<16x1xf32> to vector<16x128xf32>
      %415 = arith.cmpf oeq, %413, %414 : vector<16x128xf32>
      %cst_141 = arith.constant 1.000000e+00 : f32
      %cst_142 = arith.constant 0.000000e+00 : f32
      %416 = vector.broadcast %cst_141 : f32 to vector<16x128xf32>
      %417 = vector.broadcast %cst_142 : f32 to vector<16x128xf32>
      %418 = arith.select %415, %416, %417 : vector<16x128xi1>, vector<16x128xf32>
      %419 = vector.broadcast %412 : vector<1x128xf32> to vector<16x128xf32>
      %420 = vector.broadcast %65 : vector<16x1xf32> to vector<16x128xf32>
      %421 = arith.cmpf oeq, %419, %420 : vector<16x128xf32>
      %cst_143 = arith.constant 1.000000e+00 : f32
      %cst_144 = arith.constant 0.000000e+00 : f32
      %422 = vector.broadcast %cst_143 : f32 to vector<16x128xf32>
      %423 = vector.broadcast %cst_144 : f32 to vector<16x128xf32>
      %424 = arith.select %421, %422, %423 : vector<16x128xi1>, vector<16x128xf32>
      %425 = arith.truncf %424 : vector<16x128xf32> to vector<16x128xbf16>
      %cst_145 = arith.constant dense<0.000000e+00> : vector<16x128xf32>
      %426 = tpu.matmul %403, %425, %cst_145 {dimension_numbers = #tpu.dot_dimension_numbers<[1], [0], [0], [1], [0, 0, 1, 1], [], []>} : vector<16x16xbf16>, vector<16x128xbf16>, vector<16x128xf32> -> vector<16x128xf32>
      %427 = arith.mulf %418, %426 : vector<16x128xf32>
      %cst_146 = arith.constant dense<0.000000e+00> : vector<128xf32>
      %428 = vector.multi_reduction <add>, %427, %cst_146 [0] : vector<16x128xf32> to vector<128xf32>
      %429 = vector.shape_cast %428 : vector<128xf32> to vector<1x128xf32>
      %430 = vector.shape_cast %405 : vector<1x1xi1> to vector<1x1xi1>
      %431 = vector.broadcast %430 : vector<1x1xi1> to vector<1x128xi1>
      %432 = arith.select %431, %429, %406 : vector<1x128xi1>, vector<1x128xf32>
      %433 = vector.extract_strided_slice %63 {offsets = [3, 0], sizes = [1, 128], strides = [1, 1]} : vector<6x128xf32> to vector<1x128xf32>
      %cst_147 = arith.constant 6.250000e-02 : f32
      %434 = vector.broadcast %cst_147 : f32 to vector<1x128xf32>
      %435 = arith.mulf %433, %434 : vector<1x128xf32>
      %436 = math.floor %435 : vector<1x128xf32>
      %cst_148 = arith.constant 1.600000e+01 : f32
      %437 = vector.broadcast %cst_148 : f32 to vector<1x128xf32>
      %438 = arith.mulf %437, %436 : vector<1x128xf32>
      %439 = arith.subf %433, %438 : vector<1x128xf32>
      %440 = vector.broadcast %436 : vector<1x128xf32> to vector<16x128xf32>
      %441 = vector.broadcast %65 : vector<16x1xf32> to vector<16x128xf32>
      %442 = arith.cmpf oeq, %440, %441 : vector<16x128xf32>
      %cst_149 = arith.constant 1.000000e+00 : f32
      %cst_150 = arith.constant 0.000000e+00 : f32
      %443 = vector.broadcast %cst_149 : f32 to vector<16x128xf32>
      %444 = vector.broadcast %cst_150 : f32 to vector<16x128xf32>
      %445 = arith.select %442, %443, %444 : vector<16x128xi1>, vector<16x128xf32>
      %446 = vector.broadcast %439 : vector<1x128xf32> to vector<16x128xf32>
      %447 = vector.broadcast %65 : vector<16x1xf32> to vector<16x128xf32>
      %448 = arith.cmpf oeq, %446, %447 : vector<16x128xf32>
      %cst_151 = arith.constant 1.000000e+00 : f32
      %cst_152 = arith.constant 0.000000e+00 : f32
      %449 = vector.broadcast %cst_151 : f32 to vector<16x128xf32>
      %450 = vector.broadcast %cst_152 : f32 to vector<16x128xf32>
      %451 = arith.select %448, %449, %450 : vector<16x128xi1>, vector<16x128xf32>
      %452 = arith.truncf %451 : vector<16x128xf32> to vector<16x128xbf16>
      %cst_153 = arith.constant dense<0.000000e+00> : vector<16x128xf32>
      %453 = tpu.matmul %403, %452, %cst_153 {dimension_numbers = #tpu.dot_dimension_numbers<[1], [0], [0], [1], [0, 0, 1, 1], [], []>} : vector<16x16xbf16>, vector<16x128xbf16>, vector<16x128xf32> -> vector<16x128xf32>
      %454 = arith.mulf %445, %453 : vector<16x128xf32>
      %cst_154 = arith.constant dense<0.000000e+00> : vector<128xf32>
      %455 = vector.multi_reduction <add>, %454, %cst_154 [0] : vector<16x128xf32> to vector<128xf32>
      %456 = vector.shape_cast %455 : vector<128xf32> to vector<1x128xf32>
      %457 = vector.shape_cast %405 : vector<1x1xi1> to vector<1x1xi1>
      %458 = vector.broadcast %457 : vector<1x1xi1> to vector<1x128xi1>
      %459 = arith.select %458, %456, %433 : vector<1x128xi1>, vector<1x128xf32>
      %460 = tpu.concatenate %432, %459 in 0 : vector<1x128xf32>, vector<1x128xf32> -> vector<2x128xf32>
      %cst_155 = arith.constant 0.000000e+00 : f32
      %461 = vector.broadcast %cst_155 : f32 to vector<16x16xf32>
      %cst_156 = arith.constant 0.000000e+00 : f32
      %462 = vector.broadcast %cst_156 : f32 to vector<16x16xf32>
      %cst_157 = arith.constant 0.000000e+00 : f32
      %463 = vector.broadcast %cst_157 : f32 to vector<16x1xf32>
      %464 = vector.extract_strided_slice %63 {offsets = [4, 0], sizes = [1, 128], strides = [1, 1]} : vector<6x128xf32> to vector<1x128xf32>
      %cst_158 = arith.constant 6.250000e-02 : f32
      %465 = vector.broadcast %cst_158 : f32 to vector<1x128xf32>
      %466 = arith.mulf %464, %465 : vector<1x128xf32>
      %467 = math.floor %466 : vector<1x128xf32>
      %cst_159 = arith.constant 1.600000e+01 : f32
      %468 = vector.broadcast %cst_159 : f32 to vector<1x128xf32>
      %469 = arith.mulf %468, %467 : vector<1x128xf32>
      %470 = arith.subf %464, %469 : vector<1x128xf32>
      %471 = vector.broadcast %467 : vector<1x128xf32> to vector<16x128xf32>
      %472 = vector.broadcast %65 : vector<16x1xf32> to vector<16x128xf32>
      %473 = arith.cmpf oeq, %471, %472 : vector<16x128xf32>
      %cst_160 = arith.constant 1.000000e+00 : f32
      %cst_161 = arith.constant 0.000000e+00 : f32
      %474 = vector.broadcast %cst_160 : f32 to vector<16x128xf32>
      %475 = vector.broadcast %cst_161 : f32 to vector<16x128xf32>
      %476 = arith.select %473, %474, %475 : vector<16x128xi1>, vector<16x128xf32>
      %477 = vector.broadcast %470 : vector<1x128xf32> to vector<16x128xf32>
      %478 = vector.broadcast %65 : vector<16x1xf32> to vector<16x128xf32>
      %479 = arith.cmpf ole, %477, %478 : vector<16x128xf32>
      %cst_162 = arith.constant 1.000000e+00 : f32
      %cst_163 = arith.constant 0.000000e+00 : f32
      %480 = vector.broadcast %cst_162 : f32 to vector<16x128xf32>
      %481 = vector.broadcast %cst_163 : f32 to vector<16x128xf32>
      %482 = arith.select %479, %480, %481 : vector<16x128xi1>, vector<16x128xf32>
      %483 = arith.truncf %476 : vector<16x128xf32> to vector<16x128xbf16>
      %484 = arith.truncf %482 : vector<16x128xf32> to vector<16x128xbf16>
      %cst_164 = arith.constant dense<0.000000e+00> : vector<16x16xf32>
      %485 = tpu.matmul %483, %484, %cst_164 {dimension_numbers = #tpu.dot_dimension_numbers<[1], [1], [0], [0], [0, 0, 1, 0], [], []>} : vector<16x128xbf16>, vector<16x128xbf16>, vector<16x16xf32> -> vector<16x16xf32>
      %486 = arith.addf %461, %485 : vector<16x16xf32>
      %487 = vector.broadcast %470 : vector<1x128xf32> to vector<16x128xf32>
      %488 = vector.broadcast %65 : vector<16x1xf32> to vector<16x128xf32>
      %489 = arith.cmpf oeq, %487, %488 : vector<16x128xf32>
      %cst_165 = arith.constant 1.000000e+00 : f32
      %cst_166 = arith.constant 0.000000e+00 : f32
      %490 = vector.broadcast %cst_165 : f32 to vector<16x128xf32>
      %491 = vector.broadcast %cst_166 : f32 to vector<16x128xf32>
      %492 = arith.select %489, %490, %491 : vector<16x128xi1>, vector<16x128xf32>
      %493 = arith.truncf %476 : vector<16x128xf32> to vector<16x128xbf16>
      %494 = arith.truncf %492 : vector<16x128xf32> to vector<16x128xbf16>
      %cst_167 = arith.constant dense<0.000000e+00> : vector<16x16xf32>
      %495 = tpu.matmul %493, %494, %cst_167 {dimension_numbers = #tpu.dot_dimension_numbers<[1], [1], [0], [0], [0, 0, 1, 0], [], []>} : vector<16x128xbf16>, vector<16x128xbf16>, vector<16x16xf32> -> vector<16x16xf32>
      %496 = arith.addf %462, %495 : vector<16x16xf32>
      %497 = vector.broadcast %467 : vector<1x128xf32> to vector<16x128xf32>
      %498 = vector.broadcast %65 : vector<16x1xf32> to vector<16x128xf32>
      %499 = arith.cmpf olt, %497, %498 : vector<16x128xf32>
      %cst_168 = arith.constant 1.000000e+00 : f32
      %cst_169 = arith.constant 0.000000e+00 : f32
      %500 = vector.broadcast %cst_168 : f32 to vector<16x128xf32>
      %501 = vector.broadcast %cst_169 : f32 to vector<16x128xf32>
      %502 = arith.select %499, %500, %501 : vector<16x128xi1>, vector<16x128xf32>
      %cst_170 = arith.constant dense<0.000000e+00> : vector<16xf32>
      %503 = vector.multi_reduction <add>, %502, %cst_170 [1] : vector<16x128xf32> to vector<16xf32>
      %504 = vector.shape_cast %503 : vector<16xf32> to vector<16x1xf32>
      %505 = arith.addf %463, %504 : vector<16x1xf32>
      %506 = vector.extract_strided_slice %63 {offsets = [5, 0], sizes = [1, 128], strides = [1, 1]} : vector<6x128xf32> to vector<1x128xf32>
      %cst_171 = arith.constant 6.250000e-02 : f32
      %507 = vector.broadcast %cst_171 : f32 to vector<1x128xf32>
      %508 = arith.mulf %506, %507 : vector<1x128xf32>
      %509 = math.floor %508 : vector<1x128xf32>
      %cst_172 = arith.constant 1.600000e+01 : f32
      %510 = vector.broadcast %cst_172 : f32 to vector<1x128xf32>
      %511 = arith.mulf %510, %509 : vector<1x128xf32>
      %512 = arith.subf %506, %511 : vector<1x128xf32>
      %513 = vector.broadcast %509 : vector<1x128xf32> to vector<16x128xf32>
      %514 = vector.broadcast %65 : vector<16x1xf32> to vector<16x128xf32>
      %515 = arith.cmpf oeq, %513, %514 : vector<16x128xf32>
      %cst_173 = arith.constant 1.000000e+00 : f32
      %cst_174 = arith.constant 0.000000e+00 : f32
      %516 = vector.broadcast %cst_173 : f32 to vector<16x128xf32>
      %517 = vector.broadcast %cst_174 : f32 to vector<16x128xf32>
      %518 = arith.select %515, %516, %517 : vector<16x128xi1>, vector<16x128xf32>
      %519 = vector.broadcast %512 : vector<1x128xf32> to vector<16x128xf32>
      %520 = vector.broadcast %65 : vector<16x1xf32> to vector<16x128xf32>
      %521 = arith.cmpf ole, %519, %520 : vector<16x128xf32>
      %cst_175 = arith.constant 1.000000e+00 : f32
      %cst_176 = arith.constant 0.000000e+00 : f32
      %522 = vector.broadcast %cst_175 : f32 to vector<16x128xf32>
      %523 = vector.broadcast %cst_176 : f32 to vector<16x128xf32>
      %524 = arith.select %521, %522, %523 : vector<16x128xi1>, vector<16x128xf32>
      %525 = arith.truncf %518 : vector<16x128xf32> to vector<16x128xbf16>
      %526 = arith.truncf %524 : vector<16x128xf32> to vector<16x128xbf16>
      %cst_177 = arith.constant dense<0.000000e+00> : vector<16x16xf32>
      %527 = tpu.matmul %525, %526, %cst_177 {dimension_numbers = #tpu.dot_dimension_numbers<[1], [1], [0], [0], [0, 0, 1, 0], [], []>} : vector<16x128xbf16>, vector<16x128xbf16>, vector<16x16xf32> -> vector<16x16xf32>
      %528 = arith.addf %486, %527 : vector<16x16xf32>
      %529 = vector.broadcast %512 : vector<1x128xf32> to vector<16x128xf32>
      %530 = vector.broadcast %65 : vector<16x1xf32> to vector<16x128xf32>
      %531 = arith.cmpf oeq, %529, %530 : vector<16x128xf32>
      %cst_178 = arith.constant 1.000000e+00 : f32
      %cst_179 = arith.constant 0.000000e+00 : f32
      %532 = vector.broadcast %cst_178 : f32 to vector<16x128xf32>
      %533 = vector.broadcast %cst_179 : f32 to vector<16x128xf32>
      %534 = arith.select %531, %532, %533 : vector<16x128xi1>, vector<16x128xf32>
      %535 = arith.truncf %518 : vector<16x128xf32> to vector<16x128xbf16>
      %536 = arith.truncf %534 : vector<16x128xf32> to vector<16x128xbf16>
      %cst_180 = arith.constant dense<0.000000e+00> : vector<16x16xf32>
      %537 = tpu.matmul %535, %536, %cst_180 {dimension_numbers = #tpu.dot_dimension_numbers<[1], [1], [0], [0], [0, 0, 1, 0], [], []>} : vector<16x128xbf16>, vector<16x128xbf16>, vector<16x16xf32> -> vector<16x16xf32>
      %538 = arith.addf %496, %537 : vector<16x16xf32>
      %539 = vector.broadcast %509 : vector<1x128xf32> to vector<16x128xf32>
      %540 = vector.broadcast %65 : vector<16x1xf32> to vector<16x128xf32>
      %541 = arith.cmpf olt, %539, %540 : vector<16x128xf32>
      %cst_181 = arith.constant 1.000000e+00 : f32
      %cst_182 = arith.constant 0.000000e+00 : f32
      %542 = vector.broadcast %cst_181 : f32 to vector<16x128xf32>
      %543 = vector.broadcast %cst_182 : f32 to vector<16x128xf32>
      %544 = arith.select %541, %542, %543 : vector<16x128xi1>, vector<16x128xf32>
      %cst_183 = arith.constant dense<0.000000e+00> : vector<16xf32>
      %545 = vector.multi_reduction <add>, %544, %cst_183 [1] : vector<16x128xf32> to vector<16xf32>
      %546 = vector.shape_cast %545 : vector<16xf32> to vector<16x1xf32>
      %547 = arith.addf %505, %546 : vector<16x1xf32>
      %548 = vector.broadcast %547 : vector<16x1xf32> to vector<16x16xf32>
      %549 = arith.addf %528, %548 : vector<16x16xf32>
      %550 = arith.subf %549, %538 : vector<16x16xf32>
      %cst_184 = arith.constant 2.555000e+02 : f32
      %551 = vector.broadcast %cst_184 : f32 to vector<16x16xf32>
      %552 = arith.cmpf oge, %549, %551 : vector<16x16xf32>
      %cst_185 = arith.constant 5.000000e-01 : f32
      %553 = vector.broadcast %cst_185 : f32 to vector<16x16xf32>
      %554 = arith.cmpf ogt, %538, %553 : vector<16x16xf32>
      %555 = arith.andi %552, %554 : vector<16x16xi1>
      %cst_186 = arith.constant 0.000000e+00 : f32
      %556 = vector.broadcast %cst_186 : f32 to vector<16x16xf32>
      %557 = arith.select %555, %538, %556 : vector<16x16xi1>, vector<16x16xf32>
      %558 = vector.shape_cast %557 : vector<16x16xf32> to vector<1x16x16xf32>
      %cst_187 = arith.constant dense<0.000000e+00> : vector<1xf32>
      %559 = vector.multi_reduction <add>, %558, %cst_187 [1, 2] : vector<1x16x16xf32> to vector<1xf32>
      %560 = vector.shape_cast %559 : vector<1xf32> to vector<1x1x1xf32>
      %561 = vector.extract %560[0, 0, 0] : f32 from vector<1x1x1xf32>
      %562 = vector.broadcast %561 : f32 to vector<1x1xf32>
      %cst_188 = arith.constant 2.560000e+02 : f32
      %563 = vector.broadcast %cst_188 : f32 to vector<1x1xf32>
      %564 = arith.subf %563, %562 : vector<1x1xf32>
      %cst_189 = arith.constant 0.00392156886 : f32
      %565 = vector.broadcast %cst_189 : f32 to vector<1x1xf32>
      %566 = arith.mulf %564, %565 : vector<1x1xf32>
      %567 = math.floor %566 : vector<1x1xf32>
      %cst_190 = arith.constant 1.000000e+00 : f32
      %568 = vector.broadcast %cst_190 : f32 to vector<1x1xf32>
      %569 = arith.maximumf %567, %568 : vector<1x1xf32>
      %cst_191 = arith.constant 5.000000e-01 : f32
      %570 = vector.broadcast %cst_191 : f32 to vector<1x1xf32>
      %571 = arith.mulf %567, %570 : vector<1x1xf32>
      %572 = math.floor %571 : vector<1x1xf32>
      %573 = vector.broadcast %572 : vector<1x1xf32> to vector<16x16xf32>
      %574 = arith.addf %550, %573 : vector<16x16xf32>
      %575 = vector.broadcast %569 : vector<1x1xf32> to vector<16x16xf32>
      %576 = arith.divf %574, %575 : vector<16x16xf32>
      %577 = math.floor %576 : vector<16x16xf32>
      %578 = vector.broadcast %569 : vector<1x1xf32> to vector<16x16xf32>
      %579 = arith.mulf %577, %578 : vector<16x16xf32>
      %580 = arith.subf %574, %579 : vector<16x16xf32>
      %cst_192 = arith.constant 0.000000e+00 : f32
      %581 = vector.broadcast %cst_192 : f32 to vector<16x16xf32>
      %582 = arith.cmpf olt, %580, %581 : vector<16x16xf32>
      %cst_193 = arith.constant 1.000000e+00 : f32
      %583 = vector.broadcast %cst_193 : f32 to vector<16x16xf32>
      %584 = arith.subf %577, %583 : vector<16x16xf32>
      %585 = arith.select %582, %584, %577 : vector<16x16xi1>, vector<16x16xf32>
      %586 = vector.broadcast %569 : vector<1x1xf32> to vector<16x16xf32>
      %587 = arith.cmpf oge, %580, %586 : vector<16x16xf32>
      %cst_194 = arith.constant 1.000000e+00 : f32
      %588 = vector.broadcast %cst_194 : f32 to vector<16x16xf32>
      %589 = arith.addf %585, %588 : vector<16x16xf32>
      %590 = arith.select %587, %589, %585 : vector<16x16xi1>, vector<16x16xf32>
      %cst_195 = arith.constant 0.000000e+00 : f32
      %cst_196 = arith.constant 2.550000e+02 : f32
      %591 = vector.broadcast %cst_195 : f32 to vector<16x16xf32>
      %592 = arith.maximumf %591, %590 : vector<16x16xf32>
      %593 = vector.broadcast %cst_196 : f32 to vector<16x16xf32>
      %594 = arith.minimumf %593, %592 : vector<16x16xf32>
      %cst_197 = arith.constant 0.000000e+00 : f32
      %595 = vector.broadcast %cst_197 : f32 to vector<16x16xf32>
      %596 = arith.select %72, %595, %594 : vector<16x16xi1>, vector<16x16xf32>
      %597 = arith.truncf %596 : vector<16x16xf32> to vector<16x16xbf16>
      %cst_198 = arith.constant 5.000000e-01 : f32
      %598 = vector.broadcast %cst_198 : f32 to vector<1x1xf32>
      %599 = arith.cmpf oge, %567, %598 : vector<1x1xf32>
      %600 = vector.extract_strided_slice %63 {offsets = [4, 0], sizes = [1, 128], strides = [1, 1]} : vector<6x128xf32> to vector<1x128xf32>
      %cst_199 = arith.constant 6.250000e-02 : f32
      %601 = vector.broadcast %cst_199 : f32 to vector<1x128xf32>
      %602 = arith.mulf %600, %601 : vector<1x128xf32>
      %603 = math.floor %602 : vector<1x128xf32>
      %cst_200 = arith.constant 1.600000e+01 : f32
      %604 = vector.broadcast %cst_200 : f32 to vector<1x128xf32>
      %605 = arith.mulf %604, %603 : vector<1x128xf32>
      %606 = arith.subf %600, %605 : vector<1x128xf32>
      %607 = vector.broadcast %603 : vector<1x128xf32> to vector<16x128xf32>
      %608 = vector.broadcast %65 : vector<16x1xf32> to vector<16x128xf32>
      %609 = arith.cmpf oeq, %607, %608 : vector<16x128xf32>
      %cst_201 = arith.constant 1.000000e+00 : f32
      %cst_202 = arith.constant 0.000000e+00 : f32
      %610 = vector.broadcast %cst_201 : f32 to vector<16x128xf32>
      %611 = vector.broadcast %cst_202 : f32 to vector<16x128xf32>
      %612 = arith.select %609, %610, %611 : vector<16x128xi1>, vector<16x128xf32>
      %613 = vector.broadcast %606 : vector<1x128xf32> to vector<16x128xf32>
      %614 = vector.broadcast %65 : vector<16x1xf32> to vector<16x128xf32>
      %615 = arith.cmpf oeq, %613, %614 : vector<16x128xf32>
      %cst_203 = arith.constant 1.000000e+00 : f32
      %cst_204 = arith.constant 0.000000e+00 : f32
      %616 = vector.broadcast %cst_203 : f32 to vector<16x128xf32>
      %617 = vector.broadcast %cst_204 : f32 to vector<16x128xf32>
      %618 = arith.select %615, %616, %617 : vector<16x128xi1>, vector<16x128xf32>
      %619 = arith.truncf %618 : vector<16x128xf32> to vector<16x128xbf16>
      %cst_205 = arith.constant dense<0.000000e+00> : vector<16x128xf32>
      %620 = tpu.matmul %597, %619, %cst_205 {dimension_numbers = #tpu.dot_dimension_numbers<[1], [0], [0], [1], [0, 0, 1, 1], [], []>} : vector<16x16xbf16>, vector<16x128xbf16>, vector<16x128xf32> -> vector<16x128xf32>
      %621 = arith.mulf %612, %620 : vector<16x128xf32>
      %cst_206 = arith.constant dense<0.000000e+00> : vector<128xf32>
      %622 = vector.multi_reduction <add>, %621, %cst_206 [0] : vector<16x128xf32> to vector<128xf32>
      %623 = vector.shape_cast %622 : vector<128xf32> to vector<1x128xf32>
      %624 = vector.shape_cast %599 : vector<1x1xi1> to vector<1x1xi1>
      %625 = vector.broadcast %624 : vector<1x1xi1> to vector<1x128xi1>
      %626 = arith.select %625, %623, %600 : vector<1x128xi1>, vector<1x128xf32>
      %627 = vector.extract_strided_slice %63 {offsets = [5, 0], sizes = [1, 128], strides = [1, 1]} : vector<6x128xf32> to vector<1x128xf32>
      %cst_207 = arith.constant 6.250000e-02 : f32
      %628 = vector.broadcast %cst_207 : f32 to vector<1x128xf32>
      %629 = arith.mulf %627, %628 : vector<1x128xf32>
      %630 = math.floor %629 : vector<1x128xf32>
      %cst_208 = arith.constant 1.600000e+01 : f32
      %631 = vector.broadcast %cst_208 : f32 to vector<1x128xf32>
      %632 = arith.mulf %631, %630 : vector<1x128xf32>
      %633 = arith.subf %627, %632 : vector<1x128xf32>
      %634 = vector.broadcast %630 : vector<1x128xf32> to vector<16x128xf32>
      %635 = vector.broadcast %65 : vector<16x1xf32> to vector<16x128xf32>
      %636 = arith.cmpf oeq, %634, %635 : vector<16x128xf32>
      %cst_209 = arith.constant 1.000000e+00 : f32
      %cst_210 = arith.constant 0.000000e+00 : f32
      %637 = vector.broadcast %cst_209 : f32 to vector<16x128xf32>
      %638 = vector.broadcast %cst_210 : f32 to vector<16x128xf32>
      %639 = arith.select %636, %637, %638 : vector<16x128xi1>, vector<16x128xf32>
      %640 = vector.broadcast %633 : vector<1x128xf32> to vector<16x128xf32>
      %641 = vector.broadcast %65 : vector<16x1xf32> to vector<16x128xf32>
      %642 = arith.cmpf oeq, %640, %641 : vector<16x128xf32>
      %cst_211 = arith.constant 1.000000e+00 : f32
      %cst_212 = arith.constant 0.000000e+00 : f32
      %643 = vector.broadcast %cst_211 : f32 to vector<16x128xf32>
      %644 = vector.broadcast %cst_212 : f32 to vector<16x128xf32>
      %645 = arith.select %642, %643, %644 : vector<16x128xi1>, vector<16x128xf32>
      %646 = arith.truncf %645 : vector<16x128xf32> to vector<16x128xbf16>
      %cst_213 = arith.constant dense<0.000000e+00> : vector<16x128xf32>
      %647 = tpu.matmul %597, %646, %cst_213 {dimension_numbers = #tpu.dot_dimension_numbers<[1], [0], [0], [1], [0, 0, 1, 1], [], []>} : vector<16x16xbf16>, vector<16x128xbf16>, vector<16x128xf32> -> vector<16x128xf32>
      %648 = arith.mulf %639, %647 : vector<16x128xf32>
      %cst_214 = arith.constant dense<0.000000e+00> : vector<128xf32>
      %649 = vector.multi_reduction <add>, %648, %cst_214 [0] : vector<16x128xf32> to vector<128xf32>
      %650 = vector.shape_cast %649 : vector<128xf32> to vector<1x128xf32>
      %651 = vector.shape_cast %599 : vector<1x1xi1> to vector<1x1xi1>
      %652 = vector.broadcast %651 : vector<1x1xi1> to vector<1x128xi1>
      %653 = arith.select %652, %650, %627 : vector<1x128xi1>, vector<1x128xf32>
      %654 = tpu.concatenate %626, %653 in 0 : vector<1x128xf32>, vector<1x128xf32> -> vector<2x128xf32>
      %655 = tpu.concatenate %266, %460, %654 in 0 : vector<2x128xf32>, vector<2x128xf32>, vector<2x128xf32> -> vector<6x128xf32>
      %656 = arith.fptoui %655 : vector<6x128xf32> to vector<6x128xi8>
      %c0_215 = arith.constant 0 : index
      %c0_216 = arith.constant 0 : index
      %c0_217 = arith.constant 0 : index
      %657 = vector.load %arg4[%c0_215, %c0_216, %c0_217] : memref<1x6x128xi8, #tpu.memory_space<vmem>>, vector<1x6x128xi8>
      %658 = vector.shape_cast %657 : vector<1x6x128xi8> to vector<6x128xi8>
      %659 = vector.shape_cast %656 : vector<6x128xi8> to vector<1x6x128xi8>
      tpu.vector_store %arg4[%c0_215, %c0_216, %c0_217], %659 {strides = array<i32>} : memref<1x6x128xi8, #tpu.memory_space<vmem>>, vector<1x6x128xi8>,
    } else {
    }
    return
  }
  func.func @transform_0(%arg0: i32) -> (i32, i32) {
    %c0_i32 = arith.constant 0 : i32
    %c0_i32_0 = arith.constant 0 : i32
    %c0_i32_1 = arith.constant 0 : i32
    return %c0_i32, %c0_i32_0 : i32, i32
  }
  func.func @transform_1(%arg0: i32) -> (i32, i32) {
    %c0_i32 = arith.constant 0 : i32
    %c0_i32_0 = arith.constant 0 : i32
    %c0_i32_1 = arith.constant 0 : i32
    return %c0_i32, %c0_i32_0 : i32, i32
  }
  func.func @transform_2(%arg0: i32) -> (i32, i32, i32) {
    %c0_i32 = arith.constant 0 : i32
    %c0_i32_0 = arith.constant 0 : i32
    %c0_i32_1 = arith.constant 0 : i32
    return %arg0, %c0_i32, %c0_i32_0 : i32, i32, i32
  }
  func.func @transform_3(%arg0: i32) -> (i32, i32, i32) {
    %c0_i32 = arith.constant 0 : i32
    %c0_i32_0 = arith.constant 0 : i32
    %c0_i32_1 = arith.constant 0 : i32
    return %arg0, %c0_i32, %c0_i32_0 : i32, i32, i32
  }
}

</mosaic_0001>

<bundles_post_ra>
// kernel: run.1
= control target key start
LH: loop header
LB: loop body
LE: loop exit
PB: predicated region body
PF: predicated region fallthrough
CT: control target
= control target key end

     0   :  { %8 = vsyncpa [#allocation3], 0  ;;  %s5323_s0 = inlined_call_operand.vmem [shape: s32[1,2], index: 0, kind: input, shape index: {}]   ;;  %s5324_s1 = inlined_call_operand.vmem [shape: f32[1,2], index: 1, kind: input, shape index: {}]   ;;  %s5325_s2 = inlined_call_operand.vmem [shape: u8[1,6,128], index: 2, kind: input, shape index: {}]   ;;  %s5326_s3 = inlined_call_operand.vmem [shape: u8[1,6,128], index: 3, kind: output, shape index: {}]  }
   0x1   :  { %s16_s14 = sshll.u32 %s5323_s0, 4  ;;  %s17_s14 = int_to_ptr.vmem [resolvable:$true] %s16_s14 }
   0x2   :  { %9 = vsyncpa [#allocation5], 0  ;;  %s26_s17 = sshll.u32 %s5324_s1, 4  ;;  %s3937_s18 = scalar_lea.vmem %s17_s14, 16  ;;  %s27_s17 = int_to_ptr.vmem [resolvable:$true] %s26_s17 }
   0x3   :  { %p3938_p0 = scmp.ne.s32.totalorder %s17_s14, %s3937_s18  ;;  %p3942_p1 = scmp.lt.s32.totalorder %s17_s14, %s17_s14 }
   0x4   :  { %p3943_p2 = scmp.lt.s32.totalorder %s3937_s18, %s3937_s18 }
   0x6   :  { %p3944_p3 = por %p3943_p2, %p3942_p1 }
   0x8   :  { %p3945_p4 = pnand %p3944_p3, %p3938_p0 }
   0xa   :  { %3948 = shalt.err (!%p3945_p4)
}
   0xb   :  { %s3965_s19 = smov [#allocation2]   ;;  %s3949_s20 = scalar_lea.vmem %s27_s17, 16 }
   0xc   :  { %19 = dma.vmem_to_smem %s17_s14, 16, %s3965_s19, [#allocation3]  }
   0xd   :  { %p3950_p5 = scmp.ne.s32.totalorder %s27_s17, %s3949_s20  ;;  %p3954_p6 = scmp.lt.s32.totalorder %s27_s17, %s27_s17 }
   0xe   :  { %p3955_p7 = scmp.lt.s32.totalorder %s3949_s20, %s3949_s20 }
  0x10   :  { %p3956_p8 = por %p3955_p7, %p3954_p6 }
  0x12   :  { %p3957_p9 = pnand %p3956_p8, %p3950_p5 }
  0x14   :  { %3960 = shalt.err (!%p3957_p9)
}
  0x15   :  { %s3966_s0 = smov [#allocation4]  }
  0x16   :  { %29 = dma.vmem_to_smem %s27_s17, 16, %s3966_s0, [#allocation5]  }
  0x17   :  { %3961 = dma.done.wait [#allocation3], 16  }
  0x18   :  { %3962 = vsyncadd [#allocation3], 4294967280 }
  0x19   :  { %3963 = dma.done.wait [#allocation5], 16  }
  0x1a   :  { %3964 = vsyncadd [#allocation5], 4294967280 }
  0x1b   :  { %38 = sfence }
  0x1c   :  { %v40_v0 = vld [vmem:[%s5325_s2] sm:$0x3]  ;;  %vm5327_vm0 = vcmask 1041408   ;;  %vm42_vm1 = vsmask.f32 1280  ;;  %s4022_s24 = sld [smem:[#allocation2]] }
  0x1d   :  { %vm4015_vm2 = vmand %vm5327_vm0, %vm42_vm1  ;;  %v44_v2 = vld [vmem:[%s5326_s3] sm:$0x3]  ;;  %s4024_s25 = sld [smem:[#allocation4]] }
  0x1e   :  { %v45_v3 = vsel %vm4015_vm2, %v40_v0, %v44_v2 }
  0x1f   :  { %46 = vst [vmem:[%s5326_s3] sm:$0x3] %v45_v3 }
  0x22   :  { %p3357_p10 = scmp.ne.s32.totalorder %s4022_s24, 1 }
  0x23   :  { %s58_s29 = sadd.f32 (!%p3357_p10), 1.0, %s4024_s25 }
  0x24   :  { %53 = sbr.rel (%p3357_p10) target bundleno = 59 (0x3b), region = 25 }
  0x25   :  { %v59_v7 = vstv (!%p3357_p10), %s58_s29 }
  0x26   :  { %v54_v4 = vld [vmem:[%s5326_s3] sm:$0x3] (!%p3357_p10) }
  0x27   :  { %v55_v5 = vunpack.c.0.s8 (!%p3357_p10), %v54_v4 }
  0x29   :  { %v56_v6 = vand.u32 (!%p3357_p10), 255, %v55_v5 }
  0x2b   :  { %v57_v8 = vcvt.s32.f32 %v56_v6 }
  0x2d   :  { %v60_v9 = vmul.f32 %v59_v7, %v57_v8 }
  0x2f   :  { %v61_v10 = vmax.f32 %v60_v9, 0.0 }
  0x31   :  { %v62_v11 = vmin.f32 %v61_v10, 255.0 }
  0x33   :  { %v63_v12 = vtrunc.f32 %v62_v11 }
  0x35   :  { %v64_v13 = vpack.c.f32.eXmY %v63_v12, %v63_v12, 56 }
  0x37   :  { %v68_v14 = vpack.c.b8 %v64_v13, %v64_v13 }
  0x39   :  { %v70_v15 = vsel %vm4015_vm2, %v68_v14, %v54_v4 }
  0x3a   :  { %71 = vst [vmem:[%s5326_s3] sm:$0x3] %v70_v15 }
  0x3b PF:  { %p3358_p11 = scmp.ne.s32.totalorder %s4022_s24, 2 }
  0x3c   :  { %s80_s7 = sadd.f32 (!%p3358_p11), 1.0, %s4024_s25  ;;  %vm114_vm3 = vcmask (!%p3358_p11), 1043456  }
  0x3d   :  { %75 = sbr.rel (%p3358_p11) target bundleno = 102 (0x66), region = 29 }
  0x3e   :  { %s95_s8 = ssub.f32 (!%p3358_p11), 1.0, %s80_s7  ;;  %v93_v26 = vstv (!%p3358_p11), %s80_s7 }
  0x40   :  { %v96_v28 = vstv (!%p3358_p11), %s95_s8 }
  0x41   :  { %v76_v16 = vld [vmem:[%s5326_s3] sm:$0x3] (!%p3358_p11) }
  0x42   :  { %v77_v17 = vunpack.c.0.s8 (!%p3358_p11), %v76_v16 }
  0x44   :  { %v78_v18 = vand.u32 255, %v77_v17 }
  0x46   :  { %v79_v19 = vcvt.s32.f32 %v78_v18 }
  0x48   :  { %v81_v20 = vmul.f32 0.2989, %v79_v19  ;;  %v82_v21 = vmul.f32 0.587, %v79_v19  ;;  %v87_v22 = vmul.f32 0.114, %v79_v19  ;;  %v94_v30 = vmul.f32 %v93_v26, %v79_v19 }
  0x4a   :  { %v84_v23 = vrot.slane %v82_v21, 2  ;;  %v89_v24 = vrot.slane %v87_v22, 4 }
  0x4c   :  { %v86_v25 = vadd.f32 %v84_v23, %v81_v20 }
  0x4e   :  { %v91_v27 = vadd.f32 %v89_v24, %v86_v25 }
  0x50   :  { %v92_v29 = vfloor.f32 %v91_v27 }
  0x52   :  { %v97_v31 = vmul.f32 %v96_v28, %v92_v29 }
  0x54   :  { %v98_v32 = vadd.f32 %v97_v31, %v94_v30  ;;  %v102_v33 = vrot.slane %v97_v31, 6  ;;  %v107_v34 = vrot.slane %v97_v31, 4 }
  0x56   :  { %v99_v35 = vmax.f32 %v98_v32, 0.0  ;;  %v104_v36 = vadd.f32 %v102_v33, %v94_v30  ;;  %v109_v37 = vadd.f32 %v107_v34, %v94_v30 }
  0x58   :  { %v100_v38 = vmin.f32 %v99_v35, 255.0  ;;  %v105_v39 = vmax.f32 %v104_v36, 0.0  ;;  %v110_v40 = vmax.f32 %v109_v37, 0.0 }
  0x5a   :  { %v106_v41 = vmin.f32 %v105_v39, 255.0  ;;  %v111_v42 = vmin.f32 %v110_v40, 255.0 }
  0x5c   :  { %v113_v43 = vsel %vm5327_vm0, %v100_v38, %v106_v41 }
  0x5d   :  { %v115_v44 = vsel %vm114_vm3, %v113_v43, %v111_v42 }
  0x5e   :  { %v116_v45 = vtrunc.f32 %v115_v44 }
  0x60   :  { %v117_v46 = vpack.c.f32.eXmY %v116_v45, %v116_v45, 56 }
  0x62   :  { %v121_v47 = vpack.c.b8 %v117_v46, %v117_v46 }
  0x64   :  { %v123_v48 = vsel %vm4015_vm2, %v121_v47, %v76_v16 }
  0x65   :  { %124 = vst [vmem:[%s5326_s3] sm:$0x3] %v123_v48 }
  0x66 PF:  { %p3359_p12 = scmp.ne.s32.totalorder %s4022_s24, 3 }
  0x67   :  { %s133_s13 = sadd.f32 (!%p3359_p12), 1.0, %s4024_s25 }
  0x68   :  { %128 = sbr.rel (%p3359_p12) target bundleno = 349 (0x15d), region = 33 }
  0x69   :  { %s162_s14 = ssub.f32 (!%p3359_p12), 1.0, %s133_s13  ;;  %v160_v6 = vstv (!%p3359_p12), %s133_s13 }
  0x6b   :  { %v163_v8 = vstv (!%p3359_p12), %s162_s14 }
  0x6c   :  { %v129_v49 = vld [vmem:[%s5326_s3] sm:$0x3] (!%p3359_p12) }
  0x6d   :  { %v130_v50 = vunpack.c.0.s8 (!%p3359_p12), %v129_v49 }
  0x6f   :  { %v131_v51 = vand.u32 255, %v130_v50 }
  0x71   :  { %v132_v52 = vcvt.s32.f32 %v131_v51 }
  0x73   :  { %v134_v53 = vmul.f32 0.2989, %v132_v52  ;;  %v135_v54 = vmul.f32 0.587, %v132_v52  ;;  %v140_v55 = vmul.f32 0.114, %v132_v52  ;;  %v161_v10 = vmul.f32 %v160_v6, %v132_v52 }
  0x75   :  { %v137_v56 = vrot.slane %v135_v54, 2  ;;  %v142_v57 = vrot.slane %v140_v55, 4 }
  0x77   :  { %v139_v58 = vadd.f32 %v137_v56, %v134_v53 }
  0x79   :  { %v144_v59 = vadd.f32 %v142_v57, %v139_v58 }
  0x7b   :  { %v145_v60 = vfloor.f32 %v144_v59 }
  0x7d   :  { %v147_v61 = vsel %vm5327_vm0, %v145_v60, 0.0 }
  0x7e   :  { %148 = vadd.xlane.f32.xlu0 %v147_v61 }
 0x10b   :  { %v149_v62 = vpop.xlane.xlu0 %148 }
 0x10c   :  { %v150_v63 = vrot.slane %v149_v62, 4 }
 0x10e   :  { %v151_v0 = vadd.f32 %v150_v63, %v149_v62 }
 0x110   :  { %v152_v2 = vrot.slane %v151_v0, 2 }
 0x112   :  { %v153_v3 = vadd.f32 %v152_v2, %v151_v0 }
 0x114   :  { %v154_v4 = vrot.slane %v153_v3, 1 }
 0x116   :  { %v155_v5 = vadd.f32 %v154_v4, %v153_v3 }
 0x118   :  { %3831 = vpush %v155_v5 }
 0x149   :  { %s3832_s15 = spop %3831 }
 0x14a   :  { %v157_v7 = vstv %s3832_s15 }
 0x14b   :  { %v159_v9 = vmul.f32 0.00390625, %v157_v7 }
 0x14d   :  { %v164_v11 = vmul.f32 %v163_v8, %v159_v9 }
 0x14f   :  { %v165_v12 = vadd.f32 %v164_v11, %v161_v10 }
 0x151   :  { %v166_v13 = vmax.f32 %v165_v12, 0.0 }
 0x153   :  { %v167_v14 = vmin.f32 %v166_v13, 255.0 }
 0x155   :  { %v168_v15 = vtrunc.f32 %v167_v14 }
 0x157   :  { %v169_v16 = vpack.c.f32.eXmY %v168_v15, %v168_v15, 56 }
 0x159   :  { %v173_v17 = vpack.c.b8 %v169_v16, %v169_v16 }
 0x15b   :  { %v175_v18 = vsel %vm4015_vm2, %v173_v17, %v129_v49 }
 0x15c   :  { %176 = vst [vmem:[%s5326_s3] sm:$0x3] %v175_v18 }
 0x15d PF:  { %p3360_p13 = scmp.ne.s32.totalorder %s4022_s24, 4 }
 0x15e   :  { %v186_v20 = vlaneseq (!%p3360_p13)  ;;  %s3967_s20 = smov (!%p3360_p13), 1   ;;  %s3968_s0 = smov (!%p3360_p13), 127   ;;  %vm233_vm15 = vcmask (!%p3360_p13), 1040384   ;;  %vm239_vm1 = vcmask (!%p3360_p13), 1044480   ;;  %v3971_v55 = vmov (!%p3360_p13), 1.0  }
 0x15f   :  { %180 = sbr.rel (%p3360_p13) target bundleno = 632 (0x278), region = 37  ;;  %s3969_s1 = smov (!%p3360_p13), 16  }
 0x160   :  { %v187_v22 = vand.u32 (!%p3360_p13), 127, %v186_v20  ;;  %v190_v23 = vshrl.u32 (!%p3360_p13), %v186_v20, 7  ;;  %s3970_s21 = smov (!%p3360_p13), 112   ;;  %s185_s22 = sadd.f32 (!%p3360_p13), 1.0, %s4024_s25 }
 0x162   :  { %v188_v25 = vcvt.s32.f32 (!%p3360_p13), %v187_v22  ;;  %v191_v26 = vcvt.s32.f32 (!%p3360_p13), %v190_v23  ;;  %s252_s23 = ssub.f32 (!%p3360_p13), 1.0, %s185_s22 }
 0x163   :  { %v4067_v19 = vld [vmem:[%s5326_s3] sm:$0x3] (!%p3360_p13) }
 0x164   :  { %v182_v21 = vunpack.c.0.s8 (!%p3360_p13), %v4067_v19  ;;  %v196_v28 = vmul.f32 (!%p3360_p13), 0.5, %v191_v26  ;;  %v192_v29 = vmul.f32 (!%p3360_p13), 0.0625, %v188_v25  ;;  %vm214_vm4 = vcmp.ge.f32.partialorder (!%p3360_p13), %v188_v25, 112.0 }
 0x165   :  { %vm204_vm11 = vcmp.lt.f32.partialorder (!%p3360_p13), %v188_v25, 16.0  ;;  %v253_v57 = vstv (!%p3360_p13), %s252_s23 }
 0x166   :  { %v183_v24 = vand.u32 255, %v182_v21  ;;  %v197_v30 = vfloor.f32 %v196_v28  ;;  %v193_v31 = vfloor.f32 %v192_v29 }
 0x168   :  { %v184_v27 = vcvt.s32.f32 %v183_v24  ;;  %v198_v32 = vmul.f32 2.0, %v197_v30  ;;  %v194_v33 = vmul.f32 16.0, %v193_v31 }
 0x16a   :  { %222 = vrot.lane.b32.xlu0 %v184_v27, %s3967_s20  ;;  %v199_v34 = vsub.f32 %v191_v26, %v198_v32  ;;  %v195_v35 = vsub.f32 %v188_v25, %v194_v33  ;;  %v249_v51 = vmul.f32 4.0, %v184_v27 }
 0x16c   :  { %vm213_vm5 = vcmp.eq.f32.partialorder %v199_v34, 1.0  ;;  %vm200_vm6 = vcmp.eq.f32.partialorder %v195_v35, 0.0  ;;  %vm201_vm7 = vcmp.eq.f32.partialorder %v195_v35, 15.0  ;;  %vm203_vm8 = vcmp.eq.f32.partialorder %v199_v34, 0.0 }
 0x16d   :  { %vm219_vm9 = vmand %vm213_vm5, %vm214_vm4 }
 0x16e   :  { %225 = vrot.lane.b32.xlu0 %v184_v27, %s3968_s0  ;;  %vm202_vm10 = vmor %vm200_vm6, %vm201_vm7 }
 0x16f   :  { %vm209_vm12 = vmand %vm203_vm8, %vm204_vm11 }
 0x170   :  { %vm212_vm13 = vmor %vm202_vm10, %vm209_vm12 }
 0x171   :  { %vm4072_vm14 = vmor %vm212_vm13, %vm219_vm9 }
 0x172   :  { %v221_v56 = vsel %vm4072_vm14, 0.0, %v3971_v55 }
 0x173   :  { %v254_v59 = vmul.f32 %v253_v57, %v221_v56 }
 0x1dc   :  { %v223_v37 = vpop.permute.xlu0 %222 }
 0x1dd   :  { %v224_v38 = vadd.f32 %v223_v37, %v184_v27 }
 0x1e0   :  { %v226_v39 = vpop.permute.xlu0 %225 }
 0x1e1   :  { %v227_v40 = vadd.f32 %v226_v39, %v224_v38 }
 0x1e3   :  { %v229_v41 = vrot.slane %v227_v40, 5  ;;  %v231_v42 = vrot.slane %v227_v40, 7  ;;  %v235_v43 = vrot.slane %v227_v40, 1  ;;  %v237_v44 = vrot.slane %v227_v40, 3 }
 0x1e5   :  { %v234_v45 = vsel %vm233_vm15, %v229_v41, %v231_v42  ;;  %v240_v47 = vsel %vm239_vm1, %v235_v43, %v237_v44 }
 0x1e6   :  { %v241_v46 = vsel %vm214_vm4, %v234_v45, %v227_v40  ;;  %v242_v48 = vsel %vm204_vm11, %v240_v47, %v227_v40 }
 0x1e7   :  { %243 = vrot.lane.b32.xlu1 %v241_v46, %s3969_s1 }
 0x1eb   :  { %245 = vrot.lane.b32.xlu1 %v242_v48, %s3970_s21 }
 0x259   :  { %v244_v49 = vpop.permute.xlu1 %243 }
 0x25a   :  { %v247_v50 = vadd.f32 %v244_v49, %v227_v40 }
 0x25d   :  { %v246_v52 = vpop.permute.xlu1 %245 }
 0x25e   :  { %v248_v53 = vadd.f32 %v247_v50, %v246_v52 }
 0x260   :  { %v250_v54 = vadd.f32 %v249_v51, %v248_v53 }
 0x262   :  { %v251_v58 = vmul.f32 0.07692308, %v250_v54 }
 0x264   :  { %v3833_v60 = vround.rtne.f32 %v251_v58 }
 0x266   :  { %v256_v61 = vsub.f32 %v3833_v60, %v184_v27 }
 0x268   :  { %v257_v62 = vmul.f32 %v256_v61, %v254_v59 }
 0x26a   :  { %v258_v63 = vadd.f32 %v257_v62, %v184_v27 }
 0x26c   :  { %v259_v0 = vmax.f32 %v258_v63, 0.0 }
 0x26e   :  { %v260_v2 = vmin.f32 %v259_v0, 255.0 }
 0x270   :  { %v261_v3 = vtrunc.f32 %v260_v2 }
 0x272   :  { %v262_v4 = vpack.c.f32.eXmY %v261_v3, %v261_v3, 56 }
 0x274   :  { %v266_v5 = vpack.c.b8 %v262_v4, %v262_v4 }
 0x276   :  { %v268_v6 = vsel %vm4015_vm2, %v266_v5, %v4067_v19 }
 0x277   :  { %269 = vst [vmem:[%s5326_s3] sm:$0x3] %v268_v6 }
 0x278 PF:  { %p3361_p0 = scmp.ne.s32.totalorder %s4022_s24, 5 }
 0x279   :  { %p3834_p1 = scmp.lt.s32.totalorder (!%p3361_p0), %s4024_s25, 0  ;;  %s3835_s27 = sceil.f32 (!%p3361_p0), %s4024_s25 }
 0x27a   :  { %273 = sbr.rel (%p3361_p0) target bundleno = 725 (0x2d5), region = 41  ;;  %s3836_s28 = sfloor.f32 (!%p3361_p0), %s4024_s25 }
 0x27b   :  { %s3972_s4 = smov (!%p3361_p0), 1  }
 0x27e   :  { %v274_v9 = vld [vmem:[%s5326_s3] sm:$0x3] (!%p3361_p0) }
 0x27f   :  { %v275_v10 = vunpack.c.0.s8 (!%p3361_p0), %v274_v9 }
 0x281   :  { %s5418_s27 = smov (!%p3834_p1, %s3835_s27), %s3836_s28  ;;  %v276_v11 = vand.u32 255, %v275_v10 }
 0x282   :  { %s3838_s29 = scvt.f32.s32 %s5418_s27 }
 0x283   :  { %v277_v12 = vcvt.s32.f32 %v276_v11 }
 0x284   :  { %s279_s30 = ssub.s32 8, %s3838_s29 }
 0x285   :  { %s280_s5 = sshll.u32 %s3972_s4, %s279_s30 }
 0x286   :  { %s281_s6 = scvt.s32.f32 %s280_s5 }
 0x288   :  { %v282_v7 = vstv %s281_s6 }
 0x289   :  { %3907 = vrcp.f32 %v282_v7 }
 0x293   :  { %v3908_v8 = vpop.eup %3907 }
 0x294   :  { %3839 = vpush %v3908_v8 }
 0x2c5   :  { %s3840_s9 = spop %3839 }
 0x2c6   :  { %v285_v13 = vstv %s3840_s9 }
 0x2c7   :  { %v286_v14 = vmul.f32 %v285_v13, %v277_v12 }
 0x2c9   :  { %v287_v15 = vfloor.f32 %v286_v14 }
 0x2cb   :  { %v289_v16 = vmul.f32 %v287_v15, %v282_v7 }
 0x2cd   :  { %v290_v17 = vtrunc.f32 %v289_v16 }
 0x2cf   :  { %v291_v18 = vpack.c.f32.eXmY %v290_v17, %v290_v17, 56 }
 0x2d1   :  { %v295_v19 = vpack.c.b8 %v291_v18, %v291_v18 }
 0x2d3   :  { %v297_v20 = vsel %vm4015_vm2, %v295_v19, %v274_v9 }
 0x2d4   :  { %298 = vst [vmem:[%s5326_s3] sm:$0x3] %v297_v20 }
 0x2d5 PF:  { %p3362_p2 = scmp.ne.s32.totalorder %s4022_s24, 6 }
 0x2d6   :  { %v307_v24 = vstv (!%p3362_p2), %s4024_s25 }
 0x2d7   :  { %302 = sbr.rel (%p3362_p2) target bundleno = 749 (0x2ed), region = 45 }
 0x2db   :  { %v303_v21 = vld [vmem:[%s5326_s3] sm:$0x3] (!%p3362_p2) }
 0x2dc   :  { %v304_v22 = vunpack.c.0.s8 (!%p3362_p2), %v303_v21 }
 0x2de   :  { %v305_v23 = vand.u32 255, %v304_v22 }
 0x2e0   :  { %v306_v25 = vcvt.s32.f32 %v305_v23 }
 0x2e2   :  { %vm308_vm3 = vcmp.ge.f32.partialorder %v306_v25, %v307_v24  ;;  %v309_v26 = vsub.f32 255.0, %v306_v25 }
 0x2e4   :  { %v310_v27 = vsel %vm308_vm3, %v309_v26, %v306_v25 }
 0x2e5   :  { %v311_v28 = vtrunc.f32 %v310_v27 }
 0x2e7   :  { %v312_v29 = vpack.c.f32.eXmY %v311_v28, %v311_v28, 56 }
 0x2e9   :  { %v316_v30 = vpack.c.b8 %v312_v29, %v312_v29 }
 0x2eb   :  { %v318_v31 = vsel %vm4015_vm2, %v316_v30, %v303_v21 }
 0x2ec   :  { %319 = vst [vmem:[%s5326_s3] sm:$0x3] %v318_v31 }
 0x2ed PF:  { %p3363_p3 = scmp.ne.s32.totalorder %s4022_s24, 7 }
 0x2ee   :  { %vm362_vm4 = vcmask (!%p3363_p3), 1043458   ;;  %vm396_vm5 = vcmask (!%p3363_p3), 1045508   ;;  %vm431_vm9 = vcmask (!%p3363_p3), 1043456  }
 0x2ef   :  { %323 = sbr.rel (%p3363_p3) target bundleno = 1009 (0x3f1), region = 49 }
 0x2f3   :  { %v4113_v32 = vld [vmem:[%s5326_s3] sm:$0x3] (!%p3363_p3) }
 0x2f4   :  { %v325_v33 = vunpack.c.0.s8 (!%p3363_p3), %v4113_v32 }
 0x2f6   :  { %v326_v34 = vand.u32 255, %v325_v33 }
 0x2f8   :  { %v4116_v35 = vcvt.s32.f32 %v326_v34 }
 0x2fa   :  { %v363_v36 = vsel %vm362_vm4, %v4116_v35, inf  ;;  %v329_v37 = vsel %vm5327_vm0, %v4116_v35, inf  ;;  %v374_v38 = vsel %vm362_vm4, %v4116_v35, -inf  ;;  %v340_v39 = vsel %vm5327_vm0, %v4116_v35, -inf }
 0x2fb   :  { %364 = vmin.xlane.f32.xlu1 %v363_v36  ;;  %330 = vmin.xlane.f32.xlu0 %v329_v37  ;;  %v408_v40 = vsel %vm396_vm5, %v4116_v35, -inf  ;;  %v397_v41 = vsel %vm396_vm5, %v4116_v35, inf }
 0x2ff   :  { %375 = vmax.xlane.f32.xlu1 %v374_v38  ;;  %341 = vmax.xlane.f32.xlu0 %v340_v39 }
 0x303   :  { %409 = vmax.xlane.f32.xlu1 %v408_v40  ;;  %398 = vmin.xlane.f32.xlu0 %v397_v41 }
 0x388   :  { %v365_v42 = vpop.xlane.xlu1 %364  ;;  %v331_v43 = vpop.xlane.xlu0 %330 }
 0x389   :  { %v366_v44 = vrot.slane %v365_v42, 4  ;;  %v332_v45 = vrot.slane %v331_v43, 4 }
 0x38b   :  { %v367_v46 = vmin.f32 %v365_v42, %v366_v44  ;;  %v333_v47 = vmin.f32 %v331_v43, %v332_v45 }
 0x38c   :  { %v376_v48 = vpop.xlane.xlu1 %375  ;;  %v342_v49 = vpop.xlane.xlu0 %341 }
 0x38d   :  { %v368_v50 = vrot.slane %v367_v46, 2  ;;  %v334_v51 = vrot.slane %v333_v47, 2  ;;  %v377_v52 = vrot.slane %v376_v48, 4  ;;  %v343_v53 = vrot.slane %v342_v49, 4 }
 0x38f   :  { %v378_v54 = vmax.f32 %v376_v48, %v377_v52  ;;  %v344_v55 = vmax.f32 %v342_v49, %v343_v53  ;;  %v335_v56 = vmin.f32 %v333_v47, %v334_v51  ;;  %v369_v59 = vmin.f32 %v367_v46, %v368_v50 }
 0x390   :  { %v410_v57 = vpop.xlane.xlu1 %409  ;;  %v399_v58 = vpop.xlane.xlu0 %398 }
 0x391   :  { %v379_v60 = vrot.slane %v378_v54, 2  ;;  %v345_v61 = vrot.slane %v344_v55, 2  ;;  %v411_v62 = vrot.slane %v410_v57, 4  ;;  %v400_v63 = vrot.slane %v399_v58, 4 }
 0x392   :  { %v336_v0 = vrot.slane %v335_v56, 1  ;;  %v370_v7 = vrot.slane %v369_v59, 1 }
 0x393   :  { %v412_v2 = vmax.f32 %v410_v57, %v411_v62  ;;  %v401_v3 = vmin.f32 %v399_v58, %v400_v63  ;;  %v346_v4 = vmax.f32 %v344_v55, %v345_v61  ;;  %v380_v5 = vmax.f32 %v378_v54, %v379_v60 }
 0x394   :  { %v337_v6 = vmin.f32 %v335_v56, %v336_v0  ;;  %v371_v16 = vmin.f32 %v369_v59, %v370_v7 }
 0x395   :  { %v413_v8 = vrot.slane %v412_v2, 2  ;;  %v402_v9 = vrot.slane %v401_v3, 2  ;;  %v347_v10 = vrot.slane %v346_v4, 1  ;;  %v381_v11 = vrot.slane %v380_v5, 1 }
 0x396   :  { %3841 = vpush %v337_v6 }
 0x397   :  { %v414_v12 = vmax.f32 %v412_v2, %v413_v8  ;;  %v403_v13 = vmin.f32 %v401_v3, %v402_v9  ;;  %v348_v14 = vmax.f32 %v346_v4, %v347_v10  ;;  %v382_v15 = vmax.f32 %v380_v5, %v381_v11 }
 0x399   :  { %3843 = vpush %v348_v14  ;;  %v404_v17 = vrot.slane %v403_v13, 1  ;;  %v415_v18 = vrot.slane %v414_v12, 1 }
 0x39a   :  { %3845 = vpush %v371_v16 }
 0x39b   :  { %3847 = vpush %v382_v15  ;;  %v405_v19 = vmin.f32 %v403_v13, %v404_v17  ;;  %v416_v20 = vmax.f32 %v414_v12, %v415_v18 }
 0x39d   :  { %3849 = vpush %v405_v19 }
 0x39e   :  { %3851 = vpush %v416_v20 }
 0x3c7   :  { %s3842_s17 = spop %3841 }
 0x3c8   :  { %v339_v21 = vstv %s3842_s17 }
 0x3ca   :  { %s3844_s18 = spop %3843 }
 0x3cb   :  { %v350_v22 = vstv %s3844_s18  ;;  %s3846_s19 = spop %3845 }
 0x3cc   :  { %vm4126_vm6 = vcmp.eq.f32.partialorder %v350_v22, %v339_v21  ;;  %v352_v24 = vsub.f32 %v350_v22, %v339_v21  ;;  %v373_v25 = vstv %s3846_s19  ;;  %s3848_s20 = spop %3847 }
 0x3cd   :  { %v384_v26 = vstv %s3848_s20  ;;  %v357_v38 = vsel %vm4126_vm6, 0.0, %v339_v21 }
 0x3ce   :  { %v353_v27 = vsel %vm4126_vm6, 1.0, %v352_v24  ;;  %vm4132_vm7 = vcmp.eq.f32.partialorder %v384_v26, %v373_v25  ;;  %v386_v29 = vsub.f32 %v384_v26, %v373_v25  ;;  %s3850_s0 = spop %3849  ;;  %v358_v43 = vsub.f32 %v4116_v35, %v357_v38 }
 0x3cf   :  { %3909 = vrcp.f32 %v353_v27  ;;  %v407_v30 = vstv %s3850_s0  ;;  %s3852_s1 = spop %3851  ;;  %v391_v41 = vsel %vm4132_vm7, 0.0, %v373_v25 }
 0x3d0   :  { %v387_v31 = vsel %vm4132_vm7, 1.0, %v386_v29  ;;  %v418_v33 = vstv %s3852_s1  ;;  %v392_v47 = vsub.f32 %v4116_v35, %v391_v41 }
 0x3d1   :  { %3911 = vrcp.f32 %v387_v31  ;;  %vm4138_vm8 = vcmp.eq.f32.partialorder %v418_v33, %v407_v30  ;;  %v420_v36 = vsub.f32 %v418_v33, %v407_v30 }
 0x3d2   :  { %v425_v48 = vsel %vm4138_vm8, 0.0, %v407_v30 }
 0x3d3   :  { %v421_v37 = vsel %vm4138_vm8, 1.0, %v420_v36  ;;  %v426_v54 = vsub.f32 %v4116_v35, %v425_v48 }
 0x3d4   :  { %3913 = vrcp.f32 %v421_v37 }
 0x3d9   :  { %v3910_v39 = vpop.eup %3909 }
 0x3da   :  { %v355_v40 = vmul.f32 255.0, %v3910_v39 }
 0x3db   :  { %v3912_v42 = vpop.eup %3911 }
 0x3dc   :  { %v356_v44 = vsel %vm4126_vm6, 1.0, %v355_v40  ;;  %v389_v45 = vmul.f32 255.0, %v3912_v42 }
 0x3dd   :  { %v359_v46 = vmul.f32 %v358_v43, %v356_v44 }
 0x3de   :  { %v3914_v49 = vpop.eup %3913  ;;  %v390_v50 = vsel %vm4132_vm7, 1.0, %v389_v45 }
 0x3df   :  { %v360_v51 = vmax.f32 %v359_v46, 0.0  ;;  %v393_v52 = vmul.f32 %v392_v47, %v390_v50  ;;  %v423_v53 = vmul.f32 255.0, %v3914_v49 }
 0x3e1   :  { %v394_v55 = vmax.f32 %v393_v52, 0.0  ;;  %v424_v56 = vsel %vm4138_vm8, 1.0, %v423_v53  ;;  %v361_v58 = vmin.f32 %v360_v51, 255.0 }
 0x3e2   :  { %v427_v57 = vmul.f32 %v426_v54, %v424_v56 }
 0x3e3   :  { %v395_v59 = vmin.f32 %v394_v55, 255.0 }
 0x3e4   :  { %v428_v60 = vmax.f32 %v427_v57, 0.0 }
 0x3e5   :  { %v430_v62 = vsel %vm5327_vm0, %v361_v58, %v395_v59 }
 0x3e6   :  { %v429_v61 = vmin.f32 %v428_v60, 255.0 }
 0x3e8   :  { %v432_v63 = vsel %vm431_vm9, %v430_v62, %v429_v61 }
 0x3e9   :  { %v433_v0 = vtrunc.f32 %v432_v63 }
 0x3eb   :  { %v434_v2 = vpack.c.f32.eXmY %v433_v0, %v433_v0, 56 }
 0x3ed   :  { %v438_v3 = vpack.c.b8 %v434_v2, %v434_v2 }
 0x3ef   :  { %v440_v35 = vsel %vm4015_vm2, %v438_v3, %v4113_v32 }
 0x3f0   :  { %441 = vst [vmem:[%s5326_s3] sm:$0x3] %v440_v35 }
 0x3f1 PF:  { %p3364_p4 = scmp.ne.s32.totalorder %s4022_s24, 8 }
 0x3f2   :  { %v450_v5 = vlaneseq (!%p3364_p4)  ;;  %v3973_v6 = vmov (!%p3364_p4), 0.0   ;;  %vm3974_vm10 = vmmov (!%p3364_p4), 0   ;;  %v3975_v26 = vmov (!%p3364_p4), 1.0|1.0  }
 0x3f3   :  { %445 = sbr.rel (%p3364_p4) target bundleno = 2748 (0xabc), region = 53  ;;  %3591 = vmatprep.subr.bf16.mxu0 (!%p3364_p4), %v3973_v6  ;;  %3597 = vmatprep.subr.bf16.mxu1 (!%p3364_p4), %v3973_v6 }
 0x3f4   :  { %3593 = vmatprep.mubr.msk.bf16.mxu0 (!%p3364_p4), %vm3974_vm10, %v3973_v6  ;;  %3599 = vmatprep.mubr.msk.bf16.mxu1 (!%p3364_p4), %vm3974_vm10, %v3973_v6  ;;  %v4177_v8 = vshrl.u32 (!%p3364_p4), %v450_v5, 7 }
 0x3f6   :  { %v452_v11 = vadd.s32 (!%p3364_p4), 8, %v4177_v8  ;;  %v501_v13 = vsub.s32 (!%p3364_p4), 1, %v4177_v8  ;;  %v468_v14 = vsub.s32 (!%p3364_p4), 0, %v4177_v8  ;;  %v4189_v16 = vcvt.s32.f32 (!%p3364_p4), %v4177_v8 }
 0x3f7   :  { %v446_v4 = vld [vmem:[%s5326_s3] sm:$0x3] (!%p3364_p4)  ;;  %v903_v61 = vsub.s32 (!%p3364_p4), 3, %v4177_v8  ;;  %v870_v2 = vsub.s32 (!%p3364_p4), 2, %v4177_v8 }
 0x3f8   :  { %v447_v7 = vunpack.c.0.s8 (!%p3364_p4), %v446_v4  ;;  %v4191_v17 = vcvt.s32.f32 (!%p3364_p4), %v452_v11 }
 0x3fa   :  { %v448_v32 = vand.u32 255, %v447_v7 }
 0x3fc   :  { %v4179_v9 = vcvt.s32.f32 %v448_v32 }
 0x3fe   :  { %v462_v10 = vmul.f32 0.0625, %v4179_v9 }
 0x400   :  { %v4183_v12 = vfloor.f32 %v462_v10 }
 0x402   :  { %v464_v15 = vmul.f32 16.0, %v4183_v12  ;;  %v4194_v18 = vrot.slane %v4183_v12, %v501_v13  ;;  %v4197_v19 = vrot.slane %v4183_v12, %v468_v14  ;;  %v4307_v63 = vrot.slane %v4183_v12, %v903_v61 }
 0x403   :  { %v4352_v4 = vrot.slane %v4183_v12, %v870_v2 }
 0x404   :  { %v4200_v20 = vsub.f32 %v4179_v9, %v464_v15  ;;  %vm686_vm11 = vcmp.lt.f32.partialorder %v4194_v18, %v4189_v16  ;;  %vm489_vm12 = vcmp.lt.f32.partialorder %v4197_v19, %v4189_v16  ;;  %vm687_vm13 = vcmp.lt.f32.partialorder %v4194_v18, %v4191_v17 }
 0x405   :  { %v688_v23 = vsel %vm686_vm11, 1.0, %v3973_v6  ;;  %v491_v24 = vsel %vm489_vm12, 1.0, %v3973_v6  ;;  %vm490_vm14 = vcmp.lt.f32.partialorder %v4197_v19, %v4191_v17  ;;  %v689_v25 = vsel %vm687_vm13, 1.0, %v3973_v6 }
 0x406   :  { %v510_v21 = vrot.slane %v4200_v20, %v501_v13  ;;  %v477_v22 = vrot.slane %v4200_v20, %v468_v14  ;;  %690 = vadd.xlane.f32.xlu1 %v688_v23  ;;  %493 = vadd.xlane.f32.xlu0 %v491_v24  ;;  %vm5333_vm7 = vcmp.eq.f32.partialorder %v4194_v18, %v4189_v16  ;;  %v492_v27 = vsel %vm490_vm14, 1.0, %v3973_v6 }
 0x407   :  { %vm5332_vm8 = vcmp.eq.f32.partialorder %v4194_v18, %v4191_v17  ;;  %vm470_vm9 = vcmp.eq.f32.partialorder %v4197_v19, %v4189_v16  ;;  %vm471_vm11 = vcmp.eq.f32.partialorder %v4197_v19, %v4191_v17  ;;  %v912_v62 = vrot.slane %v4200_v20, %v903_v61 }
 0x408   :  { %vm511_vm15 = vcmp.le.f32.partialorder %v510_v21, %v4189_v16  ;;  %vm512_vm1 = vcmp.le.f32.partialorder %v510_v21, %v4191_v17  ;;  %vm478_vm3 = vcmp.le.f32.partialorder %v477_v22, %v4189_v16  ;;  %vm479_vm4 = vcmp.le.f32.partialorder %v477_v22, %v4191_v17  ;;  %vm3367_vm14 = vmpackc.low %vm5332_vm8, %vm5333_vm7 }
 0x409   :  { %vm3365_vm5 = vmpackc.low %vm512_vm1, %vm511_vm15  ;;  %vm599_vm12 = vcmp.eq.f32.partialorder %v510_v21, %v4189_v16  ;;  %vm600_vm13 = vcmp.eq.f32.partialorder %v510_v21, %v4191_v17  ;;  %v4335_v3 = vrot.slane %v4200_v20, %v870_v2  ;;  %vm5330_vm0 = vcmp.eq.f32.partialorder %v4352_v4, %v4191_v17 }
 0x40a   :  { %3592 = vmatpush3.bf16.xpose.msk.msra.mxu0 %vm3365_vm5, %v3975_v26  ;;  %vm3369_vm6 = vmpackc.low %vm479_vm4, %vm478_vm3  ;;  %692 = vadd.xlane.f32.xlu1 %v689_v25  ;;  %vm484_vm3 = vcmp.eq.f32.partialorder %v477_v22, %v4189_v16  ;;  %vm485_vm4 = vcmp.eq.f32.partialorder %v477_v22, %v4191_v17  ;;  %v472_v35 = vsel %vm470_vm9, 1.0, %v3973_v6 }
 0x40b   :  { %3598 = vmatpush3.bf16.xpose.msk.msra.mxu1 %vm3369_vm6, %v3975_v26  ;;  %3603 = vmatprep.subr.bf16.mxu0 %v3973_v6  ;;  %vm4246_vm15 = vmpackc.low %vm471_vm11, %vm470_vm9  ;;  %vm5365_vm9 = vcmp.eq.f32.partialorder %v4194_v18, %v4191_v17 }
 0x40c   :  { %495 = vadd.xlane.f32.xlu0 %v492_v27  ;;  %3615 = vmatprep.subr.bf16.mxu1 %v3973_v6  ;;  %vm4250_vm1 = vmpackc.low %vm600_vm13, %vm599_vm12 }
 0x40d   :  { %vm3377_vm5 = vmpackc.low %vm485_vm4, %vm484_vm3 }
 0x411   :  { %3594 = vmatmul.mubr.msk.bf16.vlgmr.msra.gmra.mrb[0].mxu0 %vm3367_vm14, %v3975_v26 }
 0x412   :  { %3600 = vmatmul.mubr.msk.bf16.vlgmr.msra.gmra.mrb[0].mxu1 %vm4246_vm15, %v3975_v26  ;;  %3604 = vmatpush3.bf16.xpose.msk.msra.mxu0 %vm4250_vm1, %v3975_v26 }
 0x413   :  { %3605 = vmatprep.mubr.msk.bf16.mxu0 %vm3974_vm10, %v3973_v6  ;;  %3609 = vmatprep.subr.bf16.mxu0 %v3973_v6 }
 0x414   :  { %3616 = vmatpush3.bf16.msk.msra.mxu1 %vm3377_vm5, %v3975_v26  ;;  %3617 = vmatprep.mubr.msk.bf16.mxu1 %vm3974_vm10, %v3973_v6 }
 0x415   :  { %3621 = vmatprep.subr.bf16.mxu1 %v3973_v6 }
 0x419   :  { %3606 = vmatmul.mubr.msk.bf16.vlgmr.msra.gmra.mrb[4].mxu0 %vm3367_vm14, %v3975_v26  ;;  %vm708_vm14 = vcmask 130048  }
 0x41a   :  { %3610 = vmatpush3.bf16.xpose.msk.msra.mxu0 %vm3377_vm5, %v3975_v26  ;;  %3611 = vmatprep.mubr.msk.bf16.mxu0 %vm3974_vm10, %v3973_v6  ;;  %vm913_vm5 = vcmp.le.f32.partialorder %v912_v62, %v4189_v16 }
 0x41b   :  { %3627 = vmatprep.subr.bf16.mxu0 %v3973_v6 }
 0x425   :  { %3612 = vmatmul.mubr.msk.bf16.vlgmr.msra.gmra.mrb[4].mxu0 %vm4246_vm15, %v3975_v26 }
 0x426   :  { %3629 = vmatprep.mubr.msk.bf16.mxu0 %vm3974_vm10, %v3973_v6 }
 0x493   :  { %v691_v42 = vpop.xlane.xlu1 %690  ;;  %v494_v43 = vpop.xlane.xlu0 %493 }
 0x494   :  { %v694_v46 = vadd.f32 %v691_v42, %v494_v43 }
 0x497   :  { %v693_v44 = vpop.xlane.xlu1 %692 }
 0x499   :  { %v496_v45 = vpop.xlane.xlu0 %495 }
 0x49a   :  { %v695_v47 = vadd.f32 %v693_v44, %v496_v45 }
 0x4e4   :  { %v551_v30 = vpop.f32.mrb[0].mxu0 }
 0x4e5   :  { %v592_v31 = vpop.f32.mrb[0].mxu1  ;;  %v3595_v33 = vpop.f32.mrb[1].mxu0 }
 0x4e6   :  { %v593_v34 = vadd.f32 %v592_v31, %v551_v30  ;;  %v3601_v36 = vpop.f32.mrb[1].mxu1  ;;  %v554_v37 = vpop.f32.mrb[2].mxu0 }
 0x4e7   :  { %v595_v38 = vpop.f32.mrb[2].mxu1  ;;  %v3596_v39 = vpop.f32.mrb[3].mxu0 }
 0x4e8   :  { %v596_v40 = vadd.f32 %v595_v38, %v554_v37  ;;  %v3602_v41 = vpop.f32.mrb[3].mxu1  ;;  %v4280_v48 = vadd.f32 %v694_v46, %v593_v34 }
 0x4ea   :  { %v4282_v49 = vadd.f32 %v695_v47, %v596_v40  ;;  %vm700_vm6 = vcmp.ge.f32.partialorder %v4280_v48, 255.5 }
 0x4ec   :  { %vm701_vm15 = vcmp.ge.f32.partialorder %v4282_v49, 255.5 }
 0x4f8   :  { %v4284_v50 = vpop.f32.mrb[4].mxu0 }
 0x4f9   :  { %v698_v51 = vsub.f32 %v4280_v48, %v4284_v50  ;;  %vm702_vm12 = vcmp.gt.f32.partialorder %v4284_v50, 0.5  ;;  %v3613_v52 = vpop.f32.mrb[5].mxu0 }
 0x4fa   :  { %v4290_v53 = vpop.f32.mrb[6].mxu0  ;;  %vm704_vm13 = vmand %vm700_vm6, %vm702_vm12  ;;  %vm914_vm6 = vcmp.le.f32.partialorder %v912_v62, %v4191_v17 }
 0x4fb   :  { %v699_v54 = vsub.f32 %v4282_v49, %v4290_v53  ;;  %vm703_vm3 = vcmp.gt.f32.partialorder %v4290_v53, 0.5  ;;  %v3614_v55 = vpop.f32.mrb[7].mxu0  ;;  %v706_v56 = vsel %vm704_vm13, %v4284_v50, 0.0  ;;  %vm3389_vm12 = vmpackc.low %vm914_vm6, %vm913_vm5  ;;  %vm5329_vm13 = vcmp.eq.f32.partialorder %v4307_v63, %v4189_v16 }
 0x4fc   :  { %vm705_vm4 = vmand %vm701_vm15, %vm703_vm3  ;;  %v709_v58 = vsel %vm708_vm14, %v706_v56, 0.0  ;;  %3628 = vmatpush3.bf16.xpose.msk.msra.mxu0 %vm3389_vm12, %v3975_v26  ;;  %vm5328_vm15 = vcmp.eq.f32.partialorder %v4307_v63, %v4191_v17  ;;  %vm1002_vm5 = vcmp.eq.f32.partialorder %v912_v62, %v4191_v17  ;;  %vm886_vm12 = vcmp.eq.f32.partialorder %v4335_v3, %v4189_v16 }
 0x4fd   :  { %v707_v57 = vsel %vm705_vm4, %v4290_v53, 0.0  ;;  %3639 = vmatprep.subr.bf16.mxu0 %v3973_v6  ;;  %vm3391_vm3 = vmpackc.low %vm5328_vm15, %vm5329_vm13  ;;  %vm1001_vm4 = vcmp.eq.f32.partialorder %v912_v62, %v4189_v16  ;;  %vm892_vm15 = vcmp.lt.f32.partialorder %v4352_v4, %v4191_v17  ;;  %vm1088_vm13 = vcmp.lt.f32.partialorder %v4307_v63, %v4189_v16 }
 0x4fe   :  { %v710_v59 = vsel %vm708_vm14, %v707_v57, 0.0  ;;  %vm4322_vm6 = vmpackc.low %vm1002_vm5, %vm1001_vm4  ;;  %vm887_vm4 = vcmp.eq.f32.partialorder %v4335_v3, %v4191_v17  ;;  %v894_v10 = vsel %vm892_vm15, 1.0, %v3973_v6  ;;  %v1090_v11 = vsel %vm1088_vm13, 1.0, %v3973_v6 }
 0x4ff   :  { %v711_v60 = vadd.f32 %v710_v59, %v709_v58  ;;  %vm4343_vm5 = vmpackc.low %vm887_vm4, %vm886_vm12  ;;  %vm891_vm4 = vcmp.lt.f32.partialorder %v4352_v4, %v4189_v16  ;;  %v456_v56 = vand.u32 127, %v450_v5 }
 0x500   :  { %v893_v32 = vsel %vm891_vm4, 1.0, %v3973_v6 }
 0x501   :  { %712 = vadd.xlane.f32.xlu0 %v711_v60  ;;  %895 = vadd.xlane.f32.xlu1 %v893_v32  ;;  %vm459_vm8 = vcmp.eq.s32.totalorder %v456_v56, 0 }
 0x503   :  { %3630 = vmatmul.mubr.msk.bf16.vlgmr.msra.gmra.mrb[8].mxu0 %vm3391_vm3, %v3975_v26 }
 0x504   :  { %3640 = vmatpush3.bf16.xpose.msk.msra.mxu0 %vm4322_vm6, %v3975_v26  ;;  %3641 = vmatprep.mubr.msk.bf16.mxu0 %vm3974_vm10, %v3973_v6 }
 0x505   :  { %3645 = vmatprep.subr.bf16.mxu0 %v3973_v6  ;;  %897 = vadd.xlane.f32.xlu0 %v894_v10 }
 0x506   :  { %1092 = vadd.xlane.f32.xlu1 %v1090_v11 }
 0x50b   :  { %3642 = vmatmul.mubr.msk.bf16.vlgmr.msra.gmra.mrb[12].mxu0 %vm3391_vm3, %v3975_v26  ;;  %vm5331_vm3 = vcmp.eq.f32.partialorder %v4352_v4, %v4189_v16 }
 0x50c   :  { %3647 = vmatprep.mubr.msk.bf16.mxu0 %vm3974_vm10, %v3973_v6  ;;  %3646 = vmatpush3.bf16.xpose.msk.msra.mxu0 %vm4343_vm5, %v3975_v26  ;;  %vm4364_vm12 = vmpackc.low %vm5330_vm0, %vm5331_vm3  ;;  %vm1089_vm0 = vcmp.lt.f32.partialorder %v4307_v63, %v4191_v17  ;;  %vm457_vm3 = vcmp.eq.s32.totalorder %v4177_v8, 0 }
 0x50d   :  { %3663 = vmatprep.subr.bf16.mxu0 %v3973_v6  ;;  %v1091_v13 = vsel %vm1089_vm0, 1.0, %v3973_v6  ;;  %vm4397_vm7 = vmand %vm457_vm3, %vm459_vm8  ;;  %vm880_vm8 = vcmp.le.f32.partialorder %v4335_v3, %v4189_v16  ;;  %vm881_vm3 = vcmp.le.f32.partialorder %v4335_v3, %v4191_v17 }
 0x50e   :  { %1094 = vadd.xlane.f32.xlu0 %v1091_v13 }
 0x517   :  { %3648 = vmatmul.mubr.msk.bf16.vlgmr.msra.gmra.mrb[12].mxu0 %vm4364_vm12, %v3975_v26 }
 0x518   :  { %3665 = vmatprep.mubr.msk.bf16.mxu0 %vm3974_vm10, %v3973_v6 }
 0x58e   :  { %v713_v14 = vpop.xlane.xlu0 %712 }
 0x58f   :  { %v714_v15 = vrot.slane %v713_v14, 4 }
 0x591   :  { %v715_v21 = vadd.f32 %v714_v15, %v713_v14  ;;  %v473_v15 = vsel %vm471_vm11, 1.0, %v3973_v6 }
 0x593   :  { %v716_v22 = vrot.slane %v715_v21, 2 }
 0x595   :  { %v717_v23 = vadd.f32 %v716_v22, %v715_v21 }
 0x597   :  { %v718_v24 = vrot.slane %v717_v23, 1 }
 0x599   :  { %v719_v25 = vadd.f32 %v718_v24, %v717_v23 }
 0x59b   :  { %3853 = vpush %v719_v25 }
 0x5cc   :  { %s3854_s24 = spop %3853 }
 0x5cd   :  { %v721_v27 = vstv %s3854_s24 }
 0x5ce   :  { %v722_v28 = vsub.f32 256.0, %v721_v27 }
 0x5d0   :  { %v723_v30 = vmul.f32 0.003921569, %v722_v28 }
 0x5d2   :  { %v4385_v31 = vfloor.f32 %v723_v30 }
 0x5d4   :  { %v725_v33 = vmax.f32 %v4385_v31, 1.0  ;;  %v726_v34 = vmul.f32 0.5, %v4385_v31  ;;  %vm758_vm11 = vcmp.ge.f32.partialorder %v4385_v31, 0.5 }
 0x5d6   :  { %3915 = vrcp.f32 %v725_v33  ;;  %v727_v36 = vfloor.f32 %v726_v34  ;;  %v953_v29 = vpop.f32.mrb[8].mxu0  ;;  %v506_v34 = vsel %vm5365_vm9, 1.0, %v3973_v6 }
 0x5d7   :  { %v3631_v2 = vpop.f32.mrb[9].mxu0 }
 0x5d8   :  { %v728_v37 = vadd.f32 %v727_v36, %v698_v51  ;;  %v729_v38 = vadd.f32 %v727_v36, %v699_v54  ;;  %v956_v3 = vpop.f32.mrb[10].mxu0 }
 0x5d9   :  { %v3632_v32 = vpop.f32.mrb[11].mxu0 }
 0x5e0   :  { %v3916_v39 = vpop.eup %3915 }
 0x5e1   :  { %v731_v40 = vmul.f32 %v3916_v39, %v728_v37  ;;  %v732_v41 = vmul.f32 %v3916_v39, %v729_v38 }
 0x5e3   :  { %v733_v42 = vfloor.f32 %v731_v40  ;;  %v734_v43 = vfloor.f32 %v732_v41  ;;  %v898_v41 = vpop.xlane.xlu0 %897 }
 0x5e5   :  { %v735_v44 = vmul.f32 %v733_v42, %v725_v33  ;;  %v736_v45 = vmul.f32 %v734_v43, %v725_v33  ;;  %v3381_v52 = vadd.f32 -1.0, %v733_v42  ;;  %v3382_v55 = vadd.f32 -1.0, %v734_v43 }
 0x5e7   :  { %v737_v46 = vsub.f32 %v728_v37, %v735_v44  ;;  %v738_v47 = vsub.f32 %v729_v38, %v736_v45  ;;  %v896_v37 = vpop.xlane.xlu1 %895 }
 0x5e9   :  { %vm739_vm0 = vcmp.lt.f32.partialorder %v737_v46, 0.0  ;;  %vm740_vm13 = vcmp.lt.f32.partialorder %v738_v47, 0.0  ;;  %vm745_vm15 = vcmp.ge.f32.partialorder %v737_v46, %v725_v33  ;;  %vm746_vm4 = vcmp.ge.f32.partialorder %v738_v47, %v725_v33 }
 0x5ea   :  { %v743_v48 = vsel %vm739_vm0, %v3381_v52, %v733_v42  ;;  %v744_v50 = vsel %vm740_vm13, %v3382_v55, %v734_v43  ;;  %vm3393_vm0 = vmpackc.low %vm881_vm3, %vm880_vm8  ;;  %v4428_v10 = vpop.f32.mrb[12].mxu0  ;;  %vm866_vm8 = vcmask 1040384  }
 0x5eb   :  { %v747_v51 = vadd.f32 1.0, %v743_v48  ;;  %v748_v49 = vadd.f32 1.0, %v744_v50  ;;  %v3649_v11 = vpop.f32.mrb[13].mxu0  ;;  %v1093_v52 = vpop.xlane.xlu1 %1092 }
 0x5ec   :  { %v4430_v13 = vpop.f32.mrb[14].mxu0 }
 0x5ed   :  { %v749_v53 = vsel %vm745_vm15, %v747_v51, %v743_v48  ;;  %v750_v54 = vsel %vm746_vm4, %v748_v49, %v744_v50  ;;  %v3650_v7 = vpop.f32.mrb[15].mxu0  ;;  %v1095_v48 = vpop.xlane.xlu0 %1094  ;;  %vm1105_vm15 = vcmp.gt.f32.partialorder %v4430_v13, 0.5 }
 0x5ee   :  { %v751_v57 = vmax.f32 %v749_v53, 0.0  ;;  %v752_v58 = vmax.f32 %v750_v54, 0.0 }
 0x5f0   :  { %v753_v5 = vmin.f32 %v751_v57, 255.0  ;;  %v754_v60 = vmin.f32 %v752_v58, 255.0  ;;  %v1097_v58 = vadd.f32 %v1095_v48, %v898_v41 }
 0x5f2   :  { %v755_v61 = vsel %vm4397_vm7, 0.0, %v753_v5 }
 0x5f3   :  { %v757_v62 = vpack.c.bf16 %v754_v60, %v755_v61 }
 0x5f5   :  { %3618 = vmatmul.mubr.msk.bf16.vlgmr.msra.gmra.mrb[4].mxu1 %vm708_vm14, %v757_v62 }
 0x5f6   :  { %3622 = vmatpush3.bf16.msk.msra.mxu1 %vm4250_vm1, %v3975_v26  ;;  %3623 = vmatprep.mubr.msk.bf16.mxu1 %vm3974_vm10, %v3973_v6  ;;  %vm5364_vm1 = vcmp.eq.f32.partialorder %v4194_v18, %v4189_v16  ;;  %v1096_v18 = vadd.f32 %v1093_v52, %v896_v37 }
 0x5f7   :  { %3633 = vmatprep.subr.bf16.mxu1 %v3973_v6  ;;  %v505_v30 = vsel %vm5364_vm1, 1.0, %v3973_v6 }
 0x5fd   :  { %3624 = vmatmul.mubr.msk.bf16.vlgmr.msra.gmra.mrb[8].mxu1 %vm708_vm14, %v757_v62 }
 0x5fe   :  { %3635 = vmatprep.mubr.msk.bf16.mxu1 %vm3974_vm10, %v3973_v6 }
 0x5ff   :  { %3634 = vmatpush3.bf16.xpose.msk.msra.mxu1 %vm3393_vm0, %v3975_v26 }
 0x600   :  { %3651 = vmatprep.subr.bf16.mxu1 %v3973_v6 }
 0x606   :  { %3636 = vmatmul.mubr.msk.bf16.vlgmr.msra.gmra.mrb[12].mxu1 %vm4364_vm12, %v3975_v26 }
 0x607   :  { %3652 = vmatpush3.bf16.msk.msra.mxu1 %vm4343_vm5, %v3975_v26  ;;  %3653 = vmatprep.mubr.msk.bf16.mxu1 %vm3974_vm10, %v3973_v6  ;;  %vm1104_vm5 = vcmp.gt.f32.partialorder %v4428_v10, 0.5 }
 0x608   :  { %3657 = vmatprep.subr.bf16.mxu1 %v3973_v6 }
 0x6c8   :  { %v796_v14 = vpop.f32.mrb[4].mxu1 }
 0x6c9   :  { %v3619_v21 = vpop.f32.mrb[5].mxu1  ;;  %v803_v23 = vmul.f32 %v796_v14, %v472_v35 }
 0x6ca   :  { %v799_v22 = vpop.f32.mrb[6].mxu1 }
 0x6cb   :  { %v804_v24 = vmul.f32 %v799_v22, %v473_v15  ;;  %v3620_v25 = vpop.f32.mrb[7].mxu1 }
 0x6cd   :  { %v805_v27 = vadd.f32 %v804_v24, %v803_v23  ;;  %v1309_v24 = vsub.s32 5, %v4177_v8 }
 0x6cf   :  { %v806_v28 = vrot.slane %v805_v27, 4  ;;  %v1318_v25 = vrot.slane %v4200_v20, %v1309_v24  ;;  %v4481_v31 = vrot.slane %v4183_v12, %v1309_v24 }
 0x6d0   :  { %v849_v33 = vpop.f32.mrb[8].mxu1 }
 0x6d1   :  { %v807_v19 = vadd.f32 %v806_v28, %v805_v27  ;;  %v3625_v36 = vpop.f32.mrb[9].mxu1  ;;  %v856_v40 = vmul.f32 %v849_v33, %v505_v30  ;;  %vm1319_vm0 = vcmp.le.f32.partialorder %v1318_v25, %v4189_v16  ;;  %vm1320_vm1 = vcmp.le.f32.partialorder %v1318_v25, %v4191_v17 }
 0x6d2   :  { %v852_v38 = vpop.f32.mrb[10].mxu1  ;;  %vm3413_vm9 = vmpackc.low %vm1320_vm1, %vm1319_vm0  ;;  %v1276_v28 = vsub.s32 4, %v4177_v8 }
 0x6d3   :  { %v808_v39 = vrot.slane %v807_v19, 2  ;;  %v857_v42 = vmul.f32 %v852_v38, %v506_v34  ;;  %v3626_v43 = vpop.f32.mrb[11].mxu1  ;;  %3664 = vmatpush3.bf16.xpose.msk.msra.mxu0 %vm3413_vm9, %v3975_v26 }
 0x6d4   :  { %3675 = vmatprep.subr.bf16.mxu0 %v3973_v6  ;;  %v4509_v30 = vrot.slane %v4200_v20, %v1276_v28  ;;  %v4525_v8 = vrot.slane %v4183_v12, %v1276_v28 }
 0x6d5   :  { %v809_v44 = vadd.f32 %v808_v39, %v807_v19  ;;  %v858_v45 = vadd.f32 %v857_v42, %v856_v40 }
 0x6d6   :  { %vm1293_vm0 = vcmp.eq.f32.partialorder %v4509_v30, %v4191_v17  ;;  %vm1278_vm9 = vcmp.eq.f32.partialorder %v4525_v8, %v4189_v16 }
 0x6d7   :  { %v810_v46 = vrot.slane %v809_v44, 1  ;;  %v859_v47 = vrot.slane %v858_v45, 4 }
 0x6d9   :  { %v811_v55 = vadd.f32 %v810_v46, %v809_v44  ;;  %v860_v56 = vadd.f32 %v859_v47, %v858_v45  ;;  %v994_v50 = vpop.f32.mrb[12].mxu1 }
 0x6da   :  { %v995_v51 = vadd.f32 %v994_v50, %v953_v29  ;;  %v3637_v49 = vpop.f32.mrb[13].mxu1 }
 0x6db   :  { %v814_v53 = vsel %vm758_vm11, %v811_v55, %v4179_v9  ;;  %v861_v54 = vrot.slane %v860_v56, 2  ;;  %v997_v57 = vpop.f32.mrb[14].mxu1 }
 0x6dc   :  { %v4452_v5 = vadd.f32 %v1096_v18, %v995_v51  ;;  %v998_v60 = vadd.f32 %v997_v57, %v956_v3  ;;  %v3638_v61 = vpop.f32.mrb[15].mxu1 }
 0x6dd   :  { %v862_v62 = vadd.f32 %v861_v54, %v860_v56 }
 0x6de   :  { %v1100_v2 = vsub.f32 %v4452_v5, %v4428_v10  ;;  %vm1102_vm12 = vcmp.ge.f32.partialorder %v4452_v5, 255.5  ;;  %v4458_v29 = vadd.f32 %v1097_v58, %v998_v60 }
 0x6df   :  { %v863_v32 = vrot.slane %v862_v62, 1  ;;  %vm1106_vm13 = vmand %vm1102_vm12, %vm1104_vm5  ;;  %vm5334_vm5 = vcmp.eq.f32.partialorder %v4481_v31, %v4191_v17 }
 0x6e0   :  { %v1101_v11 = vsub.f32 %v4458_v29, %v4430_v13  ;;  %vm1103_vm4 = vcmp.ge.f32.partialorder %v4458_v29, 255.5  ;;  %v1108_v3 = vsel %vm1106_vm13, %v4428_v10, 0.0  ;;  %vm1407_vm13 = vcmp.eq.f32.partialorder %v1318_v25, %v4189_v16 }
 0x6e1   :  { %v864_v7 = vadd.f32 %v863_v32, %v862_v62  ;;  %vm1107_vm3 = vmand %vm1103_vm4, %vm1105_vm15  ;;  %v1110_v15 = vsel %vm708_vm14, %v1108_v3, 0.0  ;;  %vm1408_vm15 = vcmp.eq.f32.partialorder %v1318_v25, %v4191_v17 }
 0x6e2   :  { %v1109_v35 = vsel %vm1107_vm3, %v4430_v13, 0.0  ;;  %vm4496_vm4 = vmpackc.low %vm1408_vm15, %vm1407_vm13  ;;  %vm1292_vm3 = vcmp.eq.f32.partialorder %v4509_v30, %v4189_v16  ;;  %vm1297_vm15 = vcmp.lt.f32.partialorder %v4525_v8, %v4189_v16 }
 0x6e3   :  { %v865_v14 = vsel %vm758_vm11, %v864_v7, %v4179_v9  ;;  %v1111_v21 = vsel %vm708_vm14, %v1109_v35, 0.0  ;;  %vm1311_vm11 = vcmp.eq.f32.partialorder %v4481_v31, %v4189_v16  ;;  %vm4517_vm1 = vmpackc.low %vm1293_vm0, %vm1292_vm3  ;;  %vm1298_vm3 = vcmp.lt.f32.partialorder %v4525_v8, %v4191_v17 }
 0x6e4   :  { %v4472_v22 = vsel %vm866_vm8, %v814_v53, %v865_v14  ;;  %v1112_v23 = vadd.f32 %v1111_v21, %v1110_v15  ;;  %vm3415_vm12 = vmpackc.low %vm5334_vm5, %vm1311_vm11  ;;  %vm1494_vm0 = vcmp.lt.f32.partialorder %v4481_v31, %v4189_v16  ;;  %vm1495_vm5 = vcmp.lt.f32.partialorder %v4481_v31, %v4191_v17 }
 0x6e5   :  { %3666 = vmatmul.mubr.msk.bf16.vlgmr.msra.gmra.mrb[16].mxu0 %vm3415_vm12, %v3975_v26  ;;  %v1299_v12 = vsel %vm1297_vm15, 1.0, %v3973_v6  ;;  %v1300_v34 = vsel %vm1298_vm3, 1.0, %v3973_v6  ;;  %v1496_v19 = vsel %vm1494_vm0, 1.0, %v3973_v6  ;;  %v1497_v36 = vsel %vm1495_vm5, 1.0, %v3973_v6 }
 0x6e6   :  { %1113 = vadd.xlane.f32.xlu1 %v1112_v23  ;;  %3676 = vmatpush3.bf16.xpose.msk.msra.mxu0 %vm4496_vm4, %v3975_v26 }
 0x6e7   :  { %3677 = vmatprep.mubr.msk.bf16.mxu0 %vm3974_vm10, %v3973_v6  ;;  %3681 = vmatprep.subr.bf16.mxu0 %v3973_v6 }
 0x6e8   :  { %1301 = vadd.xlane.f32.xlu0 %v1299_v12 }
 0x6ea   :  { %1303 = vadd.xlane.f32.xlu1 %v1300_v34 }
 0x6ec   :  { %1498 = vadd.xlane.f32.xlu0 %v1496_v19 }
 0x6ed   :  { %3678 = vmatmul.mubr.msk.bf16.vlgmr.msra.gmra.mrb[20].mxu0 %vm3415_vm12, %v3975_v26  ;;  %vm1279_vm12 = vcmp.eq.f32.partialorder %v4525_v8, %v4191_v17 }
 0x6ee   :  { %3683 = vmatprep.mubr.msk.bf16.mxu0 %vm3974_vm10, %v3973_v6  ;;  %3682 = vmatpush3.bf16.xpose.msk.msra.mxu0 %vm4517_vm1, %v3975_v26  ;;  %vm4537_vm13 = vmpackc.low %vm1279_vm12, %vm1278_vm9  ;;  %v1281_v59 = vsel %vm1279_vm12, 1.0, %v3973_v6 }
 0x6ef   :  { %1500 = vadd.xlane.f32.xlu1 %v1497_v36 }
 0x6f9   :  { %3684 = vmatmul.mubr.msk.bf16.vlgmr.msra.gmra.mrb[20].mxu0 %vm4537_vm13, %v3975_v26 }
 0x773   :  { %v1114_v37 = vpop.xlane.xlu1 %1113 }
 0x774   :  { %v1115_v38 = vrot.slane %v1114_v37, 4 }
 0x776   :  { %v1116_v39 = vadd.f32 %v1115_v38, %v1114_v37 }
 0x778   :  { %v1117_v40 = vrot.slane %v1116_v39, 2 }
 0x77a   :  { %v1118_v41 = vadd.f32 %v1117_v40, %v1116_v39 }
 0x77c   :  { %v1119_v42 = vrot.slane %v1118_v41, 1 }
 0x77e   :  { %v1120_v43 = vadd.f32 %v1119_v42, %v1118_v41 }
 0x780   :  { %3855 = vpush %v1120_v43 }
 0x7b1   :  { %s3856_s2 = spop %3855 }
 0x7b2   :  { %v1122_v44 = vstv %s3856_s2 }
 0x7b3   :  { %v1123_v45 = vsub.f32 256.0, %v1122_v44 }
 0x7b5   :  { %v1124_v46 = vmul.f32 0.003921569, %v1123_v45 }
 0x7b7   :  { %v4556_v47 = vfloor.f32 %v1124_v46 }
 0x7b8   :  { %v1359_v0 = vpop.f32.mrb[16].mxu0 }
 0x7b9   :  { %v1126_v52 = vmax.f32 %v4556_v47, 1.0  ;;  %v1127_v55 = vmul.f32 0.5, %v4556_v47  ;;  %v3667_v23 = vpop.f32.mrb[17].mxu0 }
 0x7ba   :  { %v1362_v24 = vpop.f32.mrb[18].mxu0 }
 0x7bb   :  { %3917 = vrcp.f32 %v1126_v52  ;;  %v1128_v56 = vfloor.f32 %v1127_v55  ;;  %v3668_v25 = vpop.f32.mrb[19].mxu0 }
 0x7bd   :  { %v1129_v48 = vadd.f32 %v1128_v56, %v1100_v2  ;;  %v1130_v50 = vadd.f32 %v1128_v56, %v1101_v11 }
 0x7c5   :  { %v3918_v18 = vpop.eup %3917 }
 0x7c6   :  { %v1132_v51 = vmul.f32 %v3918_v18, %v1129_v48  ;;  %v1133_v49 = vmul.f32 %v3918_v18, %v1130_v50  ;;  %v1304_v18 = vpop.xlane.xlu1 %1303 }
 0x7c8   :  { %v1134_v53 = vfloor.f32 %v1132_v51  ;;  %v1135_v54 = vfloor.f32 %v1133_v49 }
 0x7ca   :  { %v1136_v57 = vmul.f32 %v1134_v53, %v1126_v52  ;;  %v1137_v58 = vmul.f32 %v1135_v54, %v1126_v52  ;;  %v3405_v62 = vadd.f32 -1.0, %v1134_v53  ;;  %v3406_v32 = vadd.f32 -1.0, %v1135_v54 }
 0x7cc   :  { %v1138_v60 = vsub.f32 %v1129_v48, %v1136_v57  ;;  %v1139_v61 = vsub.f32 %v1130_v50, %v1137_v58  ;;  %v4593_v28 = vpop.f32.mrb[20].mxu0 }
 0x7ce   :  { %vm1140_vm5 = vcmp.lt.f32.partialorder %v1138_v60, 0.0  ;;  %vm1141_vm15 = vcmp.lt.f32.partialorder %v1139_v61, 0.0  ;;  %vm1146_vm3 = vcmp.ge.f32.partialorder %v1138_v60, %v1126_v52  ;;  %vm1147_vm0 = vcmp.ge.f32.partialorder %v1139_v61, %v1126_v52  ;;  %v1302_v52 = vpop.xlane.xlu0 %1301 }
 0x7cf   :  { %v1144_v3 = vsel %vm1140_vm5, %v3405_v62, %v1134_v53  ;;  %v1145_v10 = vsel %vm1141_vm15, %v3406_v32, %v1135_v54  ;;  %vm1286_vm5 = vcmp.le.f32.partialorder %v4509_v30, %v4189_v16  ;;  %vm1287_vm15 = vcmp.le.f32.partialorder %v4509_v30, %v4191_v17  ;;  %v3685_v30 = vpop.f32.mrb[21].mxu0  ;;  %v1501_v62 = vpop.xlane.xlu1 %1500 }
 0x7d0   :  { %v1148_v5 = vadd.f32 1.0, %v1144_v3  ;;  %v1149_v2 = vadd.f32 1.0, %v1145_v10  ;;  %v4595_v12 = vpop.f32.mrb[22].mxu0 }
 0x7d1   :  { %v3686_v20 = vpop.f32.mrb[23].mxu0 }
 0x7d2   :  { %v1150_v13 = vsel %vm1146_vm3, %v1148_v5, %v1144_v3  ;;  %v1151_v29 = vsel %vm1147_vm0, %v1149_v2, %v1145_v10  ;;  %vm3417_vm3 = vmpackc.low %vm1287_vm15, %vm1286_vm5  ;;  %vm5375_vm0 = vcmp.eq.f32.partialorder %v4307_v63, %v4191_v17  ;;  %v1499_v58 = vpop.xlane.xlu0 %1498  ;;  %vm1159_vm5 = vcmp.ge.f32.partialorder %v4556_v47, 0.5 }
 0x7d3   :  { %v1152_v11 = vmax.f32 %v1150_v13, 0.0  ;;  %v1153_v7 = vmax.f32 %v1151_v29, 0.0  ;;  %v908_v45 = vsel %vm5375_vm0, 1.0, %v3973_v6  ;;  %v1503_v29 = vadd.f32 %v1501_v62, %v1304_v18 }
 0x7d4   :  { %vm1510_vm15 = vcmp.gt.f32.partialorder %v4593_v28, 0.5 }
 0x7d5   :  { %v1154_v35 = vmin.f32 %v1152_v11, 255.0  ;;  %v1155_v14 = vmin.f32 %v1153_v7, 255.0 }
 0x7d7   :  { %v1156_v15 = vsel %vm4397_vm7, 0.0, %v1154_v35 }
 0x7d8   :  { %v1158_v21 = vpack.c.bf16 %v1155_v14, %v1156_v15 }
 0x7da   :  { %3654 = vmatmul.mubr.msk.bf16.vlgmr.msra.gmra.mrb[16].mxu1 %vm708_vm14, %v1158_v21 }
 0x7db   :  { %3658 = vmatpush3.bf16.msk.msra.mxu1 %vm4322_vm6, %v3975_v26  ;;  %3659 = vmatprep.mubr.msk.bf16.mxu1 %vm3974_vm10, %v3973_v6  ;;  %vm5372_vm6 = vcmp.eq.f32.partialorder %v4352_v4, %v4189_v16 }
 0x7dc   :  { %3669 = vmatprep.subr.bf16.mxu1 %v3973_v6  ;;  %v874_v33 = vsel %vm5372_vm6, 1.0, %v3973_v6 }
 0x7e2   :  { %3660 = vmatmul.mubr.msk.bf16.vlgmr.msra.gmra.mrb[20].mxu1 %vm708_vm14, %v1158_v21 }
 0x7e3   :  { %3671 = vmatprep.mubr.msk.bf16.mxu1 %vm3974_vm10, %v3973_v6 }
 0x7e4   :  { %3670 = vmatpush3.bf16.xpose.msk.msra.mxu1 %vm3417_vm3, %v3975_v26 }
 0x7e5   :  { %3687 = vmatprep.subr.bf16.mxu1 %v3973_v6 }
 0x7eb   :  { %3672 = vmatmul.mubr.msk.bf16.vlgmr.msra.gmra.mrb[24].mxu1 %vm4537_vm13, %v3975_v26  ;;  %vm5374_vm13 = vcmp.eq.f32.partialorder %v4307_v63, %v4189_v16  ;;  %v1502_v63 = vadd.f32 %v1499_v58, %v1302_v52 }
 0x7ec   :  { %3688 = vmatpush3.bf16.msk.msra.mxu1 %vm4517_vm1, %v3975_v26  ;;  %3689 = vmatprep.mubr.msk.bf16.mxu1 %vm3974_vm10, %v3973_v6  ;;  %vm5373_vm1 = vcmp.eq.f32.partialorder %v4352_v4, %v4191_v17  ;;  %v907_v43 = vsel %vm5374_vm13, 1.0, %v3973_v6 }
 0x7ed   :  { %3693 = vmatprep.subr.bf16.mxu1 %v3973_v6  ;;  %v875_v19 = vsel %vm5373_vm1, 1.0, %v3973_v6  ;;  %vm1511_vm1 = vcmp.gt.f32.partialorder %v4595_v12, 0.5 }
 0x8ad   :  { %v1197_v34 = vpop.f32.mrb[16].mxu1 }
 0x8ae   :  { %v3655_v36 = vpop.f32.mrb[17].mxu1  ;;  %v1204_v38 = vmul.f32 %v1197_v34, %v874_v33 }
 0x8af   :  { %v1200_v37 = vpop.f32.mrb[18].mxu1 }
 0x8b0   :  { %v1205_v39 = vmul.f32 %v1200_v37, %v875_v19  ;;  %v3656_v40 = vpop.f32.mrb[19].mxu1 }
 0x8b2   :  { %v1206_v41 = vadd.f32 %v1205_v39, %v1204_v38 }
 0x8b4   :  { %v1207_v42 = vrot.slane %v1206_v41, 4 }
 0x8b5   :  { %v1250_v44 = vpop.f32.mrb[20].mxu1 }
 0x8b6   :  { %v1208_v4 = vadd.f32 %v1207_v42, %v1206_v41  ;;  %v3661_v46 = vpop.f32.mrb[21].mxu1  ;;  %v1257_v48 = vmul.f32 %v1250_v44, %v907_v43 }
 0x8b7   :  { %v1253_v55 = vpop.f32.mrb[22].mxu1 }
 0x8b8   :  { %v1209_v56 = vrot.slane %v1208_v4, 2  ;;  %v1258_v50 = vmul.f32 %v1253_v55, %v908_v45  ;;  %v3662_v51 = vpop.f32.mrb[23].mxu1 }
 0x8ba   :  { %v1210_v49 = vadd.f32 %v1209_v56, %v1208_v4  ;;  %v1259_v53 = vadd.f32 %v1258_v50, %v1257_v48 }
 0x8bc   :  { %v1211_v54 = vrot.slane %v1210_v49, 1  ;;  %v1260_v57 = vrot.slane %v1259_v53, 4 }
 0x8be   :  { %v1212_v60 = vadd.f32 %v1211_v54, %v1210_v49  ;;  %v1261_v61 = vadd.f32 %v1260_v57, %v1259_v53  ;;  %v1400_v32 = vpop.f32.mrb[24].mxu1 }
 0x8bf   :  { %v1401_v3 = vadd.f32 %v1400_v32, %v1359_v0  ;;  %v3673_v10 = vpop.f32.mrb[25].mxu1 }
 0x8c0   :  { %v1215_v5 = vsel %vm1159_vm5, %v1212_v60, %v4179_v9  ;;  %v1262_v2 = vrot.slane %v1261_v61, 2  ;;  %v1403_v13 = vpop.f32.mrb[26].mxu1 }
 0x8c1   :  { %v1504_v11 = vadd.f32 %v1502_v63, %v1401_v3  ;;  %v1404_v7 = vadd.f32 %v1403_v13, %v1362_v24  ;;  %v3674_v35 = vpop.f32.mrb[27].mxu1  ;;  %v1268_v19 = vrot.slane %v1215_v5, 2 }
 0x8c2   :  { %v1263_v14 = vadd.f32 %v1262_v2, %v1261_v61 }
 0x8c3   :  { %v1506_v15 = vsub.f32 %v1504_v11, %v4593_v28  ;;  %vm1508_vm3 = vcmp.ge.f32.partialorder %v1504_v11, 255.5  ;;  %v1505_v21 = vadd.f32 %v1503_v29, %v1404_v7 }
 0x8c4   :  { %v1264_v23 = vrot.slane %v1263_v14, 1  ;;  %vm1512_vm6 = vmand %vm1508_vm3, %vm1510_vm15  ;;  %vm5376_vm15 = vcmask 1041408  }
 0x8c5   :  { %v1507_v0 = vsub.f32 %v1505_v21, %v4595_v12  ;;  %vm1509_vm13 = vcmp.ge.f32.partialorder %v1505_v21, 255.5  ;;  %v1514_v25 = vsel %vm1512_vm6, %v4593_v28, 0.0  ;;  %v1280_v21 = vsel %vm1278_vm9, 1.0, %v3973_v6 }
 0x8c6   :  { %v1265_v30 = vadd.f32 %v1264_v23, %v1263_v14  ;;  %vm1513_vm0 = vmand %vm1509_vm13, %vm1511_vm1  ;;  %v1516_v33 = vsel %vm708_vm14, %v1514_v25, 0.0 }
 0x8c7   :  { %v1515_v24 = vsel %vm1513_vm0, %v4595_v12, 0.0 }
 0x8c8   :  { %v1266_v20 = vsel %vm1159_vm5, %v1265_v30, %v4179_v9  ;;  %v1517_v34 = vsel %vm708_vm14, %v1515_v24, 0.0 }
 0x8c9   :  { %v1271_v36 = vrot.slane %v1266_v20, 2  ;;  %v1518_v37 = vadd.f32 %v1517_v34, %v1516_v33  ;;  %v1313_v33 = vsel %vm1311_vm11, 1.0, %v3973_v6 }
 0x8cb   :  { %v1273_v38 = vsel %vm866_vm8, %v1268_v19, %v1271_v36  ;;  %1519 = vadd.xlane.f32.xlu0 %v1518_v37 }
 0x8cc   :  { %v1681_v39 = vrot.slane %v1273_v38, 6 }
 0x8ce   :  { %v4631_v28 = vsel %vm5376_vm15, %v4472_v22, %v1681_v39 }
 0x958   :  { %v1520_v12 = vpop.xlane.xlu0 %1519 }
 0x959   :  { %v1521_v40 = vrot.slane %v1520_v12, 4 }
 0x95b   :  { %v1522_v41 = vadd.f32 %v1521_v40, %v1520_v12 }
 0x95d   :  { %v1523_v47 = vrot.slane %v1522_v41, 2 }
 0x95f   :  { %v1524_v42 = vadd.f32 %v1523_v47, %v1522_v41 }
 0x961   :  { %v1525_v43 = vrot.slane %v1524_v42, 1 }
 0x963   :  { %v1526_v44 = vadd.f32 %v1525_v43, %v1524_v42 }
 0x965   :  { %3857 = vpush %v1526_v44 }
 0x996   :  { %s3858_s27 = spop %3857 }
 0x997   :  { %v1528_v45 = vstv %s3858_s27 }
 0x998   :  { %v1529_v4 = vsub.f32 256.0, %v1528_v45 }
 0x99a   :  { %v1530_v46 = vmul.f32 0.003921569, %v1529_v4 }
 0x99c   :  { %v4633_v52 = vfloor.f32 %v1530_v46 }
 0x99e   :  { %v1532_v55 = vmax.f32 %v4633_v52, 1.0  ;;  %v1533_v22 = vmul.f32 0.5, %v4633_v52 }
 0x9a0   :  { %3919 = vrcp.f32 %v1532_v55  ;;  %v1534_v56 = vfloor.f32 %v1533_v22 }
 0x9a2   :  { %v1535_v48 = vadd.f32 %v1534_v56, %v1506_v15  ;;  %v1536_v50 = vadd.f32 %v1534_v56, %v1507_v0 }
 0x9aa   :  { %v3920_v18 = vpop.eup %3919 }
 0x9ab   :  { %v1538_v51 = vmul.f32 %v3920_v18, %v1535_v48  ;;  %v1539_v49 = vmul.f32 %v3920_v18, %v1536_v50 }
 0x9ad   :  { %v1540_v53 = vfloor.f32 %v1538_v51  ;;  %v1541_v54 = vfloor.f32 %v1539_v49 }
 0x9af   :  { %v1542_v57 = vmul.f32 %v1540_v53, %v1532_v55  ;;  %v1543_v58 = vmul.f32 %v1541_v54, %v1532_v55  ;;  %v3429_v62 = vadd.f32 -1.0, %v1540_v53  ;;  %v3430_v32 = vadd.f32 -1.0, %v1541_v54 }
 0x9b1   :  { %v1544_v60 = vsub.f32 %v1535_v48, %v1542_v57  ;;  %v1545_v61 = vsub.f32 %v1536_v50, %v1543_v58 }
 0x9b3   :  { %vm1546_vm5 = vcmp.lt.f32.partialorder %v1544_v60, 0.0  ;;  %vm1547_vm3 = vcmp.lt.f32.partialorder %v1545_v61, 0.0  ;;  %vm1552_vm6 = vcmp.ge.f32.partialorder %v1544_v60, %v1532_v55  ;;  %vm1553_vm1 = vcmp.ge.f32.partialorder %v1545_v61, %v1532_v55 }
 0x9b4   :  { %v1550_v63 = vsel %vm1546_vm5, %v3429_v62, %v1540_v53  ;;  %v1551_v3 = vsel %vm1547_vm3, %v3430_v32, %v1541_v54 }
 0x9b5   :  { %v1554_v10 = vadd.f32 1.0, %v1550_v63  ;;  %v1555_v5 = vadd.f32 1.0, %v1551_v3 }
 0x9b7   :  { %v1556_v2 = vsel %vm1552_vm6, %v1554_v10, %v1550_v63  ;;  %v1557_v13 = vsel %vm1553_vm1, %v1555_v5, %v1551_v3 }
 0x9b8   :  { %v1558_v29 = vmax.f32 %v1556_v2, 0.0  ;;  %v1559_v11 = vmax.f32 %v1557_v13, 0.0 }
 0x9ba   :  { %v1560_v7 = vmin.f32 %v1558_v29, 255.0  ;;  %v1561_v35 = vmin.f32 %v1559_v11, 255.0 }
 0x9bc   :  { %v1562_v14 = vsel %vm4397_vm7, 0.0, %v1560_v7  ;;  %vm1565_vm7 = vcmp.ge.f32.partialorder %v4633_v52, 0.5  ;;  %v3921_v52 = vld [vmem:[%s5326_s3] sm:$0x3] }
 0x9bd   :  { %v1564_v15 = vpack.c.bf16 %v1561_v35, %v1562_v14 }
 0x9bf   :  { %3690 = vmatmul.mubr.msk.bf16.vlgmr.msra.gmra.mrb[28].mxu1 %vm708_vm14, %v1564_v15 }
 0x9c0   :  { %3694 = vmatpush3.bf16.msk.msra.mxu1 %vm4496_vm4, %v3975_v26  ;;  %3695 = vmatprep.mubr.msk.bf16.mxu1 %vm3974_vm10, %v3973_v6  ;;  %vm5377_vm10 = vcmp.eq.f32.partialorder %v4481_v31, %v4191_v17 }
 0x9c1   :  { %v1314_v19 = vsel %vm5377_vm10, 1.0, %v3973_v6 }
 0x9c7   :  { %3696 = vmatmul.mubr.msk.bf16.vlgmr.msra.gmra.mrb[32].mxu1 %vm708_vm14, %v1564_v15  ;;  %vm1688_vm14 = vcmask 1043456  }
 0xa92   :  { %v1603_v23 = vpop.f32.mrb[28].mxu1 }
 0xa93   :  { %v3691_v0 = vpop.f32.mrb[29].mxu1  ;;  %v1610_v27 = vmul.f32 %v1603_v23, %v1280_v21 }
 0xa94   :  { %v1606_v25 = vpop.f32.mrb[30].mxu1 }
 0xa95   :  { %v1611_v26 = vmul.f32 %v1606_v25, %v1281_v59  ;;  %v3692_v30 = vpop.f32.mrb[31].mxu1 }
 0xa97   :  { %v1612_v24 = vadd.f32 %v1611_v26, %v1610_v27 }
 0xa99   :  { %v1613_v20 = vrot.slane %v1612_v24, 4 }
 0xa9a   :  { %v1656_v34 = vpop.f32.mrb[32].mxu1 }
 0xa9b   :  { %v1614_v8 = vadd.f32 %v1613_v20, %v1612_v24  ;;  %v3697_v36 = vpop.f32.mrb[33].mxu1  ;;  %v1663_v39 = vmul.f32 %v1656_v34, %v1313_v33 }
 0xa9c   :  { %v1659_v37 = vpop.f32.mrb[34].mxu1 }
 0xa9d   :  { %v1615_v38 = vrot.slane %v1614_v8, 2  ;;  %v1664_v12 = vmul.f32 %v1659_v37, %v1314_v19  ;;  %v3698_v40 = vpop.f32.mrb[35].mxu1 }
 0xa9f   :  { %v1616_v41 = vadd.f32 %v1615_v38, %v1614_v8  ;;  %v1665_v47 = vadd.f32 %v1664_v12, %v1663_v39 }
 0xaa1   :  { %v1617_v42 = vrot.slane %v1616_v41, 1  ;;  %v1666_v43 = vrot.slane %v1665_v47, 4 }
 0xaa3   :  { %v1618_v44 = vadd.f32 %v1617_v42, %v1616_v41  ;;  %v1667_v16 = vadd.f32 %v1666_v43, %v1665_v47 }
 0xaa5   :  { %v1621_v45 = vsel %vm1565_vm7, %v1618_v44, %v4179_v9  ;;  %v1668_v4 = vrot.slane %v1667_v16, 2 }
 0xaa6   :  { %v1674_v55 = vrot.slane %v1621_v45, 4 }
 0xaa7   :  { %v1669_v17 = vadd.f32 %v1668_v4, %v1667_v16 }
 0xaa9   :  { %v1670_v6 = vrot.slane %v1669_v17, 1 }
 0xaab   :  { %v1671_v31 = vadd.f32 %v1670_v6, %v1669_v17 }
 0xaad   :  { %v1672_v46 = vsel %vm1565_vm7, %v1671_v31, %v4179_v9 }
 0xaae   :  { %v1677_v22 = vrot.slane %v1672_v46, 4 }
 0xab0   :  { %v1679_v56 = vsel %vm866_vm8, %v1674_v55, %v1677_v22 }
 0xab1   :  { %v1684_v48 = vrot.slane %v1679_v56, 4 }
 0xab3   :  { %v1689_v50 = vsel %vm1688_vm14, %v4631_v28, %v1684_v48 }
 0xab4   :  { %v1690_v18 = vtrunc.f32 %v1689_v50 }
 0xab6   :  { %v1691_v51 = vpack.c.f32.eXmY %v1690_v18, %v1690_v18, 56 }
 0xab8   :  { %v1695_v49 = vpack.c.b8 %v1691_v51, %v1691_v51 }
 0xaba   :  { %v1697_v53 = vsel %vm4015_vm2, %v1695_v49, %v3921_v52 }
 0xabb   :  { %1698 = vst [vmem:[%s5326_s3] sm:$0x3] %v1697_v53 }
 0xabc PF:  { %s4675_s5 = sld [smem:[#allocation2 + $0x1]] }
 0xabd   :  { %s4677_s6 = sld [smem:[#allocation4 + $0x1]] }
 0xac2   :  { %p3439_p5 = scmp.ne.s32.totalorder %s4675_s5, 1 }
 0xac3   :  { %v1706_v9 = vld [vmem:[%s5326_s3] sm:$0x3] (!%p3439_p5)  ;;  %s1710_s9 = sadd.f32 (!%p3439_p5), 1.0, %s4677_s6 }
 0xac4   :  { %1705 = sbr.rel (%p3439_p5) target bundleno = 2776 (0xad8), region = 57  ;;  %v1707_v28 = vunpack.c.0.s8 (!%p3439_p5), %v1706_v9 }
 0xac5   :  { %v1711_v57 = vstv (!%p3439_p5), %s1710_s9 }
 0xac6   :  { %v1708_v54 = vand.u32 (!%p3439_p5), 255, %v1707_v28 }
 0xac8   :  { %v1709_v58 = vcvt.s32.f32 (!%p3439_p5), %v1708_v54 }
 0xaca   :  { %v1712_v60 = vmul.f32 (!%p3439_p5), %v1711_v57, %v1709_v58 }
 0xacc   :  { %v1713_v61 = vmax.f32 %v1712_v60, 0.0 }
 0xace   :  { %v1714_v62 = vmin.f32 %v1713_v61, 255.0 }
 0xad0   :  { %v1715_v32 = vtrunc.f32 %v1714_v62 }
 0xad2   :  { %v1716_v63 = vpack.c.f32.eXmY %v1715_v32, %v1715_v32, 56 }
 0xad4   :  { %v1720_v3 = vpack.c.b8 %v1716_v63, %v1716_v63 }
 0xad6   :  { %v1722_v10 = vsel %vm4015_vm2, %v1720_v3, %v1706_v9 }
 0xad7   :  { %1723 = vst [vmem:[%s5326_s3] sm:$0x3] %v1722_v10 }
 0xad8 PF:  { %p3440_p6 = scmp.ne.s32.totalorder %s4675_s5, 2 }
 0xad9   :  { %s1732_s14 = sadd.f32 (!%p3440_p6), 1.0, %s4677_s6  ;;  %vm1766_vm8 = vcmask (!%p3440_p6), 1043456   ;;  %vm5378_vm11 = vcmask (!%p3440_p6), 1041408  }
 0xada   :  { %1727 = sbr.rel (%p3440_p6) target bundleno = 2819 (0xb03), region = 61 }
 0xadb   :  { %s1747_s15 = ssub.f32 (!%p3440_p6), 1.0, %s1732_s14  ;;  %v1745_v23 = vstv (!%p3440_p6), %s1732_s14 }
 0xadd   :  { %v1748_v0 = vstv (!%p3440_p6), %s1747_s15 }
 0xade   :  { %v1728_v5 = vld [vmem:[%s5326_s3] sm:$0x3] (!%p3440_p6) }
 0xadf   :  { %v1729_v2 = vunpack.c.0.s8 (!%p3440_p6), %v1728_v5 }
 0xae1   :  { %v1730_v13 = vand.u32 255, %v1729_v2 }
 0xae3   :  { %v1731_v29 = vcvt.s32.f32 %v1730_v13 }
 0xae5   :  { %v1733_v11 = vmul.f32 0.2989, %v1731_v29  ;;  %v1734_v7 = vmul.f32 0.587, %v1731_v29  ;;  %v1739_v35 = vmul.f32 0.114, %v1731_v29  ;;  %v1746_v27 = vmul.f32 %v1745_v23, %v1731_v29 }
 0xae7   :  { %v1736_v14 = vrot.slane %v1734_v7, 2  ;;  %v1741_v15 = vrot.slane %v1739_v35, 4 }
 0xae9   :  { %v1738_v21 = vadd.f32 %v1736_v14, %v1733_v11 }
 0xaeb   :  { %v1743_v59 = vadd.f32 %v1741_v15, %v1738_v21 }
 0xaed   :  { %v1744_v25 = vfloor.f32 %v1743_v59 }
 0xaef   :  { %v1749_v26 = vmul.f32 %v1748_v0, %v1744_v25 }
 0xaf1   :  { %v1750_v30 = vadd.f32 %v1749_v26, %v1746_v27  ;;  %v1754_v24 = vrot.slane %v1749_v26, 6  ;;  %v1759_v20 = vrot.slane %v1749_v26, 4 }
 0xaf3   :  { %v1751_v33 = vmax.f32 %v1750_v30, 0.0  ;;  %v1756_v34 = vadd.f32 %v1754_v24, %v1746_v27  ;;  %v1761_v19 = vadd.f32 %v1759_v20, %v1746_v27 }
 0xaf5   :  { %v1752_v8 = vmin.f32 %v1751_v33, 255.0  ;;  %v1757_v36 = vmax.f32 %v1756_v34, 0.0  ;;  %v1762_v37 = vmax.f32 %v1761_v19, 0.0 }
 0xaf7   :  { %v1758_v38 = vmin.f32 %v1757_v36, 255.0  ;;  %v1763_v39 = vmin.f32 %v1762_v37, 255.0 }
 0xaf9   :  { %v1765_v12 = vsel %vm5378_vm11, %v1752_v8, %v1758_v38 }
 0xafa   :  { %v1767_v40 = vsel %vm1766_vm8, %v1765_v12, %v1763_v39 }
 0xafb   :  { %v1768_v41 = vtrunc.f32 %v1767_v40 }
 0xafd   :  { %v1769_v47 = vpack.c.f32.eXmY %v1768_v41, %v1768_v41, 56 }
 0xaff   :  { %v1773_v42 = vpack.c.b8 %v1769_v47, %v1769_v47 }
 0xb01   :  { %v1775_v43 = vsel %vm4015_vm2, %v1773_v42, %v1728_v5 }
 0xb02   :  { %1776 = vst [vmem:[%s5326_s3] sm:$0x3] %v1775_v43 }
 0xb03 PF:  { %p3441_p7 = scmp.ne.s32.totalorder %s4675_s5, 3 }
 0xb04   :  { %vm5379_vm4 = vcmask (!%p3441_p7), 1041408   ;;  %s1785_s19 = sadd.f32 (!%p3441_p7), 1.0, %s4677_s6 }
 0xb05   :  { %1780 = sbr.rel (%p3441_p7) target bundleno = 3066 (0xbfa), region = 65 }
 0xb06   :  { %s1814_s20 = ssub.f32 (!%p3441_p7), 1.0, %s1785_s19  ;;  %v1812_v54 = vstv (!%p3441_p7), %s1785_s19 }
 0xb08   :  { %v1815_v58 = vstv (!%p3441_p7), %s1814_s20 }
 0xb09   :  { %v1781_v44 = vld [vmem:[%s5326_s3] sm:$0x3] (!%p3441_p7) }
 0xb0a   :  { %v1782_v16 = vunpack.c.0.s8 (!%p3441_p7), %v1781_v44 }
 0xb0c   :  { %v1783_v45 = vand.u32 255, %v1782_v16 }
 0xb0e   :  { %v1784_v4 = vcvt.s32.f32 %v1783_v45 }
 0xb10   :  { %v1786_v17 = vmul.f32 0.2989, %v1784_v4  ;;  %v1787_v6 = vmul.f32 0.587, %v1784_v4  ;;  %v1792_v31 = vmul.f32 0.114, %v1784_v4  ;;  %v1813_v61 = vmul.f32 %v1812_v54, %v1784_v4 }
 0xb12   :  { %v1789_v46 = vrot.slane %v1787_v6, 2  ;;  %v1794_v55 = vrot.slane %v1792_v31, 4 }
 0xb14   :  { %v1791_v22 = vadd.f32 %v1789_v46, %v1786_v17 }
 0xb16   :  { %v1796_v56 = vadd.f32 %v1794_v55, %v1791_v22 }
 0xb18   :  { %v1797_v48 = vfloor.f32 %v1796_v56 }
 0xb1a   :  { %v1799_v50 = vsel %vm5379_vm4, %v1797_v48, 0.0 }
 0xb1b   :  { %1800 = vadd.xlane.f32.xlu0 %v1799_v50 }
 0xba8   :  { %v1801_v18 = vpop.xlane.xlu0 %1800 }
 0xba9   :  { %v1802_v51 = vrot.slane %v1801_v18, 4 }
 0xbab   :  { %v1803_v49 = vadd.f32 %v1802_v51, %v1801_v18 }
 0xbad   :  { %v1804_v52 = vrot.slane %v1803_v49, 2 }
 0xbaf   :  { %v1805_v53 = vadd.f32 %v1804_v52, %v1803_v49 }
 0xbb1   :  { %v1806_v9 = vrot.slane %v1805_v53, 1 }
 0xbb3   :  { %v1807_v28 = vadd.f32 %v1806_v9, %v1805_v53 }
 0xbb5   :  { %3859 = vpush %v1807_v28 }
 0xbe6   :  { %s3860_s0 = spop %3859 }
 0xbe7   :  { %v1809_v57 = vstv %s3860_s0 }
 0xbe8   :  { %v1811_v60 = vmul.f32 0.00390625, %v1809_v57 }
 0xbea   :  { %v1816_v62 = vmul.f32 %v1815_v58, %v1811_v60 }
 0xbec   :  { %v1817_v32 = vadd.f32 %v1816_v62, %v1813_v61 }
 0xbee   :  { %v1818_v63 = vmax.f32 %v1817_v32, 0.0 }
 0xbf0   :  { %v1819_v3 = vmin.f32 %v1818_v63, 255.0 }
 0xbf2   :  { %v1820_v10 = vtrunc.f32 %v1819_v3 }
 0xbf4   :  { %v1821_v5 = vpack.c.f32.eXmY %v1820_v10, %v1820_v10, 56 }
 0xbf6   :  { %v1825_v2 = vpack.c.b8 %v1821_v5, %v1821_v5 }
 0xbf8   :  { %v1827_v13 = vsel %vm4015_vm2, %v1825_v2, %v1781_v44 }
 0xbf9   :  { %1828 = vst [vmem:[%s5326_s3] sm:$0x3] %v1827_v13 }
 0xbfa PF:  { %p3442_p8 = scmp.ne.s32.totalorder %s4675_s5, 4 }
 0xbfb   :  { %v1838_v11 = vlaneseq (!%p3442_p8)  ;;  %s3976_s26 = smov (!%p3442_p8), 1   ;;  %s3977_s24 = smov (!%p3442_p8), 127   ;;  %vm1885_vm14 = vcmask (!%p3442_p8), 1040384   ;;  %vm1891_vm8 = vcmask (!%p3442_p8), 1044480   ;;  %v3980_v31 = vmov (!%p3442_p8), 1.0  }
 0xbfc   :  { %1832 = sbr.rel (%p3442_p8) target bundleno = 3349 (0xd15), region = 69  ;;  %s3978_s2 = smov (!%p3442_p8), 16  }
 0xbfd   :  { %v1839_v35 = vand.u32 (!%p3442_p8), 127, %v1838_v11  ;;  %v1842_v14 = vshrl.u32 (!%p3442_p8), %v1838_v11, 7  ;;  %s3979_s27 = smov (!%p3442_p8), 112   ;;  %s1837_s28 = sadd.f32 (!%p3442_p8), 1.0, %s4677_s6 }
 0xbff   :  { %v1840_v21 = vcvt.s32.f32 (!%p3442_p8), %v1839_v35  ;;  %v1843_v23 = vcvt.s32.f32 (!%p3442_p8), %v1842_v14  ;;  %s1904_s29 = ssub.f32 (!%p3442_p8), 1.0, %s1837_s28 }
 0xc00   :  { %v4715_v29 = vld [vmem:[%s5326_s3] sm:$0x3] (!%p3442_p8) }
 0xc01   :  { %v1834_v7 = vunpack.c.0.s8 (!%p3442_p8), %v4715_v29  ;;  %v1848_v0 = vmul.f32 (!%p3442_p8), 0.5, %v1843_v23  ;;  %v1844_v25 = vmul.f32 (!%p3442_p8), 0.0625, %v1840_v21  ;;  %vm1866_vm9 = vcmp.ge.f32.partialorder (!%p3442_p8), %v1840_v21, 112.0 }
 0xc02   :  { %vm1856_vm6 = vcmp.lt.f32.partialorder (!%p3442_p8), %v1840_v21, 16.0  ;;  %v1905_v55 = vstv (!%p3442_p8), %s1904_s29 }
 0xc03   :  { %v1835_v15 = vand.u32 255, %v1834_v7  ;;  %v1849_v27 = vfloor.f32 %v1848_v0  ;;  %v1845_v26 = vfloor.f32 %v1844_v25 }
 0xc05   :  { %v1836_v59 = vcvt.s32.f32 %v1835_v15  ;;  %v1850_v30 = vmul.f32 2.0, %v1849_v27  ;;  %v1846_v24 = vmul.f32 16.0, %v1845_v26 }
 0xc07   :  { %1874 = vrot.lane.b32.xlu0 %v1836_v59, %s3976_s26  ;;  %v1851_v20 = vsub.f32 %v1843_v23, %v1850_v30  ;;  %v1847_v33 = vsub.f32 %v1840_v21, %v1846_v24  ;;  %v1901_v45 = vmul.f32 4.0, %v1836_v59 }
 0xc09   :  { %vm1865_vm12 = vcmp.eq.f32.partialorder %v1851_v20, 1.0  ;;  %vm1852_vm13 = vcmp.eq.f32.partialorder %v1847_v33, 0.0  ;;  %vm1853_vm0 = vcmp.eq.f32.partialorder %v1847_v33, 15.0  ;;  %vm1855_vm15 = vcmp.eq.f32.partialorder %v1851_v20, 0.0 }
 0xc0a   :  { %vm1871_vm5 = vmand %vm1865_vm12, %vm1866_vm9 }
 0xc0b   :  { %1877 = vrot.lane.b32.xlu0 %v1836_v59, %s3977_s24  ;;  %vm1854_vm3 = vmor %vm1852_vm13, %vm1853_vm0 }
 0xc0c   :  { %vm1861_vm1 = vmand %vm1855_vm15, %vm1856_vm6 }
 0xc0d   :  { %vm1864_vm10 = vmor %vm1854_vm3, %vm1861_vm1 }
 0xc0e   :  { %vm4720_vm7 = vmor %vm1864_vm10, %vm1871_vm5 }
 0xc0f   :  { %v1873_v46 = vsel %vm4720_vm7, 0.0, %v3980_v31 }
 0xc10   :  { %v1906_v56 = vmul.f32 %v1905_v55, %v1873_v46 }
 0xc79   :  { %v1875_v19 = vpop.permute.xlu0 %1874 }
 0xc7a   :  { %v1876_v8 = vadd.f32 %v1875_v19, %v1836_v59 }
 0xc7d   :  { %v1878_v36 = vpop.permute.xlu0 %1877 }
 0xc7e   :  { %v1879_v37 = vadd.f32 %v1878_v36, %v1876_v8 }
 0xc80   :  { %v1881_v38 = vrot.slane %v1879_v37, 5  ;;  %v1883_v39 = vrot.slane %v1879_v37, 7  ;;  %v1887_v12 = vrot.slane %v1879_v37, 1  ;;  %v1889_v40 = vrot.slane %v1879_v37, 3 }
 0xc82   :  { %v1886_v41 = vsel %vm1885_vm14, %v1881_v38, %v1883_v39  ;;  %v1892_v42 = vsel %vm1891_vm8, %v1887_v12, %v1889_v40 }
 0xc83   :  { %v1893_v47 = vsel %vm1866_vm9, %v1886_v41, %v1879_v37  ;;  %v1894_v43 = vsel %vm1856_vm6, %v1892_v42, %v1879_v37 }
 0xc84   :  { %1895 = vrot.lane.b32.xlu1 %v1893_v47, %s3978_s2 }
 0xc88   :  { %1897 = vrot.lane.b32.xlu1 %v1894_v43, %s3979_s27 }
 0xcf6   :  { %v1896_v44 = vpop.permute.xlu1 %1895 }
 0xcf7   :  { %v1899_v16 = vadd.f32 %v1896_v44, %v1879_v37 }
 0xcfa   :  { %v1898_v4 = vpop.permute.xlu1 %1897 }
 0xcfb   :  { %v1900_v17 = vadd.f32 %v1899_v16, %v1898_v4 }
 0xcfd   :  { %v1902_v6 = vadd.f32 %v1901_v45, %v1900_v17 }
 0xcff   :  { %v1903_v22 = vmul.f32 0.07692308, %v1902_v6 }
 0xd01   :  { %v3861_v48 = vround.rtne.f32 %v1903_v22 }
 0xd03   :  { %v1908_v50 = vsub.f32 %v3861_v48, %v1836_v59 }
 0xd05   :  { %v1909_v18 = vmul.f32 %v1908_v50, %v1906_v56 }
 0xd07   :  { %v1910_v51 = vadd.f32 %v1909_v18, %v1836_v59 }
 0xd09   :  { %v1911_v49 = vmax.f32 %v1910_v51, 0.0 }
 0xd0b   :  { %v1912_v52 = vmin.f32 %v1911_v49, 255.0 }
 0xd0d   :  { %v1913_v53 = vtrunc.f32 %v1912_v52 }
 0xd0f   :  { %v1914_v9 = vpack.c.f32.eXmY %v1913_v53, %v1913_v53, 56 }
 0xd11   :  { %v1918_v28 = vpack.c.b8 %v1914_v9, %v1914_v9 }
 0xd13   :  { %v1920_v54 = vsel %vm4015_vm2, %v1918_v28, %v4715_v29 }
 0xd14   :  { %1921 = vst [vmem:[%s5326_s3] sm:$0x3] %v1920_v54 }
 0xd15 PF:  { %p3443_p9 = scmp.ne.s32.totalorder %s4675_s5, 5 }
 0xd16   :  { %p3862_p10 = scmp.lt.s32.totalorder (!%p3443_p9), %s4677_s6, 0  ;;  %s3863_s7 = sceil.f32 (!%p3443_p9), %s4677_s6 }
 0xd17   :  { %1925 = sbr.rel (%p3443_p9) target bundleno = 3442 (0xd72), region = 73  ;;  %s3864_s8 = sfloor.f32 (!%p3443_p9), %s4677_s6 }
 0xd18   :  { %s3981_s11 = smov (!%p3443_p9), 1  }
 0xd1b   :  { %v1926_v60 = vld [vmem:[%s5326_s3] sm:$0x3] (!%p3443_p9) }
 0xd1c   :  { %v1927_v61 = vunpack.c.0.s8 (!%p3443_p9), %v1926_v60 }
 0xd1e   :  { %s5420_s7 = smov (!%p3862_p10, %s3863_s7), %s3864_s8  ;;  %v1928_v62 = vand.u32 255, %v1927_v61 }
 0xd1f   :  { %s3866_s9 = scvt.f32.s32 %s5420_s7 }
 0xd20   :  { %v1929_v32 = vcvt.s32.f32 %v1928_v62 }
 0xd21   :  { %s1931_s10 = ssub.s32 8, %s3866_s9 }
 0xd22   :  { %s1932_s12 = sshll.u32 %s3981_s11, %s1931_s10 }
 0xd23   :  { %s1933_s13 = scvt.s32.f32 %s1932_s12 }
 0xd25   :  { %v1934_v57 = vstv %s1933_s13 }
 0xd26   :  { %3922 = vrcp.f32 %v1934_v57 }
 0xd30   :  { %v3923_v58 = vpop.eup %3922 }
 0xd31   :  { %3867 = vpush %v3923_v58 }
 0xd62   :  { %s3868_s16 = spop %3867 }
 0xd63   :  { %v1937_v63 = vstv %s3868_s16 }
 0xd64   :  { %v1938_v3 = vmul.f32 %v1937_v63, %v1929_v32 }
 0xd66   :  { %v1939_v10 = vfloor.f32 %v1938_v3 }
 0xd68   :  { %v1941_v5 = vmul.f32 %v1939_v10, %v1934_v57 }
 0xd6a   :  { %v1942_v2 = vtrunc.f32 %v1941_v5 }
 0xd6c   :  { %v1943_v13 = vpack.c.f32.eXmY %v1942_v2, %v1942_v2, 56 }
 0xd6e   :  { %v1947_v29 = vpack.c.b8 %v1943_v13, %v1943_v13 }
 0xd70   :  { %v1949_v11 = vsel %vm4015_vm2, %v1947_v29, %v1926_v60 }
 0xd71   :  { %1950 = vst [vmem:[%s5326_s3] sm:$0x3] %v1949_v11 }
 0xd72 PF:  { %p3444_p11 = scmp.ne.s32.totalorder %s4675_s5, 6 }
 0xd73   :  { %v1959_v15 = vstv (!%p3444_p11), %s4677_s6 }
 0xd74   :  { %1954 = sbr.rel (%p3444_p11) target bundleno = 3466 (0xd8a), region = 77 }
 0xd78   :  { %v1955_v7 = vld [vmem:[%s5326_s3] sm:$0x3] (!%p3444_p11) }
 0xd79   :  { %v1956_v35 = vunpack.c.0.s8 (!%p3444_p11), %v1955_v7 }
 0xd7b   :  { %v1957_v14 = vand.u32 255, %v1956_v35 }
 0xd7d   :  { %v1958_v21 = vcvt.s32.f32 %v1957_v14 }
 0xd7f   :  { %vm1960_vm11 = vcmp.ge.f32.partialorder %v1958_v21, %v1959_v15  ;;  %v1961_v23 = vsub.f32 255.0, %v1958_v21 }
 0xd81   :  { %v1962_v59 = vsel %vm1960_vm11, %v1961_v23, %v1958_v21 }
 0xd82   :  { %v1963_v0 = vtrunc.f32 %v1962_v59 }
 0xd84   :  { %v1964_v25 = vpack.c.f32.eXmY %v1963_v0, %v1963_v0, 56 }
 0xd86   :  { %v1968_v27 = vpack.c.b8 %v1964_v25, %v1964_v25 }
 0xd88   :  { %v1970_v26 = vsel %vm4015_vm2, %v1968_v27, %v1955_v7 }
 0xd89   :  { %1971 = vst [vmem:[%s5326_s3] sm:$0x3] %v1970_v26 }
 0xd8a PF:  { %p3445_p12 = scmp.ne.s32.totalorder %s4675_s5, 7 }
 0xd8b   :  { %vm2014_vm4 = vcmask (!%p3445_p12), 1043458   ;;  %vm5382_vm9 = vcmask (!%p3445_p12), 1041408   ;;  %vm2048_vm13 = vcmask (!%p3445_p12), 1045508   ;;  %vm2083_vm3 = vcmask (!%p3445_p12), 1043456  }
 0xd8c   :  { %1975 = sbr.rel (%p3445_p12) target bundleno = 3726 (0xe8e), region = 81  ;;  %vm5383_vm12 = vmmov (!%p3445_p12), %vm5382_vm9 }
 0xd8d   :  { %vm5390_vm6 = vmmov (!%p3445_p12), %vm5382_vm9 }
 0xd90   :  { %v4761_v30 = vld [vmem:[%s5326_s3] sm:$0x3] (!%p3445_p12) }
 0xd91   :  { %v1977_v24 = vunpack.c.0.s8 (!%p3445_p12), %v4761_v30 }
 0xd93   :  { %v1978_v20 = vand.u32 255, %v1977_v24 }
 0xd95   :  { %v4764_v33 = vcvt.s32.f32 %v1978_v20 }
 0xd97   :  { %v2015_v34 = vsel %vm2014_vm4, %v4764_v33, inf  ;;  %v1981_v19 = vsel %vm5382_vm9, %v4764_v33, inf  ;;  %v2026_v8 = vsel %vm2014_vm4, %v4764_v33, -inf  ;;  %v1992_v36 = vsel %vm5383_vm12, %v4764_v33, -inf }
 0xd98   :  { %2016 = vmin.xlane.f32.xlu1 %v2015_v34  ;;  %1982 = vmin.xlane.f32.xlu0 %v1981_v19  ;;  %v2060_v37 = vsel %vm2048_vm13, %v4764_v33, -inf  ;;  %v2049_v38 = vsel %vm2048_vm13, %v4764_v33, inf }
 0xd9c   :  { %2027 = vmax.xlane.f32.xlu1 %v2026_v8  ;;  %1993 = vmax.xlane.f32.xlu0 %v1992_v36 }
 0xda0   :  { %2061 = vmax.xlane.f32.xlu1 %v2060_v37  ;;  %2050 = vmin.xlane.f32.xlu0 %v2049_v38 }
 0xe25   :  { %v2017_v39 = vpop.xlane.xlu1 %2016  ;;  %v1983_v12 = vpop.xlane.xlu0 %1982 }
 0xe26   :  { %v2018_v40 = vrot.slane %v2017_v39, 4  ;;  %v1984_v41 = vrot.slane %v1983_v12, 4 }
 0xe28   :  { %v2019_v47 = vmin.f32 %v2017_v39, %v2018_v40  ;;  %v1985_v42 = vmin.f32 %v1983_v12, %v1984_v41 }
 0xe29   :  { %v2028_v43 = vpop.xlane.xlu1 %2027  ;;  %v1994_v44 = vpop.xlane.xlu0 %1993 }
 0xe2a   :  { %v2020_v16 = vrot.slane %v2019_v47, 2  ;;  %v1986_v45 = vrot.slane %v1985_v42, 2  ;;  %v2029_v4 = vrot.slane %v2028_v43, 4  ;;  %v1995_v17 = vrot.slane %v1994_v44, 4 }
 0xe2c   :  { %v2030_v6 = vmax.f32 %v2028_v43, %v2029_v4  ;;  %v1996_v31 = vmax.f32 %v1994_v44, %v1995_v17  ;;  %v1987_v46 = vmin.f32 %v1985_v42, %v1986_v45  ;;  %v2021_v56 = vmin.f32 %v2019_v47, %v2020_v16 }
 0xe2d   :  { %v2062_v55 = vpop.xlane.xlu1 %2061  ;;  %v2051_v22 = vpop.xlane.xlu0 %2050 }
 0xe2e   :  { %v2031_v48 = vrot.slane %v2030_v6, 2  ;;  %v1997_v50 = vrot.slane %v1996_v31, 2  ;;  %v2063_v18 = vrot.slane %v2062_v55, 4  ;;  %v2052_v51 = vrot.slane %v2051_v22, 4 }
 0xe2f   :  { %v1988_v49 = vrot.slane %v1987_v46, 1  ;;  %v2022_v57 = vrot.slane %v2021_v56, 1 }
 0xe30   :  { %v2064_v52 = vmax.f32 %v2062_v55, %v2063_v18  ;;  %v2053_v53 = vmin.f32 %v2051_v22, %v2052_v51  ;;  %v1998_v9 = vmax.f32 %v1996_v31, %v1997_v50  ;;  %v2032_v28 = vmax.f32 %v2030_v6, %v2031_v48 }
 0xe31   :  { %v1989_v54 = vmin.f32 %v1987_v46, %v1988_v49  ;;  %v2023_v5 = vmin.f32 %v2021_v56, %v2022_v57 }
 0xe32   :  { %v2065_v58 = vrot.slane %v2064_v52, 2  ;;  %v2054_v60 = vrot.slane %v2053_v53, 2  ;;  %v1999_v61 = vrot.slane %v1998_v9, 1  ;;  %v2033_v62 = vrot.slane %v2032_v28, 1 }
 0xe33   :  { %3869 = vpush %v1989_v54 }
 0xe34   :  { %v2066_v32 = vmax.f32 %v2064_v52, %v2065_v58  ;;  %v2055_v63 = vmin.f32 %v2053_v53, %v2054_v60  ;;  %v2000_v3 = vmax.f32 %v1998_v9, %v1999_v61  ;;  %v2034_v10 = vmax.f32 %v2032_v28, %v2033_v62 }
 0xe36   :  { %3871 = vpush %v2000_v3  ;;  %v2056_v2 = vrot.slane %v2055_v63, 1  ;;  %v2067_v13 = vrot.slane %v2066_v32, 1 }
 0xe37   :  { %3873 = vpush %v2023_v5 }
 0xe38   :  { %3875 = vpush %v2034_v10  ;;  %v2057_v29 = vmin.f32 %v2055_v63, %v2056_v2  ;;  %v2068_v11 = vmax.f32 %v2066_v32, %v2067_v13 }
 0xe3a   :  { %3877 = vpush %v2057_v29 }
 0xe3b   :  { %3879 = vpush %v2068_v11 }
 0xe64   :  { %s3870_s21 = spop %3869 }
 0xe65   :  { %v1991_v7 = vstv %s3870_s21 }
 0xe67   :  { %s3872_s22 = spop %3871 }
 0xe68   :  { %v2002_v35 = vstv %s3872_s22  ;;  %s3874_s23 = spop %3873 }
 0xe69   :  { %vm4774_vm0 = vcmp.eq.f32.partialorder %v2002_v35, %v1991_v7  ;;  %v2004_v15 = vsub.f32 %v2002_v35, %v1991_v7  ;;  %v2025_v21 = vstv %s3874_s23  ;;  %s3876_s26 = spop %3875 }
 0xe6a   :  { %v2036_v23 = vstv %s3876_s26  ;;  %v2009_v8 = vsel %vm4774_vm0, 0.0, %v1991_v7 }
 0xe6b   :  { %v2005_v59 = vsel %vm4774_vm0, 1.0, %v2004_v15  ;;  %vm4780_vm15 = vcmp.eq.f32.partialorder %v2036_v23, %v2025_v21  ;;  %v2038_v25 = vsub.f32 %v2036_v23, %v2025_v21  ;;  %s3878_s24 = spop %3877  ;;  %v2010_v12 = vsub.f32 %v4764_v33, %v2009_v8 }
 0xe6c   :  { %3924 = vrcp.f32 %v2005_v59  ;;  %v2059_v27 = vstv %s3878_s24  ;;  %s3880_s2 = spop %3879  ;;  %v2043_v38 = vsel %vm4780_vm15, 0.0, %v2025_v21 }
 0xe6d   :  { %v2039_v26 = vsel %vm4780_vm15, 1.0, %v2038_v25  ;;  %v2070_v24 = vstv %s3880_s2  ;;  %v2044_v42 = vsub.f32 %v4764_v33, %v2043_v38 }
 0xe6e   :  { %3926 = vrcp.f32 %v2039_v26  ;;  %vm4786_vm5 = vcmp.eq.f32.partialorder %v2070_v24, %v2059_v27  ;;  %v2072_v34 = vsub.f32 %v2070_v24, %v2059_v27 }
 0xe6f   :  { %v2077_v43 = vsel %vm4786_vm5, 0.0, %v2059_v27 }
 0xe70   :  { %v2073_v19 = vsel %vm4786_vm5, 1.0, %v2072_v34  ;;  %v2078_v6 = vsub.f32 %v4764_v33, %v2077_v43 }
 0xe71   :  { %3928 = vrcp.f32 %v2073_v19 }
 0xe76   :  { %v3925_v36 = vpop.eup %3924 }
 0xe77   :  { %v2007_v37 = vmul.f32 255.0, %v3925_v36 }
 0xe78   :  { %v3927_v39 = vpop.eup %3926 }
 0xe79   :  { %v2008_v40 = vsel %vm4774_vm0, 1.0, %v2007_v37  ;;  %v2041_v41 = vmul.f32 255.0, %v3927_v39 }
 0xe7a   :  { %v2011_v47 = vmul.f32 %v2010_v12, %v2008_v40 }
 0xe7b   :  { %v3929_v44 = vpop.eup %3928  ;;  %v2042_v16 = vsel %vm4780_vm15, 1.0, %v2041_v41 }
 0xe7c   :  { %v2012_v45 = vmax.f32 %v2011_v47, 0.0  ;;  %v2045_v4 = vmul.f32 %v2044_v42, %v2042_v16  ;;  %v2075_v17 = vmul.f32 255.0, %v3929_v44 }
 0xe7e   :  { %v2046_v31 = vmax.f32 %v2045_v4, 0.0  ;;  %v2076_v46 = vsel %vm4786_vm5, 1.0, %v2075_v17  ;;  %v2013_v22 = vmin.f32 %v2012_v45, 255.0 }
 0xe7f   :  { %v2079_v55 = vmul.f32 %v2078_v6, %v2076_v46 }
 0xe80   :  { %v2047_v56 = vmin.f32 %v2046_v31, 255.0 }
 0xe81   :  { %v2080_v48 = vmax.f32 %v2079_v55, 0.0 }
 0xe82   :  { %v2082_v18 = vsel %vm5390_vm6, %v2013_v22, %v2047_v56 }
 0xe83   :  { %v2081_v50 = vmin.f32 %v2080_v48, 255.0 }
 0xe85   :  { %v2084_v51 = vsel %vm2083_vm3, %v2082_v18, %v2081_v50 }
 0xe86   :  { %v2085_v49 = vtrunc.f32 %v2084_v51 }
 0xe88   :  { %v2086_v52 = vpack.c.f32.eXmY %v2085_v49, %v2085_v49, 56 }
 0xe8a   :  { %v2090_v53 = vpack.c.b8 %v2086_v52, %v2086_v52 }
 0xe8c   :  { %v2092_v33 = vsel %vm4015_vm2, %v2090_v53, %v4761_v30 }
 0xe8d   :  { %2093 = vst [vmem:[%s5326_s3] sm:$0x3] %v2092_v33 }
 0xe8e PF:  { %p3446_p13 = scmp.ne.s32.totalorder %s4675_s5, 8 }
 0xe8f   :  { %v2102_v28 = vlaneseq (!%p3446_p13)  ;;  %v3982_v54 = vmov (!%p3446_p13), 0.0   ;;  %vm3983_vm1 = vmmov (!%p3446_p13), 0   ;;  %v3984_v23 = vmov (!%p3446_p13), 1.0|1.0  }
 0xe90   :  { %2097 = sbr.rel (%p3446_p13) target bundleno = 5465 (0x1559), region = 85  ;;  %3699 = vmatprep.subr.bf16.mxu0 (!%p3446_p13), %v3982_v54  ;;  %3705 = vmatprep.subr.bf16.mxu1 (!%p3446_p13), %v3982_v54 }
 0xe91   :  { %3701 = vmatprep.mubr.msk.bf16.mxu0 (!%p3446_p13), %vm3983_vm1, %v3982_v54  ;;  %3707 = vmatprep.mubr.msk.bf16.mxu1 (!%p3446_p13), %vm3983_vm1, %v3982_v54  ;;  %v4825_v58 = vshrl.u32 (!%p3446_p13), %v2102_v28, 7 }
 0xe93   :  { %v2104_v62 = vadd.s32 (!%p3446_p13), 8, %v4825_v58  ;;  %v2153_v63 = vsub.s32 (!%p3446_p13), 1, %v4825_v58  ;;  %v2120_v3 = vsub.s32 (!%p3446_p13), 0, %v4825_v58  ;;  %v4837_v5 = vcvt.s32.f32 (!%p3446_p13), %v4825_v58 }
 0xe94   :  { %v2098_v9 = vld [vmem:[%s5326_s3] sm:$0x3] (!%p3446_p13)  ;;  %v2555_v50 = vsub.s32 (!%p3446_p13), 3, %v4825_v58  ;;  %v2522_v52 = vsub.s32 (!%p3446_p13), 2, %v4825_v58 }
 0xe95   :  { %v2099_v57 = vunpack.c.0.s8 (!%p3446_p13), %v2098_v9  ;;  %v4839_v2 = vcvt.s32.f32 (!%p3446_p13), %v2104_v62 }
 0xe97   :  { %v2100_v30 = vand.u32 255, %v2099_v57 }
 0xe99   :  { %v4827_v60 = vcvt.s32.f32 %v2100_v30 }
 0xe9b   :  { %v2114_v61 = vmul.f32 0.0625, %v4827_v60 }
 0xe9d   :  { %v4831_v32 = vfloor.f32 %v2114_v61 }
 0xe9f   :  { %v2116_v10 = vmul.f32 16.0, %v4831_v32  ;;  %v4842_v13 = vrot.slane %v4831_v32, %v2153_v63  ;;  %v4845_v29 = vrot.slane %v4831_v32, %v2120_v3  ;;  %v4955_v51 = vrot.slane %v4831_v32, %v2555_v50 }
 0xea0   :  { %v5000_v9 = vrot.slane %v4831_v32, %v2522_v52 }
 0xea1   :  { %v4848_v11 = vsub.f32 %v4827_v60, %v2116_v10  ;;  %vm2338_vm10 = vcmp.lt.f32.partialorder %v4842_v13, %v4837_v5  ;;  %vm2141_vm7 = vcmp.lt.f32.partialorder %v4845_v29, %v4837_v5  ;;  %vm2339_vm14 = vcmp.lt.f32.partialorder %v4842_v13, %v4839_v2 }
 0xea2   :  { %v2340_v14 = vsel %vm2338_vm10, 1.0, %v3982_v54  ;;  %v2143_v15 = vsel %vm2141_vm7, 1.0, %v3982_v54  ;;  %vm2142_vm8 = vcmp.lt.f32.partialorder %v4845_v29, %v4839_v2  ;;  %v2341_v21 = vsel %vm2339_vm14, 1.0, %v3982_v54 }
 0xea3   :  { %v2162_v7 = vrot.slane %v4848_v11, %v2153_v63  ;;  %v2129_v35 = vrot.slane %v4848_v11, %v2120_v3  ;;  %2342 = vadd.xlane.f32.xlu1 %v2340_v14  ;;  %2145 = vadd.xlane.f32.xlu0 %v2143_v15  ;;  %vm5340_vm15 = vcmp.eq.f32.partialorder %v4842_v13, %v4837_v5  ;;  %v2144_v59 = vsel %vm2142_vm8, 1.0, %v3982_v54 }
 0xea4   :  { %vm5339_vm5 = vcmp.eq.f32.partialorder %v4842_v13, %v4839_v2  ;;  %vm2122_vm3 = vcmp.eq.f32.partialorder %v4845_v29, %v4837_v5  ;;  %vm2123_vm6 = vcmp.eq.f32.partialorder %v4845_v29, %v4839_v2  ;;  %v2564_v18 = vrot.slane %v4848_v11, %v2555_v50 }
 0xea5   :  { %vm2163_vm11 = vcmp.le.f32.partialorder %v2162_v7, %v4837_v5  ;;  %vm2164_vm4 = vcmp.le.f32.partialorder %v2162_v7, %v4839_v2  ;;  %vm2130_vm9 = vcmp.le.f32.partialorder %v2129_v35, %v4837_v5  ;;  %vm2131_vm12 = vcmp.le.f32.partialorder %v2129_v35, %v4839_v2  ;;  %vm3449_vm14 = vmpackc.low %vm5339_vm5, %vm5340_vm15 }
 0xea6   :  { %vm3447_vm13 = vmpackc.low %vm2164_vm4, %vm2163_vm11  ;;  %vm2251_vm10 = vcmp.eq.f32.partialorder %v2162_v7, %v4837_v5  ;;  %vm2252_vm7 = vcmp.eq.f32.partialorder %v2162_v7, %v4839_v2  ;;  %vm2136_vm4 = vcmp.eq.f32.partialorder %v2129_v35, %v4837_v5  ;;  %v4983_v53 = vrot.slane %v4848_v11, %v2522_v52 }
 0xea7   :  { %3700 = vmatpush3.bf16.xpose.msk.msra.mxu0 %vm3447_vm13, %v3984_v23  ;;  %vm3451_vm0 = vmpackc.low %vm2131_vm12, %vm2130_vm9  ;;  %2344 = vadd.xlane.f32.xlu1 %v2341_v21  ;;  %vm2137_vm9 = vcmp.eq.f32.partialorder %v2129_v35, %v4839_v2  ;;  %v2124_v33 = vsel %vm2122_vm3, 1.0, %v3982_v54 }
 0xea8   :  { %3706 = vmatpush3.bf16.xpose.msk.msra.mxu1 %vm3451_vm0, %v3984_v23  ;;  %3711 = vmatprep.subr.bf16.mxu0 %v3982_v54  ;;  %vm4894_vm8 = vmpackc.low %vm2123_vm6, %vm2122_vm3  ;;  %vm5404_vm3 = vcmp.eq.f32.partialorder %v4842_v13, %v4839_v2 }
 0xea9   :  { %2147 = vadd.xlane.f32.xlu0 %v2144_v59  ;;  %3723 = vmatprep.subr.bf16.mxu1 %v3982_v54  ;;  %vm4898_vm11 = vmpackc.low %vm2252_vm7, %vm2251_vm10  ;;  %vm2360_vm7 = vcmask 130048  }
 0xeaa   :  { %vm3459_vm12 = vmpackc.low %vm2137_vm9, %vm2136_vm4  ;;  %vm2565_vm9 = vcmp.le.f32.partialorder %v2564_v18, %v4837_v5 }
 0xeae   :  { %3702 = vmatmul.mubr.msk.bf16.vlgmr.msra.gmra.mrb[0].mxu0 %vm3449_vm14, %v3984_v23 }
 0xeaf   :  { %3708 = vmatmul.mubr.msk.bf16.vlgmr.msra.gmra.mrb[0].mxu1 %vm4894_vm8, %v3984_v23  ;;  %3712 = vmatpush3.bf16.xpose.msk.msra.mxu0 %vm4898_vm11, %v3984_v23 }
 0xeb0   :  { %3713 = vmatprep.mubr.msk.bf16.mxu0 %vm3983_vm1, %v3982_v54  ;;  %3717 = vmatprep.subr.bf16.mxu0 %v3982_v54 }
 0xeb1   :  { %3724 = vmatpush3.bf16.msk.msra.mxu1 %vm3459_vm12, %v3984_v23  ;;  %3725 = vmatprep.mubr.msk.bf16.mxu1 %vm3983_vm1, %v3982_v54 }
 0xeb2   :  { %3729 = vmatprep.subr.bf16.mxu1 %v3982_v54 }
 0xeb6   :  { %3714 = vmatmul.mubr.msk.bf16.vlgmr.msra.gmra.mrb[4].mxu0 %vm3449_vm14, %v3984_v23 }
 0xeb7   :  { %3718 = vmatpush3.bf16.xpose.msk.msra.mxu0 %vm3459_vm12, %v3984_v23  ;;  %3719 = vmatprep.mubr.msk.bf16.mxu0 %vm3983_vm1, %v3982_v54  ;;  %vm2566_vm12 = vcmp.le.f32.partialorder %v2564_v18, %v4839_v2 }
 0xeb8   :  { %3735 = vmatprep.subr.bf16.mxu0 %v3982_v54 }
 0xec2   :  { %3720 = vmatmul.mubr.msk.bf16.vlgmr.msra.gmra.mrb[4].mxu0 %vm4894_vm8, %v3984_v23 }
 0xec3   :  { %3737 = vmatprep.mubr.msk.bf16.mxu0 %vm3983_vm1, %v3982_v54 }
 0xf30   :  { %v2343_v39 = vpop.xlane.xlu1 %2342  ;;  %v2146_v12 = vpop.xlane.xlu0 %2145 }
 0xf31   :  { %v2346_v47 = vadd.f32 %v2343_v39, %v2146_v12 }
 0xf34   :  { %v2345_v40 = vpop.xlane.xlu1 %2344 }
 0xf36   :  { %v2148_v41 = vpop.xlane.xlu0 %2147 }
 0xf37   :  { %v2347_v42 = vadd.f32 %v2345_v40, %v2148_v41 }
 0xf81   :  { %v2203_v27 = vpop.f32.mrb[0].mxu0 }
 0xf82   :  { %v2244_v26 = vpop.f32.mrb[0].mxu1  ;;  %v3703_v24 = vpop.f32.mrb[1].mxu0 }
 0xf83   :  { %v2245_v20 = vadd.f32 %v2244_v26, %v2203_v27  ;;  %v3709_v34 = vpop.f32.mrb[1].mxu1  ;;  %v2206_v19 = vpop.f32.mrb[2].mxu0 }
 0xf84   :  { %v2247_v8 = vpop.f32.mrb[2].mxu1  ;;  %v3704_v36 = vpop.f32.mrb[3].mxu0 }
 0xf85   :  { %v2248_v37 = vadd.f32 %v2247_v8, %v2206_v19  ;;  %v3710_v38 = vpop.f32.mrb[3].mxu1  ;;  %v4928_v43 = vadd.f32 %v2346_v47, %v2245_v20 }
 0xf87   :  { %v4930_v44 = vadd.f32 %v2347_v42, %v2248_v37  ;;  %vm2352_vm13 = vcmp.ge.f32.partialorder %v4928_v43, 255.5 }
 0xf89   :  { %vm2353_vm14 = vcmp.ge.f32.partialorder %v4930_v44, 255.5 }
 0xf95   :  { %v4932_v16 = vpop.f32.mrb[4].mxu0 }
 0xf96   :  { %v2350_v45 = vsub.f32 %v4928_v43, %v4932_v16  ;;  %vm2354_vm0 = vcmp.gt.f32.partialorder %v4932_v16, 0.5  ;;  %v3721_v4 = vpop.f32.mrb[5].mxu0 }
 0xf97   :  { %v4938_v17 = vpop.f32.mrb[6].mxu0  ;;  %vm2356_vm10 = vmand %vm2352_vm13, %vm2354_vm0  ;;  %vm5336_vm0 = vcmp.eq.f32.partialorder %v4955_v51, %v4837_v5 }
 0xf98   :  { %v2351_v6 = vsub.f32 %v4930_v44, %v4938_v17  ;;  %vm2355_vm8 = vcmp.gt.f32.partialorder %v4938_v17, 0.5  ;;  %v3722_v31 = vpop.f32.mrb[7].mxu0  ;;  %v2358_v46 = vsel %vm2356_vm10, %v4932_v16, 0.0  ;;  %vm3471_vm13 = vmpackc.low %vm2566_vm12, %vm2565_vm9  ;;  %vm5335_vm10 = vcmp.eq.f32.partialorder %v4955_v51, %v4839_v2 }
 0xf99   :  { %vm2357_vm4 = vmand %vm2353_vm14, %vm2355_vm8  ;;  %v2361_v22 = vsel %vm2360_vm7, %v2358_v46, 0.0  ;;  %3736 = vmatpush3.bf16.xpose.msk.msra.mxu0 %vm3471_vm13, %v3984_v23  ;;  %vm2653_vm8 = vcmp.eq.f32.partialorder %v2564_v18, %v4837_v5  ;;  %vm2538_vm12 = vcmp.eq.f32.partialorder %v4983_v53, %v4837_v5  ;;  %vm2539_vm13 = vcmp.eq.f32.partialorder %v4983_v53, %v4839_v2 }
 0xf9a   :  { %v2359_v55 = vsel %vm2357_vm4, %v4938_v17, 0.0  ;;  %3747 = vmatprep.subr.bf16.mxu0 %v3982_v54  ;;  %vm3473_vm14 = vmpackc.low %vm5335_vm10, %vm5336_vm0  ;;  %vm2654_vm4 = vcmp.eq.f32.partialorder %v2564_v18, %v4839_v2  ;;  %vm2544_vm10 = vcmp.lt.f32.partialorder %v5000_v9, %v4839_v2  ;;  %vm2740_vm0 = vcmp.lt.f32.partialorder %v4955_v51, %v4837_v5 }
 0xf9b   :  { %v2362_v56 = vsel %vm2360_vm7, %v2359_v55, 0.0  ;;  %vm4970_vm9 = vmpackc.low %vm2654_vm4, %vm2653_vm8  ;;  %vm5337_vm4 = vcmp.eq.f32.partialorder %v5000_v9, %v4839_v2  ;;  %v2546_v61 = vsel %vm2544_vm10, 1.0, %v3982_v54  ;;  %v2742_v62 = vsel %vm2740_vm0, 1.0, %v3982_v54 }
 0xf9c   :  { %v2363_v48 = vadd.f32 %v2362_v56, %v2361_v22  ;;  %vm4991_vm8 = vmpackc.low %vm2539_vm13, %vm2538_vm12  ;;  %vm2543_vm13 = vcmp.lt.f32.partialorder %v5000_v9, %v4837_v5  ;;  %v2108_v46 = vand.u32 127, %v2102_v28 }
 0xf9d   :  { %v2545_v30 = vsel %vm2543_vm13, 1.0, %v3982_v54 }
 0xf9e   :  { %2364 = vadd.xlane.f32.xlu0 %v2363_v48  ;;  %2547 = vadd.xlane.f32.xlu1 %v2545_v30  ;;  %vm2111_vm5 = vcmp.eq.s32.totalorder %v2108_v46, 0 }
 0xfa0   :  { %3738 = vmatmul.mubr.msk.bf16.vlgmr.msra.gmra.mrb[8].mxu0 %vm3473_vm14, %v3984_v23 }
 0xfa1   :  { %3748 = vmatpush3.bf16.xpose.msk.msra.mxu0 %vm4970_vm9, %v3984_v23  ;;  %3749 = vmatprep.mubr.msk.bf16.mxu0 %vm3983_vm1, %v3982_v54 }
 0xfa2   :  { %3753 = vmatprep.subr.bf16.mxu0 %v3982_v54  ;;  %2549 = vadd.xlane.f32.xlu0 %v2546_v61 }
 0xfa3   :  { %2744 = vadd.xlane.f32.xlu1 %v2742_v62 }
 0xfa8   :  { %3750 = vmatmul.mubr.msk.bf16.vlgmr.msra.gmra.mrb[12].mxu0 %vm3473_vm14, %v3984_v23  ;;  %vm5338_vm14 = vcmp.eq.f32.partialorder %v5000_v9, %v4837_v5 }
 0xfa9   :  { %3755 = vmatprep.mubr.msk.bf16.mxu0 %vm3983_vm1, %v3982_v54  ;;  %3754 = vmatpush3.bf16.xpose.msk.msra.mxu0 %vm4991_vm8, %v3984_v23  ;;  %vm5012_vm12 = vmpackc.low %vm5337_vm4, %vm5338_vm14  ;;  %vm2741_vm4 = vcmp.lt.f32.partialorder %v4955_v51, %v4839_v2  ;;  %vm2109_vm14 = vcmp.eq.s32.totalorder %v4825_v58, 0 }
 0xfaa   :  { %3771 = vmatprep.subr.bf16.mxu0 %v3982_v54  ;;  %v2743_v63 = vsel %vm2741_vm4, 1.0, %v3982_v54  ;;  %vm5045_vm15 = vmand %vm2109_vm14, %vm2111_vm5  ;;  %vm2532_vm5 = vcmp.le.f32.partialorder %v4983_v53, %v4837_v5  ;;  %vm2533_vm14 = vcmp.le.f32.partialorder %v4983_v53, %v4839_v2 }
 0xfab   :  { %2746 = vadd.xlane.f32.xlu0 %v2743_v63 }
 0xfb4   :  { %3756 = vmatmul.mubr.msk.bf16.vlgmr.msra.gmra.mrb[12].mxu0 %vm5012_vm12, %v3984_v23 }
 0xfb5   :  { %3773 = vmatprep.mubr.msk.bf16.mxu0 %vm3983_vm1, %v3982_v54 }
0x102b   :  { %v2365_v3 = vpop.xlane.xlu0 %2364 }
0x102c   :  { %v2366_v10 = vrot.slane %v2365_v3, 4 }
0x102e   :  { %v2367_v7 = vadd.f32 %v2366_v10, %v2365_v3  ;;  %v2125_v10 = vsel %vm2123_vm6, 1.0, %v3982_v54 }
0x1030   :  { %v2368_v35 = vrot.slane %v2367_v7, 2 }
0x1032   :  { %v2369_v14 = vadd.f32 %v2368_v35, %v2367_v7 }
0x1034   :  { %v2370_v15 = vrot.slane %v2369_v14, 1 }
0x1036   :  { %v2371_v21 = vadd.f32 %v2370_v15, %v2369_v14 }
0x1038   :  { %3881 = vpush %v2371_v21 }
0x1069   :  { %s3882_s5 = spop %3881 }
0x106a   :  { %v2373_v59 = vstv %s3882_s5 }
0x106b   :  { %v2374_v0 = vsub.f32 256.0, %v2373_v59 }
0x106d   :  { %v2375_v27 = vmul.f32 0.003921569, %v2374_v0 }
0x106f   :  { %v5033_v26 = vfloor.f32 %v2375_v27 }
0x1071   :  { %v2377_v24 = vmax.f32 %v5033_v26, 1.0  ;;  %v2378_v20 = vmul.f32 0.5, %v5033_v26  ;;  %vm2410_vm6 = vcmp.ge.f32.partialorder %v5033_v26, 0.5 }
0x1073   :  { %3930 = vrcp.f32 %v2377_v24  ;;  %v2379_v34 = vfloor.f32 %v2378_v20  ;;  %v2605_v25 = vpop.f32.mrb[8].mxu0  ;;  %v2158_v20 = vsel %vm5404_vm3, 1.0, %v3982_v54 }
0x1074   :  { %v3739_v52 = vpop.f32.mrb[9].mxu0 }
0x1075   :  { %v2380_v19 = vadd.f32 %v2379_v34, %v2350_v45  ;;  %v2381_v8 = vadd.f32 %v2379_v34, %v2351_v6  ;;  %v2608_v53 = vpop.f32.mrb[10].mxu0 }
0x1076   :  { %v3740_v30 = vpop.f32.mrb[11].mxu0 }
0x107d   :  { %v3931_v36 = vpop.eup %3930 }
0x107e   :  { %v2383_v37 = vmul.f32 %v3931_v36, %v2380_v19  ;;  %v2384_v38 = vmul.f32 %v3931_v36, %v2381_v8 }
0x1080   :  { %v2385_v39 = vfloor.f32 %v2383_v37  ;;  %v2386_v12 = vfloor.f32 %v2384_v38  ;;  %v2550_v38 = vpop.xlane.xlu0 %2549 }
0x1082   :  { %v2387_v40 = vmul.f32 %v2385_v39, %v2377_v24  ;;  %v2388_v41 = vmul.f32 %v2386_v12, %v2377_v24  ;;  %v3463_v4 = vadd.f32 -1.0, %v2385_v39  ;;  %v3464_v31 = vadd.f32 -1.0, %v2386_v12 }
0x1084   :  { %v2389_v47 = vsub.f32 %v2380_v19, %v2387_v40  ;;  %v2390_v42 = vsub.f32 %v2381_v8, %v2388_v41  ;;  %v2548_v19 = vpop.xlane.xlu1 %2547 }
0x1086   :  { %vm2391_vm0 = vcmp.lt.f32.partialorder %v2389_v47, 0.0  ;;  %vm2392_vm10 = vcmp.lt.f32.partialorder %v2390_v42, 0.0  ;;  %vm2397_vm4 = vcmp.ge.f32.partialorder %v2389_v47, %v2377_v24  ;;  %vm2398_vm13 = vcmp.ge.f32.partialorder %v2390_v42, %v2377_v24 }
0x1087   :  { %v2395_v43 = vsel %vm2391_vm0, %v3463_v4, %v2385_v39  ;;  %v2396_v16 = vsel %vm2392_vm10, %v3464_v31, %v2386_v12  ;;  %vm3475_vm0 = vmpackc.low %vm2533_vm14, %vm2532_vm5  ;;  %v5076_v61 = vpop.f32.mrb[12].mxu0  ;;  %vm2518_vm5 = vcmask 1040384  }
0x1088   :  { %v2399_v45 = vadd.f32 1.0, %v2395_v43  ;;  %v2400_v44 = vadd.f32 1.0, %v2396_v16  ;;  %v3757_v62 = vpop.f32.mrb[13].mxu0  ;;  %v2745_v4 = vpop.xlane.xlu1 %2744 }
0x1089   :  { %v5078_v63 = vpop.f32.mrb[14].mxu0 }
0x108a   :  { %v2401_v17 = vsel %vm2397_vm4, %v2399_v45, %v2395_v43  ;;  %v2402_v6 = vsel %vm2398_vm13, %v2400_v44, %v2396_v16  ;;  %v3758_v57 = vpop.f32.mrb[15].mxu0  ;;  %v2747_v43 = vpop.xlane.xlu0 %2746  ;;  %vm2757_vm4 = vcmp.gt.f32.partialorder %v5078_v63, 0.5 }
0x108b   :  { %v2403_v55 = vmax.f32 %v2401_v17, 0.0  ;;  %v2404_v22 = vmax.f32 %v2402_v6, 0.0 }
0x108d   :  { %v2405_v28 = vmin.f32 %v2403_v55, 255.0  ;;  %v2406_v48 = vmin.f32 %v2404_v22, 255.0  ;;  %v2749_v22 = vadd.f32 %v2747_v43, %v2550_v38 }
0x108f   :  { %v2407_v50 = vsel %vm5045_vm15, 0.0, %v2405_v28 }
0x1090   :  { %v2409_v18 = vpack.c.bf16 %v2406_v48, %v2407_v50 }
0x1092   :  { %3726 = vmatmul.mubr.msk.bf16.vlgmr.msra.gmra.mrb[4].mxu1 %vm2360_vm7, %v2409_v18 }
0x1093   :  { %3730 = vmatpush3.bf16.msk.msra.mxu1 %vm4898_vm11, %v3984_v23  ;;  %3731 = vmatprep.mubr.msk.bf16.mxu1 %vm3983_vm1, %v3982_v54  ;;  %vm5403_vm11 = vcmp.eq.f32.partialorder %v4842_v13, %v4837_v5  ;;  %v2748_v13 = vadd.f32 %v2745_v4, %v2548_v19 }
0x1094   :  { %3741 = vmatprep.subr.bf16.mxu1 %v3982_v54  ;;  %v2157_v27 = vsel %vm5403_vm11, 1.0, %v3982_v54 }
0x109a   :  { %3732 = vmatmul.mubr.msk.bf16.vlgmr.msra.gmra.mrb[8].mxu1 %vm2360_vm7, %v2409_v18 }
0x109b   :  { %3743 = vmatprep.mubr.msk.bf16.mxu1 %vm3983_vm1, %v3982_v54 }
0x109c   :  { %3742 = vmatpush3.bf16.xpose.msk.msra.mxu1 %vm3475_vm0, %v3984_v23 }
0x109d   :  { %3759 = vmatprep.subr.bf16.mxu1 %v3982_v54 }
0x10a3   :  { %3744 = vmatmul.mubr.msk.bf16.vlgmr.msra.gmra.mrb[12].mxu1 %vm5012_vm12, %v3984_v23 }
0x10a4   :  { %3760 = vmatpush3.bf16.msk.msra.mxu1 %vm4991_vm8, %v3984_v23  ;;  %3761 = vmatprep.mubr.msk.bf16.mxu1 %vm3983_vm1, %v3982_v54  ;;  %vm2756_vm8 = vcmp.gt.f32.partialorder %v5076_v61, 0.5 }
0x10a5   :  { %3765 = vmatprep.subr.bf16.mxu1 %v3982_v54 }
0x1165   :  { %v2448_v3 = vpop.f32.mrb[4].mxu1 }
0x1166   :  { %v3727_v7 = vpop.f32.mrb[5].mxu1  ;;  %v2455_v14 = vmul.f32 %v2448_v3, %v2124_v33 }
0x1167   :  { %v2451_v35 = vpop.f32.mrb[6].mxu1 }
0x1168   :  { %v2456_v15 = vmul.f32 %v2451_v35, %v2125_v10  ;;  %v3728_v21 = vpop.f32.mrb[7].mxu1 }
0x116a   :  { %v2457_v59 = vadd.f32 %v2456_v15, %v2455_v14  ;;  %v2961_v15 = vsub.s32 5, %v4825_v58 }
0x116c   :  { %v2458_v0 = vrot.slane %v2457_v59, 4  ;;  %v2970_v21 = vrot.slane %v4848_v11, %v2961_v15  ;;  %v5129_v26 = vrot.slane %v4831_v32, %v2961_v15 }
0x116d   :  { %v2501_v24 = vpop.f32.mrb[8].mxu1 }
0x116e   :  { %v2459_v29 = vadd.f32 %v2458_v0, %v2457_v59  ;;  %v3733_v34 = vpop.f32.mrb[9].mxu1  ;;  %v2508_v37 = vmul.f32 %v2501_v24, %v2157_v27  ;;  %vm2971_vm0 = vcmp.le.f32.partialorder %v2970_v21, %v4837_v5  ;;  %vm2972_vm11 = vcmp.le.f32.partialorder %v2970_v21, %v4839_v2 }
0x116f   :  { %v2504_v8 = vpop.f32.mrb[10].mxu1  ;;  %vm3495_vm3 = vmpackc.low %vm2972_vm11, %vm2971_vm0  ;;  %v2928_v0 = vsub.s32 4, %v4825_v58 }
0x1170   :  { %v2460_v36 = vrot.slane %v2459_v29, 2  ;;  %v2509_v39 = vmul.f32 %v2504_v8, %v2158_v20  ;;  %v3734_v12 = vpop.f32.mrb[11].mxu1  ;;  %3772 = vmatpush3.bf16.xpose.msk.msra.mxu0 %vm3495_vm3, %v3984_v23 }
0x1171   :  { %3783 = vmatprep.subr.bf16.mxu0 %v3982_v54  ;;  %v5157_v27 = vrot.slane %v4848_v11, %v2928_v0  ;;  %v5173_v58 = vrot.slane %v4831_v32, %v2928_v0 }
0x1172   :  { %v2461_v40 = vadd.f32 %v2460_v36, %v2459_v29  ;;  %v2510_v41 = vadd.f32 %v2509_v39, %v2508_v37 }
0x1173   :  { %vm2945_vm0 = vcmp.eq.f32.partialorder %v5157_v27, %v4839_v2  ;;  %vm2930_vm3 = vcmp.eq.f32.partialorder %v5173_v58, %v4837_v5 }
0x1174   :  { %v2462_v47 = vrot.slane %v2461_v40, 1  ;;  %v2511_v42 = vrot.slane %v2510_v41, 4 }
0x1176   :  { %v2463_v31 = vadd.f32 %v2462_v47, %v2461_v40  ;;  %v2512_v46 = vadd.f32 %v2511_v42, %v2510_v41  ;;  %v2646_v16 = vpop.f32.mrb[12].mxu1 }
0x1177   :  { %v2647_v45 = vadd.f32 %v2646_v16, %v2605_v25  ;;  %v3745_v44 = vpop.f32.mrb[13].mxu1 }
0x1178   :  { %v2466_v17 = vsel %vm2410_vm6, %v2463_v31, %v4827_v60  ;;  %v2513_v6 = vrot.slane %v2512_v46, 2  ;;  %v2649_v55 = vpop.f32.mrb[14].mxu1 }
0x1179   :  { %v5100_v28 = vadd.f32 %v2748_v13, %v2647_v45  ;;  %v2650_v48 = vadd.f32 %v2649_v55, %v2608_v53  ;;  %v3746_v50 = vpop.f32.mrb[15].mxu1 }
0x117a   :  { %v2514_v18 = vadd.f32 %v2513_v6, %v2512_v46 }
0x117b   :  { %v2752_v52 = vsub.f32 %v5100_v28, %v5076_v61  ;;  %vm2754_vm12 = vcmp.ge.f32.partialorder %v5100_v28, 255.5  ;;  %v5106_v25 = vadd.f32 %v2749_v22, %v2650_v48 }
0x117c   :  { %v2515_v30 = vrot.slane %v2514_v18, 1  ;;  %vm2758_vm10 = vmand %vm2754_vm12, %vm2756_vm8  ;;  %vm5341_vm8 = vcmp.eq.f32.partialorder %v5129_v26, %v4839_v2 }
0x117d   :  { %v2753_v62 = vsub.f32 %v5106_v25, %v5078_v63  ;;  %vm2755_vm13 = vcmp.ge.f32.partialorder %v5106_v25, 255.5  ;;  %v2760_v53 = vsel %vm2758_vm10, %v5076_v61, 0.0  ;;  %vm3059_vm10 = vcmp.eq.f32.partialorder %v2970_v21, %v4837_v5 }
0x117e   :  { %v2516_v57 = vadd.f32 %v2515_v30, %v2514_v18  ;;  %vm2759_vm14 = vmand %vm2755_vm13, %vm2757_vm4  ;;  %v2762_v10 = vsel %vm2360_vm7, %v2760_v53, 0.0  ;;  %vm3060_vm4 = vcmp.eq.f32.partialorder %v2970_v21, %v4839_v2 }
0x117f   :  { %v2761_v33 = vsel %vm2759_vm14, %v5078_v63, 0.0  ;;  %vm5144_vm13 = vmpackc.low %vm3060_vm4, %vm3059_vm10  ;;  %vm2944_vm14 = vcmp.eq.f32.partialorder %v5157_v27, %v4837_v5  ;;  %vm2949_vm4 = vcmp.lt.f32.partialorder %v5173_v58, %v4837_v5 }
0x1180   :  { %v2517_v3 = vsel %vm2410_vm6, %v2516_v57, %v4827_v60  ;;  %v2763_v7 = vsel %vm2360_vm7, %v2761_v33, 0.0  ;;  %vm2963_vm6 = vcmp.eq.f32.partialorder %v5129_v26, %v4837_v5  ;;  %vm5165_vm11 = vmpackc.low %vm2945_vm0, %vm2944_vm14  ;;  %vm2950_vm14 = vcmp.lt.f32.partialorder %v5173_v58, %v4839_v2 }
0x1181   :  { %v5120_v35 = vsel %vm2518_vm5, %v2466_v17, %v2517_v3  ;;  %v2764_v14 = vadd.f32 %v2763_v7, %v2762_v10  ;;  %vm3497_vm12 = vmpackc.low %vm5341_vm8, %vm2963_vm6  ;;  %vm3146_vm0 = vcmp.lt.f32.partialorder %v5129_v26, %v4837_v5  ;;  %vm3147_vm8 = vcmp.lt.f32.partialorder %v5129_v26, %v4839_v2 }
0x1182   :  { %3774 = vmatmul.mubr.msk.bf16.vlgmr.msra.gmra.mrb[16].mxu0 %vm3497_vm12, %v3984_v23  ;;  %v2951_v32 = vsel %vm2949_vm4, 1.0, %v3982_v54  ;;  %v2952_v20 = vsel %vm2950_vm14, 1.0, %v3982_v54  ;;  %v3148_v29 = vsel %vm3146_vm0, 1.0, %v3982_v54  ;;  %v3149_v34 = vsel %vm3147_vm8, 1.0, %v3982_v54 }
0x1183   :  { %2765 = vadd.xlane.f32.xlu1 %v2764_v14  ;;  %3784 = vmatpush3.bf16.xpose.msk.msra.mxu0 %vm5144_vm13, %v3984_v23 }
0x1184   :  { %3785 = vmatprep.mubr.msk.bf16.mxu0 %vm3983_vm1, %v3982_v54  ;;  %3789 = vmatprep.subr.bf16.mxu0 %v3982_v54 }
0x1185   :  { %2953 = vadd.xlane.f32.xlu0 %v2951_v32 }
0x1187   :  { %2955 = vadd.xlane.f32.xlu1 %v2952_v20 }
0x1189   :  { %3150 = vadd.xlane.f32.xlu0 %v3148_v29 }
0x118a   :  { %3786 = vmatmul.mubr.msk.bf16.vlgmr.msra.gmra.mrb[20].mxu0 %vm3497_vm12, %v3984_v23  ;;  %vm2931_vm12 = vcmp.eq.f32.partialorder %v5173_v58, %v4839_v2 }
0x118b   :  { %3791 = vmatprep.mubr.msk.bf16.mxu0 %vm3983_vm1, %v3982_v54  ;;  %3790 = vmatpush3.bf16.xpose.msk.msra.mxu0 %vm5165_vm11, %v3984_v23  ;;  %vm5185_vm10 = vmpackc.low %vm2931_vm12, %vm2930_vm3  ;;  %v2933_v56 = vsel %vm2931_vm12, 1.0, %v3982_v54 }
0x118c   :  { %3152 = vadd.xlane.f32.xlu1 %v3149_v34 }
0x1196   :  { %3792 = vmatmul.mubr.msk.bf16.vlgmr.msra.gmra.mrb[20].mxu0 %vm5185_vm10, %v3984_v23 }
0x1210   :  { %v2766_v19 = vpop.xlane.xlu1 %2765 }
0x1211   :  { %v2767_v8 = vrot.slane %v2766_v19, 4 }
0x1213   :  { %v2768_v36 = vadd.f32 %v2767_v8, %v2766_v19 }
0x1215   :  { %v2769_v37 = vrot.slane %v2768_v36, 2 }
0x1217   :  { %v2770_v38 = vadd.f32 %v2769_v37, %v2768_v36 }
0x1219   :  { %v2771_v39 = vrot.slane %v2770_v38, 1 }
0x121b   :  { %v2772_v12 = vadd.f32 %v2771_v39, %v2770_v38 }
0x121d   :  { %3883 = vpush %v2772_v12 }
0x124e   :  { %s3884_s4 = spop %3883 }
0x124f   :  { %v2774_v40 = vstv %s3884_s4 }
0x1250   :  { %v2775_v41 = vsub.f32 256.0, %v2774_v40 }
0x1252   :  { %v2776_v47 = vmul.f32 0.003921569, %v2775_v41 }
0x1254   :  { %v5204_v42 = vfloor.f32 %v2776_v47 }
0x1255   :  { %v3011_v49 = vpop.f32.mrb[16].mxu0 }
0x1256   :  { %v2778_v4 = vmax.f32 %v5204_v42, 1.0  ;;  %v2779_v31 = vmul.f32 0.5, %v5204_v42  ;;  %v3775_v14 = vpop.f32.mrb[17].mxu0 }
0x1257   :  { %v3014_v15 = vpop.f32.mrb[18].mxu0 }
0x1258   :  { %3932 = vrcp.f32 %v2778_v4  ;;  %v2780_v46 = vfloor.f32 %v2779_v31  ;;  %v3776_v21 = vpop.f32.mrb[19].mxu0 }
0x125a   :  { %v2781_v43 = vadd.f32 %v2780_v46, %v2752_v52  ;;  %v2782_v16 = vadd.f32 %v2780_v46, %v2753_v62 }
0x1262   :  { %v3933_v13 = vpop.eup %3932 }
0x1263   :  { %v2784_v45 = vmul.f32 %v3933_v13, %v2781_v43  ;;  %v2785_v44 = vmul.f32 %v3933_v13, %v2782_v16  ;;  %v2956_v13 = vpop.xlane.xlu1 %2955 }
0x1265   :  { %v2786_v17 = vfloor.f32 %v2784_v45  ;;  %v2787_v6 = vfloor.f32 %v2785_v44 }
0x1267   :  { %v2788_v55 = vmul.f32 %v2786_v17, %v2778_v4  ;;  %v2789_v22 = vmul.f32 %v2787_v6, %v2778_v4  ;;  %v3487_v18 = vadd.f32 -1.0, %v2786_v17  ;;  %v3488_v30 = vadd.f32 -1.0, %v2787_v6 }
0x1269   :  { %v2790_v48 = vsub.f32 %v2781_v43, %v2788_v55  ;;  %v2791_v50 = vsub.f32 %v2782_v16, %v2789_v22  ;;  %v5241_v0 = vpop.f32.mrb[20].mxu0 }
0x126b   :  { %vm2792_vm8 = vcmp.lt.f32.partialorder %v2790_v48, 0.0  ;;  %vm2793_vm4 = vcmp.lt.f32.partialorder %v2791_v50, 0.0  ;;  %vm2798_vm14 = vcmp.ge.f32.partialorder %v2790_v48, %v2778_v4  ;;  %vm2799_vm0 = vcmp.ge.f32.partialorder %v2791_v50, %v2778_v4  ;;  %v2954_v4 = vpop.xlane.xlu0 %2953 }
0x126c   :  { %v2796_v53 = vsel %vm2792_vm8, %v3487_v18, %v2786_v17  ;;  %v2797_v61 = vsel %vm2793_vm4, %v3488_v30, %v2787_v6  ;;  %vm2938_vm8 = vcmp.le.f32.partialorder %v5157_v27, %v4837_v5  ;;  %vm2939_vm4 = vcmp.le.f32.partialorder %v5157_v27, %v4839_v2  ;;  %v3793_v27 = vpop.f32.mrb[21].mxu0  ;;  %v3153_v18 = vpop.xlane.xlu1 %3152 }
0x126d   :  { %v2800_v28 = vadd.f32 1.0, %v2796_v53  ;;  %v2801_v52 = vadd.f32 1.0, %v2797_v61  ;;  %v5243_v32 = vpop.f32.mrb[22].mxu0 }
0x126e   :  { %v3794_v11 = vpop.f32.mrb[23].mxu0 }
0x126f   :  { %v2802_v63 = vsel %vm2798_vm14, %v2800_v28, %v2796_v53  ;;  %v2803_v25 = vsel %vm2799_vm0, %v2801_v52, %v2797_v61  ;;  %vm3499_vm14 = vmpackc.low %vm2939_vm4, %vm2938_vm8  ;;  %vm5414_vm0 = vcmp.eq.f32.partialorder %v4955_v51, %v4839_v2  ;;  %v3151_v22 = vpop.xlane.xlu0 %3150  ;;  %vm2811_vm8 = vcmp.ge.f32.partialorder %v5204_v42, 0.5 }
0x1270   :  { %v2804_v62 = vmax.f32 %v2802_v63, 0.0  ;;  %v2805_v57 = vmax.f32 %v2803_v25, 0.0  ;;  %v2560_v41 = vsel %vm5414_vm0, 1.0, %v3982_v54  ;;  %v3155_v25 = vadd.f32 %v3153_v18, %v2956_v13 }
0x1271   :  { %vm3162_vm4 = vcmp.gt.f32.partialorder %v5241_v0, 0.5 }
0x1272   :  { %v2806_v33 = vmin.f32 %v2804_v62, 255.0  ;;  %v2807_v3 = vmin.f32 %v2805_v57, 255.0 }
0x1274   :  { %v2808_v10 = vsel %vm5045_vm15, 0.0, %v2806_v33 }
0x1275   :  { %v2810_v7 = vpack.c.bf16 %v2807_v3, %v2808_v10 }
0x1277   :  { %3762 = vmatmul.mubr.msk.bf16.vlgmr.msra.gmra.mrb[16].mxu1 %vm2360_vm7, %v2810_v7 }
0x1278   :  { %3766 = vmatpush3.bf16.msk.msra.mxu1 %vm4970_vm9, %v3984_v23  ;;  %3767 = vmatprep.mubr.msk.bf16.mxu1 %vm3983_vm1, %v3982_v54  ;;  %vm5411_vm9 = vcmp.eq.f32.partialorder %v5000_v9, %v4837_v5 }
0x1279   :  { %3777 = vmatprep.subr.bf16.mxu1 %v3982_v54  ;;  %v2526_v24 = vsel %vm5411_vm9, 1.0, %v3982_v54 }
0x127f   :  { %3768 = vmatmul.mubr.msk.bf16.vlgmr.msra.gmra.mrb[20].mxu1 %vm2360_vm7, %v2810_v7 }
0x1280   :  { %3779 = vmatprep.mubr.msk.bf16.mxu1 %vm3983_vm1, %v3982_v54 }
0x1281   :  { %3778 = vmatpush3.bf16.xpose.msk.msra.mxu1 %vm3499_vm14, %v3984_v23 }
0x1282   :  { %3795 = vmatprep.subr.bf16.mxu1 %v3982_v54 }
0x1288   :  { %3780 = vmatmul.mubr.msk.bf16.vlgmr.msra.gmra.mrb[24].mxu1 %vm5185_vm10, %v3984_v23  ;;  %vm5413_vm10 = vcmp.eq.f32.partialorder %v4955_v51, %v4837_v5  ;;  %v3154_v51 = vadd.f32 %v3151_v22, %v2954_v4 }
0x1289   :  { %3796 = vmatpush3.bf16.msk.msra.mxu1 %vm5165_vm11, %v3984_v23  ;;  %3797 = vmatprep.mubr.msk.bf16.mxu1 %vm3983_vm1, %v3982_v54  ;;  %vm5412_vm11 = vcmp.eq.f32.partialorder %v5000_v9, %v4839_v2  ;;  %v2559_v12 = vsel %vm5413_vm10, 1.0, %v3982_v54 }
0x128a   :  { %3801 = vmatprep.subr.bf16.mxu1 %v3982_v54  ;;  %v2527_v29 = vsel %vm5412_vm11, 1.0, %v3982_v54  ;;  %vm3163_vm11 = vcmp.gt.f32.partialorder %v5243_v32, 0.5 }
0x134a   :  { %v2849_v20 = vpop.f32.mrb[16].mxu1 }
0x134b   :  { %v3763_v34 = vpop.f32.mrb[17].mxu1  ;;  %v2856_v8 = vmul.f32 %v2849_v20, %v2526_v24 }
0x134c   :  { %v2852_v19 = vpop.f32.mrb[18].mxu1 }
0x134d   :  { %v2857_v36 = vmul.f32 %v2852_v19, %v2527_v29  ;;  %v3764_v37 = vpop.f32.mrb[19].mxu1 }
0x134f   :  { %v2858_v38 = vadd.f32 %v2857_v36, %v2856_v8 }
0x1351   :  { %v2859_v39 = vrot.slane %v2858_v38, 4 }
0x1352   :  { %v2902_v40 = vpop.f32.mrb[20].mxu1 }
0x1353   :  { %v2860_v9 = vadd.f32 %v2859_v39, %v2858_v38  ;;  %v3769_v47 = vpop.f32.mrb[21].mxu1  ;;  %v2909_v43 = vmul.f32 %v2902_v40, %v2559_v12 }
0x1354   :  { %v2905_v31 = vpop.f32.mrb[22].mxu1 }
0x1355   :  { %v2861_v46 = vrot.slane %v2860_v9, 2  ;;  %v2910_v16 = vmul.f32 %v2905_v31, %v2560_v41  ;;  %v3770_v45 = vpop.f32.mrb[23].mxu1 }
0x1357   :  { %v2862_v44 = vadd.f32 %v2861_v46, %v2860_v9  ;;  %v2911_v17 = vadd.f32 %v2910_v16, %v2909_v43 }
0x1359   :  { %v2863_v6 = vrot.slane %v2862_v44, 1  ;;  %v2912_v55 = vrot.slane %v2911_v17, 4 }
0x135b   :  { %v2864_v48 = vadd.f32 %v2863_v6, %v2862_v44  ;;  %v2913_v50 = vadd.f32 %v2912_v55, %v2911_v17  ;;  %v3052_v30 = vpop.f32.mrb[24].mxu1 }
0x135c   :  { %v3053_v53 = vadd.f32 %v3052_v30, %v3011_v49  ;;  %v3781_v61 = vpop.f32.mrb[25].mxu1 }
0x135d   :  { %v2867_v28 = vsel %vm2811_vm8, %v2864_v48, %v4827_v60  ;;  %v2914_v52 = vrot.slane %v2913_v50, 2  ;;  %v3055_v63 = vpop.f32.mrb[26].mxu1 }
0x135e   :  { %v3156_v62 = vadd.f32 %v3154_v51, %v3053_v53  ;;  %v3056_v57 = vadd.f32 %v3055_v63, %v3014_v15  ;;  %v3782_v33 = vpop.f32.mrb[27].mxu1  ;;  %v2920_v29 = vrot.slane %v2867_v28, 2 }
0x135f   :  { %v2915_v3 = vadd.f32 %v2914_v52, %v2913_v50 }
0x1360   :  { %v3158_v10 = vsub.f32 %v3156_v62, %v5241_v0  ;;  %vm3160_vm14 = vcmp.ge.f32.partialorder %v3156_v62, 255.5  ;;  %v3157_v7 = vadd.f32 %v3155_v25, %v3056_v57 }
0x1361   :  { %v2916_v14 = vrot.slane %v2915_v3, 1  ;;  %vm3164_vm9 = vmand %vm3160_vm14, %vm3162_vm4  ;;  %vm5415_vm4 = vcmask 1041408  }
0x1362   :  { %v3159_v49 = vsub.f32 %v3157_v7, %v5243_v32  ;;  %vm3161_vm10 = vcmp.ge.f32.partialorder %v3157_v7, 255.5  ;;  %v3166_v21 = vsel %vm3164_vm9, %v5241_v0, 0.0  ;;  %v2932_v7 = vsel %vm2930_vm3, 1.0, %v3982_v54 }
0x1363   :  { %v2917_v27 = vadd.f32 %v2916_v14, %v2915_v3  ;;  %vm3165_vm0 = vmand %vm3161_vm10, %vm3163_vm11  ;;  %v3168_v24 = vsel %vm2360_vm7, %v3166_v21, 0.0 }
0x1364   :  { %v3167_v15 = vsel %vm3165_vm0, %v5243_v32, 0.0 }
0x1365   :  { %v2918_v11 = vsel %vm2811_vm8, %v2917_v27, %v4827_v60  ;;  %v3169_v20 = vsel %vm2360_vm7, %v3167_v15, 0.0 }
0x1366   :  { %v2923_v34 = vrot.slane %v2918_v11, 2  ;;  %v3170_v19 = vadd.f32 %v3169_v20, %v3168_v24  ;;  %v2965_v24 = vsel %vm2963_vm6, 1.0, %v3982_v54 }
0x1368   :  { %v2925_v8 = vsel %vm2518_vm5, %v2920_v29, %v2923_v34  ;;  %3171 = vadd.xlane.f32.xlu0 %v3170_v19 }
0x1369   :  { %v3333_v36 = vrot.slane %v2925_v8, 6 }
0x136b   :  { %v5279_v0 = vsel %vm5415_vm4, %v5120_v35, %v3333_v36 }
0x13f5   :  { %v3172_v32 = vpop.xlane.xlu0 %3171 }
0x13f6   :  { %v3173_v37 = vrot.slane %v3172_v32, 4 }
0x13f8   :  { %v3174_v38 = vadd.f32 %v3173_v37, %v3172_v32 }
0x13fa   :  { %v3175_v42 = vrot.slane %v3174_v38, 2 }
0x13fc   :  { %v3176_v39 = vadd.f32 %v3175_v42, %v3174_v38 }
0x13fe   :  { %v3177_v12 = vrot.slane %v3176_v39, 1 }
0x1400   :  { %v3178_v40 = vadd.f32 %v3177_v12, %v3176_v39 }
0x1402   :  { %3885 = vpush %v3178_v40 }
0x1433   :  { %s3886_s7 = spop %3885 }
0x1434   :  { %v3180_v41 = vstv %s3886_s7 }
0x1435   :  { %v3181_v9 = vsub.f32 256.0, %v3180_v41 }
0x1437   :  { %v3182_v47 = vmul.f32 0.003921569, %v3181_v9 }
0x1439   :  { %v5281_v4 = vfloor.f32 %v3182_v47 }
0x143b   :  { %v3184_v31 = vmax.f32 %v5281_v4, 1.0  ;;  %v3185_v35 = vmul.f32 0.5, %v5281_v4 }
0x143d   :  { %3934 = vrcp.f32 %v3184_v31  ;;  %v3186_v46 = vfloor.f32 %v3185_v35 }
0x143f   :  { %v3187_v43 = vadd.f32 %v3186_v46, %v3158_v10  ;;  %v3188_v16 = vadd.f32 %v3186_v46, %v3159_v49 }
0x1447   :  { %v3935_v13 = vpop.eup %3934 }
0x1448   :  { %v3190_v45 = vmul.f32 %v3935_v13, %v3187_v43  ;;  %v3191_v44 = vmul.f32 %v3935_v13, %v3188_v16 }
0x144a   :  { %v3192_v17 = vfloor.f32 %v3190_v45  ;;  %v3193_v6 = vfloor.f32 %v3191_v44 }
0x144c   :  { %v3194_v55 = vmul.f32 %v3192_v17, %v3184_v31  ;;  %v3195_v22 = vmul.f32 %v3193_v6, %v3184_v31  ;;  %v3511_v18 = vadd.f32 -1.0, %v3192_v17  ;;  %v3512_v30 = vadd.f32 -1.0, %v3193_v6 }
0x144e   :  { %v3196_v48 = vsub.f32 %v3187_v43, %v3194_v55  ;;  %v3197_v50 = vsub.f32 %v3188_v16, %v3195_v22 }
0x1450   :  { %vm3198_vm8 = vcmp.lt.f32.partialorder %v3196_v48, 0.0  ;;  %vm3199_vm14 = vcmp.lt.f32.partialorder %v3197_v50, 0.0  ;;  %vm3204_vm9 = vcmp.ge.f32.partialorder %v3196_v48, %v3184_v31  ;;  %vm3205_vm11 = vcmp.ge.f32.partialorder %v3197_v50, %v3184_v31 }
0x1451   :  { %v3202_v51 = vsel %vm3198_vm8, %v3511_v18, %v3192_v17  ;;  %v3203_v53 = vsel %vm3199_vm14, %v3512_v30, %v3193_v6 }
0x1452   :  { %v3206_v61 = vadd.f32 1.0, %v3202_v51  ;;  %v3207_v28 = vadd.f32 1.0, %v3203_v53 }
0x1454   :  { %v3208_v52 = vsel %vm3204_vm9, %v3206_v61, %v3202_v51  ;;  %v3209_v63 = vsel %vm3205_vm11, %v3207_v28, %v3203_v53 }
0x1455   :  { %v3210_v25 = vmax.f32 %v3208_v52, 0.0  ;;  %v3211_v62 = vmax.f32 %v3209_v63, 0.0 }
0x1457   :  { %v3212_v57 = vmin.f32 %v3210_v25, 255.0  ;;  %v3213_v33 = vmin.f32 %v3211_v62, 255.0 }
0x1459   :  { %v3214_v3 = vsel %vm5045_vm15, 0.0, %v3212_v57  ;;  %vm3217_vm15 = vcmp.ge.f32.partialorder %v5281_v4, 0.5  ;;  %v3936_v4 = vld [vmem:[%s5326_s3] sm:$0x3] }
0x145a   :  { %v3216_v10 = vpack.c.bf16 %v3213_v33, %v3214_v3 }
0x145c   :  { %3798 = vmatmul.mubr.msk.bf16.vlgmr.msra.gmra.mrb[28].mxu1 %vm2360_vm7, %v3216_v10 }
0x145d   :  { %3802 = vmatpush3.bf16.msk.msra.mxu1 %vm5144_vm13, %v3984_v23  ;;  %3803 = vmatprep.mubr.msk.bf16.mxu1 %vm3983_vm1, %v3982_v54  ;;  %vm5416_vm1 = vcmp.eq.f32.partialorder %v5129_v26, %v4839_v2 }
0x145e   :  { %v2966_v29 = vsel %vm5416_vm1, 1.0, %v3982_v54 }
0x1464   :  { %3804 = vmatmul.mubr.msk.bf16.vlgmr.msra.gmra.mrb[32].mxu1 %vm2360_vm7, %v3216_v10  ;;  %vm3340_vm7 = vcmask 1043456  }
0x152f   :  { %v3255_v14 = vpop.f32.mrb[28].mxu1 }
0x1530   :  { %v3799_v49 = vpop.f32.mrb[29].mxu1  ;;  %v3262_v59 = vmul.f32 %v3255_v14, %v2932_v7 }
0x1531   :  { %v3258_v21 = vpop.f32.mrb[30].mxu1 }
0x1532   :  { %v3263_v23 = vmul.f32 %v3258_v21, %v2933_v56  ;;  %v3800_v27 = vpop.f32.mrb[31].mxu1 }
0x1534   :  { %v3264_v15 = vadd.f32 %v3263_v23, %v3262_v59 }
0x1536   :  { %v3265_v11 = vrot.slane %v3264_v15, 4 }
0x1537   :  { %v3308_v20 = vpop.f32.mrb[32].mxu1 }
0x1538   :  { %v3266_v58 = vadd.f32 %v3265_v11, %v3264_v15  ;;  %v3805_v34 = vpop.f32.mrb[33].mxu1  ;;  %v3315_v36 = vmul.f32 %v3308_v20, %v2965_v24 }
0x1539   :  { %v3311_v19 = vpop.f32.mrb[34].mxu1 }
0x153a   :  { %v3267_v8 = vrot.slane %v3266_v58, 2  ;;  %v3316_v32 = vmul.f32 %v3311_v19, %v2966_v29  ;;  %v3806_v37 = vpop.f32.mrb[35].mxu1 }
0x153c   :  { %v3268_v38 = vadd.f32 %v3267_v8, %v3266_v58  ;;  %v3317_v42 = vadd.f32 %v3316_v32, %v3315_v36 }
0x153e   :  { %v3269_v39 = vrot.slane %v3268_v38, 1  ;;  %v3318_v12 = vrot.slane %v3317_v42, 4 }
0x1540   :  { %v3270_v40 = vadd.f32 %v3269_v39, %v3268_v38  ;;  %v3319_v5 = vadd.f32 %v3318_v12, %v3317_v42 }
0x1542   :  { %v3273_v41 = vsel %vm3217_vm15, %v3270_v40, %v4827_v60  ;;  %v3320_v9 = vrot.slane %v3319_v5, 2 }
0x1543   :  { %v3326_v31 = vrot.slane %v3273_v41, 4 }
0x1544   :  { %v3321_v2 = vadd.f32 %v3320_v9, %v3319_v5 }
0x1546   :  { %v3322_v54 = vrot.slane %v3321_v2, 1 }
0x1548   :  { %v3323_v26 = vadd.f32 %v3322_v54, %v3321_v2 }
0x154a   :  { %v3324_v47 = vsel %vm3217_vm15, %v3323_v26, %v4827_v60 }
0x154b   :  { %v3329_v35 = vrot.slane %v3324_v47, 4 }
0x154d   :  { %v3331_v46 = vsel %vm2518_vm5, %v3326_v31, %v3329_v35 }
0x154e   :  { %v3336_v43 = vrot.slane %v3331_v46, 4 }
0x1550   :  { %v3341_v16 = vsel %vm3340_vm7, %v5279_v0, %v3336_v43 }
0x1551   :  { %v3342_v13 = vtrunc.f32 %v3341_v16 }
0x1553   :  { %v3343_v45 = vpack.c.f32.eXmY %v3342_v13, %v3342_v13, 56 }
0x1555   :  { %v3347_v44 = vpack.c.b8 %v3343_v45, %v3343_v45 }
0x1557   :  { %v3349_v17 = vsel %vm4015_vm2, %v3347_v44, %v3936_v4 }
0x1558   :  { %3350 = vst [vmem:[%s5326_s3] sm:$0x3] %v3349_v17 }
0x1559 PF:  { %3355 = vsyncpa [#allocation3], 1 }
0x155a   :  { %3356 = vsyncpa [#allocation5], 1 }

</bundles_post_ra>
